<compile_context>
chip_gen: v6e
topology: v6e:2x2x1
jax: 0.10.0
libtpu: 0.0.40
codegen_flags: <defaults>
</compile_context>

<pallas_src>
import math

import jax
import jax.numpy as jnp
from jax.experimental import pallas as pl
from jax.experimental.pallas import tpu as pltpu


# ----------------------------- glue (plain JAX) ------------------------------

def symmetrize_by_tril(A):
    """Symmetrize A by its strictly-lower part + diagonal, A: (..., n, n)."""
    str_tril = jnp.tril(A, -1)
    diag = jnp.diagonal(A, axis1=-2, axis2=-1)
    n = A.shape[-1]
    eye = jnp.eye(n, dtype=A.dtype)
    return str_tril + jnp.swapaxes(str_tril, -1, -2) + diag[..., :, None] * eye


def _sym_logm(M):
    """Matrix log of SPD matrices via eigendecomposition (plain JAX)."""
    w, V = jnp.linalg.eigh(M)
    return jnp.einsum('...im,...m,...jm->...ij', V, jnp.log(w), V)


# ------------------------------- Pallas kernel -------------------------------

def _make_rmlr_kernel(n):
    def body(ut_ref, lam_ref, a_ref, kp_ref, out_ref, l_ref):
        # ut_ref : (n, n, tb)     ut[m, j, b] = U[b, j, m]   (eigenvectors, batch on lanes)
        # lam_ref: (n, tb)        lam[m, b]   = log-eigenvalue
        # a_ref  : (c_pad, n*n)   A_eff[k, i*n+j] = alpha*A_sym[k,i,j] + beta*tr(A_k)*(i==j)
        # kp_ref : (c_pad, 1)     alpha*<logP_k, A_k> + beta*tr(logP_k)*tr(A_k)
        # out_ref: (c_pad, tb)    logits, transposed (class on sublanes, batch on lanes)
        # l_ref  : (n*n, tb)      VMEM scratch: log(X_b) flattened over (i, j)
        tb = ut_ref.shape[-1]

        # Reconstruct log(X_b) = U diag(lam) U^T row by row on the VPU.  The contraction
        # over m is per-batch-element (batch lives on lanes), so it cannot use the MXU;
        # a single live (n, tb) accumulator keeps vreg pressure low.
        for i in range(n):
            acc = jnp.zeros((n, tb), dtype=jnp.float32)
            for m in range(n):
                u_m = ut_ref[m]                                      # (n, tb): U[b, :, m]
                coef = u_m[i:i + 1, :] * lam_ref[m:m + 1, :]         # (1, tb): U[b,i,m]*lam[b,m]
                acc = acc + coef * u_m                               # bcast over j sublanes
            l_ref[i * n:(i + 1) * n, :] = acc                        # rows [i*n, (i+1)*n)

        # Fused class contraction: one (c_pad, n^2) x (n^2, tb) MXU matmul (K = n^2),
        # then subtract the per-class constant.  Output is lane-dense (tb >= 128 lanes).
        out_ref[...] = (
            jnp.dot(a_ref[...], l_ref[...], preferred_element_type=jnp.float32)
            - kp_ref[...])

    return body


def _pick_tb(B, cap=4096, target_steps=4):
    """Batch tile (lane dim): multiple of 128, aiming for >= target_steps grid steps
    (>= 2 per v7x TensorCore for DMA/compute overlap) under a VMEM-safe cap
    (~17 MiB per-step footprint at tb=4096 incl. double buffers)."""
    tb = pl.cdiv(B, target_steps)
    tb = 128 * pl.cdiv(tb, 128)
    return int(min(cap, max(128, tb)))


def spd_rmlr_forward(X, P, A, *, alpha=1.0, beta=0.0, tb=None):
    """SPDRMLR forward with the SPDLogEuclideanMetric.

    logit[b, k] = alpha * <log X_b - log P_k, A_sym_k>_F
                  + beta * tr(log X_b - log P_k) * tr(A_sym_k)
    """
    N, h, n, _ = X.shape
    c = P.shape[0]
    B = N * h

    # --- parameter prep (glue) ---
    A_sym = symmetrize_by_tril(A).astype(jnp.float32)                   # (c, n, n)
    tr_A = jnp.trace(A_sym, axis1=-2, axis2=-1)                         # (c,)
    logP = _sym_logm(P.astype(jnp.float32))                             # (c, n, n)
    kP = (alpha * jnp.sum(logP * A_sym, axis=(-2, -1))
          + beta * jnp.trace(logP, axis1=-2, axis2=-1) * tr_A)          # (c,)

    # Fold alpha and the beta*tr(logX)*tr(A) term into one effective hyperplane:
    #   alpha*<logX, A_sym_k> + beta*tr(logX)*tr(A_k) = <logX, A_eff_k>
    eye = jnp.eye(n, dtype=jnp.float32)
    A_eff = alpha * A_sym + beta * tr_A[:, None, None] * eye            # (c, n, n)

    # --- lane-dense class padding: c -> multiple of 128 (dense MXU M-dim & stores) ---
    c_pad = 128 * ((c + 127) // 128)
    A_T = jnp.pad(A_eff.reshape(c, n * n), ((0, c_pad - c), (0, 0)))    # (c_pad, n*n)
    kP2 = jnp.pad(kP, (0, c_pad - c)).reshape(c_pad, 1).astype(jnp.float32)

    # TODO(synk): symmetric eigendecomposition (eigh) has no Pallas equivalent; it is
    # done in plain JAX and only its factors feed the kernel.  (No eigenvalue clamp,
    # matching the PyTorch module; near-singular inputs give -inf/NaN logs.)
    w, U = jnp.linalg.eigh(X.reshape(B, n, n).astype(jnp.float32))      # (B,n), (B,n,n)
    lam = jnp.log(w)                                                    # (B, n)

    # --- batch-minor (lane-dense) layout + batch tiling; pad AFTER the log ---
    if tb is None:
        tb = _pick_tb(B)
    grid = max(1, pl.cdiv(B, tb))
    Bp = grid * tb
    Ut = jnp.transpose(U, (2, 1, 0))                                    # (n, n, B): [m, j, b]
    lam_t = lam.T                                                       # (n, B):    [m, b]
    if Bp != B:
        Ut = jnp.pad(Ut, ((0, 0), (0, 0), (0, Bp - B)))
        lam_t = jnp.pad(lam_t, ((0, 0), (0, Bp - B)))

    kernel = _make_rmlr_kernel(n)
    out_t = pl.pallas_call(
        kernel,
        out_shape=jax.ShapeDtypeStruct((c_pad, Bp), jnp.float32),
        grid_spec=pltpu.PrefetchScalarGridSpec(
            num_scalar_prefetch=0,
            grid=(grid,),
            in_specs=[
                pl.BlockSpec((n, n, tb), lambda g: (0, 0, g)),       # eigenvectors
                pl.BlockSpec((n, tb), lambda g: (0, g)),             # log-eigenvalues
                pl.BlockSpec((c_pad, n * n), lambda g: (0, 0)),      # A_eff (grid-invariant)
                pl.BlockSpec((c_pad, 1), lambda g: (0, 0)),          # kP    (grid-invariant)
            ],
            out_specs=pl.BlockSpec((c_pad, tb), lambda g: (0, g)),
            scratch_shapes=[pltpu.VMEM((n * n, tb), jnp.float32)],
        ),
        compiler_params=pltpu.CompilerParams(
            dimension_semantics=("parallel",),
            vmem_limit_bytes=40 * 1024 * 1024,
        ),
    )(Ut, lam_t, A_T, kP2)

    # (c_pad, Bp) -> (B, c) -> (N, h*c)
    return out_t[:c, :B].T.reshape(N, h * c)


# ------------------------------ pure-JAX reference ----------------------------

def spd_rmlr_reference(X, P, A, *, alpha=1.0, beta=0.0):
    A_sym = symmetrize_by_tril(A)
    LX = _sym_logm(X)                                   # (N,h,n,n)
    LP = _sym_logm(P)                                   # (c,n,n)
    D = LX[:, :, None, :, :] - LP[None, None, :, :, :]  # (N,h,c,n,n)
    out = (alpha * jnp.sum(D * A_sym, axis=(-2, -1))
           + beta * jnp.trace(D, axis1=-2, axis2=-1)
           * jnp.trace(A_sym, axis1=-2, axis2=-1))
    return out.reshape(X.shape[0], -1)


# ----------------------------------- main -------------------------------------

if __name__ == "__main__":
    N, h, n, c = 16, 16, 16, 10   # B = N*h = 256 -> tb = 128, grid = 2 (exercises pipeline)

    key = jax.random.PRNGKey(0)
    kA, kX = jax.random.split(key)

    # Deterministic parameter init mirroring the module's __init__:
    #   P: (c,n,n) identity SPD prototypes; A: (c,n,n) uniform(-sqrt(6/n^2), sqrt(6/n^2))
    P = jnp.tile(jnp.eye(n, dtype=jnp.float32)[None], (c, 1, 1))
    bound = math.sqrt(6.0 / (n * n))
    A = jax.random.uniform(kA, (c, n, n), jnp.float32, -bound, bound)

    # Random SPD inputs X: (N, h, n, n)
    M = jax.random.normal(kX, (N, h, n, n), jnp.float32)
    X = jnp.einsum('nhij,nhkj->nhik', M, M) / n + jnp.eye(n, dtype=jnp.float32)

    # beta == 0 path (module default)
    out = spd_rmlr_forward(X, P, A, alpha=1.0, beta=0.0)
    out = jax.block_until_ready(out)
    ref = spd_rmlr_reference(X, P, A, alpha=1.0, beta=0.0)
    assert out.shape == (N, h * c)
    assert jnp.allclose(out, ref, rtol=1e-4, atol=1e-4), (
        f"beta=0: max abs err {jnp.max(jnp.abs(out - ref))}")

    # beta != 0 path (trace term, folded into A_eff — same kernel)
    out_b = spd_rmlr_forward(X, P, A, alpha=1.0, beta=0.2)
    out_b = jax.block_until_ready(out_b)
    ref_b = spd_rmlr_reference(X, P, A, alpha=1.0, beta=0.2)
    assert jnp.allclose(out_b, ref_b, rtol=1e-4, atol=1e-4), (
        f"beta=0.2: max abs err {jnp.max(jnp.abs(out_b - ref_b))}")

    print("KERNEL_OK")
</pallas_src>

<mosaic_0001>
module attributes {stable_mosaic.version = 11 : i64} {
  func.func @body(%arg0: i32, %arg1: memref<16x16x128xf32, #tpu.memory_space<vmem>>, %arg2: memref<16x128xf32, #tpu.memory_space<vmem>>, %arg3: memref<128x256xf32, #tpu.memory_space<vmem>>, %arg4: memref<128x1xf32, #tpu.memory_space<vmem>>, %arg5: memref<128x128xf32, #tpu.memory_space<vmem>>, %arg6: memref<256x128xf32, #tpu.memory_space<vmem>>) attributes {dimension_semantics = [#tpu.dimension_semantics<parallel>], iteration_bounds = array<i64: 2>, scalar_prefetch = 0 : i64, scratch_operands = 1 : i64, tpu.core_type = #tpu.core_type<tc>, window_params = [{transform_indices = @transform_0, window_bounds = array<i64: 16, 16, 128>}, {transform_indices = @transform_1, window_bounds = array<i64: 16, 128>}, {pipeline_mode = #tpu.pipeline_mode<synchronous>, transform_indices = @transform_2, window_bounds = array<i64: 128, 256>}, {pipeline_mode = #tpu.pipeline_mode<synchronous>, transform_indices = @transform_3, window_bounds = array<i64: 128, 1>}, {transform_indices = @transform_4, window_bounds = array<i64: 128, 128>}]} {
    %cst = arith.constant 0.000000e+00 : f32
    %0 = vector.broadcast %cst : f32 to vector<16x128xf32>
    %c0 = arith.constant 0 : index
    %c0_0 = arith.constant 0 : index
    %c0_1 = arith.constant 0 : index
    %1 = vector.load %arg1[%c0, %c0_0, %c0_1] : memref<16x16x128xf32, #tpu.memory_space<vmem>>, vector<1x16x128xf32>
    %2 = vector.shape_cast %1 : vector<1x16x128xf32> to vector<16x128xf32>
    %3 = vector.extract_strided_slice %2 {offsets = [0, 0], sizes = [1, 128], strides = [1, 1]} : vector<16x128xf32> to vector<1x128xf32>
    %c0_2 = arith.constant 0 : index
    %c0_3 = arith.constant 0 : index
    %4 = vector.load %arg2[%c0_2, %c0_3] : memref<16x128xf32, #tpu.memory_space<vmem>>, vector<1x128xf32>
    %5 = arith.mulf %3, %4 : vector<1x128xf32>
    %6 = vector.broadcast %5 : vector<1x128xf32> to vector<16x128xf32>
    %7 = arith.mulf %6, %2 : vector<16x128xf32>
    %8 = arith.addf %0, %7 : vector<16x128xf32>
    %c1 = arith.constant 1 : index
    %c0_4 = arith.constant 0 : index
    %c0_5 = arith.constant 0 : index
    %9 = vector.load %arg1[%c1, %c0_4, %c0_5] : memref<16x16x128xf32, #tpu.memory_space<vmem>>, vector<1x16x128xf32>
    %10 = vector.shape_cast %9 : vector<1x16x128xf32> to vector<16x128xf32>
    %11 = vector.extract_strided_slice %10 {offsets = [0, 0], sizes = [1, 128], strides = [1, 1]} : vector<16x128xf32> to vector<1x128xf32>
    %c1_6 = arith.constant 1 : index
    %c0_7 = arith.constant 0 : index
    %12 = vector.load %arg2[%c1_6, %c0_7] : memref<16x128xf32, #tpu.memory_space<vmem>>, vector<1x128xf32>
    %13 = arith.mulf %11, %12 : vector<1x128xf32>
    %14 = vector.broadcast %13 : vector<1x128xf32> to vector<16x128xf32>
    %15 = arith.mulf %14, %10 : vector<16x128xf32>
    %16 = arith.addf %8, %15 : vector<16x128xf32>
    %c2 = arith.constant 2 : index
    %c0_8 = arith.constant 0 : index
    %c0_9 = arith.constant 0 : index
    %17 = vector.load %arg1[%c2, %c0_8, %c0_9] : memref<16x16x128xf32, #tpu.memory_space<vmem>>, vector<1x16x128xf32>
    %18 = vector.shape_cast %17 : vector<1x16x128xf32> to vector<16x128xf32>
    %19 = vector.extract_strided_slice %18 {offsets = [0, 0], sizes = [1, 128], strides = [1, 1]} : vector<16x128xf32> to vector<1x128xf32>
    %c2_10 = arith.constant 2 : index
    %c0_11 = arith.constant 0 : index
    %20 = vector.load %arg2[%c2_10, %c0_11] : memref<16x128xf32, #tpu.memory_space<vmem>>, vector<1x128xf32>
    %21 = arith.mulf %19, %20 : vector<1x128xf32>
    %22 = vector.broadcast %21 : vector<1x128xf32> to vector<16x128xf32>
    %23 = arith.mulf %22, %18 : vector<16x128xf32>
    %24 = arith.addf %16, %23 : vector<16x128xf32>
    %c3 = arith.constant 3 : index
    %c0_12 = arith.constant 0 : index
    %c0_13 = arith.constant 0 : index
    %25 = vector.load %arg1[%c3, %c0_12, %c0_13] : memref<16x16x128xf32, #tpu.memory_space<vmem>>, vector<1x16x128xf32>
    %26 = vector.shape_cast %25 : vector<1x16x128xf32> to vector<16x128xf32>
    %27 = vector.extract_strided_slice %26 {offsets = [0, 0], sizes = [1, 128], strides = [1, 1]} : vector<16x128xf32> to vector<1x128xf32>
    %c3_14 = arith.constant 3 : index
    %c0_15 = arith.constant 0 : index
    %28 = vector.load %arg2[%c3_14, %c0_15] : memref<16x128xf32, #tpu.memory_space<vmem>>, vector<1x128xf32>
    %29 = arith.mulf %27, %28 : vector<1x128xf32>
    %30 = vector.broadcast %29 : vector<1x128xf32> to vector<16x128xf32>
    %31 = arith.mulf %30, %26 : vector<16x128xf32>
    %32 = arith.addf %24, %31 : vector<16x128xf32>
    %c4 = arith.constant 4 : index
    %c0_16 = arith.constant 0 : index
    %c0_17 = arith.constant 0 : index
    %33 = vector.load %arg1[%c4, %c0_16, %c0_17] : memref<16x16x128xf32, #tpu.memory_space<vmem>>, vector<1x16x128xf32>
    %34 = vector.shape_cast %33 : vector<1x16x128xf32> to vector<16x128xf32>
    %35 = vector.extract_strided_slice %34 {offsets = [0, 0], sizes = [1, 128], strides = [1, 1]} : vector<16x128xf32> to vector<1x128xf32>
    %c4_18 = arith.constant 4 : index
    %c0_19 = arith.constant 0 : index
    %36 = vector.load %arg2[%c4_18, %c0_19] : memref<16x128xf32, #tpu.memory_space<vmem>>, vector<1x128xf32>
    %37 = arith.mulf %35, %36 : vector<1x128xf32>
    %38 = vector.broadcast %37 : vector<1x128xf32> to vector<16x128xf32>
    %39 = arith.mulf %38, %34 : vector<16x128xf32>
    %40 = arith.addf %32, %39 : vector<16x128xf32>
    %c5 = arith.constant 5 : index
    %c0_20 = arith.constant 0 : index
    %c0_21 = arith.constant 0 : index
    %41 = vector.load %arg1[%c5, %c0_20, %c0_21] : memref<16x16x128xf32, #tpu.memory_space<vmem>>, vector<1x16x128xf32>
    %42 = vector.shape_cast %41 : vector<1x16x128xf32> to vector<16x128xf32>
    %43 = vector.extract_strided_slice %42 {offsets = [0, 0], sizes = [1, 128], strides = [1, 1]} : vector<16x128xf32> to vector<1x128xf32>
    %c5_22 = arith.constant 5 : index
    %c0_23 = arith.constant 0 : index
    %44 = vector.load %arg2[%c5_22, %c0_23] : memref<16x128xf32, #tpu.memory_space<vmem>>, vector<1x128xf32>
    %45 = arith.mulf %43, %44 : vector<1x128xf32>
    %46 = vector.broadcast %45 : vector<1x128xf32> to vector<16x128xf32>
    %47 = arith.mulf %46, %42 : vector<16x128xf32>
    %48 = arith.addf %40, %47 : vector<16x128xf32>
    %c6 = arith.constant 6 : index
    %c0_24 = arith.constant 0 : index
    %c0_25 = arith.constant 0 : index
    %49 = vector.load %arg1[%c6, %c0_24, %c0_25] : memref<16x16x128xf32, #tpu.memory_space<vmem>>, vector<1x16x128xf32>
    %50 = vector.shape_cast %49 : vector<1x16x128xf32> to vector<16x128xf32>
    %51 = vector.extract_strided_slice %50 {offsets = [0, 0], sizes = [1, 128], strides = [1, 1]} : vector<16x128xf32> to vector<1x128xf32>
    %c6_26 = arith.constant 6 : index
    %c0_27 = arith.constant 0 : index
    %52 = vector.load %arg2[%c6_26, %c0_27] : memref<16x128xf32, #tpu.memory_space<vmem>>, vector<1x128xf32>
    %53 = arith.mulf %51, %52 : vector<1x128xf32>
    %54 = vector.broadcast %53 : vector<1x128xf32> to vector<16x128xf32>
    %55 = arith.mulf %54, %50 : vector<16x128xf32>
    %56 = arith.addf %48, %55 : vector<16x128xf32>
    %c7 = arith.constant 7 : index
    %c0_28 = arith.constant 0 : index
    %c0_29 = arith.constant 0 : index
    %57 = vector.load %arg1[%c7, %c0_28, %c0_29] : memref<16x16x128xf32, #tpu.memory_space<vmem>>, vector<1x16x128xf32>
    %58 = vector.shape_cast %57 : vector<1x16x128xf32> to vector<16x128xf32>
    %59 = vector.extract_strided_slice %58 {offsets = [0, 0], sizes = [1, 128], strides = [1, 1]} : vector<16x128xf32> to vector<1x128xf32>
    %c7_30 = arith.constant 7 : index
    %c0_31 = arith.constant 0 : index
    %60 = vector.load %arg2[%c7_30, %c0_31] : memref<16x128xf32, #tpu.memory_space<vmem>>, vector<1x128xf32>
    %61 = arith.mulf %59, %60 : vector<1x128xf32>
    %62 = vector.broadcast %61 : vector<1x128xf32> to vector<16x128xf32>
    %63 = arith.mulf %62, %58 : vector<16x128xf32>
    %64 = arith.addf %56, %63 : vector<16x128xf32>
    %c8 = arith.constant 8 : index
    %c0_32 = arith.constant 0 : index
    %c0_33 = arith.constant 0 : index
    %65 = vector.load %arg1[%c8, %c0_32, %c0_33] : memref<16x16x128xf32, #tpu.memory_space<vmem>>, vector<1x16x128xf32>
    %66 = vector.shape_cast %65 : vector<1x16x128xf32> to vector<16x128xf32>
    %67 = vector.extract_strided_slice %66 {offsets = [0, 0], sizes = [1, 128], strides = [1, 1]} : vector<16x128xf32> to vector<1x128xf32>
    %c8_34 = arith.constant 8 : index
    %c0_35 = arith.constant 0 : index
    %68 = vector.load %arg2[%c8_34, %c0_35] : memref<16x128xf32, #tpu.memory_space<vmem>>, vector<1x128xf32>
    %69 = arith.mulf %67, %68 : vector<1x128xf32>
    %70 = vector.broadcast %69 : vector<1x128xf32> to vector<16x128xf32>
    %71 = arith.mulf %70, %66 : vector<16x128xf32>
    %72 = arith.addf %64, %71 : vector<16x128xf32>
    %c9 = arith.constant 9 : index
    %c0_36 = arith.constant 0 : index
    %c0_37 = arith.constant 0 : index
    %73 = vector.load %arg1[%c9, %c0_36, %c0_37] : memref<16x16x128xf32, #tpu.memory_space<vmem>>, vector<1x16x128xf32>
    %74 = vector.shape_cast %73 : vector<1x16x128xf32> to vector<16x128xf32>
    %75 = vector.extract_strided_slice %74 {offsets = [0, 0], sizes = [1, 128], strides = [1, 1]} : vector<16x128xf32> to vector<1x128xf32>
    %c9_38 = arith.constant 9 : index
    %c0_39 = arith.constant 0 : index
    %76 = vector.load %arg2[%c9_38, %c0_39] : memref<16x128xf32, #tpu.memory_space<vmem>>, vector<1x128xf32>
    %77 = arith.mulf %75, %76 : vector<1x128xf32>
    %78 = vector.broadcast %77 : vector<1x128xf32> to vector<16x128xf32>
    %79 = arith.mulf %78, %74 : vector<16x128xf32>
    %80 = arith.addf %72, %79 : vector<16x128xf32>
    %c10 = arith.constant 10 : index
    %c0_40 = arith.constant 0 : index
    %c0_41 = arith.constant 0 : index
    %81 = vector.load %arg1[%c10, %c0_40, %c0_41] : memref<16x16x128xf32, #tpu.memory_space<vmem>>, vector<1x16x128xf32>
    %82 = vector.shape_cast %81 : vector<1x16x128xf32> to vector<16x128xf32>
    %83 = vector.extract_strided_slice %82 {offsets = [0, 0], sizes = [1, 128], strides = [1, 1]} : vector<16x128xf32> to vector<1x128xf32>
    %c10_42 = arith.constant 10 : index
    %c0_43 = arith.constant 0 : index
    %84 = vector.load %arg2[%c10_42, %c0_43] : memref<16x128xf32, #tpu.memory_space<vmem>>, vector<1x128xf32>
    %85 = arith.mulf %83, %84 : vector<1x128xf32>
    %86 = vector.broadcast %85 : vector<1x128xf32> to vector<16x128xf32>
    %87 = arith.mulf %86, %82 : vector<16x128xf32>
    %88 = arith.addf %80, %87 : vector<16x128xf32>
    %c11 = arith.constant 11 : index
    %c0_44 = arith.constant 0 : index
    %c0_45 = arith.constant 0 : index
    %89 = vector.load %arg1[%c11, %c0_44, %c0_45] : memref<16x16x128xf32, #tpu.memory_space<vmem>>, vector<1x16x128xf32>
    %90 = vector.shape_cast %89 : vector<1x16x128xf32> to vector<16x128xf32>
    %91 = vector.extract_strided_slice %90 {offsets = [0, 0], sizes = [1, 128], strides = [1, 1]} : vector<16x128xf32> to vector<1x128xf32>
    %c11_46 = arith.constant 11 : index
    %c0_47 = arith.constant 0 : index
    %92 = vector.load %arg2[%c11_46, %c0_47] : memref<16x128xf32, #tpu.memory_space<vmem>>, vector<1x128xf32>
    %93 = arith.mulf %91, %92 : vector<1x128xf32>
    %94 = vector.broadcast %93 : vector<1x128xf32> to vector<16x128xf32>
    %95 = arith.mulf %94, %90 : vector<16x128xf32>
    %96 = arith.addf %88, %95 : vector<16x128xf32>
    %c12 = arith.constant 12 : index
    %c0_48 = arith.constant 0 : index
    %c0_49 = arith.constant 0 : index
    %97 = vector.load %arg1[%c12, %c0_48, %c0_49] : memref<16x16x128xf32, #tpu.memory_space<vmem>>, vector<1x16x128xf32>
    %98 = vector.shape_cast %97 : vector<1x16x128xf32> to vector<16x128xf32>
    %99 = vector.extract_strided_slice %98 {offsets = [0, 0], sizes = [1, 128], strides = [1, 1]} : vector<16x128xf32> to vector<1x128xf32>
    %c12_50 = arith.constant 12 : index
    %c0_51 = arith.constant 0 : index
    %100 = vector.load %arg2[%c12_50, %c0_51] : memref<16x128xf32, #tpu.memory_space<vmem>>, vector<1x128xf32>
    %101 = arith.mulf %99, %100 : vector<1x128xf32>
    %102 = vector.broadcast %101 : vector<1x128xf32> to vector<16x128xf32>
    %103 = arith.mulf %102, %98 : vector<16x128xf32>
    %104 = arith.addf %96, %103 : vector<16x128xf32>
    %c13 = arith.constant 13 : index
    %c0_52 = arith.constant 0 : index
    %c0_53 = arith.constant 0 : index
    %105 = vector.load %arg1[%c13, %c0_52, %c0_53] : memref<16x16x128xf32, #tpu.memory_space<vmem>>, vector<1x16x128xf32>
    %106 = vector.shape_cast %105 : vector<1x16x128xf32> to vector<16x128xf32>
    %107 = vector.extract_strided_slice %106 {offsets = [0, 0], sizes = [1, 128], strides = [1, 1]} : vector<16x128xf32> to vector<1x128xf32>
    %c13_54 = arith.constant 13 : index
    %c0_55 = arith.constant 0 : index
    %108 = vector.load %arg2[%c13_54, %c0_55] : memref<16x128xf32, #tpu.memory_space<vmem>>, vector<1x128xf32>
    %109 = arith.mulf %107, %108 : vector<1x128xf32>
    %110 = vector.broadcast %109 : vector<1x128xf32> to vector<16x128xf32>
    %111 = arith.mulf %110, %106 : vector<16x128xf32>
    %112 = arith.addf %104, %111 : vector<16x128xf32>
    %c14 = arith.constant 14 : index
    %c0_56 = arith.constant 0 : index
    %c0_57 = arith.constant 0 : index
    %113 = vector.load %arg1[%c14, %c0_56, %c0_57] : memref<16x16x128xf32, #tpu.memory_space<vmem>>, vector<1x16x128xf32>
    %114 = vector.shape_cast %113 : vector<1x16x128xf32> to vector<16x128xf32>
    %115 = vector.extract_strided_slice %114 {offsets = [0, 0], sizes = [1, 128], strides = [1, 1]} : vector<16x128xf32> to vector<1x128xf32>
    %c14_58 = arith.constant 14 : index
    %c0_59 = arith.constant 0 : index
    %116 = vector.load %arg2[%c14_58, %c0_59] : memref<16x128xf32, #tpu.memory_space<vmem>>, vector<1x128xf32>
    %117 = arith.mulf %115, %116 : vector<1x128xf32>
    %118 = vector.broadcast %117 : vector<1x128xf32> to vector<16x128xf32>
    %119 = arith.mulf %118, %114 : vector<16x128xf32>
    %120 = arith.addf %112, %119 : vector<16x128xf32>
    %c15 = arith.constant 15 : index
    %c0_60 = arith.constant 0 : index
    %c0_61 = arith.constant 0 : index
    %121 = vector.load %arg1[%c15, %c0_60, %c0_61] : memref<16x16x128xf32, #tpu.memory_space<vmem>>, vector<1x16x128xf32>
    %122 = vector.shape_cast %121 : vector<1x16x128xf32> to vector<16x128xf32>
    %123 = vector.extract_strided_slice %122 {offsets = [0, 0], sizes = [1, 128], strides = [1, 1]} : vector<16x128xf32> to vector<1x128xf32>
    %c15_62 = arith.constant 15 : index
    %c0_63 = arith.constant 0 : index
    %124 = vector.load %arg2[%c15_62, %c0_63] : memref<16x128xf32, #tpu.memory_space<vmem>>, vector<1x128xf32>
    %125 = arith.mulf %123, %124 : vector<1x128xf32>
    %126 = vector.broadcast %125 : vector<1x128xf32> to vector<16x128xf32>
    %127 = arith.mulf %126, %122 : vector<16x128xf32>
    %128 = arith.addf %120, %127 : vector<16x128xf32>
    %c0_64 = arith.constant 0 : index
    %c0_65 = arith.constant 0 : index
    %129 = vector.load %arg6[%c0_64, %c0_65] : memref<256x128xf32, #tpu.memory_space<vmem>>, vector<16x128xf32>
    tpu.vector_store %arg6[%c0_64, %c0_65], %128 {strides = array<i32>} : memref<256x128xf32, #tpu.memory_space<vmem>>, vector<16x128xf32>,
    %cst_66 = arith.constant 0.000000e+00 : f32
    %130 = vector.broadcast %cst_66 : f32 to vector<16x128xf32>
    %c0_67 = arith.constant 0 : index
    %c0_68 = arith.constant 0 : index
    %c0_69 = arith.constant 0 : index
    %131 = vector.load %arg1[%c0_67, %c0_68, %c0_69] : memref<16x16x128xf32, #tpu.memory_space<vmem>>, vector<1x16x128xf32>
    %132 = vector.shape_cast %131 : vector<1x16x128xf32> to vector<16x128xf32>
    %133 = vector.extract_strided_slice %132 {offsets = [1, 0], sizes = [1, 128], strides = [1, 1]} : vector<16x128xf32> to vector<1x128xf32>
    %c0_70 = arith.constant 0 : index
    %c0_71 = arith.constant 0 : index
    %134 = vector.load %arg2[%c0_70, %c0_71] : memref<16x128xf32, #tpu.memory_space<vmem>>, vector<1x128xf32>
    %135 = arith.mulf %133, %134 : vector<1x128xf32>
    %136 = vector.broadcast %135 : vector<1x128xf32> to vector<16x128xf32>
    %137 = arith.mulf %136, %132 : vector<16x128xf32>
    %138 = arith.addf %130, %137 : vector<16x128xf32>
    %c1_72 = arith.constant 1 : index
    %c0_73 = arith.constant 0 : index
    %c0_74 = arith.constant 0 : index
    %139 = vector.load %arg1[%c1_72, %c0_73, %c0_74] : memref<16x16x128xf32, #tpu.memory_space<vmem>>, vector<1x16x128xf32>
    %140 = vector.shape_cast %139 : vector<1x16x128xf32> to vector<16x128xf32>
    %141 = vector.extract_strided_slice %140 {offsets = [1, 0], sizes = [1, 128], strides = [1, 1]} : vector<16x128xf32> to vector<1x128xf32>
    %c1_75 = arith.constant 1 : index
    %c0_76 = arith.constant 0 : index
    %142 = vector.load %arg2[%c1_75, %c0_76] : memref<16x128xf32, #tpu.memory_space<vmem>>, vector<1x128xf32>
    %143 = arith.mulf %141, %142 : vector<1x128xf32>
    %144 = vector.broadcast %143 : vector<1x128xf32> to vector<16x128xf32>
    %145 = arith.mulf %144, %140 : vector<16x128xf32>
    %146 = arith.addf %138, %145 : vector<16x128xf32>
    %c2_77 = arith.constant 2 : index
    %c0_78 = arith.constant 0 : index
    %c0_79 = arith.constant 0 : index
    %147 = vector.load %arg1[%c2_77, %c0_78, %c0_79] : memref<16x16x128xf32, #tpu.memory_space<vmem>>, vector<1x16x128xf32>
    %148 = vector.shape_cast %147 : vector<1x16x128xf32> to vector<16x128xf32>
    %149 = vector.extract_strided_slice %148 {offsets = [1, 0], sizes = [1, 128], strides = [1, 1]} : vector<16x128xf32> to vector<1x128xf32>
    %c2_80 = arith.constant 2 : index
    %c0_81 = arith.constant 0 : index
    %150 = vector.load %arg2[%c2_80, %c0_81] : memref<16x128xf32, #tpu.memory_space<vmem>>, vector<1x128xf32>
    %151 = arith.mulf %149, %150 : vector<1x128xf32>
    %152 = vector.broadcast %151 : vector<1x128xf32> to vector<16x128xf32>
    %153 = arith.mulf %152, %148 : vector<16x128xf32>
    %154 = arith.addf %146, %153 : vector<16x128xf32>
    %c3_82 = arith.constant 3 : index
    %c0_83 = arith.constant 0 : index
    %c0_84 = arith.constant 0 : index
    %155 = vector.load %arg1[%c3_82, %c0_83, %c0_84] : memref<16x16x128xf32, #tpu.memory_space<vmem>>, vector<1x16x128xf32>
    %156 = vector.shape_cast %155 : vector<1x16x128xf32> to vector<16x128xf32>
    %157 = vector.extract_strided_slice %156 {offsets = [1, 0], sizes = [1, 128], strides = [1, 1]} : vector<16x128xf32> to vector<1x128xf32>
    %c3_85 = arith.constant 3 : index
    %c0_86 = arith.constant 0 : index
    %158 = vector.load %arg2[%c3_85, %c0_86] : memref<16x128xf32, #tpu.memory_space<vmem>>, vector<1x128xf32>
    %159 = arith.mulf %157, %158 : vector<1x128xf32>
    %160 = vector.broadcast %159 : vector<1x128xf32> to vector<16x128xf32>
    %161 = arith.mulf %160, %156 : vector<16x128xf32>
    %162 = arith.addf %154, %161 : vector<16x128xf32>
    %c4_87 = arith.constant 4 : index
    %c0_88 = arith.constant 0 : index
    %c0_89 = arith.constant 0 : index
    %163 = vector.load %arg1[%c4_87, %c0_88, %c0_89] : memref<16x16x128xf32, #tpu.memory_space<vmem>>, vector<1x16x128xf32>
    %164 = vector.shape_cast %163 : vector<1x16x128xf32> to vector<16x128xf32>
    %165 = vector.extract_strided_slice %164 {offsets = [1, 0], sizes = [1, 128], strides = [1, 1]} : vector<16x128xf32> to vector<1x128xf32>
    %c4_90 = arith.constant 4 : index
    %c0_91 = arith.constant 0 : index
    %166 = vector.load %arg2[%c4_90, %c0_91] : memref<16x128xf32, #tpu.memory_space<vmem>>, vector<1x128xf32>
    %167 = arith.mulf %165, %166 : vector<1x128xf32>
    %168 = vector.broadcast %167 : vector<1x128xf32> to vector<16x128xf32>
    %169 = arith.mulf %168, %164 : vector<16x128xf32>
    %170 = arith.addf %162, %169 : vector<16x128xf32>
    %c5_92 = arith.constant 5 : index
    %c0_93 = arith.constant 0 : index
    %c0_94 = arith.constant 0 : index
    %171 = vector.load %arg1[%c5_92, %c0_93, %c0_94] : memref<16x16x128xf32, #tpu.memory_space<vmem>>, vector<1x16x128xf32>
    %172 = vector.shape_cast %171 : vector<1x16x128xf32> to vector<16x128xf32>
    %173 = vector.extract_strided_slice %172 {offsets = [1, 0], sizes = [1, 128], strides = [1, 1]} : vector<16x128xf32> to vector<1x128xf32>
    %c5_95 = arith.constant 5 : index
    %c0_96 = arith.constant 0 : index
    %174 = vector.load %arg2[%c5_95, %c0_96] : memref<16x128xf32, #tpu.memory_space<vmem>>, vector<1x128xf32>
    %175 = arith.mulf %173, %174 : vector<1x128xf32>
    %176 = vector.broadcast %175 : vector<1x128xf32> to vector<16x128xf32>
    %177 = arith.mulf %176, %172 : vector<16x128xf32>
    %178 = arith.addf %170, %177 : vector<16x128xf32>
    %c6_97 = arith.constant 6 : index
    %c0_98 = arith.constant 0 : index
    %c0_99 = arith.constant 0 : index
    %179 = vector.load %arg1[%c6_97, %c0_98, %c0_99] : memref<16x16x128xf32, #tpu.memory_space<vmem>>, vector<1x16x128xf32>
    %180 = vector.shape_cast %179 : vector<1x16x128xf32> to vector<16x128xf32>
    %181 = vector.extract_strided_slice %180 {offsets = [1, 0], sizes = [1, 128], strides = [1, 1]} : vector<16x128xf32> to vector<1x128xf32>
    %c6_100 = arith.constant 6 : index
    %c0_101 = arith.constant 0 : index
    %182 = vector.load %arg2[%c6_100, %c0_101] : memref<16x128xf32, #tpu.memory_space<vmem>>, vector<1x128xf32>
    %183 = arith.mulf %181, %182 : vector<1x128xf32>
    %184 = vector.broadcast %183 : vector<1x128xf32> to vector<16x128xf32>
    %185 = arith.mulf %184, %180 : vector<16x128xf32>
    %186 = arith.addf %178, %185 : vector<16x128xf32>
    %c7_102 = arith.constant 7 : index
    %c0_103 = arith.constant 0 : index
    %c0_104 = arith.constant 0 : index
    %187 = vector.load %arg1[%c7_102, %c0_103, %c0_104] : memref<16x16x128xf32, #tpu.memory_space<vmem>>, vector<1x16x128xf32>
    %188 = vector.shape_cast %187 : vector<1x16x128xf32> to vector<16x128xf32>
    %189 = vector.extract_strided_slice %188 {offsets = [1, 0], sizes = [1, 128], strides = [1, 1]} : vector<16x128xf32> to vector<1x128xf32>
    %c7_105 = arith.constant 7 : index
    %c0_106 = arith.constant 0 : index
    %190 = vector.load %arg2[%c7_105, %c0_106] : memref<16x128xf32, #tpu.memory_space<vmem>>, vector<1x128xf32>
    %191 = arith.mulf %189, %190 : vector<1x128xf32>
    %192 = vector.broadcast %191 : vector<1x128xf32> to vector<16x128xf32>
    %193 = arith.mulf %192, %188 : vector<16x128xf32>
    %194 = arith.addf %186, %193 : vector<16x128xf32>
    %c8_107 = arith.constant 8 : index
    %c0_108 = arith.constant 0 : index
    %c0_109 = arith.constant 0 : index
    %195 = vector.load %arg1[%c8_107, %c0_108, %c0_109] : memref<16x16x128xf32, #tpu.memory_space<vmem>>, vector<1x16x128xf32>
    %196 = vector.shape_cast %195 : vector<1x16x128xf32> to vector<16x128xf32>
    %197 = vector.extract_strided_slice %196 {offsets = [1, 0], sizes = [1, 128], strides = [1, 1]} : vector<16x128xf32> to vector<1x128xf32>
    %c8_110 = arith.constant 8 : index
    %c0_111 = arith.constant 0 : index
    %198 = vector.load %arg2[%c8_110, %c0_111] : memref<16x128xf32, #tpu.memory_space<vmem>>, vector<1x128xf32>
    %199 = arith.mulf %197, %198 : vector<1x128xf32>
    %200 = vector.broadcast %199 : vector<1x128xf32> to vector<16x128xf32>
    %201 = arith.mulf %200, %196 : vector<16x128xf32>
    %202 = arith.addf %194, %201 : vector<16x128xf32>
    %c9_112 = arith.constant 9 : index
    %c0_113 = arith.constant 0 : index
    %c0_114 = arith.constant 0 : index
    %203 = vector.load %arg1[%c9_112, %c0_113, %c0_114] : memref<16x16x128xf32, #tpu.memory_space<vmem>>, vector<1x16x128xf32>
    %204 = vector.shape_cast %203 : vector<1x16x128xf32> to vector<16x128xf32>
    %205 = vector.extract_strided_slice %204 {offsets = [1, 0], sizes = [1, 128], strides = [1, 1]} : vector<16x128xf32> to vector<1x128xf32>
    %c9_115 = arith.constant 9 : index
    %c0_116 = arith.constant 0 : index
    %206 = vector.load %arg2[%c9_115, %c0_116] : memref<16x128xf32, #tpu.memory_space<vmem>>, vector<1x128xf32>
    %207 = arith.mulf %205, %206 : vector<1x128xf32>
    %208 = vector.broadcast %207 : vector<1x128xf32> to vector<16x128xf32>
    %209 = arith.mulf %208, %204 : vector<16x128xf32>
    %210 = arith.addf %202, %209 : vector<16x128xf32>
    %c10_117 = arith.constant 10 : index
    %c0_118 = arith.constant 0 : index
    %c0_119 = arith.constant 0 : index
    %211 = vector.load %arg1[%c10_117, %c0_118, %c0_119] : memref<16x16x128xf32, #tpu.memory_space<vmem>>, vector<1x16x128xf32>
    %212 = vector.shape_cast %211 : vector<1x16x128xf32> to vector<16x128xf32>
    %213 = vector.extract_strided_slice %212 {offsets = [1, 0], sizes = [1, 128], strides = [1, 1]} : vector<16x128xf32> to vector<1x128xf32>
    %c10_120 = arith.constant 10 : index
    %c0_121 = arith.constant 0 : index
    %214 = vector.load %arg2[%c10_120, %c0_121] : memref<16x128xf32, #tpu.memory_space<vmem>>, vector<1x128xf32>
    %215 = arith.mulf %213, %214 : vector<1x128xf32>
    %216 = vector.broadcast %215 : vector<1x128xf32> to vector<16x128xf32>
    %217 = arith.mulf %216, %212 : vector<16x128xf32>
    %218 = arith.addf %210, %217 : vector<16x128xf32>
    %c11_122 = arith.constant 11 : index
    %c0_123 = arith.constant 0 : index
    %c0_124 = arith.constant 0 : index
    %219 = vector.load %arg1[%c11_122, %c0_123, %c0_124] : memref<16x16x128xf32, #tpu.memory_space<vmem>>, vector<1x16x128xf32>
    %220 = vector.shape_cast %219 : vector<1x16x128xf32> to vector<16x128xf32>
    %221 = vector.extract_strided_slice %220 {offsets = [1, 0], sizes = [1, 128], strides = [1, 1]} : vector<16x128xf32> to vector<1x128xf32>
    %c11_125 = arith.constant 11 : index
    %c0_126 = arith.constant 0 : index
    %222 = vector.load %arg2[%c11_125, %c0_126] : memref<16x128xf32, #tpu.memory_space<vmem>>, vector<1x128xf32>
    %223 = arith.mulf %221, %222 : vector<1x128xf32>
    %224 = vector.broadcast %223 : vector<1x128xf32> to vector<16x128xf32>
    %225 = arith.mulf %224, %220 : vector<16x128xf32>
    %226 = arith.addf %218, %225 : vector<16x128xf32>
    %c12_127 = arith.constant 12 : index
    %c0_128 = arith.constant 0 : index
    %c0_129 = arith.constant 0 : index
    %227 = vector.load %arg1[%c12_127, %c0_128, %c0_129] : memref<16x16x128xf32, #tpu.memory_space<vmem>>, vector<1x16x128xf32>
    %228 = vector.shape_cast %227 : vector<1x16x128xf32> to vector<16x128xf32>
    %229 = vector.extract_strided_slice %228 {offsets = [1, 0], sizes = [1, 128], strides = [1, 1]} : vector<16x128xf32> to vector<1x128xf32>
    %c12_130 = arith.constant 12 : index
    %c0_131 = arith.constant 0 : index
    %230 = vector.load %arg2[%c12_130, %c0_131] : memref<16x128xf32, #tpu.memory_space<vmem>>, vector<1x128xf32>
    %231 = arith.mulf %229, %230 : vector<1x128xf32>
    %232 = vector.broadcast %231 : vector<1x128xf32> to vector<16x128xf32>
    %233 = arith.mulf %232, %228 : vector<16x128xf32>
    %234 = arith.addf %226, %233 : vector<16x128xf32>
    %c13_132 = arith.constant 13 : index
    %c0_133 = arith.constant 0 : index
    %c0_134 = arith.constant 0 : index
    %235 = vector.load %arg1[%c13_132, %c0_133, %c0_134] : memref<16x16x128xf32, #tpu.memory_space<vmem>>, vector<1x16x128xf32>
    %236 = vector.shape_cast %235 : vector<1x16x128xf32> to vector<16x128xf32>
    %237 = vector.extract_strided_slice %236 {offsets = [1, 0], sizes = [1, 128], strides = [1, 1]} : vector<16x128xf32> to vector<1x128xf32>
    %c13_135 = arith.constant 13 : index
    %c0_136 = arith.constant 0 : index
    %238 = vector.load %arg2[%c13_135, %c0_136] : memref<16x128xf32, #tpu.memory_space<vmem>>, vector<1x128xf32>
    %239 = arith.mulf %237, %238 : vector<1x128xf32>
    %240 = vector.broadcast %239 : vector<1x128xf32> to vector<16x128xf32>
    %241 = arith.mulf %240, %236 : vector<16x128xf32>
    %242 = arith.addf %234, %241 : vector<16x128xf32>
    %c14_137 = arith.constant 14 : index
    %c0_138 = arith.constant 0 : index
    %c0_139 = arith.constant 0 : index
    %243 = vector.load %arg1[%c14_137, %c0_138, %c0_139] : memref<16x16x128xf32, #tpu.memory_space<vmem>>, vector<1x16x128xf32>
    %244 = vector.shape_cast %243 : vector<1x16x128xf32> to vector<16x128xf32>
    %245 = vector.extract_strided_slice %244 {offsets = [1, 0], sizes = [1, 128], strides = [1, 1]} : vector<16x128xf32> to vector<1x128xf32>
    %c14_140 = arith.constant 14 : index
    %c0_141 = arith.constant 0 : index
    %246 = vector.load %arg2[%c14_140, %c0_141] : memref<16x128xf32, #tpu.memory_space<vmem>>, vector<1x128xf32>
    %247 = arith.mulf %245, %246 : vector<1x128xf32>
    %248 = vector.broadcast %247 : vector<1x128xf32> to vector<16x128xf32>
    %249 = arith.mulf %248, %244 : vector<16x128xf32>
    %250 = arith.addf %242, %249 : vector<16x128xf32>
    %c15_142 = arith.constant 15 : index
    %c0_143 = arith.constant 0 : index
    %c0_144 = arith.constant 0 : index
    %251 = vector.load %arg1[%c15_142, %c0_143, %c0_144] : memref<16x16x128xf32, #tpu.memory_space<vmem>>, vector<1x16x128xf32>
    %252 = vector.shape_cast %251 : vector<1x16x128xf32> to vector<16x128xf32>
    %253 = vector.extract_strided_slice %252 {offsets = [1, 0], sizes = [1, 128], strides = [1, 1]} : vector<16x128xf32> to vector<1x128xf32>
    %c15_145 = arith.constant 15 : index
    %c0_146 = arith.constant 0 : index
    %254 = vector.load %arg2[%c15_145, %c0_146] : memref<16x128xf32, #tpu.memory_space<vmem>>, vector<1x128xf32>
    %255 = arith.mulf %253, %254 : vector<1x128xf32>
    %256 = vector.broadcast %255 : vector<1x128xf32> to vector<16x128xf32>
    %257 = arith.mulf %256, %252 : vector<16x128xf32>
    %258 = arith.addf %250, %257 : vector<16x128xf32>
    %c16 = arith.constant 16 : index
    %c0_147 = arith.constant 0 : index
    %259 = vector.load %arg6[%c16, %c0_147] : memref<256x128xf32, #tpu.memory_space<vmem>>, vector<16x128xf32>
    tpu.vector_store %arg6[%c16, %c0_147], %258 {strides = array<i32>} : memref<256x128xf32, #tpu.memory_space<vmem>>, vector<16x128xf32>,
    %cst_148 = arith.constant 0.000000e+00 : f32
    %260 = vector.broadcast %cst_148 : f32 to vector<16x128xf32>
    %c0_149 = arith.constant 0 : index
    %c0_150 = arith.constant 0 : index
    %c0_151 = arith.constant 0 : index
    %261 = vector.load %arg1[%c0_149, %c0_150, %c0_151] : memref<16x16x128xf32, #tpu.memory_space<vmem>>, vector<1x16x128xf32>
    %262 = vector.shape_cast %261 : vector<1x16x128xf32> to vector<16x128xf32>
    %263 = vector.extract_strided_slice %262 {offsets = [2, 0], sizes = [1, 128], strides = [1, 1]} : vector<16x128xf32> to vector<1x128xf32>
    %c0_152 = arith.constant 0 : index
    %c0_153 = arith.constant 0 : index
    %264 = vector.load %arg2[%c0_152, %c0_153] : memref<16x128xf32, #tpu.memory_space<vmem>>, vector<1x128xf32>
    %265 = arith.mulf %263, %264 : vector<1x128xf32>
    %266 = vector.broadcast %265 : vector<1x128xf32> to vector<16x128xf32>
    %267 = arith.mulf %266, %262 : vector<16x128xf32>
    %268 = arith.addf %260, %267 : vector<16x128xf32>
    %c1_154 = arith.constant 1 : index
    %c0_155 = arith.constant 0 : index
    %c0_156 = arith.constant 0 : index
    %269 = vector.load %arg1[%c1_154, %c0_155, %c0_156] : memref<16x16x128xf32, #tpu.memory_space<vmem>>, vector<1x16x128xf32>
    %270 = vector.shape_cast %269 : vector<1x16x128xf32> to vector<16x128xf32>
    %271 = vector.extract_strided_slice %270 {offsets = [2, 0], sizes = [1, 128], strides = [1, 1]} : vector<16x128xf32> to vector<1x128xf32>
    %c1_157 = arith.constant 1 : index
    %c0_158 = arith.constant 0 : index
    %272 = vector.load %arg2[%c1_157, %c0_158] : memref<16x128xf32, #tpu.memory_space<vmem>>, vector<1x128xf32>
    %273 = arith.mulf %271, %272 : vector<1x128xf32>
    %274 = vector.broadcast %273 : vector<1x128xf32> to vector<16x128xf32>
    %275 = arith.mulf %274, %270 : vector<16x128xf32>
    %276 = arith.addf %268, %275 : vector<16x128xf32>
    %c2_159 = arith.constant 2 : index
    %c0_160 = arith.constant 0 : index
    %c0_161 = arith.constant 0 : index
    %277 = vector.load %arg1[%c2_159, %c0_160, %c0_161] : memref<16x16x128xf32, #tpu.memory_space<vmem>>, vector<1x16x128xf32>
    %278 = vector.shape_cast %277 : vector<1x16x128xf32> to vector<16x128xf32>
    %279 = vector.extract_strided_slice %278 {offsets = [2, 0], sizes = [1, 128], strides = [1, 1]} : vector<16x128xf32> to vector<1x128xf32>
    %c2_162 = arith.constant 2 : index
    %c0_163 = arith.constant 0 : index
    %280 = vector.load %arg2[%c2_162, %c0_163] : memref<16x128xf32, #tpu.memory_space<vmem>>, vector<1x128xf32>
    %281 = arith.mulf %279, %280 : vector<1x128xf32>
    %282 = vector.broadcast %281 : vector<1x128xf32> to vector<16x128xf32>
    %283 = arith.mulf %282, %278 : vector<16x128xf32>
    %284 = arith.addf %276, %283 : vector<16x128xf32>
    %c3_164 = arith.constant 3 : index
    %c0_165 = arith.constant 0 : index
    %c0_166 = arith.constant 0 : index
    %285 = vector.load %arg1[%c3_164, %c0_165, %c0_166] : memref<16x16x128xf32, #tpu.memory_space<vmem>>, vector<1x16x128xf32>
    %286 = vector.shape_cast %285 : vector<1x16x128xf32> to vector<16x128xf32>
    %287 = vector.extract_strided_slice %286 {offsets = [2, 0], sizes = [1, 128], strides = [1, 1]} : vector<16x128xf32> to vector<1x128xf32>
    %c3_167 = arith.constant 3 : index
    %c0_168 = arith.constant 0 : index
    %288 = vector.load %arg2[%c3_167, %c0_168] : memref<16x128xf32, #tpu.memory_space<vmem>>, vector<1x128xf32>
    %289 = arith.mulf %287, %288 : vector<1x128xf32>
    %290 = vector.broadcast %289 : vector<1x128xf32> to vector<16x128xf32>
    %291 = arith.mulf %290, %286 : vector<16x128xf32>
    %292 = arith.addf %284, %291 : vector<16x128xf32>
    %c4_169 = arith.constant 4 : index
    %c0_170 = arith.constant 0 : index
    %c0_171 = arith.constant 0 : index
    %293 = vector.load %arg1[%c4_169, %c0_170, %c0_171] : memref<16x16x128xf32, #tpu.memory_space<vmem>>, vector<1x16x128xf32>
    %294 = vector.shape_cast %293 : vector<1x16x128xf32> to vector<16x128xf32>
    %295 = vector.extract_strided_slice %294 {offsets = [2, 0], sizes = [1, 128], strides = [1, 1]} : vector<16x128xf32> to vector<1x128xf32>
    %c4_172 = arith.constant 4 : index
    %c0_173 = arith.constant 0 : index
    %296 = vector.load %arg2[%c4_172, %c0_173] : memref<16x128xf32, #tpu.memory_space<vmem>>, vector<1x128xf32>
    %297 = arith.mulf %295, %296 : vector<1x128xf32>
    %298 = vector.broadcast %297 : vector<1x128xf32> to vector<16x128xf32>
    %299 = arith.mulf %298, %294 : vector<16x128xf32>
    %300 = arith.addf %292, %299 : vector<16x128xf32>
    %c5_174 = arith.constant 5 : index
    %c0_175 = arith.constant 0 : index
    %c0_176 = arith.constant 0 : index
    %301 = vector.load %arg1[%c5_174, %c0_175, %c0_176] : memref<16x16x128xf32, #tpu.memory_space<vmem>>, vector<1x16x128xf32>
    %302 = vector.shape_cast %301 : vector<1x16x128xf32> to vector<16x128xf32>
    %303 = vector.extract_strided_slice %302 {offsets = [2, 0], sizes = [1, 128], strides = [1, 1]} : vector<16x128xf32> to vector<1x128xf32>
    %c5_177 = arith.constant 5 : index
    %c0_178 = arith.constant 0 : index
    %304 = vector.load %arg2[%c5_177, %c0_178] : memref<16x128xf32, #tpu.memory_space<vmem>>, vector<1x128xf32>
    %305 = arith.mulf %303, %304 : vector<1x128xf32>
    %306 = vector.broadcast %305 : vector<1x128xf32> to vector<16x128xf32>
    %307 = arith.mulf %306, %302 : vector<16x128xf32>
    %308 = arith.addf %300, %307 : vector<16x128xf32>
    %c6_179 = arith.constant 6 : index
    %c0_180 = arith.constant 0 : index
    %c0_181 = arith.constant 0 : index
    %309 = vector.load %arg1[%c6_179, %c0_180, %c0_181] : memref<16x16x128xf32, #tpu.memory_space<vmem>>, vector<1x16x128xf32>
    %310 = vector.shape_cast %309 : vector<1x16x128xf32> to vector<16x128xf32>
    %311 = vector.extract_strided_slice %310 {offsets = [2, 0], sizes = [1, 128], strides = [1, 1]} : vector<16x128xf32> to vector<1x128xf32>
    %c6_182 = arith.constant 6 : index
    %c0_183 = arith.constant 0 : index
    %312 = vector.load %arg2[%c6_182, %c0_183] : memref<16x128xf32, #tpu.memory_space<vmem>>, vector<1x128xf32>
    %313 = arith.mulf %311, %312 : vector<1x128xf32>
    %314 = vector.broadcast %313 : vector<1x128xf32> to vector<16x128xf32>
    %315 = arith.mulf %314, %310 : vector<16x128xf32>
    %316 = arith.addf %308, %315 : vector<16x128xf32>
    %c7_184 = arith.constant 7 : index
    %c0_185 = arith.constant 0 : index
    %c0_186 = arith.constant 0 : index
    %317 = vector.load %arg1[%c7_184, %c0_185, %c0_186] : memref<16x16x128xf32, #tpu.memory_space<vmem>>, vector<1x16x128xf32>
    %318 = vector.shape_cast %317 : vector<1x16x128xf32> to vector<16x128xf32>
    %319 = vector.extract_strided_slice %318 {offsets = [2, 0], sizes = [1, 128], strides = [1, 1]} : vector<16x128xf32> to vector<1x128xf32>
    %c7_187 = arith.constant 7 : index
    %c0_188 = arith.constant 0 : index
    %320 = vector.load %arg2[%c7_187, %c0_188] : memref<16x128xf32, #tpu.memory_space<vmem>>, vector<1x128xf32>
    %321 = arith.mulf %319, %320 : vector<1x128xf32>
    %322 = vector.broadcast %321 : vector<1x128xf32> to vector<16x128xf32>
    %323 = arith.mulf %322, %318 : vector<16x128xf32>
    %324 = arith.addf %316, %323 : vector<16x128xf32>
    %c8_189 = arith.constant 8 : index
    %c0_190 = arith.constant 0 : index
    %c0_191 = arith.constant 0 : index
    %325 = vector.load %arg1[%c8_189, %c0_190, %c0_191] : memref<16x16x128xf32, #tpu.memory_space<vmem>>, vector<1x16x128xf32>
    %326 = vector.shape_cast %325 : vector<1x16x128xf32> to vector<16x128xf32>
    %327 = vector.extract_strided_slice %326 {offsets = [2, 0], sizes = [1, 128], strides = [1, 1]} : vector<16x128xf32> to vector<1x128xf32>
    %c8_192 = arith.constant 8 : index
    %c0_193 = arith.constant 0 : index
    %328 = vector.load %arg2[%c8_192, %c0_193] : memref<16x128xf32, #tpu.memory_space<vmem>>, vector<1x128xf32>
    %329 = arith.mulf %327, %328 : vector<1x128xf32>
    %330 = vector.broadcast %329 : vector<1x128xf32> to vector<16x128xf32>
    %331 = arith.mulf %330, %326 : vector<16x128xf32>
    %332 = arith.addf %324, %331 : vector<16x128xf32>
    %c9_194 = arith.constant 9 : index
    %c0_195 = arith.constant 0 : index
    %c0_196 = arith.constant 0 : index
    %333 = vector.load %arg1[%c9_194, %c0_195, %c0_196] : memref<16x16x128xf32, #tpu.memory_space<vmem>>, vector<1x16x128xf32>
    %334 = vector.shape_cast %333 : vector<1x16x128xf32> to vector<16x128xf32>
    %335 = vector.extract_strided_slice %334 {offsets = [2, 0], sizes = [1, 128], strides = [1, 1]} : vector<16x128xf32> to vector<1x128xf32>
    %c9_197 = arith.constant 9 : index
    %c0_198 = arith.constant 0 : index
    %336 = vector.load %arg2[%c9_197, %c0_198] : memref<16x128xf32, #tpu.memory_space<vmem>>, vector<1x128xf32>
    %337 = arith.mulf %335, %336 : vector<1x128xf32>
    %338 = vector.broadcast %337 : vector<1x128xf32> to vector<16x128xf32>
    %339 = arith.mulf %338, %334 : vector<16x128xf32>
    %340 = arith.addf %332, %339 : vector<16x128xf32>
    %c10_199 = arith.constant 10 : index
    %c0_200 = arith.constant 0 : index
    %c0_201 = arith.constant 0 : index
    %341 = vector.load %arg1[%c10_199, %c0_200, %c0_201] : memref<16x16x128xf32, #tpu.memory_space<vmem>>, vector<1x16x128xf32>
    %342 = vector.shape_cast %341 : vector<1x16x128xf32> to vector<16x128xf32>
    %343 = vector.extract_strided_slice %342 {offsets = [2, 0], sizes = [1, 128], strides = [1, 1]} : vector<16x128xf32> to vector<1x128xf32>
    %c10_202 = arith.constant 10 : index
    %c0_203 = arith.constant 0 : index
    %344 = vector.load %arg2[%c10_202, %c0_203] : memref<16x128xf32, #tpu.memory_space<vmem>>, vector<1x128xf32>
    %345 = arith.mulf %343, %344 : vector<1x128xf32>
    %346 = vector.broadcast %345 : vector<1x128xf32> to vector<16x128xf32>
    %347 = arith.mulf %346, %342 : vector<16x128xf32>
    %348 = arith.addf %340, %347 : vector<16x128xf32>
    %c11_204 = arith.constant 11 : index
    %c0_205 = arith.constant 0 : index
    %c0_206 = arith.constant 0 : index
    %349 = vector.load %arg1[%c11_204, %c0_205, %c0_206] : memref<16x16x128xf32, #tpu.memory_space<vmem>>, vector<1x16x128xf32>
    %350 = vector.shape_cast %349 : vector<1x16x128xf32> to vector<16x128xf32>
    %351 = vector.extract_strided_slice %350 {offsets = [2, 0], sizes = [1, 128], strides = [1, 1]} : vector<16x128xf32> to vector<1x128xf32>
    %c11_207 = arith.constant 11 : index
    %c0_208 = arith.constant 0 : index
    %352 = vector.load %arg2[%c11_207, %c0_208] : memref<16x128xf32, #tpu.memory_space<vmem>>, vector<1x128xf32>
    %353 = arith.mulf %351, %352 : vector<1x128xf32>
    %354 = vector.broadcast %353 : vector<1x128xf32> to vector<16x128xf32>
    %355 = arith.mulf %354, %350 : vector<16x128xf32>
    %356 = arith.addf %348, %355 : vector<16x128xf32>
    %c12_209 = arith.constant 12 : index
    %c0_210 = arith.constant 0 : index
    %c0_211 = arith.constant 0 : index
    %357 = vector.load %arg1[%c12_209, %c0_210, %c0_211] : memref<16x16x128xf32, #tpu.memory_space<vmem>>, vector<1x16x128xf32>
    %358 = vector.shape_cast %357 : vector<1x16x128xf32> to vector<16x128xf32>
    %359 = vector.extract_strided_slice %358 {offsets = [2, 0], sizes = [1, 128], strides = [1, 1]} : vector<16x128xf32> to vector<1x128xf32>
    %c12_212 = arith.constant 12 : index
    %c0_213 = arith.constant 0 : index
    %360 = vector.load %arg2[%c12_212, %c0_213] : memref<16x128xf32, #tpu.memory_space<vmem>>, vector<1x128xf32>
    %361 = arith.mulf %359, %360 : vector<1x128xf32>
    %362 = vector.broadcast %361 : vector<1x128xf32> to vector<16x128xf32>
    %363 = arith.mulf %362, %358 : vector<16x128xf32>
    %364 = arith.addf %356, %363 : vector<16x128xf32>
    %c13_214 = arith.constant 13 : index
    %c0_215 = arith.constant 0 : index
    %c0_216 = arith.constant 0 : index
    %365 = vector.load %arg1[%c13_214, %c0_215, %c0_216] : memref<16x16x128xf32, #tpu.memory_space<vmem>>, vector<1x16x128xf32>
    %366 = vector.shape_cast %365 : vector<1x16x128xf32> to vector<16x128xf32>
    %367 = vector.extract_strided_slice %366 {offsets = [2, 0], sizes = [1, 128], strides = [1, 1]} : vector<16x128xf32> to vector<1x128xf32>
    %c13_217 = arith.constant 13 : index
    %c0_218 = arith.constant 0 : index
    %368 = vector.load %arg2[%c13_217, %c0_218] : memref<16x128xf32, #tpu.memory_space<vmem>>, vector<1x128xf32>
    %369 = arith.mulf %367, %368 : vector<1x128xf32>
    %370 = vector.broadcast %369 : vector<1x128xf32> to vector<16x128xf32>
    %371 = arith.mulf %370, %366 : vector<16x128xf32>
    %372 = arith.addf %364, %371 : vector<16x128xf32>
    %c14_219 = arith.constant 14 : index
    %c0_220 = arith.constant 0 : index
    %c0_221 = arith.constant 0 : index
    %373 = vector.load %arg1[%c14_219, %c0_220, %c0_221] : memref<16x16x128xf32, #tpu.memory_space<vmem>>, vector<1x16x128xf32>
    %374 = vector.shape_cast %373 : vector<1x16x128xf32> to vector<16x128xf32>
    %375 = vector.extract_strided_slice %374 {offsets = [2, 0], sizes = [1, 128], strides = [1, 1]} : vector<16x128xf32> to vector<1x128xf32>
    %c14_222 = arith.constant 14 : index
    %c0_223 = arith.constant 0 : index
    %376 = vector.load %arg2[%c14_222, %c0_223] : memref<16x128xf32, #tpu.memory_space<vmem>>, vector<1x128xf32>
    %377 = arith.mulf %375, %376 : vector<1x128xf32>
    %378 = vector.broadcast %377 : vector<1x128xf32> to vector<16x128xf32>
    %379 = arith.mulf %378, %374 : vector<16x128xf32>
    %380 = arith.addf %372, %379 : vector<16x128xf32>
    %c15_224 = arith.constant 15 : index
    %c0_225 = arith.constant 0 : index
    %c0_226 = arith.constant 0 : index
    %381 = vector.load %arg1[%c15_224, %c0_225, %c0_226] : memref<16x16x128xf32, #tpu.memory_space<vmem>>, vector<1x16x128xf32>
    %382 = vector.shape_cast %381 : vector<1x16x128xf32> to vector<16x128xf32>
    %383 = vector.extract_strided_slice %382 {offsets = [2, 0], sizes = [1, 128], strides = [1, 1]} : vector<16x128xf32> to vector<1x128xf32>
    %c15_227 = arith.constant 15 : index
    %c0_228 = arith.constant 0 : index
    %384 = vector.load %arg2[%c15_227, %c0_228] : memref<16x128xf32, #tpu.memory_space<vmem>>, vector<1x128xf32>
    %385 = arith.mulf %383, %384 : vector<1x128xf32>
    %386 = vector.broadcast %385 : vector<1x128xf32> to vector<16x128xf32>
    %387 = arith.mulf %386, %382 : vector<16x128xf32>
    %388 = arith.addf %380, %387 : vector<16x128xf32>
    %c32 = arith.constant 32 : index
    %c0_229 = arith.constant 0 : index
    %389 = vector.load %arg6[%c32, %c0_229] : memref<256x128xf32, #tpu.memory_space<vmem>>, vector<16x128xf32>
    tpu.vector_store %arg6[%c32, %c0_229], %388 {strides = array<i32>} : memref<256x128xf32, #tpu.memory_space<vmem>>, vector<16x128xf32>,
    %cst_230 = arith.constant 0.000000e+00 : f32
    %390 = vector.broadcast %cst_230 : f32 to vector<16x128xf32>
    %c0_231 = arith.constant 0 : index
    %c0_232 = arith.constant 0 : index
    %c0_233 = arith.constant 0 : index
    %391 = vector.load %arg1[%c0_231, %c0_232, %c0_233] : memref<16x16x128xf32, #tpu.memory_space<vmem>>, vector<1x16x128xf32>
    %392 = vector.shape_cast %391 : vector<1x16x128xf32> to vector<16x128xf32>
    %393 = vector.extract_strided_slice %392 {offsets = [3, 0], sizes = [1, 128], strides = [1, 1]} : vector<16x128xf32> to vector<1x128xf32>
    %c0_234 = arith.constant 0 : index
    %c0_235 = arith.constant 0 : index
    %394 = vector.load %arg2[%c0_234, %c0_235] : memref<16x128xf32, #tpu.memory_space<vmem>>, vector<1x128xf32>
    %395 = arith.mulf %393, %394 : vector<1x128xf32>
    %396 = vector.broadcast %395 : vector<1x128xf32> to vector<16x128xf32>
    %397 = arith.mulf %396, %392 : vector<16x128xf32>
    %398 = arith.addf %390, %397 : vector<16x128xf32>
    %c1_236 = arith.constant 1 : index
    %c0_237 = arith.constant 0 : index
    %c0_238 = arith.constant 0 : index
    %399 = vector.load %arg1[%c1_236, %c0_237, %c0_238] : memref<16x16x128xf32, #tpu.memory_space<vmem>>, vector<1x16x128xf32>
    %400 = vector.shape_cast %399 : vector<1x16x128xf32> to vector<16x128xf32>
    %401 = vector.extract_strided_slice %400 {offsets = [3, 0], sizes = [1, 128], strides = [1, 1]} : vector<16x128xf32> to vector<1x128xf32>
    %c1_239 = arith.constant 1 : index
    %c0_240 = arith.constant 0 : index
    %402 = vector.load %arg2[%c1_239, %c0_240] : memref<16x128xf32, #tpu.memory_space<vmem>>, vector<1x128xf32>
    %403 = arith.mulf %401, %402 : vector<1x128xf32>
    %404 = vector.broadcast %403 : vector<1x128xf32> to vector<16x128xf32>
    %405 = arith.mulf %404, %400 : vector<16x128xf32>
    %406 = arith.addf %398, %405 : vector<16x128xf32>
    %c2_241 = arith.constant 2 : index
    %c0_242 = arith.constant 0 : index
    %c0_243 = arith.constant 0 : index
    %407 = vector.load %arg1[%c2_241, %c0_242, %c0_243] : memref<16x16x128xf32, #tpu.memory_space<vmem>>, vector<1x16x128xf32>
    %408 = vector.shape_cast %407 : vector<1x16x128xf32> to vector<16x128xf32>
    %409 = vector.extract_strided_slice %408 {offsets = [3, 0], sizes = [1, 128], strides = [1, 1]} : vector<16x128xf32> to vector<1x128xf32>
    %c2_244 = arith.constant 2 : index
    %c0_245 = arith.constant 0 : index
    %410 = vector.load %arg2[%c2_244, %c0_245] : memref<16x128xf32, #tpu.memory_space<vmem>>, vector<1x128xf32>
    %411 = arith.mulf %409, %410 : vector<1x128xf32>
    %412 = vector.broadcast %411 : vector<1x128xf32> to vector<16x128xf32>
    %413 = arith.mulf %412, %408 : vector<16x128xf32>
    %414 = arith.addf %406, %413 : vector<16x128xf32>
    %c3_246 = arith.constant 3 : index
    %c0_247 = arith.constant 0 : index
    %c0_248 = arith.constant 0 : index
    %415 = vector.load %arg1[%c3_246, %c0_247, %c0_248] : memref<16x16x128xf32, #tpu.memory_space<vmem>>, vector<1x16x128xf32>
    %416 = vector.shape_cast %415 : vector<1x16x128xf32> to vector<16x128xf32>
    %417 = vector.extract_strided_slice %416 {offsets = [3, 0], sizes = [1, 128], strides = [1, 1]} : vector<16x128xf32> to vector<1x128xf32>
    %c3_249 = arith.constant 3 : index
    %c0_250 = arith.constant 0 : index
    %418 = vector.load %arg2[%c3_249, %c0_250] : memref<16x128xf32, #tpu.memory_space<vmem>>, vector<1x128xf32>
    %419 = arith.mulf %417, %418 : vector<1x128xf32>
    %420 = vector.broadcast %419 : vector<1x128xf32> to vector<16x128xf32>
    %421 = arith.mulf %420, %416 : vector<16x128xf32>
    %422 = arith.addf %414, %421 : vector<16x128xf32>
    %c4_251 = arith.constant 4 : index
    %c0_252 = arith.constant 0 : index
    %c0_253 = arith.constant 0 : index
    %423 = vector.load %arg1[%c4_251, %c0_252, %c0_253] : memref<16x16x128xf32, #tpu.memory_space<vmem>>, vector<1x16x128xf32>
    %424 = vector.shape_cast %423 : vector<1x16x128xf32> to vector<16x128xf32>
    %425 = vector.extract_strided_slice %424 {offsets = [3, 0], sizes = [1, 128], strides = [1, 1]} : vector<16x128xf32> to vector<1x128xf32>
    %c4_254 = arith.constant 4 : index
    %c0_255 = arith.constant 0 : index
    %426 = vector.load %arg2[%c4_254, %c0_255] : memref<16x128xf32, #tpu.memory_space<vmem>>, vector<1x128xf32>
    %427 = arith.mulf %425, %426 : vector<1x128xf32>
    %428 = vector.broadcast %427 : vector<1x128xf32> to vector<16x128xf32>
    %429 = arith.mulf %428, %424 : vector<16x128xf32>
    %430 = arith.addf %422, %429 : vector<16x128xf32>
    %c5_256 = arith.constant 5 : index
    %c0_257 = arith.constant 0 : index
    %c0_258 = arith.constant 0 : index
    %431 = vector.load %arg1[%c5_256, %c0_257, %c0_258] : memref<16x16x128xf32, #tpu.memory_space<vmem>>, vector<1x16x128xf32>
    %432 = vector.shape_cast %431 : vector<1x16x128xf32> to vector<16x128xf32>
    %433 = vector.extract_strided_slice %432 {offsets = [3, 0], sizes = [1, 128], strides = [1, 1]} : vector<16x128xf32> to vector<1x128xf32>
    %c5_259 = arith.constant 5 : index
    %c0_260 = arith.constant 0 : index
    %434 = vector.load %arg2[%c5_259, %c0_260] : memref<16x128xf32, #tpu.memory_space<vmem>>, vector<1x128xf32>
    %435 = arith.mulf %433, %434 : vector<1x128xf32>
    %436 = vector.broadcast %435 : vector<1x128xf32> to vector<16x128xf32>
    %437 = arith.mulf %436, %432 : vector<16x128xf32>
    %438 = arith.addf %430, %437 : vector<16x128xf32>
    %c6_261 = arith.constant 6 : index
    %c0_262 = arith.constant 0 : index
    %c0_263 = arith.constant 0 : index
    %439 = vector.load %arg1[%c6_261, %c0_262, %c0_263] : memref<16x16x128xf32, #tpu.memory_space<vmem>>, vector<1x16x128xf32>
    %440 = vector.shape_cast %439 : vector<1x16x128xf32> to vector<16x128xf32>
    %441 = vector.extract_strided_slice %440 {offsets = [3, 0], sizes = [1, 128], strides = [1, 1]} : vector<16x128xf32> to vector<1x128xf32>
    %c6_264 = arith.constant 6 : index
    %c0_265 = arith.constant 0 : index
    %442 = vector.load %arg2[%c6_264, %c0_265] : memref<16x128xf32, #tpu.memory_space<vmem>>, vector<1x128xf32>
    %443 = arith.mulf %441, %442 : vector<1x128xf32>
    %444 = vector.broadcast %443 : vector<1x128xf32> to vector<16x128xf32>
    %445 = arith.mulf %444, %440 : vector<16x128xf32>
    %446 = arith.addf %438, %445 : vector<16x128xf32>
    %c7_266 = arith.constant 7 : index
    %c0_267 = arith.constant 0 : index
    %c0_268 = arith.constant 0 : index
    %447 = vector.load %arg1[%c7_266, %c0_267, %c0_268] : memref<16x16x128xf32, #tpu.memory_space<vmem>>, vector<1x16x128xf32>
    %448 = vector.shape_cast %447 : vector<1x16x128xf32> to vector<16x128xf32>
    %449 = vector.extract_strided_slice %448 {offsets = [3, 0], sizes = [1, 128], strides = [1, 1]} : vector<16x128xf32> to vector<1x128xf32>
    %c7_269 = arith.constant 7 : index
    %c0_270 = arith.constant 0 : index
    %450 = vector.load %arg2[%c7_269, %c0_270] : memref<16x128xf32, #tpu.memory_space<vmem>>, vector<1x128xf32>
    %451 = arith.mulf %449, %450 : vector<1x128xf32>
    %452 = vector.broadcast %451 : vector<1x128xf32> to vector<16x128xf32>
    %453 = arith.mulf %452, %448 : vector<16x128xf32>
    %454 = arith.addf %446, %453 : vector<16x128xf32>
    %c8_271 = arith.constant 8 : index
    %c0_272 = arith.constant 0 : index
    %c0_273 = arith.constant 0 : index
    %455 = vector.load %arg1[%c8_271, %c0_272, %c0_273] : memref<16x16x128xf32, #tpu.memory_space<vmem>>, vector<1x16x128xf32>
    %456 = vector.shape_cast %455 : vector<1x16x128xf32> to vector<16x128xf32>
    %457 = vector.extract_strided_slice %456 {offsets = [3, 0], sizes = [1, 128], strides = [1, 1]} : vector<16x128xf32> to vector<1x128xf32>
    %c8_274 = arith.constant 8 : index
    %c0_275 = arith.constant 0 : index
    %458 = vector.load %arg2[%c8_274, %c0_275] : memref<16x128xf32, #tpu.memory_space<vmem>>, vector<1x128xf32>
    %459 = arith.mulf %457, %458 : vector<1x128xf32>
    %460 = vector.broadcast %459 : vector<1x128xf32> to vector<16x128xf32>
    %461 = arith.mulf %460, %456 : vector<16x128xf32>
    %462 = arith.addf %454, %461 : vector<16x128xf32>
    %c9_276 = arith.constant 9 : index
    %c0_277 = arith.constant 0 : index
    %c0_278 = arith.constant 0 : index
    %463 = vector.load %arg1[%c9_276, %c0_277, %c0_278] : memref<16x16x128xf32, #tpu.memory_space<vmem>>, vector<1x16x128xf32>
    %464 = vector.shape_cast %463 : vector<1x16x128xf32> to vector<16x128xf32>
    %465 = vector.extract_strided_slice %464 {offsets = [3, 0], sizes = [1, 128], strides = [1, 1]} : vector<16x128xf32> to vector<1x128xf32>
    %c9_279 = arith.constant 9 : index
    %c0_280 = arith.constant 0 : index
    %466 = vector.load %arg2[%c9_279, %c0_280] : memref<16x128xf32, #tpu.memory_space<vmem>>, vector<1x128xf32>
    %467 = arith.mulf %465, %466 : vector<1x128xf32>
    %468 = vector.broadcast %467 : vector<1x128xf32> to vector<16x128xf32>
    %469 = arith.mulf %468, %464 : vector<16x128xf32>
    %470 = arith.addf %462, %469 : vector<16x128xf32>
    %c10_281 = arith.constant 10 : index
    %c0_282 = arith.constant 0 : index
    %c0_283 = arith.constant 0 : index
    %471 = vector.load %arg1[%c10_281, %c0_282, %c0_283] : memref<16x16x128xf32, #tpu.memory_space<vmem>>, vector<1x16x128xf32>
    %472 = vector.shape_cast %471 : vector<1x16x128xf32> to vector<16x128xf32>
    %473 = vector.extract_strided_slice %472 {offsets = [3, 0], sizes = [1, 128], strides = [1, 1]} : vector<16x128xf32> to vector<1x128xf32>
    %c10_284 = arith.constant 10 : index
    %c0_285 = arith.constant 0 : index
    %474 = vector.load %arg2[%c10_284, %c0_285] : memref<16x128xf32, #tpu.memory_space<vmem>>, vector<1x128xf32>
    %475 = arith.mulf %473, %474 : vector<1x128xf32>
    %476 = vector.broadcast %475 : vector<1x128xf32> to vector<16x128xf32>
    %477 = arith.mulf %476, %472 : vector<16x128xf32>
    %478 = arith.addf %470, %477 : vector<16x128xf32>
    %c11_286 = arith.constant 11 : index
    %c0_287 = arith.constant 0 : index
    %c0_288 = arith.constant 0 : index
    %479 = vector.load %arg1[%c11_286, %c0_287, %c0_288] : memref<16x16x128xf32, #tpu.memory_space<vmem>>, vector<1x16x128xf32>
    %480 = vector.shape_cast %479 : vector<1x16x128xf32> to vector<16x128xf32>
    %481 = vector.extract_strided_slice %480 {offsets = [3, 0], sizes = [1, 128], strides = [1, 1]} : vector<16x128xf32> to vector<1x128xf32>
    %c11_289 = arith.constant 11 : index
    %c0_290 = arith.constant 0 : index
    %482 = vector.load %arg2[%c11_289, %c0_290] : memref<16x128xf32, #tpu.memory_space<vmem>>, vector<1x128xf32>
    %483 = arith.mulf %481, %482 : vector<1x128xf32>
    %484 = vector.broadcast %483 : vector<1x128xf32> to vector<16x128xf32>
    %485 = arith.mulf %484, %480 : vector<16x128xf32>
    %486 = arith.addf %478, %485 : vector<16x128xf32>
    %c12_291 = arith.constant 12 : index
    %c0_292 = arith.constant 0 : index
    %c0_293 = arith.constant 0 : index
    %487 = vector.load %arg1[%c12_291, %c0_292, %c0_293] : memref<16x16x128xf32, #tpu.memory_space<vmem>>, vector<1x16x128xf32>
    %488 = vector.shape_cast %487 : vector<1x16x128xf32> to vector<16x128xf32>
    %489 = vector.extract_strided_slice %488 {offsets = [3, 0], sizes = [1, 128], strides = [1, 1]} : vector<16x128xf32> to vector<1x128xf32>
    %c12_294 = arith.constant 12 : index
    %c0_295 = arith.constant 0 : index
    %490 = vector.load %arg2[%c12_294, %c0_295] : memref<16x128xf32, #tpu.memory_space<vmem>>, vector<1x128xf32>
    %491 = arith.mulf %489, %490 : vector<1x128xf32>
    %492 = vector.broadcast %491 : vector<1x128xf32> to vector<16x128xf32>
    %493 = arith.mulf %492, %488 : vector<16x128xf32>
    %494 = arith.addf %486, %493 : vector<16x128xf32>
    %c13_296 = arith.constant 13 : index
    %c0_297 = arith.constant 0 : index
    %c0_298 = arith.constant 0 : index
    %495 = vector.load %arg1[%c13_296, %c0_297, %c0_298] : memref<16x16x128xf32, #tpu.memory_space<vmem>>, vector<1x16x128xf32>
    %496 = vector.shape_cast %495 : vector<1x16x128xf32> to vector<16x128xf32>
    %497 = vector.extract_strided_slice %496 {offsets = [3, 0], sizes = [1, 128], strides = [1, 1]} : vector<16x128xf32> to vector<1x128xf32>
    %c13_299 = arith.constant 13 : index
    %c0_300 = arith.constant 0 : index
    %498 = vector.load %arg2[%c13_299, %c0_300] : memref<16x128xf32, #tpu.memory_space<vmem>>, vector<1x128xf32>
    %499 = arith.mulf %497, %498 : vector<1x128xf32>
    %500 = vector.broadcast %499 : vector<1x128xf32> to vector<16x128xf32>
    %501 = arith.mulf %500, %496 : vector<16x128xf32>
    %502 = arith.addf %494, %501 : vector<16x128xf32>
    %c14_301 = arith.constant 14 : index
    %c0_302 = arith.constant 0 : index
    %c0_303 = arith.constant 0 : index
    %503 = vector.load %arg1[%c14_301, %c0_302, %c0_303] : memref<16x16x128xf32, #tpu.memory_space<vmem>>, vector<1x16x128xf32>
    %504 = vector.shape_cast %503 : vector<1x16x128xf32> to vector<16x128xf32>
    %505 = vector.extract_strided_slice %504 {offsets = [3, 0], sizes = [1, 128], strides = [1, 1]} : vector<16x128xf32> to vector<1x128xf32>
    %c14_304 = arith.constant 14 : index
    %c0_305 = arith.constant 0 : index
    %506 = vector.load %arg2[%c14_304, %c0_305] : memref<16x128xf32, #tpu.memory_space<vmem>>, vector<1x128xf32>
    %507 = arith.mulf %505, %506 : vector<1x128xf32>
    %508 = vector.broadcast %507 : vector<1x128xf32> to vector<16x128xf32>
    %509 = arith.mulf %508, %504 : vector<16x128xf32>
    %510 = arith.addf %502, %509 : vector<16x128xf32>
    %c15_306 = arith.constant 15 : index
    %c0_307 = arith.constant 0 : index
    %c0_308 = arith.constant 0 : index
    %511 = vector.load %arg1[%c15_306, %c0_307, %c0_308] : memref<16x16x128xf32, #tpu.memory_space<vmem>>, vector<1x16x128xf32>
    %512 = vector.shape_cast %511 : vector<1x16x128xf32> to vector<16x128xf32>
    %513 = vector.extract_strided_slice %512 {offsets = [3, 0], sizes = [1, 128], strides = [1, 1]} : vector<16x128xf32> to vector<1x128xf32>
    %c15_309 = arith.constant 15 : index
    %c0_310 = arith.constant 0 : index
    %514 = vector.load %arg2[%c15_309, %c0_310] : memref<16x128xf32, #tpu.memory_space<vmem>>, vector<1x128xf32>
    %515 = arith.mulf %513, %514 : vector<1x128xf32>
    %516 = vector.broadcast %515 : vector<1x128xf32> to vector<16x128xf32>
    %517 = arith.mulf %516, %512 : vector<16x128xf32>
    %518 = arith.addf %510, %517 : vector<16x128xf32>
    %c48 = arith.constant 48 : index
    %c0_311 = arith.constant 0 : index
    %519 = vector.load %arg6[%c48, %c0_311] : memref<256x128xf32, #tpu.memory_space<vmem>>, vector<16x128xf32>
    tpu.vector_store %arg6[%c48, %c0_311], %518 {strides = array<i32>} : memref<256x128xf32, #tpu.memory_space<vmem>>, vector<16x128xf32>,
    %cst_312 = arith.constant 0.000000e+00 : f32
    %520 = vector.broadcast %cst_312 : f32 to vector<16x128xf32>
    %c0_313 = arith.constant 0 : index
    %c0_314 = arith.constant 0 : index
    %c0_315 = arith.constant 0 : index
    %521 = vector.load %arg1[%c0_313, %c0_314, %c0_315] : memref<16x16x128xf32, #tpu.memory_space<vmem>>, vector<1x16x128xf32>
    %522 = vector.shape_cast %521 : vector<1x16x128xf32> to vector<16x128xf32>
    %523 = vector.extract_strided_slice %522 {offsets = [4, 0], sizes = [1, 128], strides = [1, 1]} : vector<16x128xf32> to vector<1x128xf32>
    %c0_316 = arith.constant 0 : index
    %c0_317 = arith.constant 0 : index
    %524 = vector.load %arg2[%c0_316, %c0_317] : memref<16x128xf32, #tpu.memory_space<vmem>>, vector<1x128xf32>
    %525 = arith.mulf %523, %524 : vector<1x128xf32>
    %526 = vector.broadcast %525 : vector<1x128xf32> to vector<16x128xf32>
    %527 = arith.mulf %526, %522 : vector<16x128xf32>
    %528 = arith.addf %520, %527 : vector<16x128xf32>
    %c1_318 = arith.constant 1 : index
    %c0_319 = arith.constant 0 : index
    %c0_320 = arith.constant 0 : index
    %529 = vector.load %arg1[%c1_318, %c0_319, %c0_320] : memref<16x16x128xf32, #tpu.memory_space<vmem>>, vector<1x16x128xf32>
    %530 = vector.shape_cast %529 : vector<1x16x128xf32> to vector<16x128xf32>
    %531 = vector.extract_strided_slice %530 {offsets = [4, 0], sizes = [1, 128], strides = [1, 1]} : vector<16x128xf32> to vector<1x128xf32>
    %c1_321 = arith.constant 1 : index
    %c0_322 = arith.constant 0 : index
    %532 = vector.load %arg2[%c1_321, %c0_322] : memref<16x128xf32, #tpu.memory_space<vmem>>, vector<1x128xf32>
    %533 = arith.mulf %531, %532 : vector<1x128xf32>
    %534 = vector.broadcast %533 : vector<1x128xf32> to vector<16x128xf32>
    %535 = arith.mulf %534, %530 : vector<16x128xf32>
    %536 = arith.addf %528, %535 : vector<16x128xf32>
    %c2_323 = arith.constant 2 : index
    %c0_324 = arith.constant 0 : index
    %c0_325 = arith.constant 0 : index
    %537 = vector.load %arg1[%c2_323, %c0_324, %c0_325] : memref<16x16x128xf32, #tpu.memory_space<vmem>>, vector<1x16x128xf32>
    %538 = vector.shape_cast %537 : vector<1x16x128xf32> to vector<16x128xf32>
    %539 = vector.extract_strided_slice %538 {offsets = [4, 0], sizes = [1, 128], strides = [1, 1]} : vector<16x128xf32> to vector<1x128xf32>
    %c2_326 = arith.constant 2 : index
    %c0_327 = arith.constant 0 : index
    %540 = vector.load %arg2[%c2_326, %c0_327] : memref<16x128xf32, #tpu.memory_space<vmem>>, vector<1x128xf32>
    %541 = arith.mulf %539, %540 : vector<1x128xf32>
    %542 = vector.broadcast %541 : vector<1x128xf32> to vector<16x128xf32>
    %543 = arith.mulf %542, %538 : vector<16x128xf32>
    %544 = arith.addf %536, %543 : vector<16x128xf32>
    %c3_328 = arith.constant 3 : index
    %c0_329 = arith.constant 0 : index
    %c0_330 = arith.constant 0 : index
    %545 = vector.load %arg1[%c3_328, %c0_329, %c0_330] : memref<16x16x128xf32, #tpu.memory_space<vmem>>, vector<1x16x128xf32>
    %546 = vector.shape_cast %545 : vector<1x16x128xf32> to vector<16x128xf32>
    %547 = vector.extract_strided_slice %546 {offsets = [4, 0], sizes = [1, 128], strides = [1, 1]} : vector<16x128xf32> to vector<1x128xf32>
    %c3_331 = arith.constant 3 : index
    %c0_332 = arith.constant 0 : index
    %548 = vector.load %arg2[%c3_331, %c0_332] : memref<16x128xf32, #tpu.memory_space<vmem>>, vector<1x128xf32>
    %549 = arith.mulf %547, %548 : vector<1x128xf32>
    %550 = vector.broadcast %549 : vector<1x128xf32> to vector<16x128xf32>
    %551 = arith.mulf %550, %546 : vector<16x128xf32>
    %552 = arith.addf %544, %551 : vector<16x128xf32>
    %c4_333 = arith.constant 4 : index
    %c0_334 = arith.constant 0 : index
    %c0_335 = arith.constant 0 : index
    %553 = vector.load %arg1[%c4_333, %c0_334, %c0_335] : memref<16x16x128xf32, #tpu.memory_space<vmem>>, vector<1x16x128xf32>
    %554 = vector.shape_cast %553 : vector<1x16x128xf32> to vector<16x128xf32>
    %555 = vector.extract_strided_slice %554 {offsets = [4, 0], sizes = [1, 128], strides = [1, 1]} : vector<16x128xf32> to vector<1x128xf32>
    %c4_336 = arith.constant 4 : index
    %c0_337 = arith.constant 0 : index
    %556 = vector.load %arg2[%c4_336, %c0_337] : memref<16x128xf32, #tpu.memory_space<vmem>>, vector<1x128xf32>
    %557 = arith.mulf %555, %556 : vector<1x128xf32>
    %558 = vector.broadcast %557 : vector<1x128xf32> to vector<16x128xf32>
    %559 = arith.mulf %558, %554 : vector<16x128xf32>
    %560 = arith.addf %552, %559 : vector<16x128xf32>
    %c5_338 = arith.constant 5 : index
    %c0_339 = arith.constant 0 : index
    %c0_340 = arith.constant 0 : index
    %561 = vector.load %arg1[%c5_338, %c0_339, %c0_340] : memref<16x16x128xf32, #tpu.memory_space<vmem>>, vector<1x16x128xf32>
    %562 = vector.shape_cast %561 : vector<1x16x128xf32> to vector<16x128xf32>
    %563 = vector.extract_strided_slice %562 {offsets = [4, 0], sizes = [1, 128], strides = [1, 1]} : vector<16x128xf32> to vector<1x128xf32>
    %c5_341 = arith.constant 5 : index
    %c0_342 = arith.constant 0 : index
    %564 = vector.load %arg2[%c5_341, %c0_342] : memref<16x128xf32, #tpu.memory_space<vmem>>, vector<1x128xf32>
    %565 = arith.mulf %563, %564 : vector<1x128xf32>
    %566 = vector.broadcast %565 : vector<1x128xf32> to vector<16x128xf32>
    %567 = arith.mulf %566, %562 : vector<16x128xf32>
    %568 = arith.addf %560, %567 : vector<16x128xf32>
    %c6_343 = arith.constant 6 : index
    %c0_344 = arith.constant 0 : index
    %c0_345 = arith.constant 0 : index
    %569 = vector.load %arg1[%c6_343, %c0_344, %c0_345] : memref<16x16x128xf32, #tpu.memory_space<vmem>>, vector<1x16x128xf32>
    %570 = vector.shape_cast %569 : vector<1x16x128xf32> to vector<16x128xf32>
    %571 = vector.extract_strided_slice %570 {offsets = [4, 0], sizes = [1, 128], strides = [1, 1]} : vector<16x128xf32> to vector<1x128xf32>
    %c6_346 = arith.constant 6 : index
    %c0_347 = arith.constant 0 : index
    %572 = vector.load %arg2[%c6_346, %c0_347] : memref<16x128xf32, #tpu.memory_space<vmem>>, vector<1x128xf32>
    %573 = arith.mulf %571, %572 : vector<1x128xf32>
    %574 = vector.broadcast %573 : vector<1x128xf32> to vector<16x128xf32>
    %575 = arith.mulf %574, %570 : vector<16x128xf32>
    %576 = arith.addf %568, %575 : vector<16x128xf32>
    %c7_348 = arith.constant 7 : index
    %c0_349 = arith.constant 0 : index
    %c0_350 = arith.constant 0 : index
    %577 = vector.load %arg1[%c7_348, %c0_349, %c0_350] : memref<16x16x128xf32, #tpu.memory_space<vmem>>, vector<1x16x128xf32>
    %578 = vector.shape_cast %577 : vector<1x16x128xf32> to vector<16x128xf32>
    %579 = vector.extract_strided_slice %578 {offsets = [4, 0], sizes = [1, 128], strides = [1, 1]} : vector<16x128xf32> to vector<1x128xf32>
    %c7_351 = arith.constant 7 : index
    %c0_352 = arith.constant 0 : index
    %580 = vector.load %arg2[%c7_351, %c0_352] : memref<16x128xf32, #tpu.memory_space<vmem>>, vector<1x128xf32>
    %581 = arith.mulf %579, %580 : vector<1x128xf32>
    %582 = vector.broadcast %581 : vector<1x128xf32> to vector<16x128xf32>
    %583 = arith.mulf %582, %578 : vector<16x128xf32>
    %584 = arith.addf %576, %583 : vector<16x128xf32>
    %c8_353 = arith.constant 8 : index
    %c0_354 = arith.constant 0 : index
    %c0_355 = arith.constant 0 : index
    %585 = vector.load %arg1[%c8_353, %c0_354, %c0_355] : memref<16x16x128xf32, #tpu.memory_space<vmem>>, vector<1x16x128xf32>
    %586 = vector.shape_cast %585 : vector<1x16x128xf32> to vector<16x128xf32>
    %587 = vector.extract_strided_slice %586 {offsets = [4, 0], sizes = [1, 128], strides = [1, 1]} : vector<16x128xf32> to vector<1x128xf32>
    %c8_356 = arith.constant 8 : index
    %c0_357 = arith.constant 0 : index
    %588 = vector.load %arg2[%c8_356, %c0_357] : memref<16x128xf32, #tpu.memory_space<vmem>>, vector<1x128xf32>
    %589 = arith.mulf %587, %588 : vector<1x128xf32>
    %590 = vector.broadcast %589 : vector<1x128xf32> to vector<16x128xf32>
    %591 = arith.mulf %590, %586 : vector<16x128xf32>
    %592 = arith.addf %584, %591 : vector<16x128xf32>
    %c9_358 = arith.constant 9 : index
    %c0_359 = arith.constant 0 : index
    %c0_360 = arith.constant 0 : index
    %593 = vector.load %arg1[%c9_358, %c0_359, %c0_360] : memref<16x16x128xf32, #tpu.memory_space<vmem>>, vector<1x16x128xf32>
    %594 = vector.shape_cast %593 : vector<1x16x128xf32> to vector<16x128xf32>
    %595 = vector.extract_strided_slice %594 {offsets = [4, 0], sizes = [1, 128], strides = [1, 1]} : vector<16x128xf32> to vector<1x128xf32>
    %c9_361 = arith.constant 9 : index
    %c0_362 = arith.constant 0 : index
    %596 = vector.load %arg2[%c9_361, %c0_362] : memref<16x128xf32, #tpu.memory_space<vmem>>, vector<1x128xf32>
    %597 = arith.mulf %595, %596 : vector<1x128xf32>
    %598 = vector.broadcast %597 : vector<1x128xf32> to vector<16x128xf32>
    %599 = arith.mulf %598, %594 : vector<16x128xf32>
    %600 = arith.addf %592, %599 : vector<16x128xf32>
    %c10_363 = arith.constant 10 : index
    %c0_364 = arith.constant 0 : index
    %c0_365 = arith.constant 0 : index
    %601 = vector.load %arg1[%c10_363, %c0_364, %c0_365] : memref<16x16x128xf32, #tpu.memory_space<vmem>>, vector<1x16x128xf32>
    %602 = vector.shape_cast %601 : vector<1x16x128xf32> to vector<16x128xf32>
    %603 = vector.extract_strided_slice %602 {offsets = [4, 0], sizes = [1, 128], strides = [1, 1]} : vector<16x128xf32> to vector<1x128xf32>
    %c10_366 = arith.constant 10 : index
    %c0_367 = arith.constant 0 : index
    %604 = vector.load %arg2[%c10_366, %c0_367] : memref<16x128xf32, #tpu.memory_space<vmem>>, vector<1x128xf32>
    %605 = arith.mulf %603, %604 : vector<1x128xf32>
    %606 = vector.broadcast %605 : vector<1x128xf32> to vector<16x128xf32>
    %607 = arith.mulf %606, %602 : vector<16x128xf32>
    %608 = arith.addf %600, %607 : vector<16x128xf32>
    %c11_368 = arith.constant 11 : index
    %c0_369 = arith.constant 0 : index
    %c0_370 = arith.constant 0 : index
    %609 = vector.load %arg1[%c11_368, %c0_369, %c0_370] : memref<16x16x128xf32, #tpu.memory_space<vmem>>, vector<1x16x128xf32>
    %610 = vector.shape_cast %609 : vector<1x16x128xf32> to vector<16x128xf32>
    %611 = vector.extract_strided_slice %610 {offsets = [4, 0], sizes = [1, 128], strides = [1, 1]} : vector<16x128xf32> to vector<1x128xf32>
    %c11_371 = arith.constant 11 : index
    %c0_372 = arith.constant 0 : index
    %612 = vector.load %arg2[%c11_371, %c0_372] : memref<16x128xf32, #tpu.memory_space<vmem>>, vector<1x128xf32>
    %613 = arith.mulf %611, %612 : vector<1x128xf32>
    %614 = vector.broadcast %613 : vector<1x128xf32> to vector<16x128xf32>
    %615 = arith.mulf %614, %610 : vector<16x128xf32>
    %616 = arith.addf %608, %615 : vector<16x128xf32>
    %c12_373 = arith.constant 12 : index
    %c0_374 = arith.constant 0 : index
    %c0_375 = arith.constant 0 : index
    %617 = vector.load %arg1[%c12_373, %c0_374, %c0_375] : memref<16x16x128xf32, #tpu.memory_space<vmem>>, vector<1x16x128xf32>
    %618 = vector.shape_cast %617 : vector<1x16x128xf32> to vector<16x128xf32>
    %619 = vector.extract_strided_slice %618 {offsets = [4, 0], sizes = [1, 128], strides = [1, 1]} : vector<16x128xf32> to vector<1x128xf32>
    %c12_376 = arith.constant 12 : index
    %c0_377 = arith.constant 0 : index
    %620 = vector.load %arg2[%c12_376, %c0_377] : memref<16x128xf32, #tpu.memory_space<vmem>>, vector<1x128xf32>
    %621 = arith.mulf %619, %620 : vector<1x128xf32>
    %622 = vector.broadcast %621 : vector<1x128xf32> to vector<16x128xf32>
    %623 = arith.mulf %622, %618 : vector<16x128xf32>
    %624 = arith.addf %616, %623 : vector<16x128xf32>
    %c13_378 = arith.constant 13 : index
    %c0_379 = arith.constant 0 : index
    %c0_380 = arith.constant 0 : index
    %625 = vector.load %arg1[%c13_378, %c0_379, %c0_380] : memref<16x16x128xf32, #tpu.memory_space<vmem>>, vector<1x16x128xf32>
    %626 = vector.shape_cast %625 : vector<1x16x128xf32> to vector<16x128xf32>
    %627 = vector.extract_strided_slice %626 {offsets = [4, 0], sizes = [1, 128], strides = [1, 1]} : vector<16x128xf32> to vector<1x128xf32>
    %c13_381 = arith.constant 13 : index
    %c0_382 = arith.constant 0 : index
    %628 = vector.load %arg2[%c13_381, %c0_382] : memref<16x128xf32, #tpu.memory_space<vmem>>, vector<1x128xf32>
    %629 = arith.mulf %627, %628 : vector<1x128xf32>
    %630 = vector.broadcast %629 : vector<1x128xf32> to vector<16x128xf32>
    %631 = arith.mulf %630, %626 : vector<16x128xf32>
    %632 = arith.addf %624, %631 : vector<16x128xf32>
    %c14_383 = arith.constant 14 : index
    %c0_384 = arith.constant 0 : index
    %c0_385 = arith.constant 0 : index
    %633 = vector.load %arg1[%c14_383, %c0_384, %c0_385] : memref<16x16x128xf32, #tpu.memory_space<vmem>>, vector<1x16x128xf32>
    %634 = vector.shape_cast %633 : vector<1x16x128xf32> to vector<16x128xf32>
    %635 = vector.extract_strided_slice %634 {offsets = [4, 0], sizes = [1, 128], strides = [1, 1]} : vector<16x128xf32> to vector<1x128xf32>
    %c14_386 = arith.constant 14 : index
    %c0_387 = arith.constant 0 : index
    %636 = vector.load %arg2[%c14_386, %c0_387] : memref<16x128xf32, #tpu.memory_space<vmem>>, vector<1x128xf32>
    %637 = arith.mulf %635, %636 : vector<1x128xf32>
    %638 = vector.broadcast %637 : vector<1x128xf32> to vector<16x128xf32>
    %639 = arith.mulf %638, %634 : vector<16x128xf32>
    %640 = arith.addf %632, %639 : vector<16x128xf32>
    %c15_388 = arith.constant 15 : index
    %c0_389 = arith.constant 0 : index
    %c0_390 = arith.constant 0 : index
    %641 = vector.load %arg1[%c15_388, %c0_389, %c0_390] : memref<16x16x128xf32, #tpu.memory_space<vmem>>, vector<1x16x128xf32>
    %642 = vector.shape_cast %641 : vector<1x16x128xf32> to vector<16x128xf32>
    %643 = vector.extract_strided_slice %642 {offsets = [4, 0], sizes = [1, 128], strides = [1, 1]} : vector<16x128xf32> to vector<1x128xf32>
    %c15_391 = arith.constant 15 : index
    %c0_392 = arith.constant 0 : index
    %644 = vector.load %arg2[%c15_391, %c0_392] : memref<16x128xf32, #tpu.memory_space<vmem>>, vector<1x128xf32>
    %645 = arith.mulf %643, %644 : vector<1x128xf32>
    %646 = vector.broadcast %645 : vector<1x128xf32> to vector<16x128xf32>
    %647 = arith.mulf %646, %642 : vector<16x128xf32>
    %648 = arith.addf %640, %647 : vector<16x128xf32>
    %c64 = arith.constant 64 : index
    %c0_393 = arith.constant 0 : index
    %649 = vector.load %arg6[%c64, %c0_393] : memref<256x128xf32, #tpu.memory_space<vmem>>, vector<16x128xf32>
    tpu.vector_store %arg6[%c64, %c0_393], %648 {strides = array<i32>} : memref<256x128xf32, #tpu.memory_space<vmem>>, vector<16x128xf32>,
    %cst_394 = arith.constant 0.000000e+00 : f32
    %650 = vector.broadcast %cst_394 : f32 to vector<16x128xf32>
    %c0_395 = arith.constant 0 : index
    %c0_396 = arith.constant 0 : index
    %c0_397 = arith.constant 0 : index
    %651 = vector.load %arg1[%c0_395, %c0_396, %c0_397] : memref<16x16x128xf32, #tpu.memory_space<vmem>>, vector<1x16x128xf32>
    %652 = vector.shape_cast %651 : vector<1x16x128xf32> to vector<16x128xf32>
    %653 = vector.extract_strided_slice %652 {offsets = [5, 0], sizes = [1, 128], strides = [1, 1]} : vector<16x128xf32> to vector<1x128xf32>
    %c0_398 = arith.constant 0 : index
    %c0_399 = arith.constant 0 : index
    %654 = vector.load %arg2[%c0_398, %c0_399] : memref<16x128xf32, #tpu.memory_space<vmem>>, vector<1x128xf32>
    %655 = arith.mulf %653, %654 : vector<1x128xf32>
    %656 = vector.broadcast %655 : vector<1x128xf32> to vector<16x128xf32>
    %657 = arith.mulf %656, %652 : vector<16x128xf32>
    %658 = arith.addf %650, %657 : vector<16x128xf32>
    %c1_400 = arith.constant 1 : index
    %c0_401 = arith.constant 0 : index
    %c0_402 = arith.constant 0 : index
    %659 = vector.load %arg1[%c1_400, %c0_401, %c0_402] : memref<16x16x128xf32, #tpu.memory_space<vmem>>, vector<1x16x128xf32>
    %660 = vector.shape_cast %659 : vector<1x16x128xf32> to vector<16x128xf32>
    %661 = vector.extract_strided_slice %660 {offsets = [5, 0], sizes = [1, 128], strides = [1, 1]} : vector<16x128xf32> to vector<1x128xf32>
    %c1_403 = arith.constant 1 : index
    %c0_404 = arith.constant 0 : index
    %662 = vector.load %arg2[%c1_403, %c0_404] : memref<16x128xf32, #tpu.memory_space<vmem>>, vector<1x128xf32>
    %663 = arith.mulf %661, %662 : vector<1x128xf32>
    %664 = vector.broadcast %663 : vector<1x128xf32> to vector<16x128xf32>
    %665 = arith.mulf %664, %660 : vector<16x128xf32>
    %666 = arith.addf %658, %665 : vector<16x128xf32>
    %c2_405 = arith.constant 2 : index
    %c0_406 = arith.constant 0 : index
    %c0_407 = arith.constant 0 : index
    %667 = vector.load %arg1[%c2_405, %c0_406, %c0_407] : memref<16x16x128xf32, #tpu.memory_space<vmem>>, vector<1x16x128xf32>
    %668 = vector.shape_cast %667 : vector<1x16x128xf32> to vector<16x128xf32>
    %669 = vector.extract_strided_slice %668 {offsets = [5, 0], sizes = [1, 128], strides = [1, 1]} : vector<16x128xf32> to vector<1x128xf32>
    %c2_408 = arith.constant 2 : index
    %c0_409 = arith.constant 0 : index
    %670 = vector.load %arg2[%c2_408, %c0_409] : memref<16x128xf32, #tpu.memory_space<vmem>>, vector<1x128xf32>
    %671 = arith.mulf %669, %670 : vector<1x128xf32>
    %672 = vector.broadcast %671 : vector<1x128xf32> to vector<16x128xf32>
    %673 = arith.mulf %672, %668 : vector<16x128xf32>
    %674 = arith.addf %666, %673 : vector<16x128xf32>
    %c3_410 = arith.constant 3 : index
    %c0_411 = arith.constant 0 : index
    %c0_412 = arith.constant 0 : index
    %675 = vector.load %arg1[%c3_410, %c0_411, %c0_412] : memref<16x16x128xf32, #tpu.memory_space<vmem>>, vector<1x16x128xf32>
    %676 = vector.shape_cast %675 : vector<1x16x128xf32> to vector<16x128xf32>
    %677 = vector.extract_strided_slice %676 {offsets = [5, 0], sizes = [1, 128], strides = [1, 1]} : vector<16x128xf32> to vector<1x128xf32>
    %c3_413 = arith.constant 3 : index
    %c0_414 = arith.constant 0 : index
    %678 = vector.load %arg2[%c3_413, %c0_414] : memref<16x128xf32, #tpu.memory_space<vmem>>, vector<1x128xf32>
    %679 = arith.mulf %677, %678 : vector<1x128xf32>
    %680 = vector.broadcast %679 : vector<1x128xf32> to vector<16x128xf32>
    %681 = arith.mulf %680, %676 : vector<16x128xf32>
    %682 = arith.addf %674, %681 : vector<16x128xf32>
    %c4_415 = arith.constant 4 : index
    %c0_416 = arith.constant 0 : index
    %c0_417 = arith.constant 0 : index
    %683 = vector.load %arg1[%c4_415, %c0_416, %c0_417] : memref<16x16x128xf32, #tpu.memory_space<vmem>>, vector<1x16x128xf32>
    %684 = vector.shape_cast %683 : vector<1x16x128xf32> to vector<16x128xf32>
    %685 = vector.extract_strided_slice %684 {offsets = [5, 0], sizes = [1, 128], strides = [1, 1]} : vector<16x128xf32> to vector<1x128xf32>
    %c4_418 = arith.constant 4 : index
    %c0_419 = arith.constant 0 : index
    %686 = vector.load %arg2[%c4_418, %c0_419] : memref<16x128xf32, #tpu.memory_space<vmem>>, vector<1x128xf32>
    %687 = arith.mulf %685, %686 : vector<1x128xf32>
    %688 = vector.broadcast %687 : vector<1x128xf32> to vector<16x128xf32>
    %689 = arith.mulf %688, %684 : vector<16x128xf32>
    %690 = arith.addf %682, %689 : vector<16x128xf32>
    %c5_420 = arith.constant 5 : index
    %c0_421 = arith.constant 0 : index
    %c0_422 = arith.constant 0 : index
    %691 = vector.load %arg1[%c5_420, %c0_421, %c0_422] : memref<16x16x128xf32, #tpu.memory_space<vmem>>, vector<1x16x128xf32>
    %692 = vector.shape_cast %691 : vector<1x16x128xf32> to vector<16x128xf32>
    %693 = vector.extract_strided_slice %692 {offsets = [5, 0], sizes = [1, 128], strides = [1, 1]} : vector<16x128xf32> to vector<1x128xf32>
    %c5_423 = arith.constant 5 : index
    %c0_424 = arith.constant 0 : index
    %694 = vector.load %arg2[%c5_423, %c0_424] : memref<16x128xf32, #tpu.memory_space<vmem>>, vector<1x128xf32>
    %695 = arith.mulf %693, %694 : vector<1x128xf32>
    %696 = vector.broadcast %695 : vector<1x128xf32> to vector<16x128xf32>
    %697 = arith.mulf %696, %692 : vector<16x128xf32>
    %698 = arith.addf %690, %697 : vector<16x128xf32>
    %c6_425 = arith.constant 6 : index
    %c0_426 = arith.constant 0 : index
    %c0_427 = arith.constant 0 : index
    %699 = vector.load %arg1[%c6_425, %c0_426, %c0_427] : memref<16x16x128xf32, #tpu.memory_space<vmem>>, vector<1x16x128xf32>
    %700 = vector.shape_cast %699 : vector<1x16x128xf32> to vector<16x128xf32>
    %701 = vector.extract_strided_slice %700 {offsets = [5, 0], sizes = [1, 128], strides = [1, 1]} : vector<16x128xf32> to vector<1x128xf32>
    %c6_428 = arith.constant 6 : index
    %c0_429 = arith.constant 0 : index
    %702 = vector.load %arg2[%c6_428, %c0_429] : memref<16x128xf32, #tpu.memory_space<vmem>>, vector<1x128xf32>
    %703 = arith.mulf %701, %702 : vector<1x128xf32>
    %704 = vector.broadcast %703 : vector<1x128xf32> to vector<16x128xf32>
    %705 = arith.mulf %704, %700 : vector<16x128xf32>
    %706 = arith.addf %698, %705 : vector<16x128xf32>
    %c7_430 = arith.constant 7 : index
    %c0_431 = arith.constant 0 : index
    %c0_432 = arith.constant 0 : index
    %707 = vector.load %arg1[%c7_430, %c0_431, %c0_432] : memref<16x16x128xf32, #tpu.memory_space<vmem>>, vector<1x16x128xf32>
    %708 = vector.shape_cast %707 : vector<1x16x128xf32> to vector<16x128xf32>
    %709 = vector.extract_strided_slice %708 {offsets = [5, 0], sizes = [1, 128], strides = [1, 1]} : vector<16x128xf32> to vector<1x128xf32>
    %c7_433 = arith.constant 7 : index
    %c0_434 = arith.constant 0 : index
    %710 = vector.load %arg2[%c7_433, %c0_434] : memref<16x128xf32, #tpu.memory_space<vmem>>, vector<1x128xf32>
    %711 = arith.mulf %709, %710 : vector<1x128xf32>
    %712 = vector.broadcast %711 : vector<1x128xf32> to vector<16x128xf32>
    %713 = arith.mulf %712, %708 : vector<16x128xf32>
    %714 = arith.addf %706, %713 : vector<16x128xf32>
    %c8_435 = arith.constant 8 : index
    %c0_436 = arith.constant 0 : index
    %c0_437 = arith.constant 0 : index
    %715 = vector.load %arg1[%c8_435, %c0_436, %c0_437] : memref<16x16x128xf32, #tpu.memory_space<vmem>>, vector<1x16x128xf32>
    %716 = vector.shape_cast %715 : vector<1x16x128xf32> to vector<16x128xf32>
    %717 = vector.extract_strided_slice %716 {offsets = [5, 0], sizes = [1, 128], strides = [1, 1]} : vector<16x128xf32> to vector<1x128xf32>
    %c8_438 = arith.constant 8 : index
    %c0_439 = arith.constant 0 : index
    %718 = vector.load %arg2[%c8_438, %c0_439] : memref<16x128xf32, #tpu.memory_space<vmem>>, vector<1x128xf32>
    %719 = arith.mulf %717, %718 : vector<1x128xf32>
    %720 = vector.broadcast %719 : vector<1x128xf32> to vector<16x128xf32>
    %721 = arith.mulf %720, %716 : vector<16x128xf32>
    %722 = arith.addf %714, %721 : vector<16x128xf32>
    %c9_440 = arith.constant 9 : index
    %c0_441 = arith.constant 0 : index
    %c0_442 = arith.constant 0 : index
    %723 = vector.load %arg1[%c9_440, %c0_441, %c0_442] : memref<16x16x128xf32, #tpu.memory_space<vmem>>, vector<1x16x128xf32>
    %724 = vector.shape_cast %723 : vector<1x16x128xf32> to vector<16x128xf32>
    %725 = vector.extract_strided_slice %724 {offsets = [5, 0], sizes = [1, 128], strides = [1, 1]} : vector<16x128xf32> to vector<1x128xf32>
    %c9_443 = arith.constant 9 : index
    %c0_444 = arith.constant 0 : index
    %726 = vector.load %arg2[%c9_443, %c0_444] : memref<16x128xf32, #tpu.memory_space<vmem>>, vector<1x128xf32>
    %727 = arith.mulf %725, %726 : vector<1x128xf32>
    %728 = vector.broadcast %727 : vector<1x128xf32> to vector<16x128xf32>
    %729 = arith.mulf %728, %724 : vector<16x128xf32>
    %730 = arith.addf %722, %729 : vector<16x128xf32>
    %c10_445 = arith.constant 10 : index
    %c0_446 = arith.constant 0 : index
    %c0_447 = arith.constant 0 : index
    %731 = vector.load %arg1[%c10_445, %c0_446, %c0_447] : memref<16x16x128xf32, #tpu.memory_space<vmem>>, vector<1x16x128xf32>
    %732 = vector.shape_cast %731 : vector<1x16x128xf32> to vector<16x128xf32>
    %733 = vector.extract_strided_slice %732 {offsets = [5, 0], sizes = [1, 128], strides = [1, 1]} : vector<16x128xf32> to vector<1x128xf32>
    %c10_448 = arith.constant 10 : index
    %c0_449 = arith.constant 0 : index
    %734 = vector.load %arg2[%c10_448, %c0_449] : memref<16x128xf32, #tpu.memory_space<vmem>>, vector<1x128xf32>
    %735 = arith.mulf %733, %734 : vector<1x128xf32>
    %736 = vector.broadcast %735 : vector<1x128xf32> to vector<16x128xf32>
    %737 = arith.mulf %736, %732 : vector<16x128xf32>
    %738 = arith.addf %730, %737 : vector<16x128xf32>
    %c11_450 = arith.constant 11 : index
    %c0_451 = arith.constant 0 : index
    %c0_452 = arith.constant 0 : index
    %739 = vector.load %arg1[%c11_450, %c0_451, %c0_452] : memref<16x16x128xf32, #tpu.memory_space<vmem>>, vector<1x16x128xf32>
    %740 = vector.shape_cast %739 : vector<1x16x128xf32> to vector<16x128xf32>
    %741 = vector.extract_strided_slice %740 {offsets = [5, 0], sizes = [1, 128], strides = [1, 1]} : vector<16x128xf32> to vector<1x128xf32>
    %c11_453 = arith.constant 11 : index
    %c0_454 = arith.constant 0 : index
    %742 = vector.load %arg2[%c11_453, %c0_454] : memref<16x128xf32, #tpu.memory_space<vmem>>, vector<1x128xf32>
    %743 = arith.mulf %741, %742 : vector<1x128xf32>
    %744 = vector.broadcast %743 : vector<1x128xf32> to vector<16x128xf32>
    %745 = arith.mulf %744, %740 : vector<16x128xf32>
    %746 = arith.addf %738, %745 : vector<16x128xf32>
    %c12_455 = arith.constant 12 : index
    %c0_456 = arith.constant 0 : index
    %c0_457 = arith.constant 0 : index
    %747 = vector.load %arg1[%c12_455, %c0_456, %c0_457] : memref<16x16x128xf32, #tpu.memory_space<vmem>>, vector<1x16x128xf32>
    %748 = vector.shape_cast %747 : vector<1x16x128xf32> to vector<16x128xf32>
    %749 = vector.extract_strided_slice %748 {offsets = [5, 0], sizes = [1, 128], strides = [1, 1]} : vector<16x128xf32> to vector<1x128xf32>
    %c12_458 = arith.constant 12 : index
    %c0_459 = arith.constant 0 : index
    %750 = vector.load %arg2[%c12_458, %c0_459] : memref<16x128xf32, #tpu.memory_space<vmem>>, vector<1x128xf32>
    %751 = arith.mulf %749, %750 : vector<1x128xf32>
    %752 = vector.broadcast %751 : vector<1x128xf32> to vector<16x128xf32>
    %753 = arith.mulf %752, %748 : vector<16x128xf32>
    %754 = arith.addf %746, %753 : vector<16x128xf32>
    %c13_460 = arith.constant 13 : index
    %c0_461 = arith.constant 0 : index
    %c0_462 = arith.constant 0 : index
    %755 = vector.load %arg1[%c13_460, %c0_461, %c0_462] : memref<16x16x128xf32, #tpu.memory_space<vmem>>, vector<1x16x128xf32>
    %756 = vector.shape_cast %755 : vector<1x16x128xf32> to vector<16x128xf32>
    %757 = vector.extract_strided_slice %756 {offsets = [5, 0], sizes = [1, 128], strides = [1, 1]} : vector<16x128xf32> to vector<1x128xf32>
    %c13_463 = arith.constant 13 : index
    %c0_464 = arith.constant 0 : index
    %758 = vector.load %arg2[%c13_463, %c0_464] : memref<16x128xf32, #tpu.memory_space<vmem>>, vector<1x128xf32>
    %759 = arith.mulf %757, %758 : vector<1x128xf32>
    %760 = vector.broadcast %759 : vector<1x128xf32> to vector<16x128xf32>
    %761 = arith.mulf %760, %756 : vector<16x128xf32>
    %762 = arith.addf %754, %761 : vector<16x128xf32>
    %c14_465 = arith.constant 14 : index
    %c0_466 = arith.constant 0 : index
    %c0_467 = arith.constant 0 : index
    %763 = vector.load %arg1[%c14_465, %c0_466, %c0_467] : memref<16x16x128xf32, #tpu.memory_space<vmem>>, vector<1x16x128xf32>
    %764 = vector.shape_cast %763 : vector<1x16x128xf32> to vector<16x128xf32>
    %765 = vector.extract_strided_slice %764 {offsets = [5, 0], sizes = [1, 128], strides = [1, 1]} : vector<16x128xf32> to vector<1x128xf32>
    %c14_468 = arith.constant 14 : index
    %c0_469 = arith.constant 0 : index
    %766 = vector.load %arg2[%c14_468, %c0_469] : memref<16x128xf32, #tpu.memory_space<vmem>>, vector<1x128xf32>
    %767 = arith.mulf %765, %766 : vector<1x128xf32>
    %768 = vector.broadcast %767 : vector<1x128xf32> to vector<16x128xf32>
    %769 = arith.mulf %768, %764 : vector<16x128xf32>
    %770 = arith.addf %762, %769 : vector<16x128xf32>
    %c15_470 = arith.constant 15 : index
    %c0_471 = arith.constant 0 : index
    %c0_472 = arith.constant 0 : index
    %771 = vector.load %arg1[%c15_470, %c0_471, %c0_472] : memref<16x16x128xf32, #tpu.memory_space<vmem>>, vector<1x16x128xf32>
    %772 = vector.shape_cast %771 : vector<1x16x128xf32> to vector<16x128xf32>
    %773 = vector.extract_strided_slice %772 {offsets = [5, 0], sizes = [1, 128], strides = [1, 1]} : vector<16x128xf32> to vector<1x128xf32>
    %c15_473 = arith.constant 15 : index
    %c0_474 = arith.constant 0 : index
    %774 = vector.load %arg2[%c15_473, %c0_474] : memref<16x128xf32, #tpu.memory_space<vmem>>, vector<1x128xf32>
    %775 = arith.mulf %773, %774 : vector<1x128xf32>
    %776 = vector.broadcast %775 : vector<1x128xf32> to vector<16x128xf32>
    %777 = arith.mulf %776, %772 : vector<16x128xf32>
    %778 = arith.addf %770, %777 : vector<16x128xf32>
    %c80 = arith.constant 80 : index
    %c0_475 = arith.constant 0 : index
    %779 = vector.load %arg6[%c80, %c0_475] : memref<256x128xf32, #tpu.memory_space<vmem>>, vector<16x128xf32>
    tpu.vector_store %arg6[%c80, %c0_475], %778 {strides = array<i32>} : memref<256x128xf32, #tpu.memory_space<vmem>>, vector<16x128xf32>,
    %cst_476 = arith.constant 0.000000e+00 : f32
    %780 = vector.broadcast %cst_476 : f32 to vector<16x128xf32>
    %c0_477 = arith.constant 0 : index
    %c0_478 = arith.constant 0 : index
    %c0_479 = arith.constant 0 : index
    %781 = vector.load %arg1[%c0_477, %c0_478, %c0_479] : memref<16x16x128xf32, #tpu.memory_space<vmem>>, vector<1x16x128xf32>
    %782 = vector.shape_cast %781 : vector<1x16x128xf32> to vector<16x128xf32>
    %783 = vector.extract_strided_slice %782 {offsets = [6, 0], sizes = [1, 128], strides = [1, 1]} : vector<16x128xf32> to vector<1x128xf32>
    %c0_480 = arith.constant 0 : index
    %c0_481 = arith.constant 0 : index
    %784 = vector.load %arg2[%c0_480, %c0_481] : memref<16x128xf32, #tpu.memory_space<vmem>>, vector<1x128xf32>
    %785 = arith.mulf %783, %784 : vector<1x128xf32>
    %786 = vector.broadcast %785 : vector<1x128xf32> to vector<16x128xf32>
    %787 = arith.mulf %786, %782 : vector<16x128xf32>
    %788 = arith.addf %780, %787 : vector<16x128xf32>
    %c1_482 = arith.constant 1 : index
    %c0_483 = arith.constant 0 : index
    %c0_484 = arith.constant 0 : index
    %789 = vector.load %arg1[%c1_482, %c0_483, %c0_484] : memref<16x16x128xf32, #tpu.memory_space<vmem>>, vector<1x16x128xf32>
    %790 = vector.shape_cast %789 : vector<1x16x128xf32> to vector<16x128xf32>
    %791 = vector.extract_strided_slice %790 {offsets = [6, 0], sizes = [1, 128], strides = [1, 1]} : vector<16x128xf32> to vector<1x128xf32>
    %c1_485 = arith.constant 1 : index
    %c0_486 = arith.constant 0 : index
    %792 = vector.load %arg2[%c1_485, %c0_486] : memref<16x128xf32, #tpu.memory_space<vmem>>, vector<1x128xf32>
    %793 = arith.mulf %791, %792 : vector<1x128xf32>
    %794 = vector.broadcast %793 : vector<1x128xf32> to vector<16x128xf32>
    %795 = arith.mulf %794, %790 : vector<16x128xf32>
    %796 = arith.addf %788, %795 : vector<16x128xf32>
    %c2_487 = arith.constant 2 : index
    %c0_488 = arith.constant 0 : index
    %c0_489 = arith.constant 0 : index
    %797 = vector.load %arg1[%c2_487, %c0_488, %c0_489] : memref<16x16x128xf32, #tpu.memory_space<vmem>>, vector<1x16x128xf32>
    %798 = vector.shape_cast %797 : vector<1x16x128xf32> to vector<16x128xf32>
    %799 = vector.extract_strided_slice %798 {offsets = [6, 0], sizes = [1, 128], strides = [1, 1]} : vector<16x128xf32> to vector<1x128xf32>
    %c2_490 = arith.constant 2 : index
    %c0_491 = arith.constant 0 : index
    %800 = vector.load %arg2[%c2_490, %c0_491] : memref<16x128xf32, #tpu.memory_space<vmem>>, vector<1x128xf32>
    %801 = arith.mulf %799, %800 : vector<1x128xf32>
    %802 = vector.broadcast %801 : vector<1x128xf32> to vector<16x128xf32>
    %803 = arith.mulf %802, %798 : vector<16x128xf32>
    %804 = arith.addf %796, %803 : vector<16x128xf32>
    %c3_492 = arith.constant 3 : index
    %c0_493 = arith.constant 0 : index
    %c0_494 = arith.constant 0 : index
    %805 = vector.load %arg1[%c3_492, %c0_493, %c0_494] : memref<16x16x128xf32, #tpu.memory_space<vmem>>, vector<1x16x128xf32>
    %806 = vector.shape_cast %805 : vector<1x16x128xf32> to vector<16x128xf32>
    %807 = vector.extract_strided_slice %806 {offsets = [6, 0], sizes = [1, 128], strides = [1, 1]} : vector<16x128xf32> to vector<1x128xf32>
    %c3_495 = arith.constant 3 : index
    %c0_496 = arith.constant 0 : index
    %808 = vector.load %arg2[%c3_495, %c0_496] : memref<16x128xf32, #tpu.memory_space<vmem>>, vector<1x128xf32>
    %809 = arith.mulf %807, %808 : vector<1x128xf32>
    %810 = vector.broadcast %809 : vector<1x128xf32> to vector<16x128xf32>
    %811 = arith.mulf %810, %806 : vector<16x128xf32>
    %812 = arith.addf %804, %811 : vector<16x128xf32>
    %c4_497 = arith.constant 4 : index
    %c0_498 = arith.constant 0 : index
    %c0_499 = arith.constant 0 : index
    %813 = vector.load %arg1[%c4_497, %c0_498, %c0_499] : memref<16x16x128xf32, #tpu.memory_space<vmem>>, vector<1x16x128xf32>
    %814 = vector.shape_cast %813 : vector<1x16x128xf32> to vector<16x128xf32>
    %815 = vector.extract_strided_slice %814 {offsets = [6, 0], sizes = [1, 128], strides = [1, 1]} : vector<16x128xf32> to vector<1x128xf32>
    %c4_500 = arith.constant 4 : index
    %c0_501 = arith.constant 0 : index
    %816 = vector.load %arg2[%c4_500, %c0_501] : memref<16x128xf32, #tpu.memory_space<vmem>>, vector<1x128xf32>
    %817 = arith.mulf %815, %816 : vector<1x128xf32>
    %818 = vector.broadcast %817 : vector<1x128xf32> to vector<16x128xf32>
    %819 = arith.mulf %818, %814 : vector<16x128xf32>
    %820 = arith.addf %812, %819 : vector<16x128xf32>
    %c5_502 = arith.constant 5 : index
    %c0_503 = arith.constant 0 : index
    %c0_504 = arith.constant 0 : index
    %821 = vector.load %arg1[%c5_502, %c0_503, %c0_504] : memref<16x16x128xf32, #tpu.memory_space<vmem>>, vector<1x16x128xf32>
    %822 = vector.shape_cast %821 : vector<1x16x128xf32> to vector<16x128xf32>
    %823 = vector.extract_strided_slice %822 {offsets = [6, 0], sizes = [1, 128], strides = [1, 1]} : vector<16x128xf32> to vector<1x128xf32>
    %c5_505 = arith.constant 5 : index
    %c0_506 = arith.constant 0 : index
    %824 = vector.load %arg2[%c5_505, %c0_506] : memref<16x128xf32, #tpu.memory_space<vmem>>, vector<1x128xf32>
    %825 = arith.mulf %823, %824 : vector<1x128xf32>
    %826 = vector.broadcast %825 : vector<1x128xf32> to vector<16x128xf32>
    %827 = arith.mulf %826, %822 : vector<16x128xf32>
    %828 = arith.addf %820, %827 : vector<16x128xf32>
    %c6_507 = arith.constant 6 : index
    %c0_508 = arith.constant 0 : index
    %c0_509 = arith.constant 0 : index
    %829 = vector.load %arg1[%c6_507, %c0_508, %c0_509] : memref<16x16x128xf32, #tpu.memory_space<vmem>>, vector<1x16x128xf32>
    %830 = vector.shape_cast %829 : vector<1x16x128xf32> to vector<16x128xf32>
    %831 = vector.extract_strided_slice %830 {offsets = [6, 0], sizes = [1, 128], strides = [1, 1]} : vector<16x128xf32> to vector<1x128xf32>
    %c6_510 = arith.constant 6 : index
    %c0_511 = arith.constant 0 : index
    %832 = vector.load %arg2[%c6_510, %c0_511] : memref<16x128xf32, #tpu.memory_space<vmem>>, vector<1x128xf32>
    %833 = arith.mulf %831, %832 : vector<1x128xf32>
    %834 = vector.broadcast %833 : vector<1x128xf32> to vector<16x128xf32>
    %835 = arith.mulf %834, %830 : vector<16x128xf32>
    %836 = arith.addf %828, %835 : vector<16x128xf32>
    %c7_512 = arith.constant 7 : index
    %c0_513 = arith.constant 0 : index
    %c0_514 = arith.constant 0 : index
    %837 = vector.load %arg1[%c7_512, %c0_513, %c0_514] : memref<16x16x128xf32, #tpu.memory_space<vmem>>, vector<1x16x128xf32>
    %838 = vector.shape_cast %837 : vector<1x16x128xf32> to vector<16x128xf32>
    %839 = vector.extract_strided_slice %838 {offsets = [6, 0], sizes = [1, 128], strides = [1, 1]} : vector<16x128xf32> to vector<1x128xf32>
    %c7_515 = arith.constant 7 : index
    %c0_516 = arith.constant 0 : index
    %840 = vector.load %arg2[%c7_515, %c0_516] : memref<16x128xf32, #tpu.memory_space<vmem>>, vector<1x128xf32>
    %841 = arith.mulf %839, %840 : vector<1x128xf32>
    %842 = vector.broadcast %841 : vector<1x128xf32> to vector<16x128xf32>
    %843 = arith.mulf %842, %838 : vector<16x128xf32>
    %844 = arith.addf %836, %843 : vector<16x128xf32>
    %c8_517 = arith.constant 8 : index
    %c0_518 = arith.constant 0 : index
    %c0_519 = arith.constant 0 : index
    %845 = vector.load %arg1[%c8_517, %c0_518, %c0_519] : memref<16x16x128xf32, #tpu.memory_space<vmem>>, vector<1x16x128xf32>
    %846 = vector.shape_cast %845 : vector<1x16x128xf32> to vector<16x128xf32>
    %847 = vector.extract_strided_slice %846 {offsets = [6, 0], sizes = [1, 128], strides = [1, 1]} : vector<16x128xf32> to vector<1x128xf32>
    %c8_520 = arith.constant 8 : index
    %c0_521 = arith.constant 0 : index
    %848 = vector.load %arg2[%c8_520, %c0_521] : memref<16x128xf32, #tpu.memory_space<vmem>>, vector<1x128xf32>
    %849 = arith.mulf %847, %848 : vector<1x128xf32>
    %850 = vector.broadcast %849 : vector<1x128xf32> to vector<16x128xf32>
    %851 = arith.mulf %850, %846 : vector<16x128xf32>
    %852 = arith.addf %844, %851 : vector<16x128xf32>
    %c9_522 = arith.constant 9 : index
    %c0_523 = arith.constant 0 : index
    %c0_524 = arith.constant 0 : index
    %853 = vector.load %arg1[%c9_522, %c0_523, %c0_524] : memref<16x16x128xf32, #tpu.memory_space<vmem>>, vector<1x16x128xf32>
    %854 = vector.shape_cast %853 : vector<1x16x128xf32> to vector<16x128xf32>
    %855 = vector.extract_strided_slice %854 {offsets = [6, 0], sizes = [1, 128], strides = [1, 1]} : vector<16x128xf32> to vector<1x128xf32>
    %c9_525 = arith.constant 9 : index
    %c0_526 = arith.constant 0 : index
    %856 = vector.load %arg2[%c9_525, %c0_526] : memref<16x128xf32, #tpu.memory_space<vmem>>, vector<1x128xf32>
    %857 = arith.mulf %855, %856 : vector<1x128xf32>
    %858 = vector.broadcast %857 : vector<1x128xf32> to vector<16x128xf32>
    %859 = arith.mulf %858, %854 : vector<16x128xf32>
    %860 = arith.addf %852, %859 : vector<16x128xf32>
    %c10_527 = arith.constant 10 : index
    %c0_528 = arith.constant 0 : index
    %c0_529 = arith.constant 0 : index
    %861 = vector.load %arg1[%c10_527, %c0_528, %c0_529] : memref<16x16x128xf32, #tpu.memory_space<vmem>>, vector<1x16x128xf32>
    %862 = vector.shape_cast %861 : vector<1x16x128xf32> to vector<16x128xf32>
    %863 = vector.extract_strided_slice %862 {offsets = [6, 0], sizes = [1, 128], strides = [1, 1]} : vector<16x128xf32> to vector<1x128xf32>
    %c10_530 = arith.constant 10 : index
    %c0_531 = arith.constant 0 : index
    %864 = vector.load %arg2[%c10_530, %c0_531] : memref<16x128xf32, #tpu.memory_space<vmem>>, vector<1x128xf32>
    %865 = arith.mulf %863, %864 : vector<1x128xf32>
    %866 = vector.broadcast %865 : vector<1x128xf32> to vector<16x128xf32>
    %867 = arith.mulf %866, %862 : vector<16x128xf32>
    %868 = arith.addf %860, %867 : vector<16x128xf32>
    %c11_532 = arith.constant 11 : index
    %c0_533 = arith.constant 0 : index
    %c0_534 = arith.constant 0 : index
    %869 = vector.load %arg1[%c11_532, %c0_533, %c0_534] : memref<16x16x128xf32, #tpu.memory_space<vmem>>, vector<1x16x128xf32>
    %870 = vector.shape_cast %869 : vector<1x16x128xf32> to vector<16x128xf32>
    %871 = vector.extract_strided_slice %870 {offsets = [6, 0], sizes = [1, 128], strides = [1, 1]} : vector<16x128xf32> to vector<1x128xf32>
    %c11_535 = arith.constant 11 : index
    %c0_536 = arith.constant 0 : index
    %872 = vector.load %arg2[%c11_535, %c0_536] : memref<16x128xf32, #tpu.memory_space<vmem>>, vector<1x128xf32>
    %873 = arith.mulf %871, %872 : vector<1x128xf32>
    %874 = vector.broadcast %873 : vector<1x128xf32> to vector<16x128xf32>
    %875 = arith.mulf %874, %870 : vector<16x128xf32>
    %876 = arith.addf %868, %875 : vector<16x128xf32>
    %c12_537 = arith.constant 12 : index
    %c0_538 = arith.constant 0 : index
    %c0_539 = arith.constant 0 : index
    %877 = vector.load %arg1[%c12_537, %c0_538, %c0_539] : memref<16x16x128xf32, #tpu.memory_space<vmem>>, vector<1x16x128xf32>
    %878 = vector.shape_cast %877 : vector<1x16x128xf32> to vector<16x128xf32>
    %879 = vector.extract_strided_slice %878 {offsets = [6, 0], sizes = [1, 128], strides = [1, 1]} : vector<16x128xf32> to vector<1x128xf32>
    %c12_540 = arith.constant 12 : index
    %c0_541 = arith.constant 0 : index
    %880 = vector.load %arg2[%c12_540, %c0_541] : memref<16x128xf32, #tpu.memory_space<vmem>>, vector<1x128xf32>
    %881 = arith.mulf %879, %880 : vector<1x128xf32>
    %882 = vector.broadcast %881 : vector<1x128xf32> to vector<16x128xf32>
    %883 = arith.mulf %882, %878 : vector<16x128xf32>
    %884 = arith.addf %876, %883 : vector<16x128xf32>
    %c13_542 = arith.constant 13 : index
    %c0_543 = arith.constant 0 : index
    %c0_544 = arith.constant 0 : index
    %885 = vector.load %arg1[%c13_542, %c0_543, %c0_544] : memref<16x16x128xf32, #tpu.memory_space<vmem>>, vector<1x16x128xf32>
    %886 = vector.shape_cast %885 : vector<1x16x128xf32> to vector<16x128xf32>
    %887 = vector.extract_strided_slice %886 {offsets = [6, 0], sizes = [1, 128], strides = [1, 1]} : vector<16x128xf32> to vector<1x128xf32>
    %c13_545 = arith.constant 13 : index
    %c0_546 = arith.constant 0 : index
    %888 = vector.load %arg2[%c13_545, %c0_546] : memref<16x128xf32, #tpu.memory_space<vmem>>, vector<1x128xf32>
    %889 = arith.mulf %887, %888 : vector<1x128xf32>
    %890 = vector.broadcast %889 : vector<1x128xf32> to vector<16x128xf32>
    %891 = arith.mulf %890, %886 : vector<16x128xf32>
    %892 = arith.addf %884, %891 : vector<16x128xf32>
    %c14_547 = arith.constant 14 : index
    %c0_548 = arith.constant 0 : index
    %c0_549 = arith.constant 0 : index
    %893 = vector.load %arg1[%c14_547, %c0_548, %c0_549] : memref<16x16x128xf32, #tpu.memory_space<vmem>>, vector<1x16x128xf32>
    %894 = vector.shape_cast %893 : vector<1x16x128xf32> to vector<16x128xf32>
    %895 = vector.extract_strided_slice %894 {offsets = [6, 0], sizes = [1, 128], strides = [1, 1]} : vector<16x128xf32> to vector<1x128xf32>
    %c14_550 = arith.constant 14 : index
    %c0_551 = arith.constant 0 : index
    %896 = vector.load %arg2[%c14_550, %c0_551] : memref<16x128xf32, #tpu.memory_space<vmem>>, vector<1x128xf32>
    %897 = arith.mulf %895, %896 : vector<1x128xf32>
    %898 = vector.broadcast %897 : vector<1x128xf32> to vector<16x128xf32>
    %899 = arith.mulf %898, %894 : vector<16x128xf32>
    %900 = arith.addf %892, %899 : vector<16x128xf32>
    %c15_552 = arith.constant 15 : index
    %c0_553 = arith.constant 0 : index
    %c0_554 = arith.constant 0 : index
    %901 = vector.load %arg1[%c15_552, %c0_553, %c0_554] : memref<16x16x128xf32, #tpu.memory_space<vmem>>, vector<1x16x128xf32>
    %902 = vector.shape_cast %901 : vector<1x16x128xf32> to vector<16x128xf32>
    %903 = vector.extract_strided_slice %902 {offsets = [6, 0], sizes = [1, 128], strides = [1, 1]} : vector<16x128xf32> to vector<1x128xf32>
    %c15_555 = arith.constant 15 : index
    %c0_556 = arith.constant 0 : index
    %904 = vector.load %arg2[%c15_555, %c0_556] : memref<16x128xf32, #tpu.memory_space<vmem>>, vector<1x128xf32>
    %905 = arith.mulf %903, %904 : vector<1x128xf32>
    %906 = vector.broadcast %905 : vector<1x128xf32> to vector<16x128xf32>
    %907 = arith.mulf %906, %902 : vector<16x128xf32>
    %908 = arith.addf %900, %907 : vector<16x128xf32>
    %c96 = arith.constant 96 : index
    %c0_557 = arith.constant 0 : index
    %909 = vector.load %arg6[%c96, %c0_557] : memref<256x128xf32, #tpu.memory_space<vmem>>, vector<16x128xf32>
    tpu.vector_store %arg6[%c96, %c0_557], %908 {strides = array<i32>} : memref<256x128xf32, #tpu.memory_space<vmem>>, vector<16x128xf32>,
    %cst_558 = arith.constant 0.000000e+00 : f32
    %910 = vector.broadcast %cst_558 : f32 to vector<16x128xf32>
    %c0_559 = arith.constant 0 : index
    %c0_560 = arith.constant 0 : index
    %c0_561 = arith.constant 0 : index
    %911 = vector.load %arg1[%c0_559, %c0_560, %c0_561] : memref<16x16x128xf32, #tpu.memory_space<vmem>>, vector<1x16x128xf32>
    %912 = vector.shape_cast %911 : vector<1x16x128xf32> to vector<16x128xf32>
    %913 = vector.extract_strided_slice %912 {offsets = [7, 0], sizes = [1, 128], strides = [1, 1]} : vector<16x128xf32> to vector<1x128xf32>
    %c0_562 = arith.constant 0 : index
    %c0_563 = arith.constant 0 : index
    %914 = vector.load %arg2[%c0_562, %c0_563] : memref<16x128xf32, #tpu.memory_space<vmem>>, vector<1x128xf32>
    %915 = arith.mulf %913, %914 : vector<1x128xf32>
    %916 = vector.broadcast %915 : vector<1x128xf32> to vector<16x128xf32>
    %917 = arith.mulf %916, %912 : vector<16x128xf32>
    %918 = arith.addf %910, %917 : vector<16x128xf32>
    %c1_564 = arith.constant 1 : index
    %c0_565 = arith.constant 0 : index
    %c0_566 = arith.constant 0 : index
    %919 = vector.load %arg1[%c1_564, %c0_565, %c0_566] : memref<16x16x128xf32, #tpu.memory_space<vmem>>, vector<1x16x128xf32>
    %920 = vector.shape_cast %919 : vector<1x16x128xf32> to vector<16x128xf32>
    %921 = vector.extract_strided_slice %920 {offsets = [7, 0], sizes = [1, 128], strides = [1, 1]} : vector<16x128xf32> to vector<1x128xf32>
    %c1_567 = arith.constant 1 : index
    %c0_568 = arith.constant 0 : index
    %922 = vector.load %arg2[%c1_567, %c0_568] : memref<16x128xf32, #tpu.memory_space<vmem>>, vector<1x128xf32>
    %923 = arith.mulf %921, %922 : vector<1x128xf32>
    %924 = vector.broadcast %923 : vector<1x128xf32> to vector<16x128xf32>
    %925 = arith.mulf %924, %920 : vector<16x128xf32>
    %926 = arith.addf %918, %925 : vector<16x128xf32>
    %c2_569 = arith.constant 2 : index
    %c0_570 = arith.constant 0 : index
    %c0_571 = arith.constant 0 : index
    %927 = vector.load %arg1[%c2_569, %c0_570, %c0_571] : memref<16x16x128xf32, #tpu.memory_space<vmem>>, vector<1x16x128xf32>
    %928 = vector.shape_cast %927 : vector<1x16x128xf32> to vector<16x128xf32>
    %929 = vector.extract_strided_slice %928 {offsets = [7, 0], sizes = [1, 128], strides = [1, 1]} : vector<16x128xf32> to vector<1x128xf32>
    %c2_572 = arith.constant 2 : index
    %c0_573 = arith.constant 0 : index
    %930 = vector.load %arg2[%c2_572, %c0_573] : memref<16x128xf32, #tpu.memory_space<vmem>>, vector<1x128xf32>
    %931 = arith.mulf %929, %930 : vector<1x128xf32>
    %932 = vector.broadcast %931 : vector<1x128xf32> to vector<16x128xf32>
    %933 = arith.mulf %932, %928 : vector<16x128xf32>
    %934 = arith.addf %926, %933 : vector<16x128xf32>
    %c3_574 = arith.constant 3 : index
    %c0_575 = arith.constant 0 : index
    %c0_576 = arith.constant 0 : index
    %935 = vector.load %arg1[%c3_574, %c0_575, %c0_576] : memref<16x16x128xf32, #tpu.memory_space<vmem>>, vector<1x16x128xf32>
    %936 = vector.shape_cast %935 : vector<1x16x128xf32> to vector<16x128xf32>
    %937 = vector.extract_strided_slice %936 {offsets = [7, 0], sizes = [1, 128], strides = [1, 1]} : vector<16x128xf32> to vector<1x128xf32>
    %c3_577 = arith.constant 3 : index
    %c0_578 = arith.constant 0 : index
    %938 = vector.load %arg2[%c3_577, %c0_578] : memref<16x128xf32, #tpu.memory_space<vmem>>, vector<1x128xf32>
    %939 = arith.mulf %937, %938 : vector<1x128xf32>
    %940 = vector.broadcast %939 : vector<1x128xf32> to vector<16x128xf32>
    %941 = arith.mulf %940, %936 : vector<16x128xf32>
    %942 = arith.addf %934, %941 : vector<16x128xf32>
    %c4_579 = arith.constant 4 : index
    %c0_580 = arith.constant 0 : index
    %c0_581 = arith.constant 0 : index
    %943 = vector.load %arg1[%c4_579, %c0_580, %c0_581] : memref<16x16x128xf32, #tpu.memory_space<vmem>>, vector<1x16x128xf32>
    %944 = vector.shape_cast %943 : vector<1x16x128xf32> to vector<16x128xf32>
    %945 = vector.extract_strided_slice %944 {offsets = [7, 0], sizes = [1, 128], strides = [1, 1]} : vector<16x128xf32> to vector<1x128xf32>
    %c4_582 = arith.constant 4 : index
    %c0_583 = arith.constant 0 : index
    %946 = vector.load %arg2[%c4_582, %c0_583] : memref<16x128xf32, #tpu.memory_space<vmem>>, vector<1x128xf32>
    %947 = arith.mulf %945, %946 : vector<1x128xf32>
    %948 = vector.broadcast %947 : vector<1x128xf32> to vector<16x128xf32>
    %949 = arith.mulf %948, %944 : vector<16x128xf32>
    %950 = arith.addf %942, %949 : vector<16x128xf32>
    %c5_584 = arith.constant 5 : index
    %c0_585 = arith.constant 0 : index
    %c0_586 = arith.constant 0 : index
    %951 = vector.load %arg1[%c5_584, %c0_585, %c0_586] : memref<16x16x128xf32, #tpu.memory_space<vmem>>, vector<1x16x128xf32>
    %952 = vector.shape_cast %951 : vector<1x16x128xf32> to vector<16x128xf32>
    %953 = vector.extract_strided_slice %952 {offsets = [7, 0], sizes = [1, 128], strides = [1, 1]} : vector<16x128xf32> to vector<1x128xf32>
    %c5_587 = arith.constant 5 : index
    %c0_588 = arith.constant 0 : index
    %954 = vector.load %arg2[%c5_587, %c0_588] : memref<16x128xf32, #tpu.memory_space<vmem>>, vector<1x128xf32>
    %955 = arith.mulf %953, %954 : vector<1x128xf32>
    %956 = vector.broadcast %955 : vector<1x128xf32> to vector<16x128xf32>
    %957 = arith.mulf %956, %952 : vector<16x128xf32>
    %958 = arith.addf %950, %957 : vector<16x128xf32>
    %c6_589 = arith.constant 6 : index
    %c0_590 = arith.constant 0 : index
    %c0_591 = arith.constant 0 : index
    %959 = vector.load %arg1[%c6_589, %c0_590, %c0_591] : memref<16x16x128xf32, #tpu.memory_space<vmem>>, vector<1x16x128xf32>
    %960 = vector.shape_cast %959 : vector<1x16x128xf32> to vector<16x128xf32>
    %961 = vector.extract_strided_slice %960 {offsets = [7, 0], sizes = [1, 128], strides = [1, 1]} : vector<16x128xf32> to vector<1x128xf32>
    %c6_592 = arith.constant 6 : index
    %c0_593 = arith.constant 0 : index
    %962 = vector.load %arg2[%c6_592, %c0_593] : memref<16x128xf32, #tpu.memory_space<vmem>>, vector<1x128xf32>
    %963 = arith.mulf %961, %962 : vector<1x128xf32>
    %964 = vector.broadcast %963 : vector<1x128xf32> to vector<16x128xf32>
    %965 = arith.mulf %964, %960 : vector<16x128xf32>
    %966 = arith.addf %958, %965 : vector<16x128xf32>
    %c7_594 = arith.constant 7 : index
    %c0_595 = arith.constant 0 : index
    %c0_596 = arith.constant 0 : index
    %967 = vector.load %arg1[%c7_594, %c0_595, %c0_596] : memref<16x16x128xf32, #tpu.memory_space<vmem>>, vector<1x16x128xf32>
    %968 = vector.shape_cast %967 : vector<1x16x128xf32> to vector<16x128xf32>
    %969 = vector.extract_strided_slice %968 {offsets = [7, 0], sizes = [1, 128], strides = [1, 1]} : vector<16x128xf32> to vector<1x128xf32>
    %c7_597 = arith.constant 7 : index
    %c0_598 = arith.constant 0 : index
    %970 = vector.load %arg2[%c7_597, %c0_598] : memref<16x128xf32, #tpu.memory_space<vmem>>, vector<1x128xf32>
    %971 = arith.mulf %969, %970 : vector<1x128xf32>
    %972 = vector.broadcast %971 : vector<1x128xf32> to vector<16x128xf32>
    %973 = arith.mulf %972, %968 : vector<16x128xf32>
    %974 = arith.addf %966, %973 : vector<16x128xf32>
    %c8_599 = arith.constant 8 : index
    %c0_600 = arith.constant 0 : index
    %c0_601 = arith.constant 0 : index
    %975 = vector.load %arg1[%c8_599, %c0_600, %c0_601] : memref<16x16x128xf32, #tpu.memory_space<vmem>>, vector<1x16x128xf32>
    %976 = vector.shape_cast %975 : vector<1x16x128xf32> to vector<16x128xf32>
    %977 = vector.extract_strided_slice %976 {offsets = [7, 0], sizes = [1, 128], strides = [1, 1]} : vector<16x128xf32> to vector<1x128xf32>
    %c8_602 = arith.constant 8 : index
    %c0_603 = arith.constant 0 : index
    %978 = vector.load %arg2[%c8_602, %c0_603] : memref<16x128xf32, #tpu.memory_space<vmem>>, vector<1x128xf32>
    %979 = arith.mulf %977, %978 : vector<1x128xf32>
    %980 = vector.broadcast %979 : vector<1x128xf32> to vector<16x128xf32>
    %981 = arith.mulf %980, %976 : vector<16x128xf32>
    %982 = arith.addf %974, %981 : vector<16x128xf32>
    %c9_604 = arith.constant 9 : index
    %c0_605 = arith.constant 0 : index
    %c0_606 = arith.constant 0 : index
    %983 = vector.load %arg1[%c9_604, %c0_605, %c0_606] : memref<16x16x128xf32, #tpu.memory_space<vmem>>, vector<1x16x128xf32>
    %984 = vector.shape_cast %983 : vector<1x16x128xf32> to vector<16x128xf32>
    %985 = vector.extract_strided_slice %984 {offsets = [7, 0], sizes = [1, 128], strides = [1, 1]} : vector<16x128xf32> to vector<1x128xf32>
    %c9_607 = arith.constant 9 : index
    %c0_608 = arith.constant 0 : index
    %986 = vector.load %arg2[%c9_607, %c0_608] : memref<16x128xf32, #tpu.memory_space<vmem>>, vector<1x128xf32>
    %987 = arith.mulf %985, %986 : vector<1x128xf32>
    %988 = vector.broadcast %987 : vector<1x128xf32> to vector<16x128xf32>
    %989 = arith.mulf %988, %984 : vector<16x128xf32>
    %990 = arith.addf %982, %989 : vector<16x128xf32>
    %c10_609 = arith.constant 10 : index
    %c0_610 = arith.constant 0 : index
    %c0_611 = arith.constant 0 : index
    %991 = vector.load %arg1[%c10_609, %c0_610, %c0_611] : memref<16x16x128xf32, #tpu.memory_space<vmem>>, vector<1x16x128xf32>
    %992 = vector.shape_cast %991 : vector<1x16x128xf32> to vector<16x128xf32>
    %993 = vector.extract_strided_slice %992 {offsets = [7, 0], sizes = [1, 128], strides = [1, 1]} : vector<16x128xf32> to vector<1x128xf32>
    %c10_612 = arith.constant 10 : index
    %c0_613 = arith.constant 0 : index
    %994 = vector.load %arg2[%c10_612, %c0_613] : memref<16x128xf32, #tpu.memory_space<vmem>>, vector<1x128xf32>
    %995 = arith.mulf %993, %994 : vector<1x128xf32>
    %996 = vector.broadcast %995 : vector<1x128xf32> to vector<16x128xf32>
    %997 = arith.mulf %996, %992 : vector<16x128xf32>
    %998 = arith.addf %990, %997 : vector<16x128xf32>
    %c11_614 = arith.constant 11 : index
    %c0_615 = arith.constant 0 : index
    %c0_616 = arith.constant 0 : index
    %999 = vector.load %arg1[%c11_614, %c0_615, %c0_616] : memref<16x16x128xf32, #tpu.memory_space<vmem>>, vector<1x16x128xf32>
    %1000 = vector.shape_cast %999 : vector<1x16x128xf32> to vector<16x128xf32>
    %1001 = vector.extract_strided_slice %1000 {offsets = [7, 0], sizes = [1, 128], strides = [1, 1]} : vector<16x128xf32> to vector<1x128xf32>
    %c11_617 = arith.constant 11 : index
    %c0_618 = arith.constant 0 : index
    %1002 = vector.load %arg2[%c11_617, %c0_618] : memref<16x128xf32, #tpu.memory_space<vmem>>, vector<1x128xf32>
    %1003 = arith.mulf %1001, %1002 : vector<1x128xf32>
    %1004 = vector.broadcast %1003 : vector<1x128xf32> to vector<16x128xf32>
    %1005 = arith.mulf %1004, %1000 : vector<16x128xf32>
    %1006 = arith.addf %998, %1005 : vector<16x128xf32>
    %c12_619 = arith.constant 12 : index
    %c0_620 = arith.constant 0 : index
    %c0_621 = arith.constant 0 : index
    %1007 = vector.load %arg1[%c12_619, %c0_620, %c0_621] : memref<16x16x128xf32, #tpu.memory_space<vmem>>, vector<1x16x128xf32>
    %1008 = vector.shape_cast %1007 : vector<1x16x128xf32> to vector<16x128xf32>
    %1009 = vector.extract_strided_slice %1008 {offsets = [7, 0], sizes = [1, 128], strides = [1, 1]} : vector<16x128xf32> to vector<1x128xf32>
    %c12_622 = arith.constant 12 : index
    %c0_623 = arith.constant 0 : index
    %1010 = vector.load %arg2[%c12_622, %c0_623] : memref<16x128xf32, #tpu.memory_space<vmem>>, vector<1x128xf32>
    %1011 = arith.mulf %1009, %1010 : vector<1x128xf32>
    %1012 = vector.broadcast %1011 : vector<1x128xf32> to vector<16x128xf32>
    %1013 = arith.mulf %1012, %1008 : vector<16x128xf32>
    %1014 = arith.addf %1006, %1013 : vector<16x128xf32>
    %c13_624 = arith.constant 13 : index
    %c0_625 = arith.constant 0 : index
    %c0_626 = arith.constant 0 : index
    %1015 = vector.load %arg1[%c13_624, %c0_625, %c0_626] : memref<16x16x128xf32, #tpu.memory_space<vmem>>, vector<1x16x128xf32>
    %1016 = vector.shape_cast %1015 : vector<1x16x128xf32> to vector<16x128xf32>
    %1017 = vector.extract_strided_slice %1016 {offsets = [7, 0], sizes = [1, 128], strides = [1, 1]} : vector<16x128xf32> to vector<1x128xf32>
    %c13_627 = arith.constant 13 : index
    %c0_628 = arith.constant 0 : index
    %1018 = vector.load %arg2[%c13_627, %c0_628] : memref<16x128xf32, #tpu.memory_space<vmem>>, vector<1x128xf32>
    %1019 = arith.mulf %1017, %1018 : vector<1x128xf32>
    %1020 = vector.broadcast %1019 : vector<1x128xf32> to vector<16x128xf32>
    %1021 = arith.mulf %1020, %1016 : vector<16x128xf32>
    %1022 = arith.addf %1014, %1021 : vector<16x128xf32>
    %c14_629 = arith.constant 14 : index
    %c0_630 = arith.constant 0 : index
    %c0_631 = arith.constant 0 : index
    %1023 = vector.load %arg1[%c14_629, %c0_630, %c0_631] : memref<16x16x128xf32, #tpu.memory_space<vmem>>, vector<1x16x128xf32>
    %1024 = vector.shape_cast %1023 : vector<1x16x128xf32> to vector<16x128xf32>
    %1025 = vector.extract_strided_slice %1024 {offsets = [7, 0], sizes = [1, 128], strides = [1, 1]} : vector<16x128xf32> to vector<1x128xf32>
    %c14_632 = arith.constant 14 : index
    %c0_633 = arith.constant 0 : index
    %1026 = vector.load %arg2[%c14_632, %c0_633] : memref<16x128xf32, #tpu.memory_space<vmem>>, vector<1x128xf32>
    %1027 = arith.mulf %1025, %1026 : vector<1x128xf32>
    %1028 = vector.broadcast %1027 : vector<1x128xf32> to vector<16x128xf32>
    %1029 = arith.mulf %1028, %1024 : vector<16x128xf32>
    %1030 = arith.addf %1022, %1029 : vector<16x128xf32>
    %c15_634 = arith.constant 15 : index
    %c0_635 = arith.constant 0 : index
    %c0_636 = arith.constant 0 : index
    %1031 = vector.load %arg1[%c15_634, %c0_635, %c0_636] : memref<16x16x128xf32, #tpu.memory_space<vmem>>, vector<1x16x128xf32>
    %1032 = vector.shape_cast %1031 : vector<1x16x128xf32> to vector<16x128xf32>
    %1033 = vector.extract_strided_slice %1032 {offsets = [7, 0], sizes = [1, 128], strides = [1, 1]} : vector<16x128xf32> to vector<1x128xf32>
    %c15_637 = arith.constant 15 : index
    %c0_638 = arith.constant 0 : index
    %1034 = vector.load %arg2[%c15_637, %c0_638] : memref<16x128xf32, #tpu.memory_space<vmem>>, vector<1x128xf32>
    %1035 = arith.mulf %1033, %1034 : vector<1x128xf32>
    %1036 = vector.broadcast %1035 : vector<1x128xf32> to vector<16x128xf32>
    %1037 = arith.mulf %1036, %1032 : vector<16x128xf32>
    %1038 = arith.addf %1030, %1037 : vector<16x128xf32>
    %c112 = arith.constant 112 : index
    %c0_639 = arith.constant 0 : index
    %1039 = vector.load %arg6[%c112, %c0_639] : memref<256x128xf32, #tpu.memory_space<vmem>>, vector<16x128xf32>
    tpu.vector_store %arg6[%c112, %c0_639], %1038 {strides = array<i32>} : memref<256x128xf32, #tpu.memory_space<vmem>>, vector<16x128xf32>,
    %cst_640 = arith.constant 0.000000e+00 : f32
    %1040 = vector.broadcast %cst_640 : f32 to vector<16x128xf32>
    %c0_641 = arith.constant 0 : index
    %c0_642 = arith.constant 0 : index
    %c0_643 = arith.constant 0 : index
    %1041 = vector.load %arg1[%c0_641, %c0_642, %c0_643] : memref<16x16x128xf32, #tpu.memory_space<vmem>>, vector<1x16x128xf32>
    %1042 = vector.shape_cast %1041 : vector<1x16x128xf32> to vector<16x128xf32>
    %1043 = vector.extract_strided_slice %1042 {offsets = [8, 0], sizes = [1, 128], strides = [1, 1]} : vector<16x128xf32> to vector<1x128xf32>
    %c0_644 = arith.constant 0 : index
    %c0_645 = arith.constant 0 : index
    %1044 = vector.load %arg2[%c0_644, %c0_645] : memref<16x128xf32, #tpu.memory_space<vmem>>, vector<1x128xf32>
    %1045 = arith.mulf %1043, %1044 : vector<1x128xf32>
    %1046 = vector.broadcast %1045 : vector<1x128xf32> to vector<16x128xf32>
    %1047 = arith.mulf %1046, %1042 : vector<16x128xf32>
    %1048 = arith.addf %1040, %1047 : vector<16x128xf32>
    %c1_646 = arith.constant 1 : index
    %c0_647 = arith.constant 0 : index
    %c0_648 = arith.constant 0 : index
    %1049 = vector.load %arg1[%c1_646, %c0_647, %c0_648] : memref<16x16x128xf32, #tpu.memory_space<vmem>>, vector<1x16x128xf32>
    %1050 = vector.shape_cast %1049 : vector<1x16x128xf32> to vector<16x128xf32>
    %1051 = vector.extract_strided_slice %1050 {offsets = [8, 0], sizes = [1, 128], strides = [1, 1]} : vector<16x128xf32> to vector<1x128xf32>
    %c1_649 = arith.constant 1 : index
    %c0_650 = arith.constant 0 : index
    %1052 = vector.load %arg2[%c1_649, %c0_650] : memref<16x128xf32, #tpu.memory_space<vmem>>, vector<1x128xf32>
    %1053 = arith.mulf %1051, %1052 : vector<1x128xf32>
    %1054 = vector.broadcast %1053 : vector<1x128xf32> to vector<16x128xf32>
    %1055 = arith.mulf %1054, %1050 : vector<16x128xf32>
    %1056 = arith.addf %1048, %1055 : vector<16x128xf32>
    %c2_651 = arith.constant 2 : index
    %c0_652 = arith.constant 0 : index
    %c0_653 = arith.constant 0 : index
    %1057 = vector.load %arg1[%c2_651, %c0_652, %c0_653] : memref<16x16x128xf32, #tpu.memory_space<vmem>>, vector<1x16x128xf32>
    %1058 = vector.shape_cast %1057 : vector<1x16x128xf32> to vector<16x128xf32>
    %1059 = vector.extract_strided_slice %1058 {offsets = [8, 0], sizes = [1, 128], strides = [1, 1]} : vector<16x128xf32> to vector<1x128xf32>
    %c2_654 = arith.constant 2 : index
    %c0_655 = arith.constant 0 : index
    %1060 = vector.load %arg2[%c2_654, %c0_655] : memref<16x128xf32, #tpu.memory_space<vmem>>, vector<1x128xf32>
    %1061 = arith.mulf %1059, %1060 : vector<1x128xf32>
    %1062 = vector.broadcast %1061 : vector<1x128xf32> to vector<16x128xf32>
    %1063 = arith.mulf %1062, %1058 : vector<16x128xf32>
    %1064 = arith.addf %1056, %1063 : vector<16x128xf32>
    %c3_656 = arith.constant 3 : index
    %c0_657 = arith.constant 0 : index
    %c0_658 = arith.constant 0 : index
    %1065 = vector.load %arg1[%c3_656, %c0_657, %c0_658] : memref<16x16x128xf32, #tpu.memory_space<vmem>>, vector<1x16x128xf32>
    %1066 = vector.shape_cast %1065 : vector<1x16x128xf32> to vector<16x128xf32>
    %1067 = vector.extract_strided_slice %1066 {offsets = [8, 0], sizes = [1, 128], strides = [1, 1]} : vector<16x128xf32> to vector<1x128xf32>
    %c3_659 = arith.constant 3 : index
    %c0_660 = arith.constant 0 : index
    %1068 = vector.load %arg2[%c3_659, %c0_660] : memref<16x128xf32, #tpu.memory_space<vmem>>, vector<1x128xf32>
    %1069 = arith.mulf %1067, %1068 : vector<1x128xf32>
    %1070 = vector.broadcast %1069 : vector<1x128xf32> to vector<16x128xf32>
    %1071 = arith.mulf %1070, %1066 : vector<16x128xf32>
    %1072 = arith.addf %1064, %1071 : vector<16x128xf32>
    %c4_661 = arith.constant 4 : index
    %c0_662 = arith.constant 0 : index
    %c0_663 = arith.constant 0 : index
    %1073 = vector.load %arg1[%c4_661, %c0_662, %c0_663] : memref<16x16x128xf32, #tpu.memory_space<vmem>>, vector<1x16x128xf32>
    %1074 = vector.shape_cast %1073 : vector<1x16x128xf32> to vector<16x128xf32>
    %1075 = vector.extract_strided_slice %1074 {offsets = [8, 0], sizes = [1, 128], strides = [1, 1]} : vector<16x128xf32> to vector<1x128xf32>
    %c4_664 = arith.constant 4 : index
    %c0_665 = arith.constant 0 : index
    %1076 = vector.load %arg2[%c4_664, %c0_665] : memref<16x128xf32, #tpu.memory_space<vmem>>, vector<1x128xf32>
    %1077 = arith.mulf %1075, %1076 : vector<1x128xf32>
    %1078 = vector.broadcast %1077 : vector<1x128xf32> to vector<16x128xf32>
    %1079 = arith.mulf %1078, %1074 : vector<16x128xf32>
    %1080 = arith.addf %1072, %1079 : vector<16x128xf32>
    %c5_666 = arith.constant 5 : index
    %c0_667 = arith.constant 0 : index
    %c0_668 = arith.constant 0 : index
    %1081 = vector.load %arg1[%c5_666, %c0_667, %c0_668] : memref<16x16x128xf32, #tpu.memory_space<vmem>>, vector<1x16x128xf32>
    %1082 = vector.shape_cast %1081 : vector<1x16x128xf32> to vector<16x128xf32>
    %1083 = vector.extract_strided_slice %1082 {offsets = [8, 0], sizes = [1, 128], strides = [1, 1]} : vector<16x128xf32> to vector<1x128xf32>
    %c5_669 = arith.constant 5 : index
    %c0_670 = arith.constant 0 : index
    %1084 = vector.load %arg2[%c5_669, %c0_670] : memref<16x128xf32, #tpu.memory_space<vmem>>, vector<1x128xf32>
    %1085 = arith.mulf %1083, %1084 : vector<1x128xf32>
    %1086 = vector.broadcast %1085 : vector<1x128xf32> to vector<16x128xf32>
    %1087 = arith.mulf %1086, %1082 : vector<16x128xf32>
    %1088 = arith.addf %1080, %1087 : vector<16x128xf32>
    %c6_671 = arith.constant 6 : index
    %c0_672 = arith.constant 0 : index
    %c0_673 = arith.constant 0 : index
    %1089 = vector.load %arg1[%c6_671, %c0_672, %c0_673] : memref<16x16x128xf32, #tpu.memory_space<vmem>>, vector<1x16x128xf32>
    %1090 = vector.shape_cast %1089 : vector<1x16x128xf32> to vector<16x128xf32>
    %1091 = vector.extract_strided_slice %1090 {offsets = [8, 0], sizes = [1, 128], strides = [1, 1]} : vector<16x128xf32> to vector<1x128xf32>
    %c6_674 = arith.constant 6 : index
    %c0_675 = arith.constant 0 : index
    %1092 = vector.load %arg2[%c6_674, %c0_675] : memref<16x128xf32, #tpu.memory_space<vmem>>, vector<1x128xf32>
    %1093 = arith.mulf %1091, %1092 : vector<1x128xf32>
    %1094 = vector.broadcast %1093 : vector<1x128xf32> to vector<16x128xf32>
    %1095 = arith.mulf %1094, %1090 : vector<16x128xf32>
    %1096 = arith.addf %1088, %1095 : vector<16x128xf32>
    %c7_676 = arith.constant 7 : index
    %c0_677 = arith.constant 0 : index
    %c0_678 = arith.constant 0 : index
    %1097 = vector.load %arg1[%c7_676, %c0_677, %c0_678] : memref<16x16x128xf32, #tpu.memory_space<vmem>>, vector<1x16x128xf32>
    %1098 = vector.shape_cast %1097 : vector<1x16x128xf32> to vector<16x128xf32>
    %1099 = vector.extract_strided_slice %1098 {offsets = [8, 0], sizes = [1, 128], strides = [1, 1]} : vector<16x128xf32> to vector<1x128xf32>
    %c7_679 = arith.constant 7 : index
    %c0_680 = arith.constant 0 : index
    %1100 = vector.load %arg2[%c7_679, %c0_680] : memref<16x128xf32, #tpu.memory_space<vmem>>, vector<1x128xf32>
    %1101 = arith.mulf %1099, %1100 : vector<1x128xf32>
    %1102 = vector.broadcast %1101 : vector<1x128xf32> to vector<16x128xf32>
    %1103 = arith.mulf %1102, %1098 : vector<16x128xf32>
    %1104 = arith.addf %1096, %1103 : vector<16x128xf32>
    %c8_681 = arith.constant 8 : index
    %c0_682 = arith.constant 0 : index
    %c0_683 = arith.constant 0 : index
    %1105 = vector.load %arg1[%c8_681, %c0_682, %c0_683] : memref<16x16x128xf32, #tpu.memory_space<vmem>>, vector<1x16x128xf32>
    %1106 = vector.shape_cast %1105 : vector<1x16x128xf32> to vector<16x128xf32>
    %1107 = vector.extract_strided_slice %1106 {offsets = [8, 0], sizes = [1, 128], strides = [1, 1]} : vector<16x128xf32> to vector<1x128xf32>
    %c8_684 = arith.constant 8 : index
    %c0_685 = arith.constant 0 : index
    %1108 = vector.load %arg2[%c8_684, %c0_685] : memref<16x128xf32, #tpu.memory_space<vmem>>, vector<1x128xf32>
    %1109 = arith.mulf %1107, %1108 : vector<1x128xf32>
    %1110 = vector.broadcast %1109 : vector<1x128xf32> to vector<16x128xf32>
    %1111 = arith.mulf %1110, %1106 : vector<16x128xf32>
    %1112 = arith.addf %1104, %1111 : vector<16x128xf32>
    %c9_686 = arith.constant 9 : index
    %c0_687 = arith.constant 0 : index
    %c0_688 = arith.constant 0 : index
    %1113 = vector.load %arg1[%c9_686, %c0_687, %c0_688] : memref<16x16x128xf32, #tpu.memory_space<vmem>>, vector<1x16x128xf32>
    %1114 = vector.shape_cast %1113 : vector<1x16x128xf32> to vector<16x128xf32>
    %1115 = vector.extract_strided_slice %1114 {offsets = [8, 0], sizes = [1, 128], strides = [1, 1]} : vector<16x128xf32> to vector<1x128xf32>
    %c9_689 = arith.constant 9 : index
    %c0_690 = arith.constant 0 : index
    %1116 = vector.load %arg2[%c9_689, %c0_690] : memref<16x128xf32, #tpu.memory_space<vmem>>, vector<1x128xf32>
    %1117 = arith.mulf %1115, %1116 : vector<1x128xf32>
    %1118 = vector.broadcast %1117 : vector<1x128xf32> to vector<16x128xf32>
    %1119 = arith.mulf %1118, %1114 : vector<16x128xf32>
    %1120 = arith.addf %1112, %1119 : vector<16x128xf32>
    %c10_691 = arith.constant 10 : index
    %c0_692 = arith.constant 0 : index
    %c0_693 = arith.constant 0 : index
    %1121 = vector.load %arg1[%c10_691, %c0_692, %c0_693] : memref<16x16x128xf32, #tpu.memory_space<vmem>>, vector<1x16x128xf32>
    %1122 = vector.shape_cast %1121 : vector<1x16x128xf32> to vector<16x128xf32>
    %1123 = vector.extract_strided_slice %1122 {offsets = [8, 0], sizes = [1, 128], strides = [1, 1]} : vector<16x128xf32> to vector<1x128xf32>
    %c10_694 = arith.constant 10 : index
    %c0_695 = arith.constant 0 : index
    %1124 = vector.load %arg2[%c10_694, %c0_695] : memref<16x128xf32, #tpu.memory_space<vmem>>, vector<1x128xf32>
    %1125 = arith.mulf %1123, %1124 : vector<1x128xf32>
    %1126 = vector.broadcast %1125 : vector<1x128xf32> to vector<16x128xf32>
    %1127 = arith.mulf %1126, %1122 : vector<16x128xf32>
    %1128 = arith.addf %1120, %1127 : vector<16x128xf32>
    %c11_696 = arith.constant 11 : index
    %c0_697 = arith.constant 0 : index
    %c0_698 = arith.constant 0 : index
    %1129 = vector.load %arg1[%c11_696, %c0_697, %c0_698] : memref<16x16x128xf32, #tpu.memory_space<vmem>>, vector<1x16x128xf32>
    %1130 = vector.shape_cast %1129 : vector<1x16x128xf32> to vector<16x128xf32>
    %1131 = vector.extract_strided_slice %1130 {offsets = [8, 0], sizes = [1, 128], strides = [1, 1]} : vector<16x128xf32> to vector<1x128xf32>
    %c11_699 = arith.constant 11 : index
    %c0_700 = arith.constant 0 : index
    %1132 = vector.load %arg2[%c11_699, %c0_700] : memref<16x128xf32, #tpu.memory_space<vmem>>, vector<1x128xf32>
    %1133 = arith.mulf %1131, %1132 : vector<1x128xf32>
    %1134 = vector.broadcast %1133 : vector<1x128xf32> to vector<16x128xf32>
    %1135 = arith.mulf %1134, %1130 : vector<16x128xf32>
    %1136 = arith.addf %1128, %1135 : vector<16x128xf32>
    %c12_701 = arith.constant 12 : index
    %c0_702 = arith.constant 0 : index
    %c0_703 = arith.constant 0 : index
    %1137 = vector.load %arg1[%c12_701, %c0_702, %c0_703] : memref<16x16x128xf32, #tpu.memory_space<vmem>>, vector<1x16x128xf32>
    %1138 = vector.shape_cast %1137 : vector<1x16x128xf32> to vector<16x128xf32>
    %1139 = vector.extract_strided_slice %1138 {offsets = [8, 0], sizes = [1, 128], strides = [1, 1]} : vector<16x128xf32> to vector<1x128xf32>
    %c12_704 = arith.constant 12 : index
    %c0_705 = arith.constant 0 : index
    %1140 = vector.load %arg2[%c12_704, %c0_705] : memref<16x128xf32, #tpu.memory_space<vmem>>, vector<1x128xf32>
    %1141 = arith.mulf %1139, %1140 : vector<1x128xf32>
    %1142 = vector.broadcast %1141 : vector<1x128xf32> to vector<16x128xf32>
    %1143 = arith.mulf %1142, %1138 : vector<16x128xf32>
    %1144 = arith.addf %1136, %1143 : vector<16x128xf32>
    %c13_706 = arith.constant 13 : index
    %c0_707 = arith.constant 0 : index
    %c0_708 = arith.constant 0 : index
    %1145 = vector.load %arg1[%c13_706, %c0_707, %c0_708] : memref<16x16x128xf32, #tpu.memory_space<vmem>>, vector<1x16x128xf32>
    %1146 = vector.shape_cast %1145 : vector<1x16x128xf32> to vector<16x128xf32>
    %1147 = vector.extract_strided_slice %1146 {offsets = [8, 0], sizes = [1, 128], strides = [1, 1]} : vector<16x128xf32> to vector<1x128xf32>
    %c13_709 = arith.constant 13 : index
    %c0_710 = arith.constant 0 : index
    %1148 = vector.load %arg2[%c13_709, %c0_710] : memref<16x128xf32, #tpu.memory_space<vmem>>, vector<1x128xf32>
    %1149 = arith.mulf %1147, %1148 : vector<1x128xf32>
    %1150 = vector.broadcast %1149 : vector<1x128xf32> to vector<16x128xf32>
    %1151 = arith.mulf %1150, %1146 : vector<16x128xf32>
    %1152 = arith.addf %1144, %1151 : vector<16x128xf32>
    %c14_711 = arith.constant 14 : index
    %c0_712 = arith.constant 0 : index
    %c0_713 = arith.constant 0 : index
    %1153 = vector.load %arg1[%c14_711, %c0_712, %c0_713] : memref<16x16x128xf32, #tpu.memory_space<vmem>>, vector<1x16x128xf32>
    %1154 = vector.shape_cast %1153 : vector<1x16x128xf32> to vector<16x128xf32>
    %1155 = vector.extract_strided_slice %1154 {offsets = [8, 0], sizes = [1, 128], strides = [1, 1]} : vector<16x128xf32> to vector<1x128xf32>
    %c14_714 = arith.constant 14 : index
    %c0_715 = arith.constant 0 : index
    %1156 = vector.load %arg2[%c14_714, %c0_715] : memref<16x128xf32, #tpu.memory_space<vmem>>, vector<1x128xf32>
    %1157 = arith.mulf %1155, %1156 : vector<1x128xf32>
    %1158 = vector.broadcast %1157 : vector<1x128xf32> to vector<16x128xf32>
    %1159 = arith.mulf %1158, %1154 : vector<16x128xf32>
    %1160 = arith.addf %1152, %1159 : vector<16x128xf32>
    %c15_716 = arith.constant 15 : index
    %c0_717 = arith.constant 0 : index
    %c0_718 = arith.constant 0 : index
    %1161 = vector.load %arg1[%c15_716, %c0_717, %c0_718] : memref<16x16x128xf32, #tpu.memory_space<vmem>>, vector<1x16x128xf32>
    %1162 = vector.shape_cast %1161 : vector<1x16x128xf32> to vector<16x128xf32>
    %1163 = vector.extract_strided_slice %1162 {offsets = [8, 0], sizes = [1, 128], strides = [1, 1]} : vector<16x128xf32> to vector<1x128xf32>
    %c15_719 = arith.constant 15 : index
    %c0_720 = arith.constant 0 : index
    %1164 = vector.load %arg2[%c15_719, %c0_720] : memref<16x128xf32, #tpu.memory_space<vmem>>, vector<1x128xf32>
    %1165 = arith.mulf %1163, %1164 : vector<1x128xf32>
    %1166 = vector.broadcast %1165 : vector<1x128xf32> to vector<16x128xf32>
    %1167 = arith.mulf %1166, %1162 : vector<16x128xf32>
    %1168 = arith.addf %1160, %1167 : vector<16x128xf32>
    %c128 = arith.constant 128 : index
    %c0_721 = arith.constant 0 : index
    %1169 = vector.load %arg6[%c128, %c0_721] : memref<256x128xf32, #tpu.memory_space<vmem>>, vector<16x128xf32>
    tpu.vector_store %arg6[%c128, %c0_721], %1168 {strides = array<i32>} : memref<256x128xf32, #tpu.memory_space<vmem>>, vector<16x128xf32>,
    %cst_722 = arith.constant 0.000000e+00 : f32
    %1170 = vector.broadcast %cst_722 : f32 to vector<16x128xf32>
    %c0_723 = arith.constant 0 : index
    %c0_724 = arith.constant 0 : index
    %c0_725 = arith.constant 0 : index
    %1171 = vector.load %arg1[%c0_723, %c0_724, %c0_725] : memref<16x16x128xf32, #tpu.memory_space<vmem>>, vector<1x16x128xf32>
    %1172 = vector.shape_cast %1171 : vector<1x16x128xf32> to vector<16x128xf32>
    %1173 = vector.extract_strided_slice %1172 {offsets = [9, 0], sizes = [1, 128], strides = [1, 1]} : vector<16x128xf32> to vector<1x128xf32>
    %c0_726 = arith.constant 0 : index
    %c0_727 = arith.constant 0 : index
    %1174 = vector.load %arg2[%c0_726, %c0_727] : memref<16x128xf32, #tpu.memory_space<vmem>>, vector<1x128xf32>
    %1175 = arith.mulf %1173, %1174 : vector<1x128xf32>
    %1176 = vector.broadcast %1175 : vector<1x128xf32> to vector<16x128xf32>
    %1177 = arith.mulf %1176, %1172 : vector<16x128xf32>
    %1178 = arith.addf %1170, %1177 : vector<16x128xf32>
    %c1_728 = arith.constant 1 : index
    %c0_729 = arith.constant 0 : index
    %c0_730 = arith.constant 0 : index
    %1179 = vector.load %arg1[%c1_728, %c0_729, %c0_730] : memref<16x16x128xf32, #tpu.memory_space<vmem>>, vector<1x16x128xf32>
    %1180 = vector.shape_cast %1179 : vector<1x16x128xf32> to vector<16x128xf32>
    %1181 = vector.extract_strided_slice %1180 {offsets = [9, 0], sizes = [1, 128], strides = [1, 1]} : vector<16x128xf32> to vector<1x128xf32>
    %c1_731 = arith.constant 1 : index
    %c0_732 = arith.constant 0 : index
    %1182 = vector.load %arg2[%c1_731, %c0_732] : memref<16x128xf32, #tpu.memory_space<vmem>>, vector<1x128xf32>
    %1183 = arith.mulf %1181, %1182 : vector<1x128xf32>
    %1184 = vector.broadcast %1183 : vector<1x128xf32> to vector<16x128xf32>
    %1185 = arith.mulf %1184, %1180 : vector<16x128xf32>
    %1186 = arith.addf %1178, %1185 : vector<16x128xf32>
    %c2_733 = arith.constant 2 : index
    %c0_734 = arith.constant 0 : index
    %c0_735 = arith.constant 0 : index
    %1187 = vector.load %arg1[%c2_733, %c0_734, %c0_735] : memref<16x16x128xf32, #tpu.memory_space<vmem>>, vector<1x16x128xf32>
    %1188 = vector.shape_cast %1187 : vector<1x16x128xf32> to vector<16x128xf32>
    %1189 = vector.extract_strided_slice %1188 {offsets = [9, 0], sizes = [1, 128], strides = [1, 1]} : vector<16x128xf32> to vector<1x128xf32>
    %c2_736 = arith.constant 2 : index
    %c0_737 = arith.constant 0 : index
    %1190 = vector.load %arg2[%c2_736, %c0_737] : memref<16x128xf32, #tpu.memory_space<vmem>>, vector<1x128xf32>
    %1191 = arith.mulf %1189, %1190 : vector<1x128xf32>
    %1192 = vector.broadcast %1191 : vector<1x128xf32> to vector<16x128xf32>
    %1193 = arith.mulf %1192, %1188 : vector<16x128xf32>
    %1194 = arith.addf %1186, %1193 : vector<16x128xf32>
    %c3_738 = arith.constant 3 : index
    %c0_739 = arith.constant 0 : index
    %c0_740 = arith.constant 0 : index
    %1195 = vector.load %arg1[%c3_738, %c0_739, %c0_740] : memref<16x16x128xf32, #tpu.memory_space<vmem>>, vector<1x16x128xf32>
    %1196 = vector.shape_cast %1195 : vector<1x16x128xf32> to vector<16x128xf32>
    %1197 = vector.extract_strided_slice %1196 {offsets = [9, 0], sizes = [1, 128], strides = [1, 1]} : vector<16x128xf32> to vector<1x128xf32>
    %c3_741 = arith.constant 3 : index
    %c0_742 = arith.constant 0 : index
    %1198 = vector.load %arg2[%c3_741, %c0_742] : memref<16x128xf32, #tpu.memory_space<vmem>>, vector<1x128xf32>
    %1199 = arith.mulf %1197, %1198 : vector<1x128xf32>
    %1200 = vector.broadcast %1199 : vector<1x128xf32> to vector<16x128xf32>
    %1201 = arith.mulf %1200, %1196 : vector<16x128xf32>
    %1202 = arith.addf %1194, %1201 : vector<16x128xf32>
    %c4_743 = arith.constant 4 : index
    %c0_744 = arith.constant 0 : index
    %c0_745 = arith.constant 0 : index
    %1203 = vector.load %arg1[%c4_743, %c0_744, %c0_745] : memref<16x16x128xf32, #tpu.memory_space<vmem>>, vector<1x16x128xf32>
    %1204 = vector.shape_cast %1203 : vector<1x16x128xf32> to vector<16x128xf32>
    %1205 = vector.extract_strided_slice %1204 {offsets = [9, 0], sizes = [1, 128], strides = [1, 1]} : vector<16x128xf32> to vector<1x128xf32>
    %c4_746 = arith.constant 4 : index
    %c0_747 = arith.constant 0 : index
    %1206 = vector.load %arg2[%c4_746, %c0_747] : memref<16x128xf32, #tpu.memory_space<vmem>>, vector<1x128xf32>
    %1207 = arith.mulf %1205, %1206 : vector<1x128xf32>
    %1208 = vector.broadcast %1207 : vector<1x128xf32> to vector<16x128xf32>
    %1209 = arith.mulf %1208, %1204 : vector<16x128xf32>
    %1210 = arith.addf %1202, %1209 : vector<16x128xf32>
    %c5_748 = arith.constant 5 : index
    %c0_749 = arith.constant 0 : index
    %c0_750 = arith.constant 0 : index
    %1211 = vector.load %arg1[%c5_748, %c0_749, %c0_750] : memref<16x16x128xf32, #tpu.memory_space<vmem>>, vector<1x16x128xf32>
    %1212 = vector.shape_cast %1211 : vector<1x16x128xf32> to vector<16x128xf32>
    %1213 = vector.extract_strided_slice %1212 {offsets = [9, 0], sizes = [1, 128], strides = [1, 1]} : vector<16x128xf32> to vector<1x128xf32>
    %c5_751 = arith.constant 5 : index
    %c0_752 = arith.constant 0 : index
    %1214 = vector.load %arg2[%c5_751, %c0_752] : memref<16x128xf32, #tpu.memory_space<vmem>>, vector<1x128xf32>
    %1215 = arith.mulf %1213, %1214 : vector<1x128xf32>
    %1216 = vector.broadcast %1215 : vector<1x128xf32> to vector<16x128xf32>
    %1217 = arith.mulf %1216, %1212 : vector<16x128xf32>
    %1218 = arith.addf %1210, %1217 : vector<16x128xf32>
    %c6_753 = arith.constant 6 : index
    %c0_754 = arith.constant 0 : index
    %c0_755 = arith.constant 0 : index
    %1219 = vector.load %arg1[%c6_753, %c0_754, %c0_755] : memref<16x16x128xf32, #tpu.memory_space<vmem>>, vector<1x16x128xf32>
    %1220 = vector.shape_cast %1219 : vector<1x16x128xf32> to vector<16x128xf32>
    %1221 = vector.extract_strided_slice %1220 {offsets = [9, 0], sizes = [1, 128], strides = [1, 1]} : vector<16x128xf32> to vector<1x128xf32>
    %c6_756 = arith.constant 6 : index
    %c0_757 = arith.constant 0 : index
    %1222 = vector.load %arg2[%c6_756, %c0_757] : memref<16x128xf32, #tpu.memory_space<vmem>>, vector<1x128xf32>
    %1223 = arith.mulf %1221, %1222 : vector<1x128xf32>
    %1224 = vector.broadcast %1223 : vector<1x128xf32> to vector<16x128xf32>
    %1225 = arith.mulf %1224, %1220 : vector<16x128xf32>
    %1226 = arith.addf %1218, %1225 : vector<16x128xf32>
    %c7_758 = arith.constant 7 : index
    %c0_759 = arith.constant 0 : index
    %c0_760 = arith.constant 0 : index
    %1227 = vector.load %arg1[%c7_758, %c0_759, %c0_760] : memref<16x16x128xf32, #tpu.memory_space<vmem>>, vector<1x16x128xf32>
    %1228 = vector.shape_cast %1227 : vector<1x16x128xf32> to vector<16x128xf32>
    %1229 = vector.extract_strided_slice %1228 {offsets = [9, 0], sizes = [1, 128], strides = [1, 1]} : vector<16x128xf32> to vector<1x128xf32>
    %c7_761 = arith.constant 7 : index
    %c0_762 = arith.constant 0 : index
    %1230 = vector.load %arg2[%c7_761, %c0_762] : memref<16x128xf32, #tpu.memory_space<vmem>>, vector<1x128xf32>
    %1231 = arith.mulf %1229, %1230 : vector<1x128xf32>
    %1232 = vector.broadcast %1231 : vector<1x128xf32> to vector<16x128xf32>
    %1233 = arith.mulf %1232, %1228 : vector<16x128xf32>
    %1234 = arith.addf %1226, %1233 : vector<16x128xf32>
    %c8_763 = arith.constant 8 : index
    %c0_764 = arith.constant 0 : index
    %c0_765 = arith.constant 0 : index
    %1235 = vector.load %arg1[%c8_763, %c0_764, %c0_765] : memref<16x16x128xf32, #tpu.memory_space<vmem>>, vector<1x16x128xf32>
    %1236 = vector.shape_cast %1235 : vector<1x16x128xf32> to vector<16x128xf32>
    %1237 = vector.extract_strided_slice %1236 {offsets = [9, 0], sizes = [1, 128], strides = [1, 1]} : vector<16x128xf32> to vector<1x128xf32>
    %c8_766 = arith.constant 8 : index
    %c0_767 = arith.constant 0 : index
    %1238 = vector.load %arg2[%c8_766, %c0_767] : memref<16x128xf32, #tpu.memory_space<vmem>>, vector<1x128xf32>
    %1239 = arith.mulf %1237, %1238 : vector<1x128xf32>
    %1240 = vector.broadcast %1239 : vector<1x128xf32> to vector<16x128xf32>
    %1241 = arith.mulf %1240, %1236 : vector<16x128xf32>
    %1242 = arith.addf %1234, %1241 : vector<16x128xf32>
    %c9_768 = arith.constant 9 : index
    %c0_769 = arith.constant 0 : index
    %c0_770 = arith.constant 0 : index
    %1243 = vector.load %arg1[%c9_768, %c0_769, %c0_770] : memref<16x16x128xf32, #tpu.memory_space<vmem>>, vector<1x16x128xf32>
    %1244 = vector.shape_cast %1243 : vector<1x16x128xf32> to vector<16x128xf32>
    %1245 = vector.extract_strided_slice %1244 {offsets = [9, 0], sizes = [1, 128], strides = [1, 1]} : vector<16x128xf32> to vector<1x128xf32>
    %c9_771 = arith.constant 9 : index
    %c0_772 = arith.constant 0 : index
    %1246 = vector.load %arg2[%c9_771, %c0_772] : memref<16x128xf32, #tpu.memory_space<vmem>>, vector<1x128xf32>
    %1247 = arith.mulf %1245, %1246 : vector<1x128xf32>
    %1248 = vector.broadcast %1247 : vector<1x128xf32> to vector<16x128xf32>
    %1249 = arith.mulf %1248, %1244 : vector<16x128xf32>
    %1250 = arith.addf %1242, %1249 : vector<16x128xf32>
    %c10_773 = arith.constant 10 : index
    %c0_774 = arith.constant 0 : index
    %c0_775 = arith.constant 0 : index
    %1251 = vector.load %arg1[%c10_773, %c0_774, %c0_775] : memref<16x16x128xf32, #tpu.memory_space<vmem>>, vector<1x16x128xf32>
    %1252 = vector.shape_cast %1251 : vector<1x16x128xf32> to vector<16x128xf32>
    %1253 = vector.extract_strided_slice %1252 {offsets = [9, 0], sizes = [1, 128], strides = [1, 1]} : vector<16x128xf32> to vector<1x128xf32>
    %c10_776 = arith.constant 10 : index
    %c0_777 = arith.constant 0 : index
    %1254 = vector.load %arg2[%c10_776, %c0_777] : memref<16x128xf32, #tpu.memory_space<vmem>>, vector<1x128xf32>
    %1255 = arith.mulf %1253, %1254 : vector<1x128xf32>
    %1256 = vector.broadcast %1255 : vector<1x128xf32> to vector<16x128xf32>
    %1257 = arith.mulf %1256, %1252 : vector<16x128xf32>
    %1258 = arith.addf %1250, %1257 : vector<16x128xf32>
    %c11_778 = arith.constant 11 : index
    %c0_779 = arith.constant 0 : index
    %c0_780 = arith.constant 0 : index
    %1259 = vector.load %arg1[%c11_778, %c0_779, %c0_780] : memref<16x16x128xf32, #tpu.memory_space<vmem>>, vector<1x16x128xf32>
    %1260 = vector.shape_cast %1259 : vector<1x16x128xf32> to vector<16x128xf32>
    %1261 = vector.extract_strided_slice %1260 {offsets = [9, 0], sizes = [1, 128], strides = [1, 1]} : vector<16x128xf32> to vector<1x128xf32>
    %c11_781 = arith.constant 11 : index
    %c0_782 = arith.constant 0 : index
    %1262 = vector.load %arg2[%c11_781, %c0_782] : memref<16x128xf32, #tpu.memory_space<vmem>>, vector<1x128xf32>
    %1263 = arith.mulf %1261, %1262 : vector<1x128xf32>
    %1264 = vector.broadcast %1263 : vector<1x128xf32> to vector<16x128xf32>
    %1265 = arith.mulf %1264, %1260 : vector<16x128xf32>
    %1266 = arith.addf %1258, %1265 : vector<16x128xf32>
    %c12_783 = arith.constant 12 : index
    %c0_784 = arith.constant 0 : index
    %c0_785 = arith.constant 0 : index
    %1267 = vector.load %arg1[%c12_783, %c0_784, %c0_785] : memref<16x16x128xf32, #tpu.memory_space<vmem>>, vector<1x16x128xf32>
    %1268 = vector.shape_cast %1267 : vector<1x16x128xf32> to vector<16x128xf32>
    %1269 = vector.extract_strided_slice %1268 {offsets = [9, 0], sizes = [1, 128], strides = [1, 1]} : vector<16x128xf32> to vector<1x128xf32>
    %c12_786 = arith.constant 12 : index
    %c0_787 = arith.constant 0 : index
    %1270 = vector.load %arg2[%c12_786, %c0_787] : memref<16x128xf32, #tpu.memory_space<vmem>>, vector<1x128xf32>
    %1271 = arith.mulf %1269, %1270 : vector<1x128xf32>
    %1272 = vector.broadcast %1271 : vector<1x128xf32> to vector<16x128xf32>
    %1273 = arith.mulf %1272, %1268 : vector<16x128xf32>
    %1274 = arith.addf %1266, %1273 : vector<16x128xf32>
    %c13_788 = arith.constant 13 : index
    %c0_789 = arith.constant 0 : index
    %c0_790 = arith.constant 0 : index
    %1275 = vector.load %arg1[%c13_788, %c0_789, %c0_790] : memref<16x16x128xf32, #tpu.memory_space<vmem>>, vector<1x16x128xf32>
    %1276 = vector.shape_cast %1275 : vector<1x16x128xf32> to vector<16x128xf32>
    %1277 = vector.extract_strided_slice %1276 {offsets = [9, 0], sizes = [1, 128], strides = [1, 1]} : vector<16x128xf32> to vector<1x128xf32>
    %c13_791 = arith.constant 13 : index
    %c0_792 = arith.constant 0 : index
    %1278 = vector.load %arg2[%c13_791, %c0_792] : memref<16x128xf32, #tpu.memory_space<vmem>>, vector<1x128xf32>
    %1279 = arith.mulf %1277, %1278 : vector<1x128xf32>
    %1280 = vector.broadcast %1279 : vector<1x128xf32> to vector<16x128xf32>
    %1281 = arith.mulf %1280, %1276 : vector<16x128xf32>
    %1282 = arith.addf %1274, %1281 : vector<16x128xf32>
    %c14_793 = arith.constant 14 : index
    %c0_794 = arith.constant 0 : index
    %c0_795 = arith.constant 0 : index
    %1283 = vector.load %arg1[%c14_793, %c0_794, %c0_795] : memref<16x16x128xf32, #tpu.memory_space<vmem>>, vector<1x16x128xf32>
    %1284 = vector.shape_cast %1283 : vector<1x16x128xf32> to vector<16x128xf32>
    %1285 = vector.extract_strided_slice %1284 {offsets = [9, 0], sizes = [1, 128], strides = [1, 1]} : vector<16x128xf32> to vector<1x128xf32>
    %c14_796 = arith.constant 14 : index
    %c0_797 = arith.constant 0 : index
    %1286 = vector.load %arg2[%c14_796, %c0_797] : memref<16x128xf32, #tpu.memory_space<vmem>>, vector<1x128xf32>
    %1287 = arith.mulf %1285, %1286 : vector<1x128xf32>
    %1288 = vector.broadcast %1287 : vector<1x128xf32> to vector<16x128xf32>
    %1289 = arith.mulf %1288, %1284 : vector<16x128xf32>
    %1290 = arith.addf %1282, %1289 : vector<16x128xf32>
    %c15_798 = arith.constant 15 : index
    %c0_799 = arith.constant 0 : index
    %c0_800 = arith.constant 0 : index
    %1291 = vector.load %arg1[%c15_798, %c0_799, %c0_800] : memref<16x16x128xf32, #tpu.memory_space<vmem>>, vector<1x16x128xf32>
    %1292 = vector.shape_cast %1291 : vector<1x16x128xf32> to vector<16x128xf32>
    %1293 = vector.extract_strided_slice %1292 {offsets = [9, 0], sizes = [1, 128], strides = [1, 1]} : vector<16x128xf32> to vector<1x128xf32>
    %c15_801 = arith.constant 15 : index
    %c0_802 = arith.constant 0 : index
    %1294 = vector.load %arg2[%c15_801, %c0_802] : memref<16x128xf32, #tpu.memory_space<vmem>>, vector<1x128xf32>
    %1295 = arith.mulf %1293, %1294 : vector<1x128xf32>
    %1296 = vector.broadcast %1295 : vector<1x128xf32> to vector<16x128xf32>
    %1297 = arith.mulf %1296, %1292 : vector<16x128xf32>
    %1298 = arith.addf %1290, %1297 : vector<16x128xf32>
    %c144 = arith.constant 144 : index
    %c0_803 = arith.constant 0 : index
    %1299 = vector.load %arg6[%c144, %c0_803] : memref<256x128xf32, #tpu.memory_space<vmem>>, vector<16x128xf32>
    tpu.vector_store %arg6[%c144, %c0_803], %1298 {strides = array<i32>} : memref<256x128xf32, #tpu.memory_space<vmem>>, vector<16x128xf32>,
    %cst_804 = arith.constant 0.000000e+00 : f32
    %1300 = vector.broadcast %cst_804 : f32 to vector<16x128xf32>
    %c0_805 = arith.constant 0 : index
    %c0_806 = arith.constant 0 : index
    %c0_807 = arith.constant 0 : index
    %1301 = vector.load %arg1[%c0_805, %c0_806, %c0_807] : memref<16x16x128xf32, #tpu.memory_space<vmem>>, vector<1x16x128xf32>
    %1302 = vector.shape_cast %1301 : vector<1x16x128xf32> to vector<16x128xf32>
    %1303 = vector.extract_strided_slice %1302 {offsets = [10, 0], sizes = [1, 128], strides = [1, 1]} : vector<16x128xf32> to vector<1x128xf32>
    %c0_808 = arith.constant 0 : index
    %c0_809 = arith.constant 0 : index
    %1304 = vector.load %arg2[%c0_808, %c0_809] : memref<16x128xf32, #tpu.memory_space<vmem>>, vector<1x128xf32>
    %1305 = arith.mulf %1303, %1304 : vector<1x128xf32>
    %1306 = vector.broadcast %1305 : vector<1x128xf32> to vector<16x128xf32>
    %1307 = arith.mulf %1306, %1302 : vector<16x128xf32>
    %1308 = arith.addf %1300, %1307 : vector<16x128xf32>
    %c1_810 = arith.constant 1 : index
    %c0_811 = arith.constant 0 : index
    %c0_812 = arith.constant 0 : index
    %1309 = vector.load %arg1[%c1_810, %c0_811, %c0_812] : memref<16x16x128xf32, #tpu.memory_space<vmem>>, vector<1x16x128xf32>
    %1310 = vector.shape_cast %1309 : vector<1x16x128xf32> to vector<16x128xf32>
    %1311 = vector.extract_strided_slice %1310 {offsets = [10, 0], sizes = [1, 128], strides = [1, 1]} : vector<16x128xf32> to vector<1x128xf32>
    %c1_813 = arith.constant 1 : index
    %c0_814 = arith.constant 0 : index
    %1312 = vector.load %arg2[%c1_813, %c0_814] : memref<16x128xf32, #tpu.memory_space<vmem>>, vector<1x128xf32>
    %1313 = arith.mulf %1311, %1312 : vector<1x128xf32>
    %1314 = vector.broadcast %1313 : vector<1x128xf32> to vector<16x128xf32>
    %1315 = arith.mulf %1314, %1310 : vector<16x128xf32>
    %1316 = arith.addf %1308, %1315 : vector<16x128xf32>
    %c2_815 = arith.constant 2 : index
    %c0_816 = arith.constant 0 : index
    %c0_817 = arith.constant 0 : index
    %1317 = vector.load %arg1[%c2_815, %c0_816, %c0_817] : memref<16x16x128xf32, #tpu.memory_space<vmem>>, vector<1x16x128xf32>
    %1318 = vector.shape_cast %1317 : vector<1x16x128xf32> to vector<16x128xf32>
    %1319 = vector.extract_strided_slice %1318 {offsets = [10, 0], sizes = [1, 128], strides = [1, 1]} : vector<16x128xf32> to vector<1x128xf32>
    %c2_818 = arith.constant 2 : index
    %c0_819 = arith.constant 0 : index
    %1320 = vector.load %arg2[%c2_818, %c0_819] : memref<16x128xf32, #tpu.memory_space<vmem>>, vector<1x128xf32>
    %1321 = arith.mulf %1319, %1320 : vector<1x128xf32>
    %1322 = vector.broadcast %1321 : vector<1x128xf32> to vector<16x128xf32>
    %1323 = arith.mulf %1322, %1318 : vector<16x128xf32>
    %1324 = arith.addf %1316, %1323 : vector<16x128xf32>
    %c3_820 = arith.constant 3 : index
    %c0_821 = arith.constant 0 : index
    %c0_822 = arith.constant 0 : index
    %1325 = vector.load %arg1[%c3_820, %c0_821, %c0_822] : memref<16x16x128xf32, #tpu.memory_space<vmem>>, vector<1x16x128xf32>
    %1326 = vector.shape_cast %1325 : vector<1x16x128xf32> to vector<16x128xf32>
    %1327 = vector.extract_strided_slice %1326 {offsets = [10, 0], sizes = [1, 128], strides = [1, 1]} : vector<16x128xf32> to vector<1x128xf32>
    %c3_823 = arith.constant 3 : index
    %c0_824 = arith.constant 0 : index
    %1328 = vector.load %arg2[%c3_823, %c0_824] : memref<16x128xf32, #tpu.memory_space<vmem>>, vector<1x128xf32>
    %1329 = arith.mulf %1327, %1328 : vector<1x128xf32>
    %1330 = vector.broadcast %1329 : vector<1x128xf32> to vector<16x128xf32>
    %1331 = arith.mulf %1330, %1326 : vector<16x128xf32>
    %1332 = arith.addf %1324, %1331 : vector<16x128xf32>
    %c4_825 = arith.constant 4 : index
    %c0_826 = arith.constant 0 : index
    %c0_827 = arith.constant 0 : index
    %1333 = vector.load %arg1[%c4_825, %c0_826, %c0_827] : memref<16x16x128xf32, #tpu.memory_space<vmem>>, vector<1x16x128xf32>
    %1334 = vector.shape_cast %1333 : vector<1x16x128xf32> to vector<16x128xf32>
    %1335 = vector.extract_strided_slice %1334 {offsets = [10, 0], sizes = [1, 128], strides = [1, 1]} : vector<16x128xf32> to vector<1x128xf32>
    %c4_828 = arith.constant 4 : index
    %c0_829 = arith.constant 0 : index
    %1336 = vector.load %arg2[%c4_828, %c0_829] : memref<16x128xf32, #tpu.memory_space<vmem>>, vector<1x128xf32>
    %1337 = arith.mulf %1335, %1336 : vector<1x128xf32>
    %1338 = vector.broadcast %1337 : vector<1x128xf32> to vector<16x128xf32>
    %1339 = arith.mulf %1338, %1334 : vector<16x128xf32>
    %1340 = arith.addf %1332, %1339 : vector<16x128xf32>
    %c5_830 = arith.constant 5 : index
    %c0_831 = arith.constant 0 : index
    %c0_832 = arith.constant 0 : index
    %1341 = vector.load %arg1[%c5_830, %c0_831, %c0_832] : memref<16x16x128xf32, #tpu.memory_space<vmem>>, vector<1x16x128xf32>
    %1342 = vector.shape_cast %1341 : vector<1x16x128xf32> to vector<16x128xf32>
    %1343 = vector.extract_strided_slice %1342 {offsets = [10, 0], sizes = [1, 128], strides = [1, 1]} : vector<16x128xf32> to vector<1x128xf32>
    %c5_833 = arith.constant 5 : index
    %c0_834 = arith.constant 0 : index
    %1344 = vector.load %arg2[%c5_833, %c0_834] : memref<16x128xf32, #tpu.memory_space<vmem>>, vector<1x128xf32>
    %1345 = arith.mulf %1343, %1344 : vector<1x128xf32>
    %1346 = vector.broadcast %1345 : vector<1x128xf32> to vector<16x128xf32>
    %1347 = arith.mulf %1346, %1342 : vector<16x128xf32>
    %1348 = arith.addf %1340, %1347 : vector<16x128xf32>
    %c6_835 = arith.constant 6 : index
    %c0_836 = arith.constant 0 : index
    %c0_837 = arith.constant 0 : index
    %1349 = vector.load %arg1[%c6_835, %c0_836, %c0_837] : memref<16x16x128xf32, #tpu.memory_space<vmem>>, vector<1x16x128xf32>
    %1350 = vector.shape_cast %1349 : vector<1x16x128xf32> to vector<16x128xf32>
    %1351 = vector.extract_strided_slice %1350 {offsets = [10, 0], sizes = [1, 128], strides = [1, 1]} : vector<16x128xf32> to vector<1x128xf32>
    %c6_838 = arith.constant 6 : index
    %c0_839 = arith.constant 0 : index
    %1352 = vector.load %arg2[%c6_838, %c0_839] : memref<16x128xf32, #tpu.memory_space<vmem>>, vector<1x128xf32>
    %1353 = arith.mulf %1351, %1352 : vector<1x128xf32>
    %1354 = vector.broadcast %1353 : vector<1x128xf32> to vector<16x128xf32>
    %1355 = arith.mulf %1354, %1350 : vector<16x128xf32>
    %1356 = arith.addf %1348, %1355 : vector<16x128xf32>
    %c7_840 = arith.constant 7 : index
    %c0_841 = arith.constant 0 : index
    %c0_842 = arith.constant 0 : index
    %1357 = vector.load %arg1[%c7_840, %c0_841, %c0_842] : memref<16x16x128xf32, #tpu.memory_space<vmem>>, vector<1x16x128xf32>
    %1358 = vector.shape_cast %1357 : vector<1x16x128xf32> to vector<16x128xf32>
    %1359 = vector.extract_strided_slice %1358 {offsets = [10, 0], sizes = [1, 128], strides = [1, 1]} : vector<16x128xf32> to vector<1x128xf32>
    %c7_843 = arith.constant 7 : index
    %c0_844 = arith.constant 0 : index
    %1360 = vector.load %arg2[%c7_843, %c0_844] : memref<16x128xf32, #tpu.memory_space<vmem>>, vector<1x128xf32>
    %1361 = arith.mulf %1359, %1360 : vector<1x128xf32>
    %1362 = vector.broadcast %1361 : vector<1x128xf32> to vector<16x128xf32>
    %1363 = arith.mulf %1362, %1358 : vector<16x128xf32>
    %1364 = arith.addf %1356, %1363 : vector<16x128xf32>
    %c8_845 = arith.constant 8 : index
    %c0_846 = arith.constant 0 : index
    %c0_847 = arith.constant 0 : index
    %1365 = vector.load %arg1[%c8_845, %c0_846, %c0_847] : memref<16x16x128xf32, #tpu.memory_space<vmem>>, vector<1x16x128xf32>
    %1366 = vector.shape_cast %1365 : vector<1x16x128xf32> to vector<16x128xf32>
    %1367 = vector.extract_strided_slice %1366 {offsets = [10, 0], sizes = [1, 128], strides = [1, 1]} : vector<16x128xf32> to vector<1x128xf32>
    %c8_848 = arith.constant 8 : index
    %c0_849 = arith.constant 0 : index
    %1368 = vector.load %arg2[%c8_848, %c0_849] : memref<16x128xf32, #tpu.memory_space<vmem>>, vector<1x128xf32>
    %1369 = arith.mulf %1367, %1368 : vector<1x128xf32>
    %1370 = vector.broadcast %1369 : vector<1x128xf32> to vector<16x128xf32>
    %1371 = arith.mulf %1370, %1366 : vector<16x128xf32>
    %1372 = arith.addf %1364, %1371 : vector<16x128xf32>
    %c9_850 = arith.constant 9 : index
    %c0_851 = arith.constant 0 : index
    %c0_852 = arith.constant 0 : index
    %1373 = vector.load %arg1[%c9_850, %c0_851, %c0_852] : memref<16x16x128xf32, #tpu.memory_space<vmem>>, vector<1x16x128xf32>
    %1374 = vector.shape_cast %1373 : vector<1x16x128xf32> to vector<16x128xf32>
    %1375 = vector.extract_strided_slice %1374 {offsets = [10, 0], sizes = [1, 128], strides = [1, 1]} : vector<16x128xf32> to vector<1x128xf32>
    %c9_853 = arith.constant 9 : index
    %c0_854 = arith.constant 0 : index
    %1376 = vector.load %arg2[%c9_853, %c0_854] : memref<16x128xf32, #tpu.memory_space<vmem>>, vector<1x128xf32>
    %1377 = arith.mulf %1375, %1376 : vector<1x128xf32>
    %1378 = vector.broadcast %1377 : vector<1x128xf32> to vector<16x128xf32>
    %1379 = arith.mulf %1378, %1374 : vector<16x128xf32>
    %1380 = arith.addf %1372, %1379 : vector<16x128xf32>
    %c10_855 = arith.constant 10 : index
    %c0_856 = arith.constant 0 : index
    %c0_857 = arith.constant 0 : index
    %1381 = vector.load %arg1[%c10_855, %c0_856, %c0_857] : memref<16x16x128xf32, #tpu.memory_space<vmem>>, vector<1x16x128xf32>
    %1382 = vector.shape_cast %1381 : vector<1x16x128xf32> to vector<16x128xf32>
    %1383 = vector.extract_strided_slice %1382 {offsets = [10, 0], sizes = [1, 128], strides = [1, 1]} : vector<16x128xf32> to vector<1x128xf32>
    %c10_858 = arith.constant 10 : index
    %c0_859 = arith.constant 0 : index
    %1384 = vector.load %arg2[%c10_858, %c0_859] : memref<16x128xf32, #tpu.memory_space<vmem>>, vector<1x128xf32>
    %1385 = arith.mulf %1383, %1384 : vector<1x128xf32>
    %1386 = vector.broadcast %1385 : vector<1x128xf32> to vector<16x128xf32>
    %1387 = arith.mulf %1386, %1382 : vector<16x128xf32>
    %1388 = arith.addf %1380, %1387 : vector<16x128xf32>
    %c11_860 = arith.constant 11 : index
    %c0_861 = arith.constant 0 : index
    %c0_862 = arith.constant 0 : index
    %1389 = vector.load %arg1[%c11_860, %c0_861, %c0_862] : memref<16x16x128xf32, #tpu.memory_space<vmem>>, vector<1x16x128xf32>
    %1390 = vector.shape_cast %1389 : vector<1x16x128xf32> to vector<16x128xf32>
    %1391 = vector.extract_strided_slice %1390 {offsets = [10, 0], sizes = [1, 128], strides = [1, 1]} : vector<16x128xf32> to vector<1x128xf32>
    %c11_863 = arith.constant 11 : index
    %c0_864 = arith.constant 0 : index
    %1392 = vector.load %arg2[%c11_863, %c0_864] : memref<16x128xf32, #tpu.memory_space<vmem>>, vector<1x128xf32>
    %1393 = arith.mulf %1391, %1392 : vector<1x128xf32>
    %1394 = vector.broadcast %1393 : vector<1x128xf32> to vector<16x128xf32>
    %1395 = arith.mulf %1394, %1390 : vector<16x128xf32>
    %1396 = arith.addf %1388, %1395 : vector<16x128xf32>
    %c12_865 = arith.constant 12 : index
    %c0_866 = arith.constant 0 : index
    %c0_867 = arith.constant 0 : index
    %1397 = vector.load %arg1[%c12_865, %c0_866, %c0_867] : memref<16x16x128xf32, #tpu.memory_space<vmem>>, vector<1x16x128xf32>
    %1398 = vector.shape_cast %1397 : vector<1x16x128xf32> to vector<16x128xf32>
    %1399 = vector.extract_strided_slice %1398 {offsets = [10, 0], sizes = [1, 128], strides = [1, 1]} : vector<16x128xf32> to vector<1x128xf32>
    %c12_868 = arith.constant 12 : index
    %c0_869 = arith.constant 0 : index
    %1400 = vector.load %arg2[%c12_868, %c0_869] : memref<16x128xf32, #tpu.memory_space<vmem>>, vector<1x128xf32>
    %1401 = arith.mulf %1399, %1400 : vector<1x128xf32>
    %1402 = vector.broadcast %1401 : vector<1x128xf32> to vector<16x128xf32>
    %1403 = arith.mulf %1402, %1398 : vector<16x128xf32>
    %1404 = arith.addf %1396, %1403 : vector<16x128xf32>
    %c13_870 = arith.constant 13 : index
    %c0_871 = arith.constant 0 : index
    %c0_872 = arith.constant 0 : index
    %1405 = vector.load %arg1[%c13_870, %c0_871, %c0_872] : memref<16x16x128xf32, #tpu.memory_space<vmem>>, vector<1x16x128xf32>
    %1406 = vector.shape_cast %1405 : vector<1x16x128xf32> to vector<16x128xf32>
    %1407 = vector.extract_strided_slice %1406 {offsets = [10, 0], sizes = [1, 128], strides = [1, 1]} : vector<16x128xf32> to vector<1x128xf32>
    %c13_873 = arith.constant 13 : index
    %c0_874 = arith.constant 0 : index
    %1408 = vector.load %arg2[%c13_873, %c0_874] : memref<16x128xf32, #tpu.memory_space<vmem>>, vector<1x128xf32>
    %1409 = arith.mulf %1407, %1408 : vector<1x128xf32>
    %1410 = vector.broadcast %1409 : vector<1x128xf32> to vector<16x128xf32>
    %1411 = arith.mulf %1410, %1406 : vector<16x128xf32>
    %1412 = arith.addf %1404, %1411 : vector<16x128xf32>
    %c14_875 = arith.constant 14 : index
    %c0_876 = arith.constant 0 : index
    %c0_877 = arith.constant 0 : index
    %1413 = vector.load %arg1[%c14_875, %c0_876, %c0_877] : memref<16x16x128xf32, #tpu.memory_space<vmem>>, vector<1x16x128xf32>
    %1414 = vector.shape_cast %1413 : vector<1x16x128xf32> to vector<16x128xf32>
    %1415 = vector.extract_strided_slice %1414 {offsets = [10, 0], sizes = [1, 128], strides = [1, 1]} : vector<16x128xf32> to vector<1x128xf32>
    %c14_878 = arith.constant 14 : index
    %c0_879 = arith.constant 0 : index
    %1416 = vector.load %arg2[%c14_878, %c0_879] : memref<16x128xf32, #tpu.memory_space<vmem>>, vector<1x128xf32>
    %1417 = arith.mulf %1415, %1416 : vector<1x128xf32>
    %1418 = vector.broadcast %1417 : vector<1x128xf32> to vector<16x128xf32>
    %1419 = arith.mulf %1418, %1414 : vector<16x128xf32>
    %1420 = arith.addf %1412, %1419 : vector<16x128xf32>
    %c15_880 = arith.constant 15 : index
    %c0_881 = arith.constant 0 : index
    %c0_882 = arith.constant 0 : index
    %1421 = vector.load %arg1[%c15_880, %c0_881, %c0_882] : memref<16x16x128xf32, #tpu.memory_space<vmem>>, vector<1x16x128xf32>
    %1422 = vector.shape_cast %1421 : vector<1x16x128xf32> to vector<16x128xf32>
    %1423 = vector.extract_strided_slice %1422 {offsets = [10, 0], sizes = [1, 128], strides = [1, 1]} : vector<16x128xf32> to vector<1x128xf32>
    %c15_883 = arith.constant 15 : index
    %c0_884 = arith.constant 0 : index
    %1424 = vector.load %arg2[%c15_883, %c0_884] : memref<16x128xf32, #tpu.memory_space<vmem>>, vector<1x128xf32>
    %1425 = arith.mulf %1423, %1424 : vector<1x128xf32>
    %1426 = vector.broadcast %1425 : vector<1x128xf32> to vector<16x128xf32>
    %1427 = arith.mulf %1426, %1422 : vector<16x128xf32>
    %1428 = arith.addf %1420, %1427 : vector<16x128xf32>
    %c160 = arith.constant 160 : index
    %c0_885 = arith.constant 0 : index
    %1429 = vector.load %arg6[%c160, %c0_885] : memref<256x128xf32, #tpu.memory_space<vmem>>, vector<16x128xf32>
    tpu.vector_store %arg6[%c160, %c0_885], %1428 {strides = array<i32>} : memref<256x128xf32, #tpu.memory_space<vmem>>, vector<16x128xf32>,
    %cst_886 = arith.constant 0.000000e+00 : f32
    %1430 = vector.broadcast %cst_886 : f32 to vector<16x128xf32>
    %c0_887 = arith.constant 0 : index
    %c0_888 = arith.constant 0 : index
    %c0_889 = arith.constant 0 : index
    %1431 = vector.load %arg1[%c0_887, %c0_888, %c0_889] : memref<16x16x128xf32, #tpu.memory_space<vmem>>, vector<1x16x128xf32>
    %1432 = vector.shape_cast %1431 : vector<1x16x128xf32> to vector<16x128xf32>
    %1433 = vector.extract_strided_slice %1432 {offsets = [11, 0], sizes = [1, 128], strides = [1, 1]} : vector<16x128xf32> to vector<1x128xf32>
    %c0_890 = arith.constant 0 : index
    %c0_891 = arith.constant 0 : index
    %1434 = vector.load %arg2[%c0_890, %c0_891] : memref<16x128xf32, #tpu.memory_space<vmem>>, vector<1x128xf32>
    %1435 = arith.mulf %1433, %1434 : vector<1x128xf32>
    %1436 = vector.broadcast %1435 : vector<1x128xf32> to vector<16x128xf32>
    %1437 = arith.mulf %1436, %1432 : vector<16x128xf32>
    %1438 = arith.addf %1430, %1437 : vector<16x128xf32>
    %c1_892 = arith.constant 1 : index
    %c0_893 = arith.constant 0 : index
    %c0_894 = arith.constant 0 : index
    %1439 = vector.load %arg1[%c1_892, %c0_893, %c0_894] : memref<16x16x128xf32, #tpu.memory_space<vmem>>, vector<1x16x128xf32>
    %1440 = vector.shape_cast %1439 : vector<1x16x128xf32> to vector<16x128xf32>
    %1441 = vector.extract_strided_slice %1440 {offsets = [11, 0], sizes = [1, 128], strides = [1, 1]} : vector<16x128xf32> to vector<1x128xf32>
    %c1_895 = arith.constant 1 : index
    %c0_896 = arith.constant 0 : index
    %1442 = vector.load %arg2[%c1_895, %c0_896] : memref<16x128xf32, #tpu.memory_space<vmem>>, vector<1x128xf32>
    %1443 = arith.mulf %1441, %1442 : vector<1x128xf32>
    %1444 = vector.broadcast %1443 : vector<1x128xf32> to vector<16x128xf32>
    %1445 = arith.mulf %1444, %1440 : vector<16x128xf32>
    %1446 = arith.addf %1438, %1445 : vector<16x128xf32>
    %c2_897 = arith.constant 2 : index
    %c0_898 = arith.constant 0 : index
    %c0_899 = arith.constant 0 : index
    %1447 = vector.load %arg1[%c2_897, %c0_898, %c0_899] : memref<16x16x128xf32, #tpu.memory_space<vmem>>, vector<1x16x128xf32>
    %1448 = vector.shape_cast %1447 : vector<1x16x128xf32> to vector<16x128xf32>
    %1449 = vector.extract_strided_slice %1448 {offsets = [11, 0], sizes = [1, 128], strides = [1, 1]} : vector<16x128xf32> to vector<1x128xf32>
    %c2_900 = arith.constant 2 : index
    %c0_901 = arith.constant 0 : index
    %1450 = vector.load %arg2[%c2_900, %c0_901] : memref<16x128xf32, #tpu.memory_space<vmem>>, vector<1x128xf32>
    %1451 = arith.mulf %1449, %1450 : vector<1x128xf32>
    %1452 = vector.broadcast %1451 : vector<1x128xf32> to vector<16x128xf32>
    %1453 = arith.mulf %1452, %1448 : vector<16x128xf32>
    %1454 = arith.addf %1446, %1453 : vector<16x128xf32>
    %c3_902 = arith.constant 3 : index
    %c0_903 = arith.constant 0 : index
    %c0_904 = arith.constant 0 : index
    %1455 = vector.load %arg1[%c3_902, %c0_903, %c0_904] : memref<16x16x128xf32, #tpu.memory_space<vmem>>, vector<1x16x128xf32>
    %1456 = vector.shape_cast %1455 : vector<1x16x128xf32> to vector<16x128xf32>
    %1457 = vector.extract_strided_slice %1456 {offsets = [11, 0], sizes = [1, 128], strides = [1, 1]} : vector<16x128xf32> to vector<1x128xf32>
    %c3_905 = arith.constant 3 : index
    %c0_906 = arith.constant 0 : index
    %1458 = vector.load %arg2[%c3_905, %c0_906] : memref<16x128xf32, #tpu.memory_space<vmem>>, vector<1x128xf32>
    %1459 = arith.mulf %1457, %1458 : vector<1x128xf32>
    %1460 = vector.broadcast %1459 : vector<1x128xf32> to vector<16x128xf32>
    %1461 = arith.mulf %1460, %1456 : vector<16x128xf32>
    %1462 = arith.addf %1454, %1461 : vector<16x128xf32>
    %c4_907 = arith.constant 4 : index
    %c0_908 = arith.constant 0 : index
    %c0_909 = arith.constant 0 : index
    %1463 = vector.load %arg1[%c4_907, %c0_908, %c0_909] : memref<16x16x128xf32, #tpu.memory_space<vmem>>, vector<1x16x128xf32>
    %1464 = vector.shape_cast %1463 : vector<1x16x128xf32> to vector<16x128xf32>
    %1465 = vector.extract_strided_slice %1464 {offsets = [11, 0], sizes = [1, 128], strides = [1, 1]} : vector<16x128xf32> to vector<1x128xf32>
    %c4_910 = arith.constant 4 : index
    %c0_911 = arith.constant 0 : index
    %1466 = vector.load %arg2[%c4_910, %c0_911] : memref<16x128xf32, #tpu.memory_space<vmem>>, vector<1x128xf32>
    %1467 = arith.mulf %1465, %1466 : vector<1x128xf32>
    %1468 = vector.broadcast %1467 : vector<1x128xf32> to vector<16x128xf32>
    %1469 = arith.mulf %1468, %1464 : vector<16x128xf32>
    %1470 = arith.addf %1462, %1469 : vector<16x128xf32>
    %c5_912 = arith.constant 5 : index
    %c0_913 = arith.constant 0 : index
    %c0_914 = arith.constant 0 : index
    %1471 = vector.load %arg1[%c5_912, %c0_913, %c0_914] : memref<16x16x128xf32, #tpu.memory_space<vmem>>, vector<1x16x128xf32>
    %1472 = vector.shape_cast %1471 : vector<1x16x128xf32> to vector<16x128xf32>
    %1473 = vector.extract_strided_slice %1472 {offsets = [11, 0], sizes = [1, 128], strides = [1, 1]} : vector<16x128xf32> to vector<1x128xf32>
    %c5_915 = arith.constant 5 : index
    %c0_916 = arith.constant 0 : index
    %1474 = vector.load %arg2[%c5_915, %c0_916] : memref<16x128xf32, #tpu.memory_space<vmem>>, vector<1x128xf32>
    %1475 = arith.mulf %1473, %1474 : vector<1x128xf32>
    %1476 = vector.broadcast %1475 : vector<1x128xf32> to vector<16x128xf32>
    %1477 = arith.mulf %1476, %1472 : vector<16x128xf32>
    %1478 = arith.addf %1470, %1477 : vector<16x128xf32>
    %c6_917 = arith.constant 6 : index
    %c0_918 = arith.constant 0 : index
    %c0_919 = arith.constant 0 : index
    %1479 = vector.load %arg1[%c6_917, %c0_918, %c0_919] : memref<16x16x128xf32, #tpu.memory_space<vmem>>, vector<1x16x128xf32>
    %1480 = vector.shape_cast %1479 : vector<1x16x128xf32> to vector<16x128xf32>
    %1481 = vector.extract_strided_slice %1480 {offsets = [11, 0], sizes = [1, 128], strides = [1, 1]} : vector<16x128xf32> to vector<1x128xf32>
    %c6_920 = arith.constant 6 : index
    %c0_921 = arith.constant 0 : index
    %1482 = vector.load %arg2[%c6_920, %c0_921] : memref<16x128xf32, #tpu.memory_space<vmem>>, vector<1x128xf32>
    %1483 = arith.mulf %1481, %1482 : vector<1x128xf32>
    %1484 = vector.broadcast %1483 : vector<1x128xf32> to vector<16x128xf32>
    %1485 = arith.mulf %1484, %1480 : vector<16x128xf32>
    %1486 = arith.addf %1478, %1485 : vector<16x128xf32>
    %c7_922 = arith.constant 7 : index
    %c0_923 = arith.constant 0 : index
    %c0_924 = arith.constant 0 : index
    %1487 = vector.load %arg1[%c7_922, %c0_923, %c0_924] : memref<16x16x128xf32, #tpu.memory_space<vmem>>, vector<1x16x128xf32>
    %1488 = vector.shape_cast %1487 : vector<1x16x128xf32> to vector<16x128xf32>
    %1489 = vector.extract_strided_slice %1488 {offsets = [11, 0], sizes = [1, 128], strides = [1, 1]} : vector<16x128xf32> to vector<1x128xf32>
    %c7_925 = arith.constant 7 : index
    %c0_926 = arith.constant 0 : index
    %1490 = vector.load %arg2[%c7_925, %c0_926] : memref<16x128xf32, #tpu.memory_space<vmem>>, vector<1x128xf32>
    %1491 = arith.mulf %1489, %1490 : vector<1x128xf32>
    %1492 = vector.broadcast %1491 : vector<1x128xf32> to vector<16x128xf32>
    %1493 = arith.mulf %1492, %1488 : vector<16x128xf32>
    %1494 = arith.addf %1486, %1493 : vector<16x128xf32>
    %c8_927 = arith.constant 8 : index
    %c0_928 = arith.constant 0 : index
    %c0_929 = arith.constant 0 : index
    %1495 = vector.load %arg1[%c8_927, %c0_928, %c0_929] : memref<16x16x128xf32, #tpu.memory_space<vmem>>, vector<1x16x128xf32>
    %1496 = vector.shape_cast %1495 : vector<1x16x128xf32> to vector<16x128xf32>
    %1497 = vector.extract_strided_slice %1496 {offsets = [11, 0], sizes = [1, 128], strides = [1, 1]} : vector<16x128xf32> to vector<1x128xf32>
    %c8_930 = arith.constant 8 : index
    %c0_931 = arith.constant 0 : index
    %1498 = vector.load %arg2[%c8_930, %c0_931] : memref<16x128xf32, #tpu.memory_space<vmem>>, vector<1x128xf32>
    %1499 = arith.mulf %1497, %1498 : vector<1x128xf32>
    %1500 = vector.broadcast %1499 : vector<1x128xf32> to vector<16x128xf32>
    %1501 = arith.mulf %1500, %1496 : vector<16x128xf32>
    %1502 = arith.addf %1494, %1501 : vector<16x128xf32>
    %c9_932 = arith.constant 9 : index
    %c0_933 = arith.constant 0 : index
    %c0_934 = arith.constant 0 : index
    %1503 = vector.load %arg1[%c9_932, %c0_933, %c0_934] : memref<16x16x128xf32, #tpu.memory_space<vmem>>, vector<1x16x128xf32>
    %1504 = vector.shape_cast %1503 : vector<1x16x128xf32> to vector<16x128xf32>
    %1505 = vector.extract_strided_slice %1504 {offsets = [11, 0], sizes = [1, 128], strides = [1, 1]} : vector<16x128xf32> to vector<1x128xf32>
    %c9_935 = arith.constant 9 : index
    %c0_936 = arith.constant 0 : index
    %1506 = vector.load %arg2[%c9_935, %c0_936] : memref<16x128xf32, #tpu.memory_space<vmem>>, vector<1x128xf32>
    %1507 = arith.mulf %1505, %1506 : vector<1x128xf32>
    %1508 = vector.broadcast %1507 : vector<1x128xf32> to vector<16x128xf32>
    %1509 = arith.mulf %1508, %1504 : vector<16x128xf32>
    %1510 = arith.addf %1502, %1509 : vector<16x128xf32>
    %c10_937 = arith.constant 10 : index
    %c0_938 = arith.constant 0 : index
    %c0_939 = arith.constant 0 : index
    %1511 = vector.load %arg1[%c10_937, %c0_938, %c0_939] : memref<16x16x128xf32, #tpu.memory_space<vmem>>, vector<1x16x128xf32>
    %1512 = vector.shape_cast %1511 : vector<1x16x128xf32> to vector<16x128xf32>
    %1513 = vector.extract_strided_slice %1512 {offsets = [11, 0], sizes = [1, 128], strides = [1, 1]} : vector<16x128xf32> to vector<1x128xf32>
    %c10_940 = arith.constant 10 : index
    %c0_941 = arith.constant 0 : index
    %1514 = vector.load %arg2[%c10_940, %c0_941] : memref<16x128xf32, #tpu.memory_space<vmem>>, vector<1x128xf32>
    %1515 = arith.mulf %1513, %1514 : vector<1x128xf32>
    %1516 = vector.broadcast %1515 : vector<1x128xf32> to vector<16x128xf32>
    %1517 = arith.mulf %1516, %1512 : vector<16x128xf32>
    %1518 = arith.addf %1510, %1517 : vector<16x128xf32>
    %c11_942 = arith.constant 11 : index
    %c0_943 = arith.constant 0 : index
    %c0_944 = arith.constant 0 : index
    %1519 = vector.load %arg1[%c11_942, %c0_943, %c0_944] : memref<16x16x128xf32, #tpu.memory_space<vmem>>, vector<1x16x128xf32>
    %1520 = vector.shape_cast %1519 : vector<1x16x128xf32> to vector<16x128xf32>
    %1521 = vector.extract_strided_slice %1520 {offsets = [11, 0], sizes = [1, 128], strides = [1, 1]} : vector<16x128xf32> to vector<1x128xf32>
    %c11_945 = arith.constant 11 : index
    %c0_946 = arith.constant 0 : index
    %1522 = vector.load %arg2[%c11_945, %c0_946] : memref<16x128xf32, #tpu.memory_space<vmem>>, vector<1x128xf32>
    %1523 = arith.mulf %1521, %1522 : vector<1x128xf32>
    %1524 = vector.broadcast %1523 : vector<1x128xf32> to vector<16x128xf32>
    %1525 = arith.mulf %1524, %1520 : vector<16x128xf32>
    %1526 = arith.addf %1518, %1525 : vector<16x128xf32>
    %c12_947 = arith.constant 12 : index
    %c0_948 = arith.constant 0 : index
    %c0_949 = arith.constant 0 : index
    %1527 = vector.load %arg1[%c12_947, %c0_948, %c0_949] : memref<16x16x128xf32, #tpu.memory_space<vmem>>, vector<1x16x128xf32>
    %1528 = vector.shape_cast %1527 : vector<1x16x128xf32> to vector<16x128xf32>
    %1529 = vector.extract_strided_slice %1528 {offsets = [11, 0], sizes = [1, 128], strides = [1, 1]} : vector<16x128xf32> to vector<1x128xf32>
    %c12_950 = arith.constant 12 : index
    %c0_951 = arith.constant 0 : index
    %1530 = vector.load %arg2[%c12_950, %c0_951] : memref<16x128xf32, #tpu.memory_space<vmem>>, vector<1x128xf32>
    %1531 = arith.mulf %1529, %1530 : vector<1x128xf32>
    %1532 = vector.broadcast %1531 : vector<1x128xf32> to vector<16x128xf32>
    %1533 = arith.mulf %1532, %1528 : vector<16x128xf32>
    %1534 = arith.addf %1526, %1533 : vector<16x128xf32>
    %c13_952 = arith.constant 13 : index
    %c0_953 = arith.constant 0 : index
    %c0_954 = arith.constant 0 : index
    %1535 = vector.load %arg1[%c13_952, %c0_953, %c0_954] : memref<16x16x128xf32, #tpu.memory_space<vmem>>, vector<1x16x128xf32>
    %1536 = vector.shape_cast %1535 : vector<1x16x128xf32> to vector<16x128xf32>
    %1537 = vector.extract_strided_slice %1536 {offsets = [11, 0], sizes = [1, 128], strides = [1, 1]} : vector<16x128xf32> to vector<1x128xf32>
    %c13_955 = arith.constant 13 : index
    %c0_956 = arith.constant 0 : index
    %1538 = vector.load %arg2[%c13_955, %c0_956] : memref<16x128xf32, #tpu.memory_space<vmem>>, vector<1x128xf32>
    %1539 = arith.mulf %1537, %1538 : vector<1x128xf32>
    %1540 = vector.broadcast %1539 : vector<1x128xf32> to vector<16x128xf32>
    %1541 = arith.mulf %1540, %1536 : vector<16x128xf32>
    %1542 = arith.addf %1534, %1541 : vector<16x128xf32>
    %c14_957 = arith.constant 14 : index
    %c0_958 = arith.constant 0 : index
    %c0_959 = arith.constant 0 : index
    %1543 = vector.load %arg1[%c14_957, %c0_958, %c0_959] : memref<16x16x128xf32, #tpu.memory_space<vmem>>, vector<1x16x128xf32>
    %1544 = vector.shape_cast %1543 : vector<1x16x128xf32> to vector<16x128xf32>
    %1545 = vector.extract_strided_slice %1544 {offsets = [11, 0], sizes = [1, 128], strides = [1, 1]} : vector<16x128xf32> to vector<1x128xf32>
    %c14_960 = arith.constant 14 : index
    %c0_961 = arith.constant 0 : index
    %1546 = vector.load %arg2[%c14_960, %c0_961] : memref<16x128xf32, #tpu.memory_space<vmem>>, vector<1x128xf32>
    %1547 = arith.mulf %1545, %1546 : vector<1x128xf32>
    %1548 = vector.broadcast %1547 : vector<1x128xf32> to vector<16x128xf32>
    %1549 = arith.mulf %1548, %1544 : vector<16x128xf32>
    %1550 = arith.addf %1542, %1549 : vector<16x128xf32>
    %c15_962 = arith.constant 15 : index
    %c0_963 = arith.constant 0 : index
    %c0_964 = arith.constant 0 : index
    %1551 = vector.load %arg1[%c15_962, %c0_963, %c0_964] : memref<16x16x128xf32, #tpu.memory_space<vmem>>, vector<1x16x128xf32>
    %1552 = vector.shape_cast %1551 : vector<1x16x128xf32> to vector<16x128xf32>
    %1553 = vector.extract_strided_slice %1552 {offsets = [11, 0], sizes = [1, 128], strides = [1, 1]} : vector<16x128xf32> to vector<1x128xf32>
    %c15_965 = arith.constant 15 : index
    %c0_966 = arith.constant 0 : index
    %1554 = vector.load %arg2[%c15_965, %c0_966] : memref<16x128xf32, #tpu.memory_space<vmem>>, vector<1x128xf32>
    %1555 = arith.mulf %1553, %1554 : vector<1x128xf32>
    %1556 = vector.broadcast %1555 : vector<1x128xf32> to vector<16x128xf32>
    %1557 = arith.mulf %1556, %1552 : vector<16x128xf32>
    %1558 = arith.addf %1550, %1557 : vector<16x128xf32>
    %c176 = arith.constant 176 : index
    %c0_967 = arith.constant 0 : index
    %1559 = vector.load %arg6[%c176, %c0_967] : memref<256x128xf32, #tpu.memory_space<vmem>>, vector<16x128xf32>
    tpu.vector_store %arg6[%c176, %c0_967], %1558 {strides = array<i32>} : memref<256x128xf32, #tpu.memory_space<vmem>>, vector<16x128xf32>,
    %cst_968 = arith.constant 0.000000e+00 : f32
    %1560 = vector.broadcast %cst_968 : f32 to vector<16x128xf32>
    %c0_969 = arith.constant 0 : index
    %c0_970 = arith.constant 0 : index
    %c0_971 = arith.constant 0 : index
    %1561 = vector.load %arg1[%c0_969, %c0_970, %c0_971] : memref<16x16x128xf32, #tpu.memory_space<vmem>>, vector<1x16x128xf32>
    %1562 = vector.shape_cast %1561 : vector<1x16x128xf32> to vector<16x128xf32>
    %1563 = vector.extract_strided_slice %1562 {offsets = [12, 0], sizes = [1, 128], strides = [1, 1]} : vector<16x128xf32> to vector<1x128xf32>
    %c0_972 = arith.constant 0 : index
    %c0_973 = arith.constant 0 : index
    %1564 = vector.load %arg2[%c0_972, %c0_973] : memref<16x128xf32, #tpu.memory_space<vmem>>, vector<1x128xf32>
    %1565 = arith.mulf %1563, %1564 : vector<1x128xf32>
    %1566 = vector.broadcast %1565 : vector<1x128xf32> to vector<16x128xf32>
    %1567 = arith.mulf %1566, %1562 : vector<16x128xf32>
    %1568 = arith.addf %1560, %1567 : vector<16x128xf32>
    %c1_974 = arith.constant 1 : index
    %c0_975 = arith.constant 0 : index
    %c0_976 = arith.constant 0 : index
    %1569 = vector.load %arg1[%c1_974, %c0_975, %c0_976] : memref<16x16x128xf32, #tpu.memory_space<vmem>>, vector<1x16x128xf32>
    %1570 = vector.shape_cast %1569 : vector<1x16x128xf32> to vector<16x128xf32>
    %1571 = vector.extract_strided_slice %1570 {offsets = [12, 0], sizes = [1, 128], strides = [1, 1]} : vector<16x128xf32> to vector<1x128xf32>
    %c1_977 = arith.constant 1 : index
    %c0_978 = arith.constant 0 : index
    %1572 = vector.load %arg2[%c1_977, %c0_978] : memref<16x128xf32, #tpu.memory_space<vmem>>, vector<1x128xf32>
    %1573 = arith.mulf %1571, %1572 : vector<1x128xf32>
    %1574 = vector.broadcast %1573 : vector<1x128xf32> to vector<16x128xf32>
    %1575 = arith.mulf %1574, %1570 : vector<16x128xf32>
    %1576 = arith.addf %1568, %1575 : vector<16x128xf32>
    %c2_979 = arith.constant 2 : index
    %c0_980 = arith.constant 0 : index
    %c0_981 = arith.constant 0 : index
    %1577 = vector.load %arg1[%c2_979, %c0_980, %c0_981] : memref<16x16x128xf32, #tpu.memory_space<vmem>>, vector<1x16x128xf32>
    %1578 = vector.shape_cast %1577 : vector<1x16x128xf32> to vector<16x128xf32>
    %1579 = vector.extract_strided_slice %1578 {offsets = [12, 0], sizes = [1, 128], strides = [1, 1]} : vector<16x128xf32> to vector<1x128xf32>
    %c2_982 = arith.constant 2 : index
    %c0_983 = arith.constant 0 : index
    %1580 = vector.load %arg2[%c2_982, %c0_983] : memref<16x128xf32, #tpu.memory_space<vmem>>, vector<1x128xf32>
    %1581 = arith.mulf %1579, %1580 : vector<1x128xf32>
    %1582 = vector.broadcast %1581 : vector<1x128xf32> to vector<16x128xf32>
    %1583 = arith.mulf %1582, %1578 : vector<16x128xf32>
    %1584 = arith.addf %1576, %1583 : vector<16x128xf32>
    %c3_984 = arith.constant 3 : index
    %c0_985 = arith.constant 0 : index
    %c0_986 = arith.constant 0 : index
    %1585 = vector.load %arg1[%c3_984, %c0_985, %c0_986] : memref<16x16x128xf32, #tpu.memory_space<vmem>>, vector<1x16x128xf32>
    %1586 = vector.shape_cast %1585 : vector<1x16x128xf32> to vector<16x128xf32>
    %1587 = vector.extract_strided_slice %1586 {offsets = [12, 0], sizes = [1, 128], strides = [1, 1]} : vector<16x128xf32> to vector<1x128xf32>
    %c3_987 = arith.constant 3 : index
    %c0_988 = arith.constant 0 : index
    %1588 = vector.load %arg2[%c3_987, %c0_988] : memref<16x128xf32, #tpu.memory_space<vmem>>, vector<1x128xf32>
    %1589 = arith.mulf %1587, %1588 : vector<1x128xf32>
    %1590 = vector.broadcast %1589 : vector<1x128xf32> to vector<16x128xf32>
    %1591 = arith.mulf %1590, %1586 : vector<16x128xf32>
    %1592 = arith.addf %1584, %1591 : vector<16x128xf32>
    %c4_989 = arith.constant 4 : index
    %c0_990 = arith.constant 0 : index
    %c0_991 = arith.constant 0 : index
    %1593 = vector.load %arg1[%c4_989, %c0_990, %c0_991] : memref<16x16x128xf32, #tpu.memory_space<vmem>>, vector<1x16x128xf32>
    %1594 = vector.shape_cast %1593 : vector<1x16x128xf32> to vector<16x128xf32>
    %1595 = vector.extract_strided_slice %1594 {offsets = [12, 0], sizes = [1, 128], strides = [1, 1]} : vector<16x128xf32> to vector<1x128xf32>
    %c4_992 = arith.constant 4 : index
    %c0_993 = arith.constant 0 : index
    %1596 = vector.load %arg2[%c4_992, %c0_993] : memref<16x128xf32, #tpu.memory_space<vmem>>, vector<1x128xf32>
    %1597 = arith.mulf %1595, %1596 : vector<1x128xf32>
    %1598 = vector.broadcast %1597 : vector<1x128xf32> to vector<16x128xf32>
    %1599 = arith.mulf %1598, %1594 : vector<16x128xf32>
    %1600 = arith.addf %1592, %1599 : vector<16x128xf32>
    %c5_994 = arith.constant 5 : index
    %c0_995 = arith.constant 0 : index
    %c0_996 = arith.constant 0 : index
    %1601 = vector.load %arg1[%c5_994, %c0_995, %c0_996] : memref<16x16x128xf32, #tpu.memory_space<vmem>>, vector<1x16x128xf32>
    %1602 = vector.shape_cast %1601 : vector<1x16x128xf32> to vector<16x128xf32>
    %1603 = vector.extract_strided_slice %1602 {offsets = [12, 0], sizes = [1, 128], strides = [1, 1]} : vector<16x128xf32> to vector<1x128xf32>
    %c5_997 = arith.constant 5 : index
    %c0_998 = arith.constant 0 : index
    %1604 = vector.load %arg2[%c5_997, %c0_998] : memref<16x128xf32, #tpu.memory_space<vmem>>, vector<1x128xf32>
    %1605 = arith.mulf %1603, %1604 : vector<1x128xf32>
    %1606 = vector.broadcast %1605 : vector<1x128xf32> to vector<16x128xf32>
    %1607 = arith.mulf %1606, %1602 : vector<16x128xf32>
    %1608 = arith.addf %1600, %1607 : vector<16x128xf32>
    %c6_999 = arith.constant 6 : index
    %c0_1000 = arith.constant 0 : index
    %c0_1001 = arith.constant 0 : index
    %1609 = vector.load %arg1[%c6_999, %c0_1000, %c0_1001] : memref<16x16x128xf32, #tpu.memory_space<vmem>>, vector<1x16x128xf32>
    %1610 = vector.shape_cast %1609 : vector<1x16x128xf32> to vector<16x128xf32>
    %1611 = vector.extract_strided_slice %1610 {offsets = [12, 0], sizes = [1, 128], strides = [1, 1]} : vector<16x128xf32> to vector<1x128xf32>
    %c6_1002 = arith.constant 6 : index
    %c0_1003 = arith.constant 0 : index
    %1612 = vector.load %arg2[%c6_1002, %c0_1003] : memref<16x128xf32, #tpu.memory_space<vmem>>, vector<1x128xf32>
    %1613 = arith.mulf %1611, %1612 : vector<1x128xf32>
    %1614 = vector.broadcast %1613 : vector<1x128xf32> to vector<16x128xf32>
    %1615 = arith.mulf %1614, %1610 : vector<16x128xf32>
    %1616 = arith.addf %1608, %1615 : vector<16x128xf32>
    %c7_1004 = arith.constant 7 : index
    %c0_1005 = arith.constant 0 : index
    %c0_1006 = arith.constant 0 : index
    %1617 = vector.load %arg1[%c7_1004, %c0_1005, %c0_1006] : memref<16x16x128xf32, #tpu.memory_space<vmem>>, vector<1x16x128xf32>
    %1618 = vector.shape_cast %1617 : vector<1x16x128xf32> to vector<16x128xf32>
    %1619 = vector.extract_strided_slice %1618 {offsets = [12, 0], sizes = [1, 128], strides = [1, 1]} : vector<16x128xf32> to vector<1x128xf32>
    %c7_1007 = arith.constant 7 : index
    %c0_1008 = arith.constant 0 : index
    %1620 = vector.load %arg2[%c7_1007, %c0_1008] : memref<16x128xf32, #tpu.memory_space<vmem>>, vector<1x128xf32>
    %1621 = arith.mulf %1619, %1620 : vector<1x128xf32>
    %1622 = vector.broadcast %1621 : vector<1x128xf32> to vector<16x128xf32>
    %1623 = arith.mulf %1622, %1618 : vector<16x128xf32>
    %1624 = arith.addf %1616, %1623 : vector<16x128xf32>
    %c8_1009 = arith.constant 8 : index
    %c0_1010 = arith.constant 0 : index
    %c0_1011 = arith.constant 0 : index
    %1625 = vector.load %arg1[%c8_1009, %c0_1010, %c0_1011] : memref<16x16x128xf32, #tpu.memory_space<vmem>>, vector<1x16x128xf32>
    %1626 = vector.shape_cast %1625 : vector<1x16x128xf32> to vector<16x128xf32>
    %1627 = vector.extract_strided_slice %1626 {offsets = [12, 0], sizes = [1, 128], strides = [1, 1]} : vector<16x128xf32> to vector<1x128xf32>
    %c8_1012 = arith.constant 8 : index
    %c0_1013 = arith.constant 0 : index
    %1628 = vector.load %arg2[%c8_1012, %c0_1013] : memref<16x128xf32, #tpu.memory_space<vmem>>, vector<1x128xf32>
    %1629 = arith.mulf %1627, %1628 : vector<1x128xf32>
    %1630 = vector.broadcast %1629 : vector<1x128xf32> to vector<16x128xf32>
    %1631 = arith.mulf %1630, %1626 : vector<16x128xf32>
    %1632 = arith.addf %1624, %1631 : vector<16x128xf32>
    %c9_1014 = arith.constant 9 : index
    %c0_1015 = arith.constant 0 : index
    %c0_1016 = arith.constant 0 : index
    %1633 = vector.load %arg1[%c9_1014, %c0_1015, %c0_1016] : memref<16x16x128xf32, #tpu.memory_space<vmem>>, vector<1x16x128xf32>
    %1634 = vector.shape_cast %1633 : vector<1x16x128xf32> to vector<16x128xf32>
    %1635 = vector.extract_strided_slice %1634 {offsets = [12, 0], sizes = [1, 128], strides = [1, 1]} : vector<16x128xf32> to vector<1x128xf32>
    %c9_1017 = arith.constant 9 : index
    %c0_1018 = arith.constant 0 : index
    %1636 = vector.load %arg2[%c9_1017, %c0_1018] : memref<16x128xf32, #tpu.memory_space<vmem>>, vector<1x128xf32>
    %1637 = arith.mulf %1635, %1636 : vector<1x128xf32>
    %1638 = vector.broadcast %1637 : vector<1x128xf32> to vector<16x128xf32>
    %1639 = arith.mulf %1638, %1634 : vector<16x128xf32>
    %1640 = arith.addf %1632, %1639 : vector<16x128xf32>
    %c10_1019 = arith.constant 10 : index
    %c0_1020 = arith.constant 0 : index
    %c0_1021 = arith.constant 0 : index
    %1641 = vector.load %arg1[%c10_1019, %c0_1020, %c0_1021] : memref<16x16x128xf32, #tpu.memory_space<vmem>>, vector<1x16x128xf32>
    %1642 = vector.shape_cast %1641 : vector<1x16x128xf32> to vector<16x128xf32>
    %1643 = vector.extract_strided_slice %1642 {offsets = [12, 0], sizes = [1, 128], strides = [1, 1]} : vector<16x128xf32> to vector<1x128xf32>
    %c10_1022 = arith.constant 10 : index
    %c0_1023 = arith.constant 0 : index
    %1644 = vector.load %arg2[%c10_1022, %c0_1023] : memref<16x128xf32, #tpu.memory_space<vmem>>, vector<1x128xf32>
    %1645 = arith.mulf %1643, %1644 : vector<1x128xf32>
    %1646 = vector.broadcast %1645 : vector<1x128xf32> to vector<16x128xf32>
    %1647 = arith.mulf %1646, %1642 : vector<16x128xf32>
    %1648 = arith.addf %1640, %1647 : vector<16x128xf32>
    %c11_1024 = arith.constant 11 : index
    %c0_1025 = arith.constant 0 : index
    %c0_1026 = arith.constant 0 : index
    %1649 = vector.load %arg1[%c11_1024, %c0_1025, %c0_1026] : memref<16x16x128xf32, #tpu.memory_space<vmem>>, vector<1x16x128xf32>
    %1650 = vector.shape_cast %1649 : vector<1x16x128xf32> to vector<16x128xf32>
    %1651 = vector.extract_strided_slice %1650 {offsets = [12, 0], sizes = [1, 128], strides = [1, 1]} : vector<16x128xf32> to vector<1x128xf32>
    %c11_1027 = arith.constant 11 : index
    %c0_1028 = arith.constant 0 : index
    %1652 = vector.load %arg2[%c11_1027, %c0_1028] : memref<16x128xf32, #tpu.memory_space<vmem>>, vector<1x128xf32>
    %1653 = arith.mulf %1651, %1652 : vector<1x128xf32>
    %1654 = vector.broadcast %1653 : vector<1x128xf32> to vector<16x128xf32>
    %1655 = arith.mulf %1654, %1650 : vector<16x128xf32>
    %1656 = arith.addf %1648, %1655 : vector<16x128xf32>
    %c12_1029 = arith.constant 12 : index
    %c0_1030 = arith.constant 0 : index
    %c0_1031 = arith.constant 0 : index
    %1657 = vector.load %arg1[%c12_1029, %c0_1030, %c0_1031] : memref<16x16x128xf32, #tpu.memory_space<vmem>>, vector<1x16x128xf32>
    %1658 = vector.shape_cast %1657 : vector<1x16x128xf32> to vector<16x128xf32>
    %1659 = vector.extract_strided_slice %1658 {offsets = [12, 0], sizes = [1, 128], strides = [1, 1]} : vector<16x128xf32> to vector<1x128xf32>
    %c12_1032 = arith.constant 12 : index
    %c0_1033 = arith.constant 0 : index
    %1660 = vector.load %arg2[%c12_1032, %c0_1033] : memref<16x128xf32, #tpu.memory_space<vmem>>, vector<1x128xf32>
    %1661 = arith.mulf %1659, %1660 : vector<1x128xf32>
    %1662 = vector.broadcast %1661 : vector<1x128xf32> to vector<16x128xf32>
    %1663 = arith.mulf %1662, %1658 : vector<16x128xf32>
    %1664 = arith.addf %1656, %1663 : vector<16x128xf32>
    %c13_1034 = arith.constant 13 : index
    %c0_1035 = arith.constant 0 : index
    %c0_1036 = arith.constant 0 : index
    %1665 = vector.load %arg1[%c13_1034, %c0_1035, %c0_1036] : memref<16x16x128xf32, #tpu.memory_space<vmem>>, vector<1x16x128xf32>
    %1666 = vector.shape_cast %1665 : vector<1x16x128xf32> to vector<16x128xf32>
    %1667 = vector.extract_strided_slice %1666 {offsets = [12, 0], sizes = [1, 128], strides = [1, 1]} : vector<16x128xf32> to vector<1x128xf32>
    %c13_1037 = arith.constant 13 : index
    %c0_1038 = arith.constant 0 : index
    %1668 = vector.load %arg2[%c13_1037, %c0_1038] : memref<16x128xf32, #tpu.memory_space<vmem>>, vector<1x128xf32>
    %1669 = arith.mulf %1667, %1668 : vector<1x128xf32>
    %1670 = vector.broadcast %1669 : vector<1x128xf32> to vector<16x128xf32>
    %1671 = arith.mulf %1670, %1666 : vector<16x128xf32>
    %1672 = arith.addf %1664, %1671 : vector<16x128xf32>
    %c14_1039 = arith.constant 14 : index
    %c0_1040 = arith.constant 0 : index
    %c0_1041 = arith.constant 0 : index
    %1673 = vector.load %arg1[%c14_1039, %c0_1040, %c0_1041] : memref<16x16x128xf32, #tpu.memory_space<vmem>>, vector<1x16x128xf32>
    %1674 = vector.shape_cast %1673 : vector<1x16x128xf32> to vector<16x128xf32>
    %1675 = vector.extract_strided_slice %1674 {offsets = [12, 0], sizes = [1, 128], strides = [1, 1]} : vector<16x128xf32> to vector<1x128xf32>
    %c14_1042 = arith.constant 14 : index
    %c0_1043 = arith.constant 0 : index
    %1676 = vector.load %arg2[%c14_1042, %c0_1043] : memref<16x128xf32, #tpu.memory_space<vmem>>, vector<1x128xf32>
    %1677 = arith.mulf %1675, %1676 : vector<1x128xf32>
    %1678 = vector.broadcast %1677 : vector<1x128xf32> to vector<16x128xf32>
    %1679 = arith.mulf %1678, %1674 : vector<16x128xf32>
    %1680 = arith.addf %1672, %1679 : vector<16x128xf32>
    %c15_1044 = arith.constant 15 : index
    %c0_1045 = arith.constant 0 : index
    %c0_1046 = arith.constant 0 : index
    %1681 = vector.load %arg1[%c15_1044, %c0_1045, %c0_1046] : memref<16x16x128xf32, #tpu.memory_space<vmem>>, vector<1x16x128xf32>
    %1682 = vector.shape_cast %1681 : vector<1x16x128xf32> to vector<16x128xf32>
    %1683 = vector.extract_strided_slice %1682 {offsets = [12, 0], sizes = [1, 128], strides = [1, 1]} : vector<16x128xf32> to vector<1x128xf32>
    %c15_1047 = arith.constant 15 : index
    %c0_1048 = arith.constant 0 : index
    %1684 = vector.load %arg2[%c15_1047, %c0_1048] : memref<16x128xf32, #tpu.memory_space<vmem>>, vector<1x128xf32>
    %1685 = arith.mulf %1683, %1684 : vector<1x128xf32>
    %1686 = vector.broadcast %1685 : vector<1x128xf32> to vector<16x128xf32>
    %1687 = arith.mulf %1686, %1682 : vector<16x128xf32>
    %1688 = arith.addf %1680, %1687 : vector<16x128xf32>
    %c192 = arith.constant 192 : index
    %c0_1049 = arith.constant 0 : index
    %1689 = vector.load %arg6[%c192, %c0_1049] : memref<256x128xf32, #tpu.memory_space<vmem>>, vector<16x128xf32>
    tpu.vector_store %arg6[%c192, %c0_1049], %1688 {strides = array<i32>} : memref<256x128xf32, #tpu.memory_space<vmem>>, vector<16x128xf32>,
    %cst_1050 = arith.constant 0.000000e+00 : f32
    %1690 = vector.broadcast %cst_1050 : f32 to vector<16x128xf32>
    %c0_1051 = arith.constant 0 : index
    %c0_1052 = arith.constant 0 : index
    %c0_1053 = arith.constant 0 : index
    %1691 = vector.load %arg1[%c0_1051, %c0_1052, %c0_1053] : memref<16x16x128xf32, #tpu.memory_space<vmem>>, vector<1x16x128xf32>
    %1692 = vector.shape_cast %1691 : vector<1x16x128xf32> to vector<16x128xf32>
    %1693 = vector.extract_strided_slice %1692 {offsets = [13, 0], sizes = [1, 128], strides = [1, 1]} : vector<16x128xf32> to vector<1x128xf32>
    %c0_1054 = arith.constant 0 : index
    %c0_1055 = arith.constant 0 : index
    %1694 = vector.load %arg2[%c0_1054, %c0_1055] : memref<16x128xf32, #tpu.memory_space<vmem>>, vector<1x128xf32>
    %1695 = arith.mulf %1693, %1694 : vector<1x128xf32>
    %1696 = vector.broadcast %1695 : vector<1x128xf32> to vector<16x128xf32>
    %1697 = arith.mulf %1696, %1692 : vector<16x128xf32>
    %1698 = arith.addf %1690, %1697 : vector<16x128xf32>
    %c1_1056 = arith.constant 1 : index
    %c0_1057 = arith.constant 0 : index
    %c0_1058 = arith.constant 0 : index
    %1699 = vector.load %arg1[%c1_1056, %c0_1057, %c0_1058] : memref<16x16x128xf32, #tpu.memory_space<vmem>>, vector<1x16x128xf32>
    %1700 = vector.shape_cast %1699 : vector<1x16x128xf32> to vector<16x128xf32>
    %1701 = vector.extract_strided_slice %1700 {offsets = [13, 0], sizes = [1, 128], strides = [1, 1]} : vector<16x128xf32> to vector<1x128xf32>
    %c1_1059 = arith.constant 1 : index
    %c0_1060 = arith.constant 0 : index
    %1702 = vector.load %arg2[%c1_1059, %c0_1060] : memref<16x128xf32, #tpu.memory_space<vmem>>, vector<1x128xf32>
    %1703 = arith.mulf %1701, %1702 : vector<1x128xf32>
    %1704 = vector.broadcast %1703 : vector<1x128xf32> to vector<16x128xf32>
    %1705 = arith.mulf %1704, %1700 : vector<16x128xf32>
    %1706 = arith.addf %1698, %1705 : vector<16x128xf32>
    %c2_1061 = arith.constant 2 : index
    %c0_1062 = arith.constant 0 : index
    %c0_1063 = arith.constant 0 : index
    %1707 = vector.load %arg1[%c2_1061, %c0_1062, %c0_1063] : memref<16x16x128xf32, #tpu.memory_space<vmem>>, vector<1x16x128xf32>
    %1708 = vector.shape_cast %1707 : vector<1x16x128xf32> to vector<16x128xf32>
    %1709 = vector.extract_strided_slice %1708 {offsets = [13, 0], sizes = [1, 128], strides = [1, 1]} : vector<16x128xf32> to vector<1x128xf32>
    %c2_1064 = arith.constant 2 : index
    %c0_1065 = arith.constant 0 : index
    %1710 = vector.load %arg2[%c2_1064, %c0_1065] : memref<16x128xf32, #tpu.memory_space<vmem>>, vector<1x128xf32>
    %1711 = arith.mulf %1709, %1710 : vector<1x128xf32>
    %1712 = vector.broadcast %1711 : vector<1x128xf32> to vector<16x128xf32>
    %1713 = arith.mulf %1712, %1708 : vector<16x128xf32>
    %1714 = arith.addf %1706, %1713 : vector<16x128xf32>
    %c3_1066 = arith.constant 3 : index
    %c0_1067 = arith.constant 0 : index
    %c0_1068 = arith.constant 0 : index
    %1715 = vector.load %arg1[%c3_1066, %c0_1067, %c0_1068] : memref<16x16x128xf32, #tpu.memory_space<vmem>>, vector<1x16x128xf32>
    %1716 = vector.shape_cast %1715 : vector<1x16x128xf32> to vector<16x128xf32>
    %1717 = vector.extract_strided_slice %1716 {offsets = [13, 0], sizes = [1, 128], strides = [1, 1]} : vector<16x128xf32> to vector<1x128xf32>
    %c3_1069 = arith.constant 3 : index
    %c0_1070 = arith.constant 0 : index
    %1718 = vector.load %arg2[%c3_1069, %c0_1070] : memref<16x128xf32, #tpu.memory_space<vmem>>, vector<1x128xf32>
    %1719 = arith.mulf %1717, %1718 : vector<1x128xf32>
    %1720 = vector.broadcast %1719 : vector<1x128xf32> to vector<16x128xf32>
    %1721 = arith.mulf %1720, %1716 : vector<16x128xf32>
    %1722 = arith.addf %1714, %1721 : vector<16x128xf32>
    %c4_1071 = arith.constant 4 : index
    %c0_1072 = arith.constant 0 : index
    %c0_1073 = arith.constant 0 : index
    %1723 = vector.load %arg1[%c4_1071, %c0_1072, %c0_1073] : memref<16x16x128xf32, #tpu.memory_space<vmem>>, vector<1x16x128xf32>
    %1724 = vector.shape_cast %1723 : vector<1x16x128xf32> to vector<16x128xf32>
    %1725 = vector.extract_strided_slice %1724 {offsets = [13, 0], sizes = [1, 128], strides = [1, 1]} : vector<16x128xf32> to vector<1x128xf32>
    %c4_1074 = arith.constant 4 : index
    %c0_1075 = arith.constant 0 : index
    %1726 = vector.load %arg2[%c4_1074, %c0_1075] : memref<16x128xf32, #tpu.memory_space<vmem>>, vector<1x128xf32>
    %1727 = arith.mulf %1725, %1726 : vector<1x128xf32>
    %1728 = vector.broadcast %1727 : vector<1x128xf32> to vector<16x128xf32>
    %1729 = arith.mulf %1728, %1724 : vector<16x128xf32>
    %1730 = arith.addf %1722, %1729 : vector<16x128xf32>
    %c5_1076 = arith.constant 5 : index
    %c0_1077 = arith.constant 0 : index
    %c0_1078 = arith.constant 0 : index
    %1731 = vector.load %arg1[%c5_1076, %c0_1077, %c0_1078] : memref<16x16x128xf32, #tpu.memory_space<vmem>>, vector<1x16x128xf32>
    %1732 = vector.shape_cast %1731 : vector<1x16x128xf32> to vector<16x128xf32>
    %1733 = vector.extract_strided_slice %1732 {offsets = [13, 0], sizes = [1, 128], strides = [1, 1]} : vector<16x128xf32> to vector<1x128xf32>
    %c5_1079 = arith.constant 5 : index
    %c0_1080 = arith.constant 0 : index
    %1734 = vector.load %arg2[%c5_1079, %c0_1080] : memref<16x128xf32, #tpu.memory_space<vmem>>, vector<1x128xf32>
    %1735 = arith.mulf %1733, %1734 : vector<1x128xf32>
    %1736 = vector.broadcast %1735 : vector<1x128xf32> to vector<16x128xf32>
    %1737 = arith.mulf %1736, %1732 : vector<16x128xf32>
    %1738 = arith.addf %1730, %1737 : vector<16x128xf32>
    %c6_1081 = arith.constant 6 : index
    %c0_1082 = arith.constant 0 : index
    %c0_1083 = arith.constant 0 : index
    %1739 = vector.load %arg1[%c6_1081, %c0_1082, %c0_1083] : memref<16x16x128xf32, #tpu.memory_space<vmem>>, vector<1x16x128xf32>
    %1740 = vector.shape_cast %1739 : vector<1x16x128xf32> to vector<16x128xf32>
    %1741 = vector.extract_strided_slice %1740 {offsets = [13, 0], sizes = [1, 128], strides = [1, 1]} : vector<16x128xf32> to vector<1x128xf32>
    %c6_1084 = arith.constant 6 : index
    %c0_1085 = arith.constant 0 : index
    %1742 = vector.load %arg2[%c6_1084, %c0_1085] : memref<16x128xf32, #tpu.memory_space<vmem>>, vector<1x128xf32>
    %1743 = arith.mulf %1741, %1742 : vector<1x128xf32>
    %1744 = vector.broadcast %1743 : vector<1x128xf32> to vector<16x128xf32>
    %1745 = arith.mulf %1744, %1740 : vector<16x128xf32>
    %1746 = arith.addf %1738, %1745 : vector<16x128xf32>
    %c7_1086 = arith.constant 7 : index
    %c0_1087 = arith.constant 0 : index
    %c0_1088 = arith.constant 0 : index
    %1747 = vector.load %arg1[%c7_1086, %c0_1087, %c0_1088] : memref<16x16x128xf32, #tpu.memory_space<vmem>>, vector<1x16x128xf32>
    %1748 = vector.shape_cast %1747 : vector<1x16x128xf32> to vector<16x128xf32>
    %1749 = vector.extract_strided_slice %1748 {offsets = [13, 0], sizes = [1, 128], strides = [1, 1]} : vector<16x128xf32> to vector<1x128xf32>
    %c7_1089 = arith.constant 7 : index
    %c0_1090 = arith.constant 0 : index
    %1750 = vector.load %arg2[%c7_1089, %c0_1090] : memref<16x128xf32, #tpu.memory_space<vmem>>, vector<1x128xf32>
    %1751 = arith.mulf %1749, %1750 : vector<1x128xf32>
    %1752 = vector.broadcast %1751 : vector<1x128xf32> to vector<16x128xf32>
    %1753 = arith.mulf %1752, %1748 : vector<16x128xf32>
    %1754 = arith.addf %1746, %1753 : vector<16x128xf32>
    %c8_1091 = arith.constant 8 : index
    %c0_1092 = arith.constant 0 : index
    %c0_1093 = arith.constant 0 : index
    %1755 = vector.load %arg1[%c8_1091, %c0_1092, %c0_1093] : memref<16x16x128xf32, #tpu.memory_space<vmem>>, vector<1x16x128xf32>
    %1756 = vector.shape_cast %1755 : vector<1x16x128xf32> to vector<16x128xf32>
    %1757 = vector.extract_strided_slice %1756 {offsets = [13, 0], sizes = [1, 128], strides = [1, 1]} : vector<16x128xf32> to vector<1x128xf32>
    %c8_1094 = arith.constant 8 : index
    %c0_1095 = arith.constant 0 : index
    %1758 = vector.load %arg2[%c8_1094, %c0_1095] : memref<16x128xf32, #tpu.memory_space<vmem>>, vector<1x128xf32>
    %1759 = arith.mulf %1757, %1758 : vector<1x128xf32>
    %1760 = vector.broadcast %1759 : vector<1x128xf32> to vector<16x128xf32>
    %1761 = arith.mulf %1760, %1756 : vector<16x128xf32>
    %1762 = arith.addf %1754, %1761 : vector<16x128xf32>
    %c9_1096 = arith.constant 9 : index
    %c0_1097 = arith.constant 0 : index
    %c0_1098 = arith.constant 0 : index
    %1763 = vector.load %arg1[%c9_1096, %c0_1097, %c0_1098] : memref<16x16x128xf32, #tpu.memory_space<vmem>>, vector<1x16x128xf32>
    %1764 = vector.shape_cast %1763 : vector<1x16x128xf32> to vector<16x128xf32>
    %1765 = vector.extract_strided_slice %1764 {offsets = [13, 0], sizes = [1, 128], strides = [1, 1]} : vector<16x128xf32> to vector<1x128xf32>
    %c9_1099 = arith.constant 9 : index
    %c0_1100 = arith.constant 0 : index
    %1766 = vector.load %arg2[%c9_1099, %c0_1100] : memref<16x128xf32, #tpu.memory_space<vmem>>, vector<1x128xf32>
    %1767 = arith.mulf %1765, %1766 : vector<1x128xf32>
    %1768 = vector.broadcast %1767 : vector<1x128xf32> to vector<16x128xf32>
    %1769 = arith.mulf %1768, %1764 : vector<16x128xf32>
    %1770 = arith.addf %1762, %1769 : vector<16x128xf32>
    %c10_1101 = arith.constant 10 : index
    %c0_1102 = arith.constant 0 : index
    %c0_1103 = arith.constant 0 : index
    %1771 = vector.load %arg1[%c10_1101, %c0_1102, %c0_1103] : memref<16x16x128xf32, #tpu.memory_space<vmem>>, vector<1x16x128xf32>
    %1772 = vector.shape_cast %1771 : vector<1x16x128xf32> to vector<16x128xf32>
    %1773 = vector.extract_strided_slice %1772 {offsets = [13, 0], sizes = [1, 128], strides = [1, 1]} : vector<16x128xf32> to vector<1x128xf32>
    %c10_1104 = arith.constant 10 : index
    %c0_1105 = arith.constant 0 : index
    %1774 = vector.load %arg2[%c10_1104, %c0_1105] : memref<16x128xf32, #tpu.memory_space<vmem>>, vector<1x128xf32>
    %1775 = arith.mulf %1773, %1774 : vector<1x128xf32>
    %1776 = vector.broadcast %1775 : vector<1x128xf32> to vector<16x128xf32>
    %1777 = arith.mulf %1776, %1772 : vector<16x128xf32>
    %1778 = arith.addf %1770, %1777 : vector<16x128xf32>
    %c11_1106 = arith.constant 11 : index
    %c0_1107 = arith.constant 0 : index
    %c0_1108 = arith.constant 0 : index
    %1779 = vector.load %arg1[%c11_1106, %c0_1107, %c0_1108] : memref<16x16x128xf32, #tpu.memory_space<vmem>>, vector<1x16x128xf32>
    %1780 = vector.shape_cast %1779 : vector<1x16x128xf32> to vector<16x128xf32>
    %1781 = vector.extract_strided_slice %1780 {offsets = [13, 0], sizes = [1, 128], strides = [1, 1]} : vector<16x128xf32> to vector<1x128xf32>
    %c11_1109 = arith.constant 11 : index
    %c0_1110 = arith.constant 0 : index
    %1782 = vector.load %arg2[%c11_1109, %c0_1110] : memref<16x128xf32, #tpu.memory_space<vmem>>, vector<1x128xf32>
    %1783 = arith.mulf %1781, %1782 : vector<1x128xf32>
    %1784 = vector.broadcast %1783 : vector<1x128xf32> to vector<16x128xf32>
    %1785 = arith.mulf %1784, %1780 : vector<16x128xf32>
    %1786 = arith.addf %1778, %1785 : vector<16x128xf32>
    %c12_1111 = arith.constant 12 : index
    %c0_1112 = arith.constant 0 : index
    %c0_1113 = arith.constant 0 : index
    %1787 = vector.load %arg1[%c12_1111, %c0_1112, %c0_1113] : memref<16x16x128xf32, #tpu.memory_space<vmem>>, vector<1x16x128xf32>
    %1788 = vector.shape_cast %1787 : vector<1x16x128xf32> to vector<16x128xf32>
    %1789 = vector.extract_strided_slice %1788 {offsets = [13, 0], sizes = [1, 128], strides = [1, 1]} : vector<16x128xf32> to vector<1x128xf32>
    %c12_1114 = arith.constant 12 : index
    %c0_1115 = arith.constant 0 : index
    %1790 = vector.load %arg2[%c12_1114, %c0_1115] : memref<16x128xf32, #tpu.memory_space<vmem>>, vector<1x128xf32>
    %1791 = arith.mulf %1789, %1790 : vector<1x128xf32>
    %1792 = vector.broadcast %1791 : vector<1x128xf32> to vector<16x128xf32>
    %1793 = arith.mulf %1792, %1788 : vector<16x128xf32>
    %1794 = arith.addf %1786, %1793 : vector<16x128xf32>
    %c13_1116 = arith.constant 13 : index
    %c0_1117 = arith.constant 0 : index
    %c0_1118 = arith.constant 0 : index
    %1795 = vector.load %arg1[%c13_1116, %c0_1117, %c0_1118] : memref<16x16x128xf32, #tpu.memory_space<vmem>>, vector<1x16x128xf32>
    %1796 = vector.shape_cast %1795 : vector<1x16x128xf32> to vector<16x128xf32>
    %1797 = vector.extract_strided_slice %1796 {offsets = [13, 0], sizes = [1, 128], strides = [1, 1]} : vector<16x128xf32> to vector<1x128xf32>
    %c13_1119 = arith.constant 13 : index
    %c0_1120 = arith.constant 0 : index
    %1798 = vector.load %arg2[%c13_1119, %c0_1120] : memref<16x128xf32, #tpu.memory_space<vmem>>, vector<1x128xf32>
    %1799 = arith.mulf %1797, %1798 : vector<1x128xf32>
    %1800 = vector.broadcast %1799 : vector<1x128xf32> to vector<16x128xf32>
    %1801 = arith.mulf %1800, %1796 : vector<16x128xf32>
    %1802 = arith.addf %1794, %1801 : vector<16x128xf32>
    %c14_1121 = arith.constant 14 : index
    %c0_1122 = arith.constant 0 : index
    %c0_1123 = arith.constant 0 : index
    %1803 = vector.load %arg1[%c14_1121, %c0_1122, %c0_1123] : memref<16x16x128xf32, #tpu.memory_space<vmem>>, vector<1x16x128xf32>
    %1804 = vector.shape_cast %1803 : vector<1x16x128xf32> to vector<16x128xf32>
    %1805 = vector.extract_strided_slice %1804 {offsets = [13, 0], sizes = [1, 128], strides = [1, 1]} : vector<16x128xf32> to vector<1x128xf32>
    %c14_1124 = arith.constant 14 : index
    %c0_1125 = arith.constant 0 : index
    %1806 = vector.load %arg2[%c14_1124, %c0_1125] : memref<16x128xf32, #tpu.memory_space<vmem>>, vector<1x128xf32>
    %1807 = arith.mulf %1805, %1806 : vector<1x128xf32>
    %1808 = vector.broadcast %1807 : vector<1x128xf32> to vector<16x128xf32>
    %1809 = arith.mulf %1808, %1804 : vector<16x128xf32>
    %1810 = arith.addf %1802, %1809 : vector<16x128xf32>
    %c15_1126 = arith.constant 15 : index
    %c0_1127 = arith.constant 0 : index
    %c0_1128 = arith.constant 0 : index
    %1811 = vector.load %arg1[%c15_1126, %c0_1127, %c0_1128] : memref<16x16x128xf32, #tpu.memory_space<vmem>>, vector<1x16x128xf32>
    %1812 = vector.shape_cast %1811 : vector<1x16x128xf32> to vector<16x128xf32>
    %1813 = vector.extract_strided_slice %1812 {offsets = [13, 0], sizes = [1, 128], strides = [1, 1]} : vector<16x128xf32> to vector<1x128xf32>
    %c15_1129 = arith.constant 15 : index
    %c0_1130 = arith.constant 0 : index
    %1814 = vector.load %arg2[%c15_1129, %c0_1130] : memref<16x128xf32, #tpu.memory_space<vmem>>, vector<1x128xf32>
    %1815 = arith.mulf %1813, %1814 : vector<1x128xf32>
    %1816 = vector.broadcast %1815 : vector<1x128xf32> to vector<16x128xf32>
    %1817 = arith.mulf %1816, %1812 : vector<16x128xf32>
    %1818 = arith.addf %1810, %1817 : vector<16x128xf32>
    %c208 = arith.constant 208 : index
    %c0_1131 = arith.constant 0 : index
    %1819 = vector.load %arg6[%c208, %c0_1131] : memref<256x128xf32, #tpu.memory_space<vmem>>, vector<16x128xf32>
    tpu.vector_store %arg6[%c208, %c0_1131], %1818 {strides = array<i32>} : memref<256x128xf32, #tpu.memory_space<vmem>>, vector<16x128xf32>,
    %cst_1132 = arith.constant 0.000000e+00 : f32
    %1820 = vector.broadcast %cst_1132 : f32 to vector<16x128xf32>
    %c0_1133 = arith.constant 0 : index
    %c0_1134 = arith.constant 0 : index
    %c0_1135 = arith.constant 0 : index
    %1821 = vector.load %arg1[%c0_1133, %c0_1134, %c0_1135] : memref<16x16x128xf32, #tpu.memory_space<vmem>>, vector<1x16x128xf32>
    %1822 = vector.shape_cast %1821 : vector<1x16x128xf32> to vector<16x128xf32>
    %1823 = vector.extract_strided_slice %1822 {offsets = [14, 0], sizes = [1, 128], strides = [1, 1]} : vector<16x128xf32> to vector<1x128xf32>
    %c0_1136 = arith.constant 0 : index
    %c0_1137 = arith.constant 0 : index
    %1824 = vector.load %arg2[%c0_1136, %c0_1137] : memref<16x128xf32, #tpu.memory_space<vmem>>, vector<1x128xf32>
    %1825 = arith.mulf %1823, %1824 : vector<1x128xf32>
    %1826 = vector.broadcast %1825 : vector<1x128xf32> to vector<16x128xf32>
    %1827 = arith.mulf %1826, %1822 : vector<16x128xf32>
    %1828 = arith.addf %1820, %1827 : vector<16x128xf32>
    %c1_1138 = arith.constant 1 : index
    %c0_1139 = arith.constant 0 : index
    %c0_1140 = arith.constant 0 : index
    %1829 = vector.load %arg1[%c1_1138, %c0_1139, %c0_1140] : memref<16x16x128xf32, #tpu.memory_space<vmem>>, vector<1x16x128xf32>
    %1830 = vector.shape_cast %1829 : vector<1x16x128xf32> to vector<16x128xf32>
    %1831 = vector.extract_strided_slice %1830 {offsets = [14, 0], sizes = [1, 128], strides = [1, 1]} : vector<16x128xf32> to vector<1x128xf32>
    %c1_1141 = arith.constant 1 : index
    %c0_1142 = arith.constant 0 : index
    %1832 = vector.load %arg2[%c1_1141, %c0_1142] : memref<16x128xf32, #tpu.memory_space<vmem>>, vector<1x128xf32>
    %1833 = arith.mulf %1831, %1832 : vector<1x128xf32>
    %1834 = vector.broadcast %1833 : vector<1x128xf32> to vector<16x128xf32>
    %1835 = arith.mulf %1834, %1830 : vector<16x128xf32>
    %1836 = arith.addf %1828, %1835 : vector<16x128xf32>
    %c2_1143 = arith.constant 2 : index
    %c0_1144 = arith.constant 0 : index
    %c0_1145 = arith.constant 0 : index
    %1837 = vector.load %arg1[%c2_1143, %c0_1144, %c0_1145] : memref<16x16x128xf32, #tpu.memory_space<vmem>>, vector<1x16x128xf32>
    %1838 = vector.shape_cast %1837 : vector<1x16x128xf32> to vector<16x128xf32>
    %1839 = vector.extract_strided_slice %1838 {offsets = [14, 0], sizes = [1, 128], strides = [1, 1]} : vector<16x128xf32> to vector<1x128xf32>
    %c2_1146 = arith.constant 2 : index
    %c0_1147 = arith.constant 0 : index
    %1840 = vector.load %arg2[%c2_1146, %c0_1147] : memref<16x128xf32, #tpu.memory_space<vmem>>, vector<1x128xf32>
    %1841 = arith.mulf %1839, %1840 : vector<1x128xf32>
    %1842 = vector.broadcast %1841 : vector<1x128xf32> to vector<16x128xf32>
    %1843 = arith.mulf %1842, %1838 : vector<16x128xf32>
    %1844 = arith.addf %1836, %1843 : vector<16x128xf32>
    %c3_1148 = arith.constant 3 : index
    %c0_1149 = arith.constant 0 : index
    %c0_1150 = arith.constant 0 : index
    %1845 = vector.load %arg1[%c3_1148, %c0_1149, %c0_1150] : memref<16x16x128xf32, #tpu.memory_space<vmem>>, vector<1x16x128xf32>
    %1846 = vector.shape_cast %1845 : vector<1x16x128xf32> to vector<16x128xf32>
    %1847 = vector.extract_strided_slice %1846 {offsets = [14, 0], sizes = [1, 128], strides = [1, 1]} : vector<16x128xf32> to vector<1x128xf32>
    %c3_1151 = arith.constant 3 : index
    %c0_1152 = arith.constant 0 : index
    %1848 = vector.load %arg2[%c3_1151, %c0_1152] : memref<16x128xf32, #tpu.memory_space<vmem>>, vector<1x128xf32>
    %1849 = arith.mulf %1847, %1848 : vector<1x128xf32>
    %1850 = vector.broadcast %1849 : vector<1x128xf32> to vector<16x128xf32>
    %1851 = arith.mulf %1850, %1846 : vector<16x128xf32>
    %1852 = arith.addf %1844, %1851 : vector<16x128xf32>
    %c4_1153 = arith.constant 4 : index
    %c0_1154 = arith.constant 0 : index
    %c0_1155 = arith.constant 0 : index
    %1853 = vector.load %arg1[%c4_1153, %c0_1154, %c0_1155] : memref<16x16x128xf32, #tpu.memory_space<vmem>>, vector<1x16x128xf32>
    %1854 = vector.shape_cast %1853 : vector<1x16x128xf32> to vector<16x128xf32>
    %1855 = vector.extract_strided_slice %1854 {offsets = [14, 0], sizes = [1, 128], strides = [1, 1]} : vector<16x128xf32> to vector<1x128xf32>
    %c4_1156 = arith.constant 4 : index
    %c0_1157 = arith.constant 0 : index
    %1856 = vector.load %arg2[%c4_1156, %c0_1157] : memref<16x128xf32, #tpu.memory_space<vmem>>, vector<1x128xf32>
    %1857 = arith.mulf %1855, %1856 : vector<1x128xf32>
    %1858 = vector.broadcast %1857 : vector<1x128xf32> to vector<16x128xf32>
    %1859 = arith.mulf %1858, %1854 : vector<16x128xf32>
    %1860 = arith.addf %1852, %1859 : vector<16x128xf32>
    %c5_1158 = arith.constant 5 : index
    %c0_1159 = arith.constant 0 : index
    %c0_1160 = arith.constant 0 : index
    %1861 = vector.load %arg1[%c5_1158, %c0_1159, %c0_1160] : memref<16x16x128xf32, #tpu.memory_space<vmem>>, vector<1x16x128xf32>
    %1862 = vector.shape_cast %1861 : vector<1x16x128xf32> to vector<16x128xf32>
    %1863 = vector.extract_strided_slice %1862 {offsets = [14, 0], sizes = [1, 128], strides = [1, 1]} : vector<16x128xf32> to vector<1x128xf32>
    %c5_1161 = arith.constant 5 : index
    %c0_1162 = arith.constant 0 : index
    %1864 = vector.load %arg2[%c5_1161, %c0_1162] : memref<16x128xf32, #tpu.memory_space<vmem>>, vector<1x128xf32>
    %1865 = arith.mulf %1863, %1864 : vector<1x128xf32>
    %1866 = vector.broadcast %1865 : vector<1x128xf32> to vector<16x128xf32>
    %1867 = arith.mulf %1866, %1862 : vector<16x128xf32>
    %1868 = arith.addf %1860, %1867 : vector<16x128xf32>
    %c6_1163 = arith.constant 6 : index
    %c0_1164 = arith.constant 0 : index
    %c0_1165 = arith.constant 0 : index
    %1869 = vector.load %arg1[%c6_1163, %c0_1164, %c0_1165] : memref<16x16x128xf32, #tpu.memory_space<vmem>>, vector<1x16x128xf32>
    %1870 = vector.shape_cast %1869 : vector<1x16x128xf32> to vector<16x128xf32>
    %1871 = vector.extract_strided_slice %1870 {offsets = [14, 0], sizes = [1, 128], strides = [1, 1]} : vector<16x128xf32> to vector<1x128xf32>
    %c6_1166 = arith.constant 6 : index
    %c0_1167 = arith.constant 0 : index
    %1872 = vector.load %arg2[%c6_1166, %c0_1167] : memref<16x128xf32, #tpu.memory_space<vmem>>, vector<1x128xf32>
    %1873 = arith.mulf %1871, %1872 : vector<1x128xf32>
    %1874 = vector.broadcast %1873 : vector<1x128xf32> to vector<16x128xf32>
    %1875 = arith.mulf %1874, %1870 : vector<16x128xf32>
    %1876 = arith.addf %1868, %1875 : vector<16x128xf32>
    %c7_1168 = arith.constant 7 : index
    %c0_1169 = arith.constant 0 : index
    %c0_1170 = arith.constant 0 : index
    %1877 = vector.load %arg1[%c7_1168, %c0_1169, %c0_1170] : memref<16x16x128xf32, #tpu.memory_space<vmem>>, vector<1x16x128xf32>
    %1878 = vector.shape_cast %1877 : vector<1x16x128xf32> to vector<16x128xf32>
    %1879 = vector.extract_strided_slice %1878 {offsets = [14, 0], sizes = [1, 128], strides = [1, 1]} : vector<16x128xf32> to vector<1x128xf32>
    %c7_1171 = arith.constant 7 : index
    %c0_1172 = arith.constant 0 : index
    %1880 = vector.load %arg2[%c7_1171, %c0_1172] : memref<16x128xf32, #tpu.memory_space<vmem>>, vector<1x128xf32>
    %1881 = arith.mulf %1879, %1880 : vector<1x128xf32>
    %1882 = vector.broadcast %1881 : vector<1x128xf32> to vector<16x128xf32>
    %1883 = arith.mulf %1882, %1878 : vector<16x128xf32>
    %1884 = arith.addf %1876, %1883 : vector<16x128xf32>
    %c8_1173 = arith.constant 8 : index
    %c0_1174 = arith.constant 0 : index
    %c0_1175 = arith.constant 0 : index
    %1885 = vector.load %arg1[%c8_1173, %c0_1174, %c0_1175] : memref<16x16x128xf32, #tpu.memory_space<vmem>>, vector<1x16x128xf32>
    %1886 = vector.shape_cast %1885 : vector<1x16x128xf32> to vector<16x128xf32>
    %1887 = vector.extract_strided_slice %1886 {offsets = [14, 0], sizes = [1, 128], strides = [1, 1]} : vector<16x128xf32> to vector<1x128xf32>
    %c8_1176 = arith.constant 8 : index
    %c0_1177 = arith.constant 0 : index
    %1888 = vector.load %arg2[%c8_1176, %c0_1177] : memref<16x128xf32, #tpu.memory_space<vmem>>, vector<1x128xf32>
    %1889 = arith.mulf %1887, %1888 : vector<1x128xf32>
    %1890 = vector.broadcast %1889 : vector<1x128xf32> to vector<16x128xf32>
    %1891 = arith.mulf %1890, %1886 : vector<16x128xf32>
    %1892 = arith.addf %1884, %1891 : vector<16x128xf32>
    %c9_1178 = arith.constant 9 : index
    %c0_1179 = arith.constant 0 : index
    %c0_1180 = arith.constant 0 : index
    %1893 = vector.load %arg1[%c9_1178, %c0_1179, %c0_1180] : memref<16x16x128xf32, #tpu.memory_space<vmem>>, vector<1x16x128xf32>
    %1894 = vector.shape_cast %1893 : vector<1x16x128xf32> to vector<16x128xf32>
    %1895 = vector.extract_strided_slice %1894 {offsets = [14, 0], sizes = [1, 128], strides = [1, 1]} : vector<16x128xf32> to vector<1x128xf32>
    %c9_1181 = arith.constant 9 : index
    %c0_1182 = arith.constant 0 : index
    %1896 = vector.load %arg2[%c9_1181, %c0_1182] : memref<16x128xf32, #tpu.memory_space<vmem>>, vector<1x128xf32>
    %1897 = arith.mulf %1895, %1896 : vector<1x128xf32>
    %1898 = vector.broadcast %1897 : vector<1x128xf32> to vector<16x128xf32>
    %1899 = arith.mulf %1898, %1894 : vector<16x128xf32>
    %1900 = arith.addf %1892, %1899 : vector<16x128xf32>
    %c10_1183 = arith.constant 10 : index
    %c0_1184 = arith.constant 0 : index
    %c0_1185 = arith.constant 0 : index
    %1901 = vector.load %arg1[%c10_1183, %c0_1184, %c0_1185] : memref<16x16x128xf32, #tpu.memory_space<vmem>>, vector<1x16x128xf32>
    %1902 = vector.shape_cast %1901 : vector<1x16x128xf32> to vector<16x128xf32>
    %1903 = vector.extract_strided_slice %1902 {offsets = [14, 0], sizes = [1, 128], strides = [1, 1]} : vector<16x128xf32> to vector<1x128xf32>
    %c10_1186 = arith.constant 10 : index
    %c0_1187 = arith.constant 0 : index
    %1904 = vector.load %arg2[%c10_1186, %c0_1187] : memref<16x128xf32, #tpu.memory_space<vmem>>, vector<1x128xf32>
    %1905 = arith.mulf %1903, %1904 : vector<1x128xf32>
    %1906 = vector.broadcast %1905 : vector<1x128xf32> to vector<16x128xf32>
    %1907 = arith.mulf %1906, %1902 : vector<16x128xf32>
    %1908 = arith.addf %1900, %1907 : vector<16x128xf32>
    %c11_1188 = arith.constant 11 : index
    %c0_1189 = arith.constant 0 : index
    %c0_1190 = arith.constant 0 : index
    %1909 = vector.load %arg1[%c11_1188, %c0_1189, %c0_1190] : memref<16x16x128xf32, #tpu.memory_space<vmem>>, vector<1x16x128xf32>
    %1910 = vector.shape_cast %1909 : vector<1x16x128xf32> to vector<16x128xf32>
    %1911 = vector.extract_strided_slice %1910 {offsets = [14, 0], sizes = [1, 128], strides = [1, 1]} : vector<16x128xf32> to vector<1x128xf32>
    %c11_1191 = arith.constant 11 : index
    %c0_1192 = arith.constant 0 : index
    %1912 = vector.load %arg2[%c11_1191, %c0_1192] : memref<16x128xf32, #tpu.memory_space<vmem>>, vector<1x128xf32>
    %1913 = arith.mulf %1911, %1912 : vector<1x128xf32>
    %1914 = vector.broadcast %1913 : vector<1x128xf32> to vector<16x128xf32>
    %1915 = arith.mulf %1914, %1910 : vector<16x128xf32>
    %1916 = arith.addf %1908, %1915 : vector<16x128xf32>
    %c12_1193 = arith.constant 12 : index
    %c0_1194 = arith.constant 0 : index
    %c0_1195 = arith.constant 0 : index
    %1917 = vector.load %arg1[%c12_1193, %c0_1194, %c0_1195] : memref<16x16x128xf32, #tpu.memory_space<vmem>>, vector<1x16x128xf32>
    %1918 = vector.shape_cast %1917 : vector<1x16x128xf32> to vector<16x128xf32>
    %1919 = vector.extract_strided_slice %1918 {offsets = [14, 0], sizes = [1, 128], strides = [1, 1]} : vector<16x128xf32> to vector<1x128xf32>
    %c12_1196 = arith.constant 12 : index
    %c0_1197 = arith.constant 0 : index
    %1920 = vector.load %arg2[%c12_1196, %c0_1197] : memref<16x128xf32, #tpu.memory_space<vmem>>, vector<1x128xf32>
    %1921 = arith.mulf %1919, %1920 : vector<1x128xf32>
    %1922 = vector.broadcast %1921 : vector<1x128xf32> to vector<16x128xf32>
    %1923 = arith.mulf %1922, %1918 : vector<16x128xf32>
    %1924 = arith.addf %1916, %1923 : vector<16x128xf32>
    %c13_1198 = arith.constant 13 : index
    %c0_1199 = arith.constant 0 : index
    %c0_1200 = arith.constant 0 : index
    %1925 = vector.load %arg1[%c13_1198, %c0_1199, %c0_1200] : memref<16x16x128xf32, #tpu.memory_space<vmem>>, vector<1x16x128xf32>
    %1926 = vector.shape_cast %1925 : vector<1x16x128xf32> to vector<16x128xf32>
    %1927 = vector.extract_strided_slice %1926 {offsets = [14, 0], sizes = [1, 128], strides = [1, 1]} : vector<16x128xf32> to vector<1x128xf32>
    %c13_1201 = arith.constant 13 : index
    %c0_1202 = arith.constant 0 : index
    %1928 = vector.load %arg2[%c13_1201, %c0_1202] : memref<16x128xf32, #tpu.memory_space<vmem>>, vector<1x128xf32>
    %1929 = arith.mulf %1927, %1928 : vector<1x128xf32>
    %1930 = vector.broadcast %1929 : vector<1x128xf32> to vector<16x128xf32>
    %1931 = arith.mulf %1930, %1926 : vector<16x128xf32>
    %1932 = arith.addf %1924, %1931 : vector<16x128xf32>
    %c14_1203 = arith.constant 14 : index
    %c0_1204 = arith.constant 0 : index
    %c0_1205 = arith.constant 0 : index
    %1933 = vector.load %arg1[%c14_1203, %c0_1204, %c0_1205] : memref<16x16x128xf32, #tpu.memory_space<vmem>>, vector<1x16x128xf32>
    %1934 = vector.shape_cast %1933 : vector<1x16x128xf32> to vector<16x128xf32>
    %1935 = vector.extract_strided_slice %1934 {offsets = [14, 0], sizes = [1, 128], strides = [1, 1]} : vector<16x128xf32> to vector<1x128xf32>
    %c14_1206 = arith.constant 14 : index
    %c0_1207 = arith.constant 0 : index
    %1936 = vector.load %arg2[%c14_1206, %c0_1207] : memref<16x128xf32, #tpu.memory_space<vmem>>, vector<1x128xf32>
    %1937 = arith.mulf %1935, %1936 : vector<1x128xf32>
    %1938 = vector.broadcast %1937 : vector<1x128xf32> to vector<16x128xf32>
    %1939 = arith.mulf %1938, %1934 : vector<16x128xf32>
    %1940 = arith.addf %1932, %1939 : vector<16x128xf32>
    %c15_1208 = arith.constant 15 : index
    %c0_1209 = arith.constant 0 : index
    %c0_1210 = arith.constant 0 : index
    %1941 = vector.load %arg1[%c15_1208, %c0_1209, %c0_1210] : memref<16x16x128xf32, #tpu.memory_space<vmem>>, vector<1x16x128xf32>
    %1942 = vector.shape_cast %1941 : vector<1x16x128xf32> to vector<16x128xf32>
    %1943 = vector.extract_strided_slice %1942 {offsets = [14, 0], sizes = [1, 128], strides = [1, 1]} : vector<16x128xf32> to vector<1x128xf32>
    %c15_1211 = arith.constant 15 : index
    %c0_1212 = arith.constant 0 : index
    %1944 = vector.load %arg2[%c15_1211, %c0_1212] : memref<16x128xf32, #tpu.memory_space<vmem>>, vector<1x128xf32>
    %1945 = arith.mulf %1943, %1944 : vector<1x128xf32>
    %1946 = vector.broadcast %1945 : vector<1x128xf32> to vector<16x128xf32>
    %1947 = arith.mulf %1946, %1942 : vector<16x128xf32>
    %1948 = arith.addf %1940, %1947 : vector<16x128xf32>
    %c224 = arith.constant 224 : index
    %c0_1213 = arith.constant 0 : index
    %1949 = vector.load %arg6[%c224, %c0_1213] : memref<256x128xf32, #tpu.memory_space<vmem>>, vector<16x128xf32>
    tpu.vector_store %arg6[%c224, %c0_1213], %1948 {strides = array<i32>} : memref<256x128xf32, #tpu.memory_space<vmem>>, vector<16x128xf32>,
    %cst_1214 = arith.constant 0.000000e+00 : f32
    %1950 = vector.broadcast %cst_1214 : f32 to vector<16x128xf32>
    %c0_1215 = arith.constant 0 : index
    %c0_1216 = arith.constant 0 : index
    %c0_1217 = arith.constant 0 : index
    %1951 = vector.load %arg1[%c0_1215, %c0_1216, %c0_1217] : memref<16x16x128xf32, #tpu.memory_space<vmem>>, vector<1x16x128xf32>
    %1952 = vector.shape_cast %1951 : vector<1x16x128xf32> to vector<16x128xf32>
    %1953 = vector.extract_strided_slice %1952 {offsets = [15, 0], sizes = [1, 128], strides = [1, 1]} : vector<16x128xf32> to vector<1x128xf32>
    %c0_1218 = arith.constant 0 : index
    %c0_1219 = arith.constant 0 : index
    %1954 = vector.load %arg2[%c0_1218, %c0_1219] : memref<16x128xf32, #tpu.memory_space<vmem>>, vector<1x128xf32>
    %1955 = arith.mulf %1953, %1954 : vector<1x128xf32>
    %1956 = vector.broadcast %1955 : vector<1x128xf32> to vector<16x128xf32>
    %1957 = arith.mulf %1956, %1952 : vector<16x128xf32>
    %1958 = arith.addf %1950, %1957 : vector<16x128xf32>
    %c1_1220 = arith.constant 1 : index
    %c0_1221 = arith.constant 0 : index
    %c0_1222 = arith.constant 0 : index
    %1959 = vector.load %arg1[%c1_1220, %c0_1221, %c0_1222] : memref<16x16x128xf32, #tpu.memory_space<vmem>>, vector<1x16x128xf32>
    %1960 = vector.shape_cast %1959 : vector<1x16x128xf32> to vector<16x128xf32>
    %1961 = vector.extract_strided_slice %1960 {offsets = [15, 0], sizes = [1, 128], strides = [1, 1]} : vector<16x128xf32> to vector<1x128xf32>
    %c1_1223 = arith.constant 1 : index
    %c0_1224 = arith.constant 0 : index
    %1962 = vector.load %arg2[%c1_1223, %c0_1224] : memref<16x128xf32, #tpu.memory_space<vmem>>, vector<1x128xf32>
    %1963 = arith.mulf %1961, %1962 : vector<1x128xf32>
    %1964 = vector.broadcast %1963 : vector<1x128xf32> to vector<16x128xf32>
    %1965 = arith.mulf %1964, %1960 : vector<16x128xf32>
    %1966 = arith.addf %1958, %1965 : vector<16x128xf32>
    %c2_1225 = arith.constant 2 : index
    %c0_1226 = arith.constant 0 : index
    %c0_1227 = arith.constant 0 : index
    %1967 = vector.load %arg1[%c2_1225, %c0_1226, %c0_1227] : memref<16x16x128xf32, #tpu.memory_space<vmem>>, vector<1x16x128xf32>
    %1968 = vector.shape_cast %1967 : vector<1x16x128xf32> to vector<16x128xf32>
    %1969 = vector.extract_strided_slice %1968 {offsets = [15, 0], sizes = [1, 128], strides = [1, 1]} : vector<16x128xf32> to vector<1x128xf32>
    %c2_1228 = arith.constant 2 : index
    %c0_1229 = arith.constant 0 : index
    %1970 = vector.load %arg2[%c2_1228, %c0_1229] : memref<16x128xf32, #tpu.memory_space<vmem>>, vector<1x128xf32>
    %1971 = arith.mulf %1969, %1970 : vector<1x128xf32>
    %1972 = vector.broadcast %1971 : vector<1x128xf32> to vector<16x128xf32>
    %1973 = arith.mulf %1972, %1968 : vector<16x128xf32>
    %1974 = arith.addf %1966, %1973 : vector<16x128xf32>
    %c3_1230 = arith.constant 3 : index
    %c0_1231 = arith.constant 0 : index
    %c0_1232 = arith.constant 0 : index
    %1975 = vector.load %arg1[%c3_1230, %c0_1231, %c0_1232] : memref<16x16x128xf32, #tpu.memory_space<vmem>>, vector<1x16x128xf32>
    %1976 = vector.shape_cast %1975 : vector<1x16x128xf32> to vector<16x128xf32>
    %1977 = vector.extract_strided_slice %1976 {offsets = [15, 0], sizes = [1, 128], strides = [1, 1]} : vector<16x128xf32> to vector<1x128xf32>
    %c3_1233 = arith.constant 3 : index
    %c0_1234 = arith.constant 0 : index
    %1978 = vector.load %arg2[%c3_1233, %c0_1234] : memref<16x128xf32, #tpu.memory_space<vmem>>, vector<1x128xf32>
    %1979 = arith.mulf %1977, %1978 : vector<1x128xf32>
    %1980 = vector.broadcast %1979 : vector<1x128xf32> to vector<16x128xf32>
    %1981 = arith.mulf %1980, %1976 : vector<16x128xf32>
    %1982 = arith.addf %1974, %1981 : vector<16x128xf32>
    %c4_1235 = arith.constant 4 : index
    %c0_1236 = arith.constant 0 : index
    %c0_1237 = arith.constant 0 : index
    %1983 = vector.load %arg1[%c4_1235, %c0_1236, %c0_1237] : memref<16x16x128xf32, #tpu.memory_space<vmem>>, vector<1x16x128xf32>
    %1984 = vector.shape_cast %1983 : vector<1x16x128xf32> to vector<16x128xf32>
    %1985 = vector.extract_strided_slice %1984 {offsets = [15, 0], sizes = [1, 128], strides = [1, 1]} : vector<16x128xf32> to vector<1x128xf32>
    %c4_1238 = arith.constant 4 : index
    %c0_1239 = arith.constant 0 : index
    %1986 = vector.load %arg2[%c4_1238, %c0_1239] : memref<16x128xf32, #tpu.memory_space<vmem>>, vector<1x128xf32>
    %1987 = arith.mulf %1985, %1986 : vector<1x128xf32>
    %1988 = vector.broadcast %1987 : vector<1x128xf32> to vector<16x128xf32>
    %1989 = arith.mulf %1988, %1984 : vector<16x128xf32>
    %1990 = arith.addf %1982, %1989 : vector<16x128xf32>
    %c5_1240 = arith.constant 5 : index
    %c0_1241 = arith.constant 0 : index
    %c0_1242 = arith.constant 0 : index
    %1991 = vector.load %arg1[%c5_1240, %c0_1241, %c0_1242] : memref<16x16x128xf32, #tpu.memory_space<vmem>>, vector<1x16x128xf32>
    %1992 = vector.shape_cast %1991 : vector<1x16x128xf32> to vector<16x128xf32>
    %1993 = vector.extract_strided_slice %1992 {offsets = [15, 0], sizes = [1, 128], strides = [1, 1]} : vector<16x128xf32> to vector<1x128xf32>
    %c5_1243 = arith.constant 5 : index
    %c0_1244 = arith.constant 0 : index
    %1994 = vector.load %arg2[%c5_1243, %c0_1244] : memref<16x128xf32, #tpu.memory_space<vmem>>, vector<1x128xf32>
    %1995 = arith.mulf %1993, %1994 : vector<1x128xf32>
    %1996 = vector.broadcast %1995 : vector<1x128xf32> to vector<16x128xf32>
    %1997 = arith.mulf %1996, %1992 : vector<16x128xf32>
    %1998 = arith.addf %1990, %1997 : vector<16x128xf32>
    %c6_1245 = arith.constant 6 : index
    %c0_1246 = arith.constant 0 : index
    %c0_1247 = arith.constant 0 : index
    %1999 = vector.load %arg1[%c6_1245, %c0_1246, %c0_1247] : memref<16x16x128xf32, #tpu.memory_space<vmem>>, vector<1x16x128xf32>
    %2000 = vector.shape_cast %1999 : vector<1x16x128xf32> to vector<16x128xf32>
    %2001 = vector.extract_strided_slice %2000 {offsets = [15, 0], sizes = [1, 128], strides = [1, 1]} : vector<16x128xf32> to vector<1x128xf32>
    %c6_1248 = arith.constant 6 : index
    %c0_1249 = arith.constant 0 : index
    %2002 = vector.load %arg2[%c6_1248, %c0_1249] : memref<16x128xf32, #tpu.memory_space<vmem>>, vector<1x128xf32>
    %2003 = arith.mulf %2001, %2002 : vector<1x128xf32>
    %2004 = vector.broadcast %2003 : vector<1x128xf32> to vector<16x128xf32>
    %2005 = arith.mulf %2004, %2000 : vector<16x128xf32>
    %2006 = arith.addf %1998, %2005 : vector<16x128xf32>
    %c7_1250 = arith.constant 7 : index
    %c0_1251 = arith.constant 0 : index
    %c0_1252 = arith.constant 0 : index
    %2007 = vector.load %arg1[%c7_1250, %c0_1251, %c0_1252] : memref<16x16x128xf32, #tpu.memory_space<vmem>>, vector<1x16x128xf32>
    %2008 = vector.shape_cast %2007 : vector<1x16x128xf32> to vector<16x128xf32>
    %2009 = vector.extract_strided_slice %2008 {offsets = [15, 0], sizes = [1, 128], strides = [1, 1]} : vector<16x128xf32> to vector<1x128xf32>
    %c7_1253 = arith.constant 7 : index
    %c0_1254 = arith.constant 0 : index
    %2010 = vector.load %arg2[%c7_1253, %c0_1254] : memref<16x128xf32, #tpu.memory_space<vmem>>, vector<1x128xf32>
    %2011 = arith.mulf %2009, %2010 : vector<1x128xf32>
    %2012 = vector.broadcast %2011 : vector<1x128xf32> to vector<16x128xf32>
    %2013 = arith.mulf %2012, %2008 : vector<16x128xf32>
    %2014 = arith.addf %2006, %2013 : vector<16x128xf32>
    %c8_1255 = arith.constant 8 : index
    %c0_1256 = arith.constant 0 : index
    %c0_1257 = arith.constant 0 : index
    %2015 = vector.load %arg1[%c8_1255, %c0_1256, %c0_1257] : memref<16x16x128xf32, #tpu.memory_space<vmem>>, vector<1x16x128xf32>
    %2016 = vector.shape_cast %2015 : vector<1x16x128xf32> to vector<16x128xf32>
    %2017 = vector.extract_strided_slice %2016 {offsets = [15, 0], sizes = [1, 128], strides = [1, 1]} : vector<16x128xf32> to vector<1x128xf32>
    %c8_1258 = arith.constant 8 : index
    %c0_1259 = arith.constant 0 : index
    %2018 = vector.load %arg2[%c8_1258, %c0_1259] : memref<16x128xf32, #tpu.memory_space<vmem>>, vector<1x128xf32>
    %2019 = arith.mulf %2017, %2018 : vector<1x128xf32>
    %2020 = vector.broadcast %2019 : vector<1x128xf32> to vector<16x128xf32>
    %2021 = arith.mulf %2020, %2016 : vector<16x128xf32>
    %2022 = arith.addf %2014, %2021 : vector<16x128xf32>
    %c9_1260 = arith.constant 9 : index
    %c0_1261 = arith.constant 0 : index
    %c0_1262 = arith.constant 0 : index
    %2023 = vector.load %arg1[%c9_1260, %c0_1261, %c0_1262] : memref<16x16x128xf32, #tpu.memory_space<vmem>>, vector<1x16x128xf32>
    %2024 = vector.shape_cast %2023 : vector<1x16x128xf32> to vector<16x128xf32>
    %2025 = vector.extract_strided_slice %2024 {offsets = [15, 0], sizes = [1, 128], strides = [1, 1]} : vector<16x128xf32> to vector<1x128xf32>
    %c9_1263 = arith.constant 9 : index
    %c0_1264 = arith.constant 0 : index
    %2026 = vector.load %arg2[%c9_1263, %c0_1264] : memref<16x128xf32, #tpu.memory_space<vmem>>, vector<1x128xf32>
    %2027 = arith.mulf %2025, %2026 : vector<1x128xf32>
    %2028 = vector.broadcast %2027 : vector<1x128xf32> to vector<16x128xf32>
    %2029 = arith.mulf %2028, %2024 : vector<16x128xf32>
    %2030 = arith.addf %2022, %2029 : vector<16x128xf32>
    %c10_1265 = arith.constant 10 : index
    %c0_1266 = arith.constant 0 : index
    %c0_1267 = arith.constant 0 : index
    %2031 = vector.load %arg1[%c10_1265, %c0_1266, %c0_1267] : memref<16x16x128xf32, #tpu.memory_space<vmem>>, vector<1x16x128xf32>
    %2032 = vector.shape_cast %2031 : vector<1x16x128xf32> to vector<16x128xf32>
    %2033 = vector.extract_strided_slice %2032 {offsets = [15, 0], sizes = [1, 128], strides = [1, 1]} : vector<16x128xf32> to vector<1x128xf32>
    %c10_1268 = arith.constant 10 : index
    %c0_1269 = arith.constant 0 : index
    %2034 = vector.load %arg2[%c10_1268, %c0_1269] : memref<16x128xf32, #tpu.memory_space<vmem>>, vector<1x128xf32>
    %2035 = arith.mulf %2033, %2034 : vector<1x128xf32>
    %2036 = vector.broadcast %2035 : vector<1x128xf32> to vector<16x128xf32>
    %2037 = arith.mulf %2036, %2032 : vector<16x128xf32>
    %2038 = arith.addf %2030, %2037 : vector<16x128xf32>
    %c11_1270 = arith.constant 11 : index
    %c0_1271 = arith.constant 0 : index
    %c0_1272 = arith.constant 0 : index
    %2039 = vector.load %arg1[%c11_1270, %c0_1271, %c0_1272] : memref<16x16x128xf32, #tpu.memory_space<vmem>>, vector<1x16x128xf32>
    %2040 = vector.shape_cast %2039 : vector<1x16x128xf32> to vector<16x128xf32>
    %2041 = vector.extract_strided_slice %2040 {offsets = [15, 0], sizes = [1, 128], strides = [1, 1]} : vector<16x128xf32> to vector<1x128xf32>
    %c11_1273 = arith.constant 11 : index
    %c0_1274 = arith.constant 0 : index
    %2042 = vector.load %arg2[%c11_1273, %c0_1274] : memref<16x128xf32, #tpu.memory_space<vmem>>, vector<1x128xf32>
    %2043 = arith.mulf %2041, %2042 : vector<1x128xf32>
    %2044 = vector.broadcast %2043 : vector<1x128xf32> to vector<16x128xf32>
    %2045 = arith.mulf %2044, %2040 : vector<16x128xf32>
    %2046 = arith.addf %2038, %2045 : vector<16x128xf32>
    %c12_1275 = arith.constant 12 : index
    %c0_1276 = arith.constant 0 : index
    %c0_1277 = arith.constant 0 : index
    %2047 = vector.load %arg1[%c12_1275, %c0_1276, %c0_1277] : memref<16x16x128xf32, #tpu.memory_space<vmem>>, vector<1x16x128xf32>
    %2048 = vector.shape_cast %2047 : vector<1x16x128xf32> to vector<16x128xf32>
    %2049 = vector.extract_strided_slice %2048 {offsets = [15, 0], sizes = [1, 128], strides = [1, 1]} : vector<16x128xf32> to vector<1x128xf32>
    %c12_1278 = arith.constant 12 : index
    %c0_1279 = arith.constant 0 : index
    %2050 = vector.load %arg2[%c12_1278, %c0_1279] : memref<16x128xf32, #tpu.memory_space<vmem>>, vector<1x128xf32>
    %2051 = arith.mulf %2049, %2050 : vector<1x128xf32>
    %2052 = vector.broadcast %2051 : vector<1x128xf32> to vector<16x128xf32>
    %2053 = arith.mulf %2052, %2048 : vector<16x128xf32>
    %2054 = arith.addf %2046, %2053 : vector<16x128xf32>
    %c13_1280 = arith.constant 13 : index
    %c0_1281 = arith.constant 0 : index
    %c0_1282 = arith.constant 0 : index
    %2055 = vector.load %arg1[%c13_1280, %c0_1281, %c0_1282] : memref<16x16x128xf32, #tpu.memory_space<vmem>>, vector<1x16x128xf32>
    %2056 = vector.shape_cast %2055 : vector<1x16x128xf32> to vector<16x128xf32>
    %2057 = vector.extract_strided_slice %2056 {offsets = [15, 0], sizes = [1, 128], strides = [1, 1]} : vector<16x128xf32> to vector<1x128xf32>
    %c13_1283 = arith.constant 13 : index
    %c0_1284 = arith.constant 0 : index
    %2058 = vector.load %arg2[%c13_1283, %c0_1284] : memref<16x128xf32, #tpu.memory_space<vmem>>, vector<1x128xf32>
    %2059 = arith.mulf %2057, %2058 : vector<1x128xf32>
    %2060 = vector.broadcast %2059 : vector<1x128xf32> to vector<16x128xf32>
    %2061 = arith.mulf %2060, %2056 : vector<16x128xf32>
    %2062 = arith.addf %2054, %2061 : vector<16x128xf32>
    %c14_1285 = arith.constant 14 : index
    %c0_1286 = arith.constant 0 : index
    %c0_1287 = arith.constant 0 : index
    %2063 = vector.load %arg1[%c14_1285, %c0_1286, %c0_1287] : memref<16x16x128xf32, #tpu.memory_space<vmem>>, vector<1x16x128xf32>
    %2064 = vector.shape_cast %2063 : vector<1x16x128xf32> to vector<16x128xf32>
    %2065 = vector.extract_strided_slice %2064 {offsets = [15, 0], sizes = [1, 128], strides = [1, 1]} : vector<16x128xf32> to vector<1x128xf32>
    %c14_1288 = arith.constant 14 : index
    %c0_1289 = arith.constant 0 : index
    %2066 = vector.load %arg2[%c14_1288, %c0_1289] : memref<16x128xf32, #tpu.memory_space<vmem>>, vector<1x128xf32>
    %2067 = arith.mulf %2065, %2066 : vector<1x128xf32>
    %2068 = vector.broadcast %2067 : vector<1x128xf32> to vector<16x128xf32>
    %2069 = arith.mulf %2068, %2064 : vector<16x128xf32>
    %2070 = arith.addf %2062, %2069 : vector<16x128xf32>
    %c15_1290 = arith.constant 15 : index
    %c0_1291 = arith.constant 0 : index
    %c0_1292 = arith.constant 0 : index
    %2071 = vector.load %arg1[%c15_1290, %c0_1291, %c0_1292] : memref<16x16x128xf32, #tpu.memory_space<vmem>>, vector<1x16x128xf32>
    %2072 = vector.shape_cast %2071 : vector<1x16x128xf32> to vector<16x128xf32>
    %2073 = vector.extract_strided_slice %2072 {offsets = [15, 0], sizes = [1, 128], strides = [1, 1]} : vector<16x128xf32> to vector<1x128xf32>
    %c15_1293 = arith.constant 15 : index
    %c0_1294 = arith.constant 0 : index
    %2074 = vector.load %arg2[%c15_1293, %c0_1294] : memref<16x128xf32, #tpu.memory_space<vmem>>, vector<1x128xf32>
    %2075 = arith.mulf %2073, %2074 : vector<1x128xf32>
    %2076 = vector.broadcast %2075 : vector<1x128xf32> to vector<16x128xf32>
    %2077 = arith.mulf %2076, %2072 : vector<16x128xf32>
    %2078 = arith.addf %2070, %2077 : vector<16x128xf32>
    %c240 = arith.constant 240 : index
    %c0_1295 = arith.constant 0 : index
    %2079 = vector.load %arg6[%c240, %c0_1295] : memref<256x128xf32, #tpu.memory_space<vmem>>, vector<16x128xf32>
    tpu.vector_store %arg6[%c240, %c0_1295], %2078 {strides = array<i32>} : memref<256x128xf32, #tpu.memory_space<vmem>>, vector<16x128xf32>,
    %c0_1296 = arith.constant 0 : index
    %c0_1297 = arith.constant 0 : index
    %2080 = vector.load %arg3[%c0_1296, %c0_1297] : memref<128x256xf32, #tpu.memory_space<vmem>>, vector<128x256xf32>
    %c0_1298 = arith.constant 0 : index
    %c0_1299 = arith.constant 0 : index
    %2081 = vector.load %arg6[%c0_1298, %c0_1299] : memref<256x128xf32, #tpu.memory_space<vmem>>, vector<256x128xf32>
    %cst_1300 = arith.constant dense<0.000000e+00> : vector<128x128xf32>
    %2082 = tpu.matmul %2080, %2081, %cst_1300 {dimension_numbers = #tpu.dot_dimension_numbers<[1], [0], [0], [1], [0, 0, 1, 1], [], []>} : vector<128x256xf32>, vector<256x128xf32>, vector<128x128xf32> -> vector<128x128xf32>
    %c0_1301 = arith.constant 0 : index
    %c0_1302 = arith.constant 0 : index
    %2083 = vector.load %arg4[%c0_1301, %c0_1302] : memref<128x1xf32, #tpu.memory_space<vmem>>, vector<128x1xf32>
    %2084 = vector.broadcast %2083 : vector<128x1xf32> to vector<128x128xf32>
    %2085 = arith.subf %2082, %2084 : vector<128x128xf32>
    %c0_1303 = arith.constant 0 : index
    %c0_1304 = arith.constant 0 : index
    %2086 = vector.load %arg5[%c0_1303, %c0_1304] : memref<128x128xf32, #tpu.memory_space<vmem>>, vector<128x128xf32>
    tpu.vector_store %arg5[%c0_1303, %c0_1304], %2085 {strides = array<i32>} : memref<128x128xf32, #tpu.memory_space<vmem>>, vector<128x128xf32>,
    return
  }
  func.func @transform_0(%arg0: i32) -> (i32, i32, i32) {
    %c0_i32 = arith.constant 0 : i32
    %c0_i32_0 = arith.constant 0 : i32
    %c0_i32_1 = arith.constant 0 : i32
    return %c0_i32, %c0_i32_0, %arg0 : i32, i32, i32
  }
  func.func @transform_1(%arg0: i32) -> (i32, i32) {
    %c0_i32 = arith.constant 0 : i32
    %c0_i32_0 = arith.constant 0 : i32
    return %c0_i32, %arg0 : i32, i32
  }
  func.func @transform_2(%arg0: i32) -> (i32, i32) {
    %c0_i32 = arith.constant 0 : i32
    %c0_i32_0 = arith.constant 0 : i32
    %c0_i32_1 = arith.constant 0 : i32
    return %c0_i32, %c0_i32_0 : i32, i32
  }
  func.func @transform_3(%arg0: i32) -> (i32, i32) {
    %c0_i32 = arith.constant 0 : i32
    %c0_i32_0 = arith.constant 0 : i32
    %c0_i32_1 = arith.constant 0 : i32
    return %c0_i32, %c0_i32_0 : i32, i32
  }
  func.func @transform_4(%arg0: i32) -> (i32, i32) {
    %c0_i32 = arith.constant 0 : i32
    %c0_i32_0 = arith.constant 0 : i32
    return %c0_i32, %arg0 : i32, i32
  }
}

</mosaic_0001>

<bundles_post_ra>
// kernel: tpu_custom_call.1
= control target key start
LH: loop header
LB: loop body
LE: loop exit
PB: predicated region body
PF: predicated region fallthrough
CT: control target
= control target key end

     0   :  { %9 = vsyncpa [#allocation4], 0  ;;  %s8573_s0 = inlined_call_operand.hbm [shape: f32[16,16,256], index: 0, kind: input, shape index: {}]   ;;  %s8574_s1 = inlined_call_operand.vmem [shape: f32[16,256], index: 1, kind: input, shape index: {}]   ;;  %s8575_s2 = inlined_call_operand.hbm [shape: f32[128,256], index: 2, kind: input, shape index: {}]   ;;  %s8576_s3 = inlined_call_operand.vmem [shape: f32[128,1], index: 3, kind: input, shape index: {}]   ;;  %s8577_s4 = inlined_call_operand.hbm [shape: f32[128,256], index: 4, kind: output, shape index: {}]  }
   0x1   :  { %11 = vsyncpa [#allocation4 + $0x1], 0 }
   0x2   :  { %12 = vsyncpa [#allocation8], 0 }
   0x3   :  { %13 = vsyncpa [#allocation5], 0 }
   0x4   :  { %15 = vsyncpa [#allocation5 + $0x1], 0  ;;  %s5362_s15 = smov 0   ;;  %s5364_s16 = smov 0  }
   0x5   :  { %s5366_s17 = smov 0   ;;  %s5368_s18 = smov 0  }
   0x6 LB: > { %s5383_s19 = sadd.s32 4294967295, %s5323_s18   ;;  %s4531_s20 = sadd.s32 4294967294, %s5323_s18   ;;  %s5323_s18 = sphi %s5368_s18, %s9106_s18   ;;  %s5319_s17 = sphi %s5366_s17, %s9105_s17   ;;  %s5315_s16 = sphi %s5364_s16, %s9104_s16   ;;  %s5311_s15 = sphi %s5362_s15, %s9103_s15  }
   0x7   : > { %s5387_s21 = sadd.s32 1, %s5323_s18   ;;  %s28_s22 = sadd.s32 1, %s5319_s17 }
   0x8   : > { %s25_s23 = ssub.s32 %s5323_s18, %s5387_s21  ;;  %p35_p0 = scmp.ne.s32.totalorder %s5319_s17, %s5315_s16 }
   0x9   : > { %p26_p1 = scmp.eq.s32.totalorder %s25_s23, 0  ;;  %p36_p2 = scmp.eq.s32.totalorder %s5323_s18, 0 }
   0xa   : > { %p41_p3 = scmp.ne.s32.totalorder %s5315_s16, %s5311_s15  ;;  %p8581_p4 = scmp.eq.s32.totalorder %s5383_s19, 0 }
   0xb   : > { %s5399_s24 = scalar_select %p26_p1, %s5319_s17, %s28_s22  }
   0xc   : > { %p5401_p5 = por %p36_p2, %p35_p0  ;;  %p5407_p6 = por %p8581_p4, %p41_p3 }
   0xd   : > { %p133_p7 = scmp.eq.s32.totalorder %s5383_s19, 1  ;;  %p139_p8 = scmp.eq.s32.totalorder %s4531_s20, 1 }
   0xe   : > { %s8801_s26 = scalar_select %p5407_p6, 1, 0 }
   0xf   : > { %p4532_p9 = scmp.ge.s32.totalorder %s5323_s18, 1  ;;  %p146_p10 = scmp.lt.s32.totalorder %s5323_s18, 3 }
  0x10   : > { %p5414_p11 = por %p133_p7, %p35_p0  ;;  %p5418_p12 = por %p139_p8, %p41_p3 }
  0x11   : > { %p5422_p13 = pnand %p4532_p9, %p146_p10  ;;  %s5325_s30 = smov [#allocation7]  }
  0x12   : > { %s8802_s27 = scalar_select %p5414_p11, 1, 0 }
  0x13   : > { %s8803_s28 = scalar_select %p5418_p12, 1, 0 }
  0x14   : > { %p5148_p1 = pneg %p5422_p13  ;;  %s158_s5 = sshll.u32 %s5325_s30, 4  ;;  %s159_s5 = int_to_ptr.vmem [resolvable:$true] %s158_s5 }
  0x15   : > { %s5214_s6 = scalar_lea.vmem %s159_s5, 4096  ;;  %p5222_p8 = scmp.lt.s32.totalorder %s159_s5, %s159_s5 }
  0x16   : > { %p5149_p2 = pnand %p5148_p1, %p8581_p4  ;;  %p5215_p7 = scmp.ne.s32.totalorder %s159_s5, %s5214_s6 }
  0x17   : > { %p5223_p6 = scmp.lt.s32.totalorder %s5214_s6, %s5214_s6 }
  0x18   : > { %p5205_p0 = pneg %p5149_p2 }
  0x19   : > { %p5224_p12 = por %p5223_p6, %p5222_p8 }
  0x1a   : > { %p5217_p11 = pnand %p5215_p7, %p5205_p0 }
  0x1c   : > { %p5218_p3 = pneg %p5217_p11 }
  0x1e   : > { %p5225_p9 = pnand %p5224_p12, %p5218_p3 }
  0x20   : > { %5228 = shalt.err (!%p5225_p9)
}
  0x21   : > { %s5326_s7 = smov 256   ;;  %s5327_s8 = smov 16  }
  0x22   : > { %5151 = dma.hbm_to_vmem [thread:$0]  (!%p5149_p2), %s8575_s2, 4096, %s159_s5, [#allocation8], %s5326_s7, %s5326_s7, %s5327_s8  }
  0x23   : > { %p8580_p10 = scmp.ge.s32.totalorder %s5323_s18, 2 }
  0x24   : > { %s5437_s11 = sand.u32 (!%p8580_p10), 1, %s5319_s17   ;;  %s4536_s12 = sshll.u32 (!%p8580_p10), %s5323_s18, 7 }
  0x25   : > { %171 = sbr.rel (%p8580_p10) target bundleno = 67 (0x43), region = 24  ;;  %s4535_s13 = sshll.u32 (!%p8580_p10), %s5437_s11, 8 }
  0x26   : > { %s5444_s22 = scalar_lea.hbm (!%p8580_p10), %s8573_s0, %s4536_s12  ;;  %s179_s23 = scalar_lea.vmem (!%p8580_p10), [#allocation3], %s4535_s13 }
  0x27   : > { %s185_s30 = sshll.u32 (!%p8580_p10), %s179_s23, 4  ;;  %s176_s5 = scalar_lea.sflag (!%p8580_p10), [#allocation4], %s5437_s11  ;;  %s5446_s30 = int_to_ptr.vmem [resolvable:$true] %s185_s30 }
  0x28   : > { %s5229_s6 = scalar_lea.hbm (!%p8580_p10), %s5444_s22, 4096  ;;  %s5233_s9 = scalar_lea.hbm (!%p8580_p10), %s8573_s0, 8192 }
  0x29   : > { %p5230_p6 = scmp.ne.s32.totalorder (!%p8580_p10), %s5444_s22, %s5229_s6  ;;  %p5234_p1 = scmp.lt.s32.totalorder (!%p8580_p10), %s5444_s22, %s8573_s0 }
  0x2a   : > { %p5235_p2 = scmp.lt.s32.totalorder %s5233_s9, %s5229_s6 }
  0x2b   : > { %p5231_p11 = pnand %p5230_p6, %p5401_p5 }
  0x2c   : > { %p5236_p0 = por %p5235_p2, %p5234_p1 }
  0x2d   : > { %p5232_p12 = pneg %p5231_p11 }
  0x2f   : > { %p5237_p7 = pnand %p5236_p0, %p5232_p12 }
  0x31   : > { %5240 = shalt.err (!%p5237_p7)
}
  0x32   : > { %s5241_s13 = scalar_lea.vmem %s5446_s30, 4096  ;;  %s5328_s14 = smov [#allocation3]  }
  0x33   : > { %p5242_p3 = scmp.ne.s32.totalorder %s5446_s30, %s5241_s13  ;;  %s5245_s20 = sshll.u32 %s5328_s14, 4  ;;  %s5246_s20 = int_to_ptr.vmem [resolvable:$false] %s5245_s20 }
  0x34   : > { %s5247_s23 = scalar_lea.vmem %s5246_s20, 8192  ;;  %p5248_p6 = scmp.lt.s32.totalorder %s5446_s30, %s5246_s20 }
  0x35   : > { %p5243_p8 = pnand %p5242_p3, %p5401_p5  ;;  %p5249_p11 = scmp.lt.s32.totalorder %s5247_s23, %s5241_s13 }
  0x37   : > { %p5244_p9 = pneg %p5243_p8  ;;  %p5250_p10 = por %p5249_p11, %p5248_p6 }
  0x39   : > { %p5251_p4 = pnand %p5250_p10, %p5244_p9 }
  0x3b   : > { %5254 = shalt.err (!%p5251_p4)
}
  0x3c   : > { %s5329_s6 = smov 256   ;;  %s5330_s7 = smov 128  }
  0x3d   : > { %s5331_s8 = smov 8   ;;  %194 = sbr.rel (!%p5401_p5) target bundleno = 67 (0x43), region = 32 }
  0x3e   : > { %5142 = dma.hbm_to_vmem [thread:$0]  (%p5401_p5), %s5444_s22, 4096, %s5446_s30, %s176_s5, %s5329_s6, %s5330_s7, %s5331_s8  }
  0x3f   : > { %s4537_s9 = sshll.u32 (%p5401_p5), %s5437_s11, 4  ;;  %s4538_s10 = sshll.u32 (%p5401_p5), %s5323_s18, 3 }
  0x40   : > { %s200_s14 = scalar_lea.vmem (%p5401_p5), %s8574_s1, %s4538_s10  ;;  %s198_s20 = scalar_lea.vmem (%p5401_p5), [#allocation6], %s4537_s9 }
  0x41   : > { %v231_v0 = vld [vmem:[%s200_s14] sm:$0xff] (%p5401_p5)  ;;  %v233_v1 = vld [vmem:[%s200_s14 + $0x10] sm:$0xff] (%p5401_p5) }
  0x42   : > { %232 = vst [vmem:[%s198_s20] sm:$0xff] %v231_v0  ;;  %234 = vst [vmem:[%s198_s20 + $0x8] sm:$0xff] %v233_v1 }
  0x43 PF: > { %243 = sbr.rel (%p5422_p13) target bundleno = 776 (0x308), region = 70 }
  0x48   : > { %s5481_s25 = sand.u32 1, %s5315_s16   ;;  %p8805_p4 = scmp.ne.s32.totalorder %s8801_s26, 0 }
  0x49   : > { %s4540_s11 = sshll.u32 %s5481_s25, 8  ;;  %s246_s22 = scalar_lea.sflag [#allocation4], %s5481_s25 }
  0x4a   : > { %s5485_s30 = scalar_lea.vmem [#allocation3], %s4540_s11 }
  0x4b   : > { %5298 = dma.done.wait (%p8805_p4), %s246_s22, 4096  }
  0x4c   : > { %5300 = vsyncadd (%p8805_p4), %s246_s22, 4294963200  ;;  %s4541_s5 = sshll.u32 %s5481_s25, 4  ;;  %p8806_p5 = scmp.eq.s32.totalorder %s5383_s19, 0 }
  0x4d   : > { %s5492_s29 = scalar_lea.vmem [#allocation6], %s4541_s5 }
  0x4e   : > { %5302 = dma.done.wait (%p8806_p5), [#allocation8], 4096   ;;  %p8807_p13 = pmov %p8806_p5 }
  0x4f   : > { %v293_v2 = vlaneseq  ;;  %v5504_v5 = vld [vmem:[%s5485_s30 + $0x8] sm:$0xff]  ;;  %v3840_v6 = vld [vmem:[%s5492_s29] sm:$0x1]  ;;  %v5508_v7 = vld [vmem:[%s5485_s30 + $0x18] sm:$0xff]  ;;  %s5025_s7 = sshll.u32 %s5383_s19, 7  ;;  %s4418_s19 = scalar_lea.sflag [#allocation5], %s5481_s25 }
  0x50   : > { %5304 = vsyncadd (%p8807_p13), [#allocation8], 4294963200  ;;  %8809 = vst [vmem:[#allocation14_spill] sm:$0xff] %v5504_v5  ;;  %v3842_v8 = vrot.slane %v3840_v6, 1  ;;  %v3855_v9 = vld [vmem:[%s5492_s29 + $0x1] sm:$0x1]  ;;  %s8525_s12 = scalar_lea.hbm %s8577_s4, %s5025_s7 }
  0x51   : > { %v5498_v3 = vshrl.u32 %v293_v2, 7  ;;  %8810 = vst [vmem:[#allocation15_spill] sm:$0xff] %v5508_v7  ;;  %v5512_v10 = vld [vmem:[%s5485_s30 + $0x28] sm:$0xff]  ;;  %v3870_v11 = vld [vmem:[%s5492_s29 + $0x2] sm:$0x1]  ;;  %v3857_v12 = vrot.slane %v3855_v9, 1 }
  0x52   : > { %8811 = vst [vmem:[#allocation16_spill] sm:$0xff] %v5512_v10  ;;  %v3872_v13 = vrot.slane %v3870_v11, 1  ;;  %v5516_v14 = vld [vmem:[%s5485_s30 + $0x38] sm:$0xff]  ;;  %v3885_v15 = vld [vmem:[%s5492_s29 + $0x3] sm:$0x1]  ;;  %v5520_v16 = vld [vmem:[%s5485_s30 + $0x48] sm:$0xff]  ;;  %v3844_v17 = vmul.f32 %v3842_v8, %v5504_v5 }
  0x53   : > { %8808 = vst [vmem:[#allocation13_spill] sm:$0xff] %v5498_v3  ;;  %v5501_v4 = vsub.s32 7, %v5498_v3  ;;  %8812 = vst [vmem:[#allocation17_spill] sm:$0xff] %v5516_v14  ;;  %v3887_v18 = vrot.slane %v3885_v15, 1  ;;  %v3900_v19 = vld [vmem:[%s5492_s29 + $0x4] sm:$0x1]  ;;  %v3859_v22 = vmul.f32 %v5508_v7, %v3857_v12 }
  0x54   : > { %8813 = vst [vmem:[#allocation18_spill] sm:$0xff] %v5520_v16  ;;  %v5525_v20 = vld [vmem:[%s5485_s30 + $0x58] sm:$0xff]  ;;  %v3915_v21 = vld [vmem:[%s5492_s29 + $0x5] sm:$0x1]  ;;  %v3874_v23 = vmul.f32 %v5512_v10, %v3872_v13  ;;  %v3902_v24 = vrot.slane %v3900_v19, 1  ;;  %v5531_v26 = vld [vmem:[%s5485_s30 + $0x68] sm:$0xff] }
  0x55   : > { %8814 = vst [vmem:[#allocation19_spill] sm:$0xff] %v5525_v20  ;;  %v3917_v25 = vrot.slane %v3915_v21, 1  ;;  %8815 = vst [vmem:[#allocation20_spill] sm:$0xff] %v5531_v26  ;;  %v3930_v27 = vld [vmem:[%s5492_s29 + $0x6] sm:$0x1]  ;;  %v5535_v28 = vrot.slane %v3844_v17, %v5501_v4  ;;  %v3889_v29 = vmul.f32 %v5516_v14, %v3887_v18  ;;  %v5540_v32 = vsub.s32 6, %v5498_v3 }
  0x56   : > { %v3932_v30 = vrot.slane %v3930_v27, 1  ;;  %v3945_v31 = vld [vmem:[%s5492_s29 + $0x7] sm:$0x1]  ;;  %v5543_v33 = vrot.slane %v3859_v22, %v5501_v4  ;;  %v5546_v34 = vrot.slane %v3874_v23, %v5501_v4  ;;  %v3904_v35 = vmul.f32 %v5520_v16, %v3902_v24  ;;  %v5551_v37 = vld [vmem:[%s5485_s30 + $0x78] sm:$0xff]  ;;  %v5572_v48 = vld [vmem:[%s5485_s30 + $0x88] sm:$0xff]  ;;  %p9100_p12 = scmp.ne.s32.totalorder %s8802_s27, 0 }
  0x57   : > { %8816 = vst [vmem:[#allocation21_spill] sm:$0xff] %v5540_v32  ;;  %v3919_v36 = vmul.f32 %v5525_v20, %v3917_v25  ;;  %8817 = vst [vmem:[#allocation22_spill] sm:$0xff] %v5551_v37  ;;  %v3960_v38 = vld [vmem:[%s5492_s29 + $0x8] sm:$0x1]  ;;  %v3850_v39 = vmul.f32 %v5535_v28, %v5504_v5  ;;  %v5557_v40 = vrot.slane %v3889_v29, %v5501_v4  ;;  %v3947_v42 = vrot.slane %v3945_v31, 1  ;;  %s5333_s14 = smov [#allocation9]  }
  0x58   : > { %v3934_v41 = vmul.f32 %v5531_v26, %v3932_v30  ;;  %v3975_v43 = vld [vmem:[%s5492_s29 + $0x9] sm:$0x1]  ;;  %v3865_v44 = vmul.f32 %v5508_v7, %v5543_v33  ;;  %v3880_v45 = vmul.f32 %v5512_v10, %v5546_v34  ;;  %v5566_v46 = vrot.slane %v3904_v35, %v5501_v4  ;;  %8818 = vst [vmem:[#allocation23_spill] sm:$0xff] %v5572_v48  ;;  %v3990_v49 = vld [vmem:[%s5492_s29 + $0xa] sm:$0x1]  ;;  %s5259_s20 = sshll.u32 %s5333_s14, 4  ;;  %s5260_s20 = int_to_ptr.vmem [resolvable:$false] %s5259_s20 }
  0x59   : > { %v5569_v47 = vrot.slane %v3919_v36, %v5501_v4  ;;  %v3895_v50 = vmul.f32 %v5516_v14, %v5557_v40  ;;  %v3949_v52 = vmul.f32 %v5551_v37, %v3947_v42  ;;  %v3962_v53 = vrot.slane %v3960_v38, 1  ;;  %v5582_v54 = vld [vmem:[%s5485_s30 + $0x98] sm:$0xff]  ;;  %v5591_v61 = vld [vmem:[%s5485_s30 + $0xa8] sm:$0xff]  ;;  %s5261_s11 = scalar_lea.vmem %s5260_s20, 4096 }
  0x5a   : > { %v5578_v51 = vrot.slane %v3934_v41, %v5501_v4  ;;  %8819 = vst [vmem:[#allocation24_spill] sm:$0xff] %v5582_v54  ;;  %v4005_v55 = vld [vmem:[%s5492_s29 + $0xb] sm:$0x1]  ;;  %v4020_v56 = vld [vmem:[%s5492_s29 + $0xc] sm:$0x1]  ;;  %v3867_v57 = vadd.f32 %v3865_v44, %v3850_v39  ;;  %v3910_v58 = vmul.f32 %v5520_v16, %v5566_v46  ;;  %v3977_v60 = vrot.slane %v3975_v43, 1 }
  0x5b   : > { %v3925_v59 = vmul.f32 %v5525_v20, %v5569_v47  ;;  %8820 = vst [vmem:[#allocation25_spill] sm:$0xff] %v5591_v61  ;;  %v4035_v62 = vld [vmem:[%s5492_s29 + $0xd] sm:$0x1]  ;;  %v5597_v0 = vrot.slane %v3949_v52, %v5501_v4  ;;  %v3964_v1 = vmul.f32 %v5572_v48, %v3962_v53  ;;  %v3992_v2 = vrot.slane %v3990_v49, 1  ;;  %v4050_v17 = vld [vmem:[%s5492_s29 + $0xe] sm:$0x1] }
  0x5c   : > { %v3940_v63 = vmul.f32 %v5531_v26, %v5578_v51  ;;  %v5601_v6 = vld [vmem:[%s5485_s30 + $0xb8] sm:$0xff]  ;;  %v5604_v8 = vld [vmem:[%s5485_s30 + $0xc8] sm:$0xff]  ;;  %v3882_v9 = vadd.f32 %v3880_v45, %v3867_v57  ;;  %v3979_v11 = vmul.f32 %v5582_v54, %v3977_v60  ;;  %v4007_v12 = vrot.slane %v4005_v55, 1  ;;  %v1952_v39 = vld [vmem:[%s5492_s29] sm:$0x1] }
  0x5d   : > { %v4022_v13 = vrot.slane %v4020_v56, 1  ;;  %v5608_v15 = vld [vmem:[%s5485_s30 + $0xd8] sm:$0xff]  ;;  %v3955_v18 = vmul.f32 %v5551_v37, %v5597_v0  ;;  %v5614_v19 = vrot.slane %v3964_v1, %v5501_v4  ;;  %v3994_v21 = vmul.f32 %v5591_v61, %v3992_v2  ;;  %v5623_v29 = vld [vmem:[%s5485_s30 + $0xe8] sm:$0xff]  ;;  %v1967_v49 = vld [vmem:[%s5492_s29 + $0x1] sm:$0x1] }
  0x5e   : > { %v4037_v22 = vrot.slane %v4035_v62, 1  ;;  %v3897_v23 = vadd.f32 %v3895_v50, %v3882_v9  ;;  %v5618_v24 = vrot.slane %v3979_v11, %v5501_v4  ;;  %v4009_v25 = vmul.f32 %v5601_v6, %v4007_v12  ;;  %v4065_v30 = vld [vmem:[%s5492_s29 + $0xf] sm:$0x1]  ;;  %v5654_v56 = vld [vmem:[%s5485_s30] sm:$0xff]  ;;  %v5667_v9 = vld [vmem:[%s5485_s30 + $0x10] sm:$0xff] }
  0x5f   : > { %v4024_v27 = vmul.f32 %v5604_v8, %v4022_v13  ;;  %v3970_v31 = vmul.f32 %v5572_v48, %v5614_v19  ;;  %v5629_v35 = vrot.slane %v3994_v21, %v5501_v4  ;;  %v4052_v38 = vrot.slane %v4050_v17, 1  ;;  %v5642_v45 = vld [vmem:[%s5485_s30 + $0xf8] sm:$0xff]  ;;  %v1982_v57 = vld [vmem:[%s5492_s29 + $0x2] sm:$0x1]  ;;  %v2012_v11 = vld [vmem:[%s5492_s29 + $0x4] sm:$0x1] }
  0x60   : > { %v4039_v36 = vmul.f32 %v5608_v15, %v4037_v22  ;;  %v3912_v41 = vadd.f32 %v3910_v58, %v3897_v23  ;;  %v3985_v42 = vmul.f32 %v5582_v54, %v5618_v24  ;;  %v5636_v43 = vrot.slane %v4009_v25, %v5501_v4  ;;  %v1997_v58 = vld [vmem:[%s5492_s29 + $0x3] sm:$0x1] }
  0x61   : > { %v5639_v44 = vrot.slane %v4024_v27, %v5501_v4  ;;  %v5647_v50 = vmul.f32 %v5591_v61, %v5629_v35  ;;  %v4054_v53 = vmul.f32 %v5623_v29, %v4052_v38  ;;  %v4067_v55 = vrot.slane %v4065_v30, 1  ;;  %v5679_v21 = vld [vmem:[%s5485_s30 + $0x20] sm:$0xff]  ;;  %v5682_v22 = vld [vmem:[%s5485_s30 + $0x30] sm:$0xff] }
  0x62   : > { %v5650_v52 = vrot.slane %v4039_v36, %v5501_v4  ;;  %v3927_v60 = vadd.f32 %v3925_v59, %v3912_v41  ;;  %v5660_v62 = vmul.f32 %v5601_v6, %v5636_v43  ;;  %v1954_v2 = vrot.slane %v1952_v39, 1  ;;  %v5686_v36 = vld [vmem:[%s5485_s30 + $0x40] sm:$0xff] }
  0x63   : > { %8821 = vst [vmem:[#allocation26_spill] sm:$0xff] %v5639_v44  ;;  %v5664_v1 = vmul.f32 %v5604_v8, %v5639_v44  ;;  %v5675_v59 = vrot.slane %v4054_v53, %v5501_v4  ;;  %v4069_v13 = vmul.f32 %v5642_v45, %v4067_v55  ;;  %v1969_v17 = vrot.slane %v1967_v49, 1  ;;  %v2027_v38 = vld [vmem:[%s5492_s29 + $0x5] sm:$0x1] }
  0x64   : > { %8822 = vst [vmem:[#allocation27_spill] sm:$0xff] %v5650_v52  ;;  %v5672_v12 = vmul.f32 %v5608_v15, %v5650_v52  ;;  %v3942_v23 = vadd.f32 %v3940_v63, %v3927_v60  ;;  %v1956_v25 = vmul.f32 %v1954_v2, %v5654_v56  ;;  %v1984_v27 = vrot.slane %v1982_v57, 1  ;;  %v5703_v60 = vld [vmem:[%s5485_s30 + $0x50] sm:$0xff]  ;;  %v5749_v44 = vld [vmem:[%s5485_s30 + $0x80] sm:$0xff] }
  0x65   : > { %8823 = vst [vmem:[#allocation28_spill] sm:$0xff] %v5675_v59  ;;  %v1999_v30 = vrot.slane %v1997_v58, 1  ;;  %v5691_v39 = vmul.f32 %v5623_v29, %v5675_v59  ;;  %v5694_v41 = vrot.slane %v4069_v13, %v5501_v4  ;;  %v1971_v49 = vmul.f32 %v5667_v9, %v1969_v17  ;;  %v2042_v2 = vld [vmem:[%s5492_s29 + $0x6] sm:$0x1]  ;;  %8830 = vst [vmem:[#allocation35_spill] sm:$0xff] %v5749_v44 }
  0x66   : > { %v2014_v53 = vrot.slane %v2012_v11, 1  ;;  %v3957_v63 = vadd.f32 %v3955_v18, %v3942_v23  ;;  %v5698_v55 = vrot.slane %v1956_v25, %v5501_v4  ;;  %v1986_v57 = vmul.f32 %v5679_v21, %v1984_v27  ;;  %v2057_v23 = vld [vmem:[%s5492_s29 + $0x7] sm:$0x1] }
  0x67   : > { %8824 = vst [vmem:[#allocation29_spill] sm:$0xff] %v5694_v41  ;;  %v2001_v58 = vmul.f32 %v5682_v22, %v1999_v30  ;;  %v5708_v13 = vmul.f32 %v5642_v45, %v5694_v41  ;;  %v5711_v11 = vrot.slane %v1971_v49, %v5501_v4  ;;  %v2029_v17 = vrot.slane %v2027_v38, 1  ;;  %v5724_v41 = vld [vmem:[%s5485_s30 + $0x60] sm:$0xff] }
  0x68   : > { %8825 = vst [vmem:[#allocation30_spill] sm:$0xff] %v5698_v55  ;;  %v2016_v18 = vmul.f32 %v5686_v36, %v2014_v53  ;;  %v3972_v25 = vadd.f32 %v3970_v31, %v3957_v63  ;;  %v1962_v27 = vmul.f32 %v5504_v5, %v5698_v55  ;;  %v5718_v30 = vrot.slane %v1986_v57, %v5501_v4  ;;  %v5733_v63 = vld [vmem:[%s5485_s30 + $0x70] sm:$0xff]  ;;  %v2072_v57 = vld [vmem:[%s5492_s29 + $0x8] sm:$0x1]  ;;  %v2087_v5 = vld [vmem:[%s5492_s29 + $0x9] sm:$0x1] }
  0x69   : > { %8826 = vst [vmem:[#allocation31_spill] sm:$0xff] %v5711_v11  ;;  %v5721_v32 = vrot.slane %v2001_v58, %v5501_v4  ;;  %v1977_v49 = vmul.f32 %v5508_v7, %v5711_v11  ;;  %v2031_v31 = vmul.f32 %v5703_v60, %v2029_v17  ;;  %v2044_v53 = vrot.slane %v2042_v2, 1  ;;  %8829 = vst [vmem:[#allocation34_spill] sm:$0xff] %v5733_v63 }
  0x6a   : > { %v5729_v38 = vrot.slane %v2016_v18, %v5501_v4  ;;  %v3987_v58 = vadd.f32 %v3985_v42, %v3972_v25  ;;  %v1992_v55 = vmul.f32 %v5512_v10, %v5718_v30  ;;  %v2059_v11 = vrot.slane %v2057_v23, 1  ;;  %v2102_v18 = vld [vmem:[%s5492_s29 + $0xa] sm:$0x1]  ;;  %v5752_v42 = vld [vmem:[%s5485_s30 + $0x90] sm:$0xff] }
  0x6b   : > { %8827 = vst [vmem:[#allocation32_spill] sm:$0xff] %v5721_v32  ;;  %v2007_v7 = vmul.f32 %v5516_v14, %v5721_v32  ;;  %v1979_v59 = vadd.f32 %v1977_v49, %v1962_v27  ;;  %v5745_v2 = vrot.slane %v2031_v31, %v5501_v4  ;;  %v2046_v52 = vmul.f32 %v5724_v41, %v2044_v53  ;;  %v5757_v49 = vld [vmem:[%s5485_s30 + $0xa0] sm:$0xff] }
  0x6c   : > { %8828 = vst [vmem:[#allocation33_spill] sm:$0xff] %v5729_v38  ;;  %v2022_v17 = vmul.f32 %v5520_v16, %v5729_v38  ;;  %8831 = vst [vmem:[#allocation36_spill] sm:$0xff] %v5752_v42  ;;  %v4002_v25 = vadd.f32 %v5647_v50, %v3987_v58  ;;  %v2061_v23 = vmul.f32 %v5733_v63, %v2059_v11  ;;  %v2074_v14 = vrot.slane %v2072_v57, 1  ;;  %v2117_v16 = vld [vmem:[%s5492_s29 + $0xb] sm:$0x1]  ;;  %v5772_v57 = vld [vmem:[%s5485_s30 + $0xb0] sm:$0xff] }
  0x6d   : > { %v2089_v27 = vrot.slane %v2087_v5, 1  ;;  %8832 = vst [vmem:[#allocation37_spill] sm:$0xff] %v5757_v49  ;;  %v1994_v31 = vadd.f32 %v1992_v55, %v1979_v59  ;;  %v2037_v53 = vmul.f32 %v5525_v20, %v5745_v2  ;;  %v5763_v10 = vrot.slane %v2046_v52, %v5501_v4  ;;  %8834 = vst [vmem:[#allocation39_spill] sm:$0xff] %v5772_v57  ;;  %v2132_v59 = vld [vmem:[%s5492_s29 + $0xc] sm:$0x1] }
  0x6e   : > { %v2104_v38 = vrot.slane %v2102_v18, 1  ;;  %v4017_v32 = vadd.f32 %v5660_v62, %v4002_v25  ;;  %v5767_v50 = vrot.slane %v2061_v23, %v5501_v4  ;;  %v2076_v5 = vmul.f32 %v5749_v44, %v2074_v14  ;;  %v2147_v18 = vld [vmem:[%s5492_s29 + $0xd] sm:$0x1] }
  0x6f   : > { %v2091_v11 = vmul.f32 %v5752_v42, %v2089_v27  ;;  %v2009_v55 = vadd.f32 %v2007_v7, %v1994_v31  ;;  %v2052_v52 = vmul.f32 %v5531_v26, %v5763_v10  ;;  %v2119_v62 = vrot.slane %v2117_v16, 1  ;;  %v5789_v7 = vld [vmem:[%s5485_s30 + $0xc0] sm:$0xff]  ;;  %v2177_v26 = vld [vmem:[%s5492_s29 + $0xf] sm:$0x1] }
  0x70   : > { %8833 = vst [vmem:[#allocation38_spill] sm:$0xff] %v5767_v50  ;;  %v2106_v58 = vmul.f32 %v5757_v49, %v2104_v38  ;;  %v4032_v25 = vadd.f32 %v5664_v1, %v4017_v32  ;;  %v2067_v14 = vmul.f32 %v5551_v37, %v5767_v50  ;;  %v5783_v23 = vrot.slane %v2076_v5, %v5501_v4  ;;  %v5796_v1 = vld [vmem:[%s5485_s30 + $0xd0] sm:$0xff]  ;;  %v2162_v37 = vld [vmem:[%s5492_s29 + $0xe] sm:$0x1]  ;;  %v5812_v50 = vld [vmem:[%s5485_s30 + $0xe0] sm:$0xff] }
  0x71   : > { %v5786_v27 = vrot.slane %v2091_v11, %v5501_v4  ;;  %8836 = vst [vmem:[#allocation41_spill] sm:$0xff] %v5789_v7  ;;  %v2024_v31 = vadd.f32 %v2022_v17, %v2009_v55  ;;  %v2121_v16 = vmul.f32 %v5772_v57, %v2119_v62  ;;  %v2134_v32 = vrot.slane %v2132_v59, 1  ;;  %8838 = vst [vmem:[#allocation43_spill] sm:$0xff] %v5796_v1 }
  0x72   : > { %v5792_v38 = vrot.slane %v2106_v58, %v5501_v4  ;;  %v4047_v5 = vadd.f32 %v5672_v12, %v4032_v25  ;;  %v2082_v11 = vmul.f32 %v5572_v48, %v5783_v23  ;;  %v2149_v17 = vrot.slane %v2147_v18, 1  ;;  %8839 = vst [vmem:[#allocation44_spill] sm:$0xff] %v5812_v50  ;;  %v5815_v12 = vld [vmem:[%s5485_s30 + $0xf0] sm:$0xff] }
  0x73   : > { %8835 = vst [vmem:[#allocation40_spill] sm:$0xff] %v5786_v27  ;;  %v2097_v20 = vmul.f32 %v5582_v54, %v5786_v27  ;;  %v2039_v55 = vadd.f32 %v2037_v53, %v2024_v31  ;;  %v5808_v62 = vrot.slane %v2121_v16, %v5501_v4  ;;  %v2136_v59 = vmul.f32 %v5789_v7, %v2134_v32 }
  0x74   : > { %8837 = vst [vmem:[#allocation42_spill] sm:$0xff] %v5792_v38  ;;  %v2112_v58 = vmul.f32 %v5591_v61, %v5792_v38  ;;  %v4062_v25 = vadd.f32 %v5691_v39, %v4047_v5  ;;  %v2151_v48 = vmul.f32 %v5796_v1, %v2149_v17  ;;  %v2164_v54 = vrot.slane %v2162_v37, 1  ;;  %v3598_v5 = vld [vmem:[%s5492_s29] sm:$0x1] }
  0x75   : > { %v2179_v18 = vrot.slane %v2177_v26, 1  ;;  %v2054_v53 = vadd.f32 %v2052_v52, %v2039_v55  ;;  %v2127_v31 = vmul.f32 %v5601_v6, %v5808_v62  ;;  %v2140_v16 = vrot.slane %v2136_v59, %v5501_v4 }
  0x76   : > { %v3849_v61 = vmul.f32 %v5535_v28, %v5654_v56  ;;  %v4077_v32 = vadd.f32 %v5708_v13, %v4062_v25  ;;  %v2155_v38 = vrot.slane %v2151_v48, %v5501_v4  ;;  %v2166_v27 = vmul.f32 %v5812_v50, %v2164_v54 }
  0x77   : > { %v2181_v39 = vmul.f32 %v5815_v12, %v2179_v18  ;;  %v2069_v37 = vadd.f32 %v2067_v14, %v2054_v53  ;;  %v2142_v26 = vmul.f32 %v5604_v8, %v2140_v16  ;;  %v3864_v52 = vmul.f32 %v5667_v9, %v5543_v33 }
  0x78   : > { %v3879_v17 = vmul.f32 %v5679_v21, %v5546_v34  ;;  %5028 = vmatprep.subr.mxu0 %v4077_v32  ;;  %5108 = vmatprep.subr.mxu1 %v4077_v32  ;;  %v2157_v28 = vmul.f32 %v5608_v15, %v2155_v38  ;;  %v2170_v48 = vrot.slane %v2166_v27, %v5501_v4  ;;  %v5840_v13 = vsub.s32 5, %v5498_v3 }
  0x79   : > { %v5837_v54 = vrot.slane %v2181_v39, %v5501_v4  ;;  %v2084_v14 = vadd.f32 %v2082_v11, %v2069_v37  ;;  %v3866_v55 = vadd.f32 %v3864_v52, %v3849_v61  ;;  %v3894_v33 = vmul.f32 %v5682_v22, %v5557_v40  ;;  %v8843_v37 = vld [vmem:[#allocation28_spill] sm:$0xff] }
  0x7a   : > { %8840 = vst [vmem:[#allocation45_spill] sm:$0xff] %v5840_v13  ;;  %v3600_v59 = vrot.slane %v3598_v5, 2  ;;  %v2172_v34 = vmul.f32 %v5623_v29, %v2170_v48  ;;  %v3909_v27 = vmul.f32 %v5686_v36, %v5566_v46  ;;  %v3924_v4 = vmul.f32 %v5703_v60, %v5569_v47 }
  0x7b   : > { %v2187_v25 = vmul.f32 %v5642_v45, %v5837_v54  ;;  %v2099_v18 = vadd.f32 %v2097_v20, %v2084_v14  ;;  %v3881_v53 = vadd.f32 %v3879_v17, %v3866_v55  ;;  %v3939_v61 = vmul.f32 %v5724_v41, %v5578_v51  ;;  %v8841_v51 = vld [vmem:[#allocation26_spill] sm:$0xff] }
  0x7c   : > { %v3954_v40 = vmul.f32 %v5733_v63, %v5597_v0  ;;  %v3969_v11 = vmul.f32 %v5749_v44, %v5614_v19  ;;  %v3984_v32 = vmul.f32 %v5752_v42, %v5618_v24  ;;  %v5861_v46 = vmul.f32 %v5757_v49, %v5629_v35  ;;  %v8842_v0 = vld [vmem:[#allocation27_spill] sm:$0xff]  ;;  %v8844_v35 = vld [vmem:[#allocation30_spill] sm:$0xff] }
  0x7d   : > { %v5865_v20 = vmul.f32 %v5772_v57, %v5636_v43  ;;  %v2114_v47 = vadd.f32 %v2112_v58, %v2099_v18  ;;  %v3896_v39 = vadd.f32 %v3894_v33, %v3881_v53  ;;  %v5869_v5 = vmul.f32 %v5789_v7, %v8841_v51  ;;  %v8845_v43 = vld [vmem:[#allocation31_spill] sm:$0xff]  ;;  %v8846_v33 = vld [vmem:[#allocation29_spill] sm:$0xff]  ;;  %v8847_v53 = vld [vmem:[#allocation32_spill] sm:$0xff] }
  0x7e   : > { %v5873_v19 = vmul.f32 %v5796_v1, %v8842_v0  ;;  %v5877_v24 = vmul.f32 %v5812_v50, %v8843_v37  ;;  %v1961_v52 = vmul.f32 %v8844_v35, %v5654_v56  ;;  %v1976_v58 = vmul.f32 %v5667_v9, %v8845_v43  ;;  %v8848_v37 = vld [vmem:[#allocation33_spill] sm:$0xff]  ;;  %v8851_v3 = vld [vmem:[#allocation42_spill] sm:$0xff] }
  0x7f   : > { %v1991_v17 = vmul.f32 %v5679_v21, %v5718_v30  ;;  %v2129_v14 = vadd.f32 %v2127_v31, %v2114_v47  ;;  %v3911_v55 = vadd.f32 %v3909_v27, %v3896_v39  ;;  %v5887_v18 = vmul.f32 %v5815_v12, %v8846_v33  ;;  %v8849_v47 = vld [vmem:[#allocation38_spill] sm:$0xff] }
  0x80   : > { %v2006_v51 = vmul.f32 %v5682_v22, %v8847_v53  ;;  %v1978_v0 = vadd.f32 %v1976_v58, %v1961_v52  ;;  %v2021_v35 = vmul.f32 %v5686_v36, %v8848_v37  ;;  %v2036_v43 = vmul.f32 %v5703_v60, %v5745_v2  ;;  %v3613_v53 = vld [vmem:[%s5492_s29 + $0x1] sm:$0x1]  ;;  %v8850_v58 = vld [vmem:[#allocation40_spill] sm:$0xff] }
  0x81   : > { %v2051_v30 = vmul.f32 %v5724_v41, %v5763_v10  ;;  %v2144_v31 = vadd.f32 %v2142_v26, %v2129_v14  ;;  %v3926_v27 = vadd.f32 %v3924_v4, %v3911_v55  ;;  %v2066_v39 = vmul.f32 %v5733_v63, %v8849_v47  ;;  %v3628_v26 = vld [vmem:[%s5492_s29 + $0x2] sm:$0x1]  ;;  %v3643_v4 = vld [vmem:[%s5492_s29 + $0x3] sm:$0x1] }
  0x82   : > { %v2081_v33 = vmul.f32 %v5749_v44, %v5783_v23  ;;  %v1993_v52 = vadd.f32 %v1991_v17, %v1978_v0  ;;  %v5904_v37 = vmul.f32 %v5752_v42, %v8850_v58  ;;  %v5908_v2 = vmul.f32 %v5757_v49, %v8851_v3  ;;  %v3658_v0 = vld [vmem:[%s5492_s29 + $0x4] sm:$0x1]  ;;  %v8852_v58 = vld [vmem:[#allocation14_spill] sm:$0xff]  ;;  %v3673_v42 = vld [vmem:[%s5492_s29 + $0x5] sm:$0x1] }
  0x83   : > { %v5912_v10 = vmul.f32 %v5772_v57, %v5808_v62  ;;  %v2159_v14 = vadd.f32 %v2157_v28, %v2144_v31  ;;  %v3941_v55 = vadd.f32 %v3939_v61, %v3926_v27  ;;  %v5917_v23 = vmul.f32 %v5789_v7, %v2140_v16  ;;  %v8853_v27 = vld [vmem:[#allocation21_spill] sm:$0xff]  ;;  %v8854_v7 = vld [vmem:[#allocation15_spill] sm:$0xff] }
  0x84   : > { %v5920_v17 = vmul.f32 %v5796_v1, %v2155_v38  ;;  %v2008_v47 = vadd.f32 %v2006_v51, %v1993_v52  ;;  %v5924_v3 = vmul.f32 %v5812_v50, %v2170_v48  ;;  %v3602_v62 = vmul.f32 %v8852_v58, %v3600_v59  ;;  %v8855_v48 = vld [vmem:[#allocation16_spill] sm:$0xff]  ;;  %v8856_v44 = vld [vmem:[#allocation17_spill] sm:$0xff] }
  0x85   : > { %v3615_v13 = vrot.slane %v3613_v53, 2  ;;  %v2174_v57 = vadd.f32 %v2172_v34, %v2159_v14  ;;  %v3956_v49 = vadd.f32 %v3954_v40, %v3941_v55  ;;  %v3630_v28 = vrot.slane %v3628_v26, 2  ;;  %v3688_v59 = vld [vmem:[%s5492_s29 + $0x6] sm:$0x1]  ;;  %v8857_v53 = vld [vmem:[#allocation18_spill] sm:$0xff] }
  0x86   : > { %v3645_v61 = vrot.slane %v3643_v4, 2  ;;  %v2023_v31 = vadd.f32 %v2021_v35, %v2008_v47  ;;  %v5928_v16 = vrot.slane %v3602_v62, %v8853_v27  ;;  %v3660_v1 = vrot.slane %v3658_v0, 2  ;;  %v3718_v55 = vld [vmem:[%s5492_s29 + $0x8] sm:$0x1] }
  0x87   : > { %v3617_v38 = vmul.f32 %v8854_v7, %v3615_v13  ;;  %v2189_v51 = vadd.f32 %v2187_v25, %v2174_v57  ;;  %v3971_v52 = vadd.f32 %v3969_v11, %v3956_v49  ;;  %v3632_v50 = vmul.f32 %v8855_v48, %v3630_v28 }
  0x88   : > { %v3647_v63 = vmul.f32 %v8856_v44, %v3645_v61  ;;  %v2038_v34 = vadd.f32 %v2036_v43, %v2023_v31  ;;  %v3608_v40 = vmul.f32 %v8852_v58, %v5928_v16  ;;  %v3662_v13 = vmul.f32 %v8857_v53, %v3660_v1  ;;  %v3703_v1 = vld [vmem:[%s5492_s29 + $0x7] sm:$0x1]  ;;  %v8859_v61 = vld [vmem:[#allocation20_spill] sm:$0xff] }
  0x89   : > { %v5938_v35 = vrot.slane %v3617_v38, %v8853_v27  ;;  %5029 = vmatpush3.msra.mxu0 %v2189_v51  ;;  %5124 = vmatpush3.msra.mxu1 %v2189_v51  ;;  %v3986_v49 = vadd.f32 %v3984_v32, %v3971_v52  ;;  %v5942_v57 = vrot.slane %v3632_v50, %v8853_v27  ;;  %v3675_v11 = vrot.slane %v3673_v42, 2  ;;  %v8858_v42 = vld [vmem:[#allocation19_spill] sm:$0xff] }
  0x8a   : > { %v5945_v25 = vrot.slane %v3647_v63, %v8853_v27  ;;  %v2053_v43 = vadd.f32 %v2051_v30, %v2038_v34  ;;  %v5950_v4 = vrot.slane %v3662_v13, %v8853_v27  ;;  %v3690_v14 = vrot.slane %v3688_v59, 2  ;;  %v3733_v30 = vld [vmem:[%s5492_s29 + $0x9] sm:$0x1] }
  0x8b   : > { %v3623_v26 = vmul.f32 %v8854_v7, %v5938_v35  ;;  %v4001_v0 = vadd.f32 %v5861_v46, %v3986_v49  ;;  %v3638_v50 = vmul.f32 %v8855_v48, %v5942_v57  ;;  %v3677_v32 = vmul.f32 %v8858_v42, %v3675_v11 }
  0x8c   : > { %v3653_v63 = vmul.f32 %v8856_v44, %v5945_v25  ;;  %v2068_v47 = vadd.f32 %v2066_v39, %v2053_v43  ;;  %v3668_v28 = vmul.f32 %v8857_v53, %v5950_v4  ;;  %v3692_v31 = vmul.f32 %v8859_v61, %v3690_v14  ;;  %v8860_v43 = vld [vmem:[#allocation22_spill] sm:$0xff] }
  0x8d   : > { %v3625_v62 = vadd.f32 %v3623_v26, %v3608_v40  ;;  %v4016_v46 = vadd.f32 %v5865_v20, %v4001_v0  ;;  %v5966_v38 = vrot.slane %v3677_v32, %v8853_v27  ;;  %v3705_v51 = vrot.slane %v3703_v1, 2  ;;  %v3748_v40 = vld [vmem:[%s5492_s29 + $0xa] sm:$0x1]  ;;  %v8861_v26 = vld [vmem:[#allocation23_spill] sm:$0xff]  ;;  %v3763_v1 = vld [vmem:[%s5492_s29 + $0xb] sm:$0x1] }
  0x8e   : > { %v3720_v52 = vrot.slane %v3718_v55, 2  ;;  %v2083_v59 = vadd.f32 %v2081_v33, %v2068_v47  ;;  %v5969_v13 = vrot.slane %v3692_v31, %v8853_v27  ;;  %v3735_v39 = vrot.slane %v3733_v30, 2 }
  0x8f   : > { %v3640_v34 = vadd.f32 %v3638_v50, %v3625_v62  ;;  %v4031_v49 = vadd.f32 %v5869_v5, %v4016_v46  ;;  %v3683_v11 = vmul.f32 %v8858_v42, %v5966_v38  ;;  %v3707_v20 = vmul.f32 %v8860_v43, %v3705_v51  ;;  %v8862_v50 = vld [vmem:[#allocation24_spill] sm:$0xff] }
  0x90   : > { %v3722_v14 = vmul.f32 %v8861_v26, %v3720_v52  ;;  %v2098_v33 = vadd.f32 %v5904_v37, %v2083_v59  ;;  %v3698_v0 = vmul.f32 %v8859_v61, %v5969_v13  ;;  %v3737_v32 = vmul.f32 %v8862_v50, %v3735_v39  ;;  %v3778_v51 = vld [vmem:[%s5492_s29 + $0xc] sm:$0x1]  ;;  %v3793_v52 = vld [vmem:[%s5492_s29 + $0xd] sm:$0x1]  ;;  %v8863_v39 = vld [vmem:[#allocation25_spill] sm:$0xff] }
  0x91   : > { %v3655_v55 = vadd.f32 %v3653_v63, %v3640_v34  ;;  %v4046_v5 = vadd.f32 %v5873_v19, %v4031_v49  ;;  %v5984_v30 = vrot.slane %v3707_v20, %v8853_v27  ;;  %v3750_v62 = vrot.slane %v3748_v40, 2  ;;  %v3808_v49 = vld [vmem:[%s5492_s29 + $0xe] sm:$0x1] }
  0x92   : > { %v5987_v47 = vrot.slane %v3722_v14, %v8853_v27  ;;  %v2113_v31 = vadd.f32 %v5908_v2, %v2098_v33  ;;  %v5991_v63 = vrot.slane %v3737_v32, %v8853_v27  ;;  %v3765_v46 = vrot.slane %v3763_v1, 2  ;;  %v3823_v1 = vld [vmem:[%s5492_s29 + $0xf] sm:$0x1] }
  0x93   : > { %v3670_v37 = vadd.f32 %v3668_v28, %v3655_v55  ;;  %v4061_v59 = vadd.f32 %v5877_v24, %v4046_v5  ;;  %v2186_v19 = vmul.f32 %v5815_v12, %v5837_v54  ;;  %v3713_v34 = vmul.f32 %v8860_v43, %v5984_v30 }
  0x94   : > { %v3752_v40 = vmul.f32 %v8863_v39, %v3750_v62  ;;  %v2128_v2 = vadd.f32 %v5912_v10, %v2113_v31  ;;  %v3728_v20 = vmul.f32 %v8861_v26, %v5987_v47  ;;  %v3767_v14 = vmul.f32 %v5601_v6, %v3765_v46  ;;  %v1710_v62 = vld [vmem:[%s5492_s29] sm:$0x1] }
  0x95   : > { %v3685_v28 = vadd.f32 %v3683_v11, %v3670_v37  ;;  %v4076_v24 = vadd.f32 %v5887_v18, %v4061_v59  ;;  %v3780_v33 = vrot.slane %v3778_v51, 2  ;;  %v3795_v55 = vrot.slane %v3793_v52, 2  ;;  %v1725_v51 = vld [vmem:[%s5492_s29 + $0x1] sm:$0x1] }
  0x96   : > { %v6009_v54 = vrot.slane %v3752_v40, %v8853_v27  ;;  %v2143_v32 = vadd.f32 %v5917_v23, %v2128_v2  ;;  %v3743_v10 = vmul.f32 %v8862_v50, %v5991_v63  ;;  %v3810_v11 = vrot.slane %v3808_v49, 2 }
  0x97   : > { %v3700_v5 = vadd.f32 %v3698_v0, %v3685_v28  ;;  %5030 = vmatprep.subr.mxu0 %v4076_v24  ;;  %5109 = vmatprep.subr.mxu1 %v4076_v24  ;;  %v6016_v31 = vrot.slane %v3767_v14, %v8853_v27  ;;  %v3782_v18 = vmul.f32 %v5604_v8, %v3780_v33  ;;  %v3825_v46 = vrot.slane %v3823_v1, 2  ;;  %v1740_v24 = vld [vmem:[%s5492_s29 + $0x2] sm:$0x1]  ;;  %v1755_v33 = vld [vmem:[%s5492_s29 + $0x3] sm:$0x1] }
  0x98   : > { %v3797_v37 = vmul.f32 %v5608_v15, %v3795_v55  ;;  %v2158_v23 = vadd.f32 %v5920_v17, %v2143_v32  ;;  %v3758_v52 = vmul.f32 %v8863_v39, %v6009_v54  ;;  %v3812_v59 = vmul.f32 %v5623_v29, %v3810_v11 }
  0x99   : > { %v3715_v0 = vadd.f32 %v3713_v34, %v3700_v5  ;;  %v6026_v40 = vrot.slane %v3782_v18, %v8853_v27  ;;  %v3827_v2 = vmul.f32 %v5642_v45, %v3825_v46  ;;  %v1712_v28 = vrot.slane %v1710_v62, 2  ;;  %v1785_v62 = vld [vmem:[%s5492_s29 + $0x5] sm:$0x1] }
  0x9a   : > { %v6029_v49 = vrot.slane %v3797_v37, %v8853_v27  ;;  %v2173_v14 = vadd.f32 %v5924_v3, %v2158_v23  ;;  %v6034_v34 = vrot.slane %v3812_v59, %v8853_v27  ;;  %v1727_v1 = vrot.slane %v1725_v51, 2  ;;  %v1770_v3 = vld [vmem:[%s5492_s29 + $0x4] sm:$0x1]  ;;  %v1800_v51 = vld [vmem:[%s5492_s29 + $0x6] sm:$0x1] }
  0x9b   : > { %v3730_v17 = vadd.f32 %v3728_v20, %v3715_v0  ;;  %v3773_v55 = vmul.f32 %v5601_v6, %v6016_v31  ;;  %v3788_v32 = vmul.f32 %v5604_v8, %v6026_v40  ;;  %v1714_v11 = vmul.f32 %v5654_v56, %v1712_v28 }
  0x9c   : > { %8864 = vst [vmem:[#allocation26_spill] sm:$0xff] %v6029_v49  ;;  %v3803_v5 = vmul.f32 %v5608_v15, %v6029_v49  ;;  %v2188_v20 = vadd.f32 %v2186_v19, %v2173_v14  ;;  %v6048_v37 = vrot.slane %v3827_v2, %v8853_v27  ;;  %v1729_v46 = vmul.f32 %v5667_v9, %v1727_v1  ;;  %v1815_v14 = vld [vmem:[%s5492_s29 + $0x7] sm:$0x1] }
  0x9d   : > { %v3745_v18 = vadd.f32 %v3743_v10, %v3730_v17  ;;  %v3818_v23 = vmul.f32 %v5623_v29, %v6034_v34  ;;  %v6055_v0 = vrot.slane %v1714_v11, %v8853_v27  ;;  %v1742_v59 = vrot.slane %v1740_v24, 2 }
  0x9e   : > { %8865 = vst [vmem:[#allocation27_spill] sm:$0xff] %v6048_v37  ;;  %v1757_v49 = vrot.slane %v1755_v33, 2  ;;  %5031 = vmatpush3.msra.mxu0 %v2188_v20  ;;  %5125 = vmatpush3.msra.mxu1 %v2188_v20  ;;  %v6058_v19 = vrot.slane %v1729_v46, %v8853_v27  ;;  %v1772_v10 = vrot.slane %v1770_v3, 2  ;;  %v1787_v2 = vrot.slane %v1785_v62, 2  ;;  %v1830_v46 = vld [vmem:[%s5492_s29 + $0x8] sm:$0x1] }
  0x9f   : > { %8866 = vst [vmem:[#allocation28_spill] sm:$0xff] %v6055_v0  ;;  %v3760_v28 = vadd.f32 %v3758_v52, %v3745_v18  ;;  %v1720_v17 = vmul.f32 %v8852_v58, %v6055_v0  ;;  %v1744_v1 = vmul.f32 %v5679_v21, %v1742_v59  ;;  %v1802_v24 = vrot.slane %v1800_v51, 2 }
  0xa0   : > { %8867 = vst [vmem:[#allocation30_spill] sm:$0xff] %v6058_v19  ;;  %v1759_v11 = vmul.f32 %v5682_v22, %v1757_v49  ;;  %v1735_v52 = vmul.f32 %v8854_v7, %v6058_v19  ;;  %v1774_v20 = vmul.f32 %v5686_v36, %v1772_v10  ;;  %v1789_v3 = vmul.f32 %v5703_v60, %v1787_v2 }
  0xa1   : > { %v3775_v33 = vadd.f32 %v3773_v55, %v3760_v28  ;;  %v6070_v62 = vrot.slane %v1744_v1, %v8853_v27  ;;  %v1804_v18 = vmul.f32 %v5724_v41, %v1802_v24  ;;  %v1817_v49 = vrot.slane %v1815_v14, 2  ;;  %v1845_v28 = vld [vmem:[%s5492_s29 + $0x9] sm:$0x1] }
  0xa2   : > { %v6073_v58 = vrot.slane %v1759_v11, %v8853_v27  ;;  %v1737_v51 = vadd.f32 %v1735_v52, %v1720_v17  ;;  %v6078_v7 = vrot.slane %v1774_v20, %v8853_v27  ;;  %v6081_v59 = vrot.slane %v1789_v3, %v8853_v27  ;;  %v8872_v14 = vld [vmem:[#allocation34_spill] sm:$0xff] }
  0xa3   : > { %8868 = vst [vmem:[#allocation31_spill] sm:$0xff] %v6070_v62  ;;  %v3790_v55 = vadd.f32 %v3788_v32, %v3775_v33  ;;  %v1750_v10 = vmul.f32 %v8855_v48, %v6070_v62  ;;  %v6089_v1 = vrot.slane %v1804_v18, %v8853_v27  ;;  %v1819_v11 = vmul.f32 %v8872_v14, %v1817_v49  ;;  %v1860_v32 = vld [vmem:[%s5492_s29 + $0xa] sm:$0x1]  ;;  %v1875_v17 = vld [vmem:[%s5492_s29 + $0xb] sm:$0x1]  ;;  %v8873_v62 = vld [vmem:[#allocation35_spill] sm:$0xff] }
  0xa4   : > { %8869 = vst [vmem:[#allocation29_spill] sm:$0xff] %v6073_v58  ;;  %8870 = vst [vmem:[#allocation32_spill] sm:$0xff] %v6078_v7  ;;  %v1765_v2 = vmul.f32 %v8856_v44, %v6073_v58  ;;  %v3833_v33 = vmul.f32 %v5642_v45, %v6048_v37  ;;  %v1780_v52 = vmul.f32 %v8857_v53, %v6078_v7  ;;  %v1832_v48 = vrot.slane %v1830_v46, 2  ;;  %v1890_v20 = vld [vmem:[%s5492_s29 + $0xc] sm:$0x1] }
  0xa5   : > { %8871 = vst [vmem:[#allocation33_spill] sm:$0xff] %v6081_v59  ;;  %v3805_v24 = vadd.f32 %v3803_v5, %v3790_v55  ;;  %v1752_v3 = vadd.f32 %v1750_v10, %v1737_v51  ;;  %v1795_v44 = vmul.f32 %v8858_v42, %v6081_v59  ;;  %v6102_v18 = vrot.slane %v1819_v11, %v8853_v27  ;;  %v1905_v37 = vld [vmem:[%s5492_s29 + $0xd] sm:$0x1]  ;;  %v1920_v7 = vld [vmem:[%s5492_s29 + $0xe] sm:$0x1] }
  0xa6   : > { %v1847_v49 = vrot.slane %v1845_v28, 2  ;;  %v1834_v5 = vmul.f32 %v8873_v62, %v1832_v48  ;;  %v1862_v55 = vrot.slane %v1860_v32, 2  ;;  %v1877_v19 = vrot.slane %v1875_v17, 2  ;;  %v8874_v46 = vld [vmem:[#allocation36_spill] sm:$0xff]  ;;  %v8875_v28 = vld [vmem:[#allocation37_spill] sm:$0xff] }
  0xa7   : > { %v3820_v58 = vadd.f32 %v3818_v23, %v3805_v24  ;;  %v1767_v0 = vadd.f32 %v1765_v2, %v1752_v3  ;;  %v1810_v53 = vmul.f32 %v8859_v61, %v6089_v1  ;;  %v1892_v10 = vrot.slane %v1890_v20, 2  ;;  %v8876_v24 = vld [vmem:[#allocation39_spill] sm:$0xff]  ;;  %v8877_v2 = vld [vmem:[#allocation41_spill] sm:$0xff]  ;;  %v1935_v61 = vld [vmem:[%s5492_s29 + $0xf] sm:$0x1] }
  0xa8   : > { %v1849_v51 = vmul.f32 %v8874_v46, %v1847_v49  ;;  %v6111_v11 = vrot.slane %v1834_v5, %v8853_v27  ;;  %v1864_v23 = vmul.f32 %v8875_v28, %v1862_v55  ;;  %v1879_v48 = vmul.f32 %v8876_v24, %v1877_v19  ;;  %v8878_v5 = vld [vmem:[#allocation43_spill] sm:$0xff] }
  0xa9   : > { %v3835_v42 = vadd.f32 %v3833_v33, %v3820_v58  ;;  %v1782_v32 = vadd.f32 %v1780_v52, %v1767_v0  ;;  %v1894_v3 = vmul.f32 %v8877_v2, %v1892_v10  ;;  %v1907_v59 = vrot.slane %v1905_v37, 2 }
  0xaa   : > { %v6116_v17 = vrot.slane %v1849_v51, %v8853_v27  ;;  %v1825_v58 = vmul.f32 %v8860_v43, %v6102_v18  ;;  %v1868_v33 = vrot.slane %v1864_v23, %v8853_v27  ;;  %v6124_v20 = vrot.slane %v1879_v48, %v8853_v27  ;;  %v8879_v43 = vld [vmem:[#allocation44_spill] sm:$0xff] }
  0xab   : > { %5032 = vmatprep.subr.mxu0 %v3835_v42  ;;  %5110 = vmatprep.subr.mxu1 %v3835_v42  ;;  %v1922_v49 = vrot.slane %v1920_v7, 2  ;;  %v1797_v19 = vadd.f32 %v1795_v44, %v1782_v32  ;;  %v1840_v0 = vmul.f32 %v8861_v26, %v6111_v11  ;;  %v1898_v52 = vrot.slane %v1894_v3, %v8853_v27 }
  0xac   : > { %v1909_v37 = vmul.f32 %v8878_v5, %v1907_v59  ;;  %v1855_v55 = vmul.f32 %v8862_v50, %v6116_v17  ;;  %v1870_v51 = vmul.f32 %v8863_v39, %v1868_v33  ;;  %v1937_v42 = vrot.slane %v1935_v61, 2 }
  0xad   : > { %v1924_v10 = vmul.f32 %v8879_v43, %v1922_v49  ;;  %v1812_v23 = vadd.f32 %v1810_v53, %v1797_v19  ;;  %v1885_v7 = vmul.f32 %v5601_v6, %v6124_v20  ;;  %v3607_v26 = vmul.f32 %v5928_v16, %v5654_v56 }
  0xae   : > { %v1913_v44 = vrot.slane %v1909_v37, %v8853_v27  ;;  %v1939_v59 = vmul.f32 %v5815_v12, %v1937_v42  ;;  %v3622_v50 = vmul.f32 %v5667_v9, %v5938_v35  ;;  %v3637_v39 = vmul.f32 %v5679_v21, %v5942_v57 }
  0xaf   : > { %v1928_v48 = vrot.slane %v1924_v10, %v8853_v27  ;;  %v1827_v32 = vadd.f32 %v1825_v58, %v1812_v23  ;;  %v1900_v53 = vmul.f32 %v5604_v8, %v1898_v52  ;;  %v3652_v3 = vmul.f32 %v5682_v22, %v5945_v25  ;;  %v8884_v23 = vld [vmem:[#allocation31_spill] sm:$0xff] }
  0xb0   : > { %v1915_v6 = vmul.f32 %v5608_v15, %v1913_v44  ;;  %v6151_v61 = vrot.slane %v1939_v59, %v8853_v27  ;;  %v3624_v49 = vadd.f32 %v3622_v50, %v3607_v26  ;;  %v3667_v35 = vmul.f32 %v5686_v36, %v5950_v4  ;;  %v8885_v50 = vld [vmem:[#allocation29_spill] sm:$0xff] }
  0xb1   : > { %v1930_v16 = vmul.f32 %v5623_v29, %v1928_v48  ;;  %v1842_v19 = vadd.f32 %v1840_v0, %v1827_v32  ;;  %v3682_v57 = vmul.f32 %v5703_v60, %v5966_v38  ;;  %v3697_v8 = vmul.f32 %v5724_v41, %v5969_v13  ;;  %v8880_v0 = vld [vmem:[#allocation26_spill] sm:$0xff] }
  0xb2   : > { %v3712_v15 = vmul.f32 %v8872_v14, %v5984_v30  ;;  %v6163_v29 = vmul.f32 %v5642_v45, %v6151_v61  ;;  %v3639_v27 = vadd.f32 %v3637_v39, %v3624_v49  ;;  %v3727_v25 = vmul.f32 %v8873_v62, %v5987_v47  ;;  %v8886_v39 = vld [vmem:[#allocation32_spill] sm:$0xff] }
  0xb3   : > { %v6169_v4 = vmul.f32 %v8874_v46, %v5991_v63  ;;  %v1857_v58 = vadd.f32 %v1855_v55, %v1842_v19  ;;  %v6173_v38 = vmul.f32 %v8875_v28, %v6009_v54  ;;  %v6177_v13 = vmul.f32 %v8876_v24, %v6016_v31  ;;  %v8881_v54 = vld [vmem:[#allocation28_spill] sm:$0xff]  ;;  %v8882_v31 = vld [vmem:[#allocation27_spill] sm:$0xff] }
  0xb4   : > { %v6181_v45 = vmul.f32 %v8877_v2, %v6026_v40  ;;  %v3654_v30 = vadd.f32 %v3652_v3, %v3639_v27  ;;  %v6185_v47 = vmul.f32 %v8878_v5, %v8880_v0  ;;  %v6189_v63 = vmul.f32 %v8879_v43, %v6034_v34  ;;  %v8883_v40 = vld [vmem:[#allocation30_spill] sm:$0xff]  ;;  %v6246_v27 = vld [vmem:[%s5485_s30 + $0x18] sm:$0xff] }
  0xb5   : > { %v1719_v37 = vmul.f32 %v5654_v56, %v8881_v54  ;;  %v1872_v55 = vadd.f32 %v1870_v51, %v1857_v58  ;;  %v6195_v10 = vmul.f32 %v5815_v12, %v8882_v31  ;;  %v1734_v42 = vmul.f32 %v5667_v9, %v8883_v40  ;;  %v8887_v51 = vld [vmem:[#allocation33_spill] sm:$0xff]  ;;  %8889 = vst [vmem:[#allocation40_spill] sm:$0xff] %v6246_v27  ;;  %v6255_v0 = vld [vmem:[%s5485_s30 + $0x48] sm:$0xff] }
  0xb6   : > { %v1749_v26 = vmul.f32 %v5679_v21, %v8884_v23  ;;  %v3669_v59 = vadd.f32 %v3667_v35, %v3654_v30  ;;  %v1764_v34 = vmul.f32 %v5682_v22, %v8885_v50  ;;  %v1779_v56 = vmul.f32 %v5686_v36, %v8886_v39  ;;  %v3356_v35 = vld [vmem:[%s5492_s29] sm:$0x1]  ;;  %v6252_v30 = vld [vmem:[%s5485_s30 + $0x38] sm:$0xff]  ;;  %8892 = vst [vmem:[#allocation21_spill] sm:$0xff] %v6255_v0  ;;  %v3431_v23 = vld [vmem:[%s5492_s29 + $0x5] sm:$0x1] }
  0xb7   : > { %v1794_v32 = vmul.f32 %v5703_v60, %v8887_v51  ;;  %v1887_v3 = vadd.f32 %v1885_v7, %v1872_v55  ;;  %v1736_v49 = vadd.f32 %v1734_v42, %v1719_v37  ;;  %v1809_v9 = vmul.f32 %v5724_v41, %v6089_v1  ;;  %v3371_v41 = vld [vmem:[%s5492_s29 + $0x1] sm:$0x1]  ;;  %v3386_v1 = vld [vmem:[%s5492_s29 + $0x2] sm:$0x1]  ;;  %8891 = vst [vmem:[#allocation14_spill] sm:$0xff] %v6252_v30  ;;  %v6284_v51 = vld [vmem:[%s5485_s30 + $0x58] sm:$0xff] }
  0xb8   : > { %v6211_v21 = vmul.f32 %v8872_v14, %v6102_v18  ;;  %v3684_v22 = vadd.f32 %v3682_v57, %v3669_v59  ;;  %v6216_v36 = vmul.f32 %v8873_v62, %v6111_v11  ;;  %v6220_v60 = vmul.f32 %v8874_v46, %v6116_v17  ;;  %v6235_v11 = vld [vmem:[%s5485_s30 + $0x8] sm:$0xff]  ;;  %v3401_v46 = vld [vmem:[%s5492_s29 + $0x3] sm:$0x1]  ;;  %v3416_v17 = vld [vmem:[%s5492_s29 + $0x4] sm:$0x1]  ;;  %8894 = vst [vmem:[#allocation15_spill] sm:$0xff] %v6284_v51 }
  0xb9   : > { %v6223_v7 = vmul.f32 %v8875_v28, %v1868_v33  ;;  %v1902_v19 = vadd.f32 %v1900_v53, %v1887_v3  ;;  %v1751_v14 = vadd.f32 %v1749_v26, %v1736_v49  ;;  %v6229_v18 = vmul.f32 %v8876_v24, %v6124_v20  ;;  %8888 = vst [vmem:[#allocation38_spill] sm:$0xff] %v6235_v11  ;;  %v6249_v24 = vld [vmem:[%s5485_s30 + $0x28] sm:$0xff]  ;;  %v8893_v31 = vld [vmem:[#allocation45_spill] sm:$0xff] }
  0xba   : > { %v6232_v62 = vmul.f32 %v8877_v2, %v1898_v52  ;;  %v3699_v57 = vadd.f32 %v3697_v8, %v3684_v22  ;;  %v6240_v28 = vmul.f32 %v8878_v5, %v1913_v44  ;;  %v6243_v33 = vmul.f32 %v8879_v43, %v1928_v48  ;;  %8890 = vst [vmem:[#allocation42_spill] sm:$0xff] %v6249_v24  ;;  %v6292_v22 = vld [vmem:[%s5485_s30 + $0x68] sm:$0xff] }
  0xbb   : > { %v3358_v53 = vrot.slane %v3356_v35, 3  ;;  %v1917_v20 = vadd.f32 %v1915_v6, %v1902_v19  ;;  %v1766_v58 = vadd.f32 %v1764_v34, %v1751_v14  ;;  %v3373_v2 = vrot.slane %v3371_v41, 3  ;;  %8895 = vst [vmem:[#allocation16_spill] sm:$0xff] %v6292_v22  ;;  %v3476_v41 = vld [vmem:[%s5492_s29 + $0x8] sm:$0x1] }
  0xbc   : > { %v3388_v52 = vrot.slane %v3386_v1, 3  ;;  %v3714_v8 = vadd.f32 %v3712_v15, %v3699_v57  ;;  %v3403_v43 = vrot.slane %v3401_v46, 3  ;;  %v3418_v44 = vrot.slane %v3416_v17, 3  ;;  %v3491_v1 = vld [vmem:[%s5492_s29 + $0x9] sm:$0x1] }
  0xbd   : > { %v3360_v5 = vmul.f32 %v3358_v53, %v6235_v11  ;;  %v1932_v48 = vadd.f32 %v1930_v16, %v1917_v20  ;;  %v1781_v54 = vadd.f32 %v1779_v56, %v1766_v58  ;;  %v3375_v37 = vmul.f32 %v6246_v27, %v3373_v2  ;;  %v6302_v17 = vld [vmem:[%s5485_s30 + $0x78] sm:$0xff]  ;;  %v6307_v2 = vld [vmem:[%s5485_s30 + $0x88] sm:$0xff] }
  0xbe   : > { %v3390_v6 = vmul.f32 %v6249_v24, %v3388_v52  ;;  %v3729_v55 = vadd.f32 %v3727_v25, %v3714_v8  ;;  %v3405_v42 = vmul.f32 %v6252_v30, %v3403_v43  ;;  %v3420_v15 = vmul.f32 %v6255_v0, %v3418_v44  ;;  %v3446_v25 = vld [vmem:[%s5492_s29 + $0x6] sm:$0x1]  ;;  %8896 = vst [vmem:[#allocation17_spill] sm:$0xff] %v6302_v17  ;;  %v6310_v52 = vld [vmem:[%s5485_s30 + $0x98] sm:$0xff] }
  0xbf   : > { %v6261_v40 = vrot.slane %v3360_v5, %v8893_v31  ;;  %v1947_v26 = vadd.f32 %v6163_v29, %v1932_v48  ;;  %v1796_v59 = vadd.f32 %v1794_v32, %v1781_v54  ;;  %v6268_v16 = vrot.slane %v3375_v37, %v8893_v31  ;;  %v3461_v32 = vld [vmem:[%s5492_s29 + $0x7] sm:$0x1]  ;;  %8897 = vst [vmem:[#allocation18_spill] sm:$0xff] %v6307_v2 }
  0xc0   : > { %v6271_v50 = vrot.slane %v3390_v6, %v8893_v31  ;;  %v3744_v34 = vadd.f32 %v6169_v4, %v3729_v55  ;;  %v6278_v56 = vrot.slane %v3405_v42, %v8893_v31  ;;  %v6281_v29 = vrot.slane %v3420_v15, %v8893_v31  ;;  %8898 = vst [vmem:[#allocation19_spill] sm:$0xff] %v6310_v52  ;;  %v3506_v42 = vld [vmem:[%s5492_s29 + $0xa] sm:$0x1] }
  0xc1   : > { %v3366_v39 = vmul.f32 %v6261_v40, %v6235_v11  ;;  %5033 = vmatpush3.msra.mxu0 %v1947_v26  ;;  %5126 = vmatpush3.msra.mxu1 %v1947_v26  ;;  %v1811_v3 = vadd.f32 %v1809_v9, %v1796_v59  ;;  %v3381_v4 = vmul.f32 %v6246_v27, %v6268_v16  ;;  %v3433_v35 = vrot.slane %v3431_v23, 3 }
  0xc2   : > { %v3396_v49 = vmul.f32 %v6249_v24, %v6271_v50  ;;  %v3759_v19 = vadd.f32 %v6173_v38, %v3744_v34  ;;  %v3411_v14 = vmul.f32 %v6252_v30, %v6278_v56  ;;  %v3426_v9 = vmul.f32 %v6255_v0, %v6281_v29 }
  0xc3   : > { %v3448_v46 = vrot.slane %v3446_v25, 3  ;;  %v1826_v57 = vadd.f32 %v6211_v21, %v1811_v3  ;;  %v3383_v53 = vadd.f32 %v3381_v4, %v3366_v39  ;;  %v3435_v20 = vmul.f32 %v6284_v51, %v3433_v35  ;;  %v6344_v39 = vld [vmem:[%s5485_s30 + $0xa8] sm:$0xff] }
  0xc4   : > { %v3463_v58 = vrot.slane %v3461_v32, 3  ;;  %v3774_v38 = vadd.f32 %v6177_v13, %v3759_v19  ;;  %v3478_v5 = vrot.slane %v3476_v41, 3  ;;  %v3493_v43 = vrot.slane %v3491_v1, 3  ;;  %8899 = vst [vmem:[#allocation20_spill] sm:$0xff] %v6344_v39  ;;  %v3536_v32 = vld [vmem:[%s5492_s29 + $0xc] sm:$0x1] }
  0xc5   : > { %v3450_v8 = vmul.f32 %v6292_v22, %v3448_v46  ;;  %v1841_v44 = vadd.f32 %v6216_v36, %v1826_v57  ;;  %v3398_v48 = vadd.f32 %v3396_v49, %v3383_v53  ;;  %v6316_v21 = vrot.slane %v3435_v20, %v8893_v31  ;;  %v3551_v49 = vld [vmem:[%s5492_s29 + $0xd] sm:$0x1]  ;;  %v3566_v35 = vld [vmem:[%s5492_s29 + $0xe] sm:$0x1] }
  0xc6   : > { %v3465_v54 = vmul.f32 %v6302_v17, %v3463_v58  ;;  %v3789_v37 = vadd.f32 %v6181_v45, %v3774_v38  ;;  %v3480_v13 = vmul.f32 %v6307_v2, %v3478_v5  ;;  %v3495_v55 = vmul.f32 %v6310_v52, %v3493_v43  ;;  %v3521_v45 = vld [vmem:[%s5492_s29 + $0xb] sm:$0x1] }
  0xc7   : > { %v6321_v6 = vrot.slane %v3450_v8, %v8893_v31  ;;  %v1856_v36 = vadd.f32 %v6220_v60, %v1841_v44  ;;  %v3413_v15 = vadd.f32 %v3411_v14, %v3398_v48  ;;  %v3441_v23 = vmul.f32 %v6284_v51, %v6316_v21  ;;  %v6362_v14 = vld [vmem:[%s5485_s30 + $0xc8] sm:$0xff]  ;;  %v6367_v20 = vld [vmem:[%s5485_s30 + $0xd8] sm:$0xff] }
  0xc8   : > { %v6330_v26 = vrot.slane %v3465_v54, %v8893_v31  ;;  %v3804_v59 = vadd.f32 %v6185_v47, %v3789_v37  ;;  %v6336_v25 = vmul.f32 %v5815_v12, %v6151_v61  ;;  %v6341_v34 = vrot.slane %v3480_v13, %v8893_v31  ;;  %v6352_v61 = vld [vmem:[%s5485_s30 + $0xb8] sm:$0xff]  ;;  %v6370_v58 = vld [vmem:[%s5485_s30 + $0xe8] sm:$0xff] }
  0xc9   : > { %v3456_v60 = vmul.f32 %v6292_v22, %v6321_v6  ;;  %v1871_v3 = vadd.f32 %v6223_v7, %v1856_v36  ;;  %v3428_v4 = vadd.f32 %v3426_v9, %v3413_v15  ;;  %v6349_v47 = vrot.slane %v3495_v55, %v8893_v31  ;;  %v6381_v37 = vld [vmem:[%s5485_s30 + $0xf8] sm:$0xff] }
  0xca   : > { %v3508_v12 = vrot.slane %v3506_v42, 3  ;;  %v3819_v41 = vadd.f32 %v6189_v63, %v3804_v59  ;;  %v3471_v1 = vmul.f32 %v6302_v17, %v6330_v26  ;;  %v3486_v7 = vmul.f32 %v6307_v2, %v6341_v34  ;;  %v3581_v63 = vld [vmem:[%s5492_s29 + $0xf] sm:$0x1]  ;;  %v1468_v42 = vld [vmem:[%s5492_s29] sm:$0x1] }
  0xcb   : > { %v3523_v19 = vrot.slane %v3521_v45, 3  ;;  %v1886_v9 = vadd.f32 %v6229_v18, %v1871_v3  ;;  %v3443_v46 = vadd.f32 %v3441_v23, %v3428_v4  ;;  %v3538_v53 = vrot.slane %v3536_v32, 3  ;;  %v1483_v59 = vld [vmem:[%s5492_s29 + $0x1] sm:$0x1] }
  0xcc   : > { %v3510_v57 = vmul.f32 %v6344_v39, %v3508_v12  ;;  %v3834_v38 = vadd.f32 %v6195_v10, %v3819_v41  ;;  %v3553_v5 = vrot.slane %v3551_v49, 3  ;;  %v3568_v43 = vrot.slane %v3566_v35, 3  ;;  %v6406_v4 = vld [vmem:[%s5485_s30] sm:$0xff] }
  0xcd   : > { %v3525_v8 = vmul.f32 %v6352_v61, %v3523_v19  ;;  %v1901_v44 = vadd.f32 %v6232_v62, %v1886_v9  ;;  %v3458_v18 = vadd.f32 %v3456_v60, %v3443_v46  ;;  %v3540_v54 = vmul.f32 %v6362_v14, %v3538_v53  ;;  %v1498_v12 = vld [vmem:[%s5492_s29 + $0x2] sm:$0x1]  ;;  %v1513_v9 = vld [vmem:[%s5492_s29 + $0x3] sm:$0x1]  ;;  %v1528_v46 = vld [vmem:[%s5492_s29 + $0x4] sm:$0x1] }
  0xce   : > { %v6377_v48 = vrot.slane %v3510_v57, %v8893_v31  ;;  %5034 = vmatprep.subr.mxu0 %v3834_v38  ;;  %5111 = vmatprep.subr.mxu1 %v3834_v38  ;;  %v3555_v13 = vmul.f32 %v6367_v20, %v3553_v5  ;;  %v3570_v62 = vmul.f32 %v6370_v58, %v3568_v43  ;;  %v3583_v55 = vrot.slane %v3581_v63, 3  ;;  %v6413_v19 = vld [vmem:[%s5485_s30 + $0x10] sm:$0xff]  ;;  %v6424_v63 = vld [vmem:[%s5485_s30 + $0x20] sm:$0xff] }
  0xcf   : > { %v6384_v10 = vrot.slane %v3525_v8, %v8893_v31  ;;  %v1916_v36 = vadd.f32 %v6240_v28, %v1901_v44  ;;  %v3473_v15 = vadd.f32 %v3471_v1, %v3458_v18  ;;  %v3501_v23 = vmul.f32 %v6310_v52, %v6349_v47  ;;  %v1543_v38 = vld [vmem:[%s5492_s29 + $0x5] sm:$0x1] }
  0xd0   : > { %v6393_v45 = vrot.slane %v3540_v54, %v8893_v31  ;;  %v3516_v60 = vmul.f32 %v6344_v39, %v6377_v48  ;;  %v6399_v32 = vrot.slane %v3555_v13, %v8893_v31  ;;  %v6402_v3 = vrot.slane %v3570_v62, %v8893_v31  ;;  %v6430_v18 = vld [vmem:[%s5485_s30 + $0x30] sm:$0xff]  ;;  %v6433_v54 = vld [vmem:[%s5485_s30 + $0x40] sm:$0xff] }
  0xd1   : > { %v3585_v28 = vmul.f32 %v6381_v37, %v3583_v55  ;;  %v1931_v49 = vadd.f32 %v6243_v33, %v1916_v36  ;;  %v3488_v35 = vadd.f32 %v3486_v7, %v3473_v15  ;;  %v3531_v41 = vmul.f32 %v6352_v61, %v6384_v10  ;;  %v1558_v13 = vld [vmem:[%s5492_s29 + $0x6] sm:$0x1] }
  0xd2   : > { %v1470_v1 = vrot.slane %v1468_v42, 3  ;;  %v3546_v57 = vmul.f32 %v6362_v14, %v6393_v45  ;;  %v3561_v53 = vmul.f32 %v6367_v20, %v6399_v32  ;;  %v3576_v33 = vmul.f32 %v6370_v58, %v6402_v3  ;;  %v6441_v15 = vld [vmem:[%s5485_s30 + $0x50] sm:$0xff] }
  0xd3   : > { %v1485_v7 = vrot.slane %v1483_v59, 3  ;;  %v1946_v8 = vadd.f32 %v6336_v25, %v1931_v49  ;;  %v3503_v5 = vadd.f32 %v3501_v23, %v3488_v35  ;;  %v1500_v44 = vrot.slane %v1498_v12, 3 }
  0xd4   : > { %v1472_v43 = vmul.f32 %v1470_v1, %v6406_v4  ;;  %v6437_v62 = vrot.slane %v3585_v28, %v8893_v31  ;;  %v1515_v42 = vrot.slane %v1513_v9, 3  ;;  %v1530_v36 = vrot.slane %v1528_v46, 3  ;;  %v6448_v28 = vld [vmem:[%s5485_s30 + $0x60] sm:$0xff] }
  0xd5   : > { %v1487_v55 = vmul.f32 %v6413_v19, %v1485_v7  ;;  %5035 = vmatpush3.msra.mxu0 %v1946_v8  ;;  %5127 = vmatpush3.msra.mxu1 %v1946_v8  ;;  %v3518_v25 = vadd.f32 %v3516_v60, %v3503_v5  ;;  %v1502_v59 = vmul.f32 %v6424_v63, %v1500_v44  ;;  %v1545_v12 = vrot.slane %v1543_v38, 3  ;;  %v1573_v60 = vld [vmem:[%s5492_s29 + $0x7] sm:$0x1] }
  0xd6   : > { %8900 = vst [vmem:[#allocation22_spill] sm:$0xff] %v6437_v62  ;;  %v6444_v23 = vrot.slane %v1472_v43, %v8893_v31  ;;  %v1517_v35 = vmul.f32 %v6430_v18, %v1515_v42  ;;  %v1532_v1 = vmul.f32 %v6433_v54, %v1530_v36  ;;  %v1560_v9 = vrot.slane %v1558_v13, 3  ;;  %v6472_v13 = vld [vmem:[%s5485_s30 + $0x70] sm:$0xff] }
  0xd7   : > { %v6451_v49 = vrot.slane %v1487_v55, %v8893_v31  ;;  %v3533_v46 = vadd.f32 %v3531_v41, %v3518_v25  ;;  %v6459_v38 = vrot.slane %v1502_v59, %v8893_v31  ;;  %v1547_v8 = vmul.f32 %v6441_v15, %v1545_v12  ;;  %8906 = vst [vmem:[#allocation36_spill] sm:$0xff] %v6472_v13  ;;  %v1588_v55 = vld [vmem:[%s5492_s29 + $0x8] sm:$0x1]  ;;  %v1603_v12 = vld [vmem:[%s5492_s29 + $0x9] sm:$0x1] }
  0xd8   : > { %8901 = vst [vmem:[#allocation23_spill] sm:$0xff] %v6444_v23  ;;  %v1478_v7 = vmul.f32 %v6235_v11, %v6444_v23  ;;  %v6465_v43 = vrot.slane %v1517_v35, %v8893_v31  ;;  %v6468_v44 = vrot.slane %v1532_v1, %v8893_v31  ;;  %v1562_v41 = vmul.f32 %v6448_v28, %v1560_v9  ;;  %v1618_v35 = vld [vmem:[%s5492_s29 + $0xa] sm:$0x1] }
  0xd9   : > { %8902 = vst [vmem:[#allocation24_spill] sm:$0xff] %v6451_v49  ;;  %8903 = vst [vmem:[#allocation25_spill] sm:$0xff] %v6459_v38  ;;  %v1493_v5 = vmul.f32 %v6246_v27, %v6451_v49  ;;  %v3548_v42 = vadd.f32 %v3546_v57, %v3533_v46  ;;  %v1508_v36 = vmul.f32 %v6249_v24, %v6459_v38  ;;  %v1575_v59 = vrot.slane %v1573_v60, 3  ;;  %v6489_v24 = vld [vmem:[%s5485_s30 + $0x80] sm:$0xff]  ;;  %v1633_v27 = vld [vmem:[%s5492_s29 + $0xb] sm:$0x1] }
  0xda   : > { %8904 = vst [vmem:[#allocation34_spill] sm:$0xff] %v6465_v43  ;;  %8905 = vst [vmem:[#allocation35_spill] sm:$0xff] %v6468_v44  ;;  %v6478_v25 = vrot.slane %v1547_v8, %v8893_v31  ;;  %v3591_v1 = vmul.f32 %v6381_v37, %v6437_v62  ;;  %v1523_v57 = vmul.f32 %v6252_v30, %v6465_v43  ;;  %v1590_v38 = vrot.slane %v1588_v55, 3  ;;  %v6497_v62 = vld [vmem:[%s5485_s30 + $0x90] sm:$0xff]  ;;  %v6513_v49 = vld [vmem:[%s5485_s30 + $0xc0] sm:$0xff] }
  0xdb   : > { %v1495_v9 = vadd.f32 %v1493_v5, %v1478_v7  ;;  %v1538_v46 = vmul.f32 %v6255_v0, %v6468_v44  ;;  %8907 = vst [vmem:[#allocation37_spill] sm:$0xff] %v6489_v24  ;;  %v3563_v8 = vadd.f32 %v3561_v53, %v3548_v42  ;;  %v6493_v60 = vrot.slane %v1562_v41, %v8893_v31  ;;  %v6500_v7 = vld [vmem:[%s5485_s30 + $0xa0] sm:$0xff]  ;;  %v1648_v5 = vld [vmem:[%s5492_s29 + $0xc] sm:$0x1]  ;;  %v6506_v42 = vld [vmem:[%s5485_s30 + $0xb0] sm:$0xff] }
  0xdc   : > { %v1577_v11 = vmul.f32 %v6472_v13, %v1575_v59  ;;  %8908 = vst [vmem:[#allocation39_spill] sm:$0xff] %v6497_v62  ;;  %8909 = vst [vmem:[#allocation41_spill] sm:$0xff] %v6500_v7  ;;  %v1553_v0 = vmul.f32 %v6284_v51, %v6478_v25  ;;  %v1605_v44 = vrot.slane %v1603_v12, 3  ;;  %v1620_v53 = vrot.slane %v1618_v35, 3  ;;  %v1678_v51 = vld [vmem:[%s5492_s29 + $0xe] sm:$0x1] }
  0xdd   : > { %v1510_v30 = vadd.f32 %v1508_v36, %v1495_v9  ;;  %8910 = vst [vmem:[#allocation43_spill] sm:$0xff] %v6506_v42  ;;  %v3578_v41 = vadd.f32 %v3576_v33, %v3563_v8  ;;  %v1592_v55 = vmul.f32 %v6489_v24, %v1590_v38  ;;  %v1635_v59 = vrot.slane %v1633_v27, 3  ;;  %8911 = vst [vmem:[#allocation44_spill] sm:$0xff] %v6513_v49  ;;  %v1663_v9 = vld [vmem:[%s5492_s29 + $0xd] sm:$0x1] }
  0xde   : > { %v6509_v43 = vrot.slane %v1577_v11, %v8893_v31  ;;  %v1607_v36 = vmul.f32 %v6497_v62, %v1605_v44  ;;  %v1622_v12 = vmul.f32 %v6500_v7, %v1620_v53  ;;  %v1650_v35 = vrot.slane %v1648_v5, 3  ;;  %v6533_v5 = vld [vmem:[%s5485_s30 + $0xd0] sm:$0xff]  ;;  %v1693_v53 = vld [vmem:[%s5492_s29 + $0xf] sm:$0x1] }
  0xdf   : > { %v1525_v23 = vadd.f32 %v1523_v57, %v1510_v30  ;;  %v3593_v33 = vadd.f32 %v3591_v1, %v3578_v41  ;;  %v1568_v11 = vmul.f32 %v6292_v22, %v6493_v60  ;;  %v6522_v38 = vrot.slane %v1592_v55, %v8893_v31  ;;  %8912 = vst [vmem:[#allocation26_spill] sm:$0xff] %v6533_v5  ;;  %v6536_v1 = vld [vmem:[%s5485_s30 + $0xe0] sm:$0xff]  ;;  %v6552_v22 = vld [vmem:[%s5485_s30 + $0xf0] sm:$0xff] }
  0xe0   : > { %v1637_v27 = vmul.f32 %v6506_v42, %v1635_v59  ;;  %v6526_v30 = vrot.slane %v1607_v36, %v8893_v31  ;;  %v6529_v44 = vrot.slane %v1622_v12, %v8893_v31  ;;  %v1652_v57 = vmul.f32 %v6513_v49, %v1650_v35  ;;  %8913 = vst [vmem:[#allocation28_spill] sm:$0xff] %v6536_v1 }
  0xe1   : > { %v1540_v8 = vadd.f32 %v1538_v46, %v1525_v23  ;;  %5036 = vmatprep.subr.mxu0 %v3593_v33  ;;  %5112 = vmatprep.subr.mxu1 %v3593_v33  ;;  %v1583_v41 = vmul.f32 %v6302_v17, %v6509_v43  ;;  %v1665_v46 = vrot.slane %v1663_v9, 3  ;;  %v1680_v55 = vrot.slane %v1678_v51, 3 }
  0xe2   : > { %v6542_v23 = vrot.slane %v1637_v27, %v8893_v31  ;;  %v1598_v36 = vmul.f32 %v6307_v2, %v6522_v38  ;;  %v1613_v12 = vmul.f32 %v6310_v52, %v6526_v30  ;;  %v6549_v35 = vrot.slane %v1652_v57, %v8893_v31 }
  0xe3   : > { %v1555_v59 = vadd.f32 %v1553_v0, %v1540_v8  ;;  %v1628_v33 = vmul.f32 %v6344_v39, %v6529_v44  ;;  %v1667_v27 = vmul.f32 %v6533_v5, %v1665_v46  ;;  %v1682_v9 = vmul.f32 %v6536_v1, %v1680_v55 }
  0xe4   : > { %v1695_v51 = vrot.slane %v1693_v53, 3  ;;  %v1643_v8 = vmul.f32 %v6352_v61, %v6542_v23  ;;  %v3365_v52 = vmul.f32 %v6261_v40, %v6406_v4  ;;  %v3380_v57 = vmul.f32 %v6413_v19, %v6268_v16 }
  0xe5   : > { %v1570_v0 = vadd.f32 %v1568_v11, %v1555_v59  ;;  %v1671_v2 = vrot.slane %v1667_v27, %v8893_v31  ;;  %v1686_v17 = vrot.slane %v1682_v9, %v8893_v31  ;;  %v3395_v46 = vmul.f32 %v6424_v63, %v6271_v50 }
  0xe6   : > { %v1697_v39 = vmul.f32 %v6552_v22, %v1695_v51  ;;  %v1658_v11 = vmul.f32 %v6362_v14, %v6549_v35  ;;  %v3382_v55 = vadd.f32 %v3380_v57, %v3365_v52  ;;  %v3410_v40 = vmul.f32 %v6430_v18, %v6278_v56 }
  0xe7   : > { %v1585_v53 = vadd.f32 %v1583_v41, %v1570_v0  ;;  %v1673_v59 = vmul.f32 %v6367_v20, %v1671_v2  ;;  %v1688_v16 = vmul.f32 %v6370_v58, %v1686_v17  ;;  %v3425_v9 = vmul.f32 %v6433_v54, %v6281_v29 }
  0xe8   : > { %v6576_v27 = vrot.slane %v1697_v39, %v8893_v31  ;;  %v3397_v50 = vadd.f32 %v3395_v46, %v3382_v55  ;;  %v3440_v41 = vmul.f32 %v6441_v15, %v6316_v21  ;;  %v3455_v52 = vmul.f32 %v6448_v28, %v6321_v6 }
  0xe9   : > { %v1600_v51 = vadd.f32 %v1598_v36, %v1585_v53  ;;  %v3470_v0 = vmul.f32 %v6472_v13, %v6330_v26  ;;  %v3485_v31 = vmul.f32 %v6489_v24, %v6341_v34  ;;  %v3500_v29 = vmul.f32 %v6497_v62, %v6349_v47  ;;  %v8914_v47 = vld [vmem:[#allocation23_spill] sm:$0xff] }
  0xea   : > { %v1703_v56 = vmul.f32 %v6381_v37, %v6576_v27  ;;  %v3412_v36 = vadd.f32 %v3410_v40, %v3397_v50  ;;  %v6594_v21 = vmul.f32 %v6500_v7, %v6377_v48  ;;  %v6598_v6 = vmul.f32 %v6506_v42, %v6384_v10  ;;  %v8915_v10 = vld [vmem:[#allocation24_spill] sm:$0xff]  ;;  %v8917_v40 = vld [vmem:[#allocation22_spill] sm:$0xff]  ;;  %v8919_v50 = vld [vmem:[#allocation35_spill] sm:$0xff] }
  0xeb   : > { %v1615_v39 = vadd.f32 %v1613_v12, %v1600_v51  ;;  %v6602_v57 = vmul.f32 %v6513_v49, %v6393_v45  ;;  %v6606_v26 = vmul.f32 %v6533_v5, %v6399_v32  ;;  %v6610_v34 = vmul.f32 %v6536_v1, %v6402_v3  ;;  %v8916_v45 = vld [vmem:[#allocation25_spill] sm:$0xff]  ;;  %v8918_v51 = vld [vmem:[#allocation34_spill] sm:$0xff] }
  0xec   : > { %v1477_v48 = vmul.f32 %v8914_v47, %v6406_v4  ;;  %v3427_v46 = vadd.f32 %v3425_v9, %v3412_v36  ;;  %v1492_v53 = vmul.f32 %v6413_v19, %v8915_v10  ;;  %v1507_v55 = vmul.f32 %v6424_v63, %v8916_v45 }
  0xed   : > { %v1630_v12 = vadd.f32 %v1628_v33, %v1615_v39  ;;  %v6620_v32 = vmul.f32 %v6552_v22, %v8917_v40  ;;  %v1522_v3 = vmul.f32 %v6430_v18, %v8918_v51  ;;  %v1537_v47 = vmul.f32 %v6433_v54, %v8919_v50 }
  0xee   : > { %v1552_v33 = vmul.f32 %v6441_v15, %v6478_v25  ;;  %v3442_v39 = vadd.f32 %v3440_v41, %v3427_v46  ;;  %v1494_v36 = vadd.f32 %v1492_v53, %v1477_v48  ;;  %v1567_v10 = vmul.f32 %v6448_v28, %v6493_v60  ;;  %v3129_v41 = vld [vmem:[%s5492_s29 + $0x1] sm:$0x1]  ;;  %v3144_v46 = vld [vmem:[%s5492_s29 + $0x2] sm:$0x1]  ;;  %v3174_v53 = vld [vmem:[%s5492_s29 + $0x4] sm:$0x1] }
  0xef   : > { %v1645_v9 = vadd.f32 %v1643_v8, %v1630_v12  ;;  %v1582_v45 = vmul.f32 %v6472_v13, %v6509_v43  ;;  %v6634_v40 = vmul.f32 %v6489_v24, %v6522_v38  ;;  %v6638_v51 = vmul.f32 %v6497_v62, %v6526_v30  ;;  %v3114_v8 = vld [vmem:[%s5492_s29] sm:$0x1]  ;;  %v3159_v38 = vld [vmem:[%s5492_s29 + $0x3] sm:$0x1] }
  0xf0   : > { %v6642_v25 = vmul.f32 %v6500_v7, %v6529_v44  ;;  %v3457_v12 = vadd.f32 %v3455_v52, %v3442_v39  ;;  %v1509_v60 = vadd.f32 %v1507_v55, %v1494_v36  ;;  %v6648_v43 = vmul.f32 %v6506_v42, %v6542_v23 }
  0xf1   : > { %v1660_v48 = vadd.f32 %v1658_v11, %v1645_v9  ;;  %v6655_v30 = vmul.f32 %v6513_v49, %v6549_v35  ;;  %v6658_v50 = vmul.f32 %v6533_v5, %v1671_v2  ;;  %v6661_v44 = vmul.f32 %v6536_v1, %v1686_v17  ;;  %v8920_v11 = vld [vmem:[#allocation13_spill] sm:$0xff]  ;;  %v8921_v5 = vld [vmem:[#allocation38_spill] sm:$0xff]  ;;  %v8922_v1 = vld [vmem:[#allocation40_spill] sm:$0xff] }
  0xf2   : > { %v6664_v52 = vsub.s32 4, %v8920_v11  ;;  %v3472_v23 = vadd.f32 %v3470_v0, %v3457_v12  ;;  %v1524_v9 = vadd.f32 %v1522_v3, %v1509_v60  ;;  %v3116_v39 = vrot.slane %v3114_v8, 4  ;;  %v8923_v11 = vld [vmem:[#allocation42_spill] sm:$0xff]  ;;  %v8925_v0 = vld [vmem:[#allocation21_spill] sm:$0xff] }
  0xf3   : > { %v1675_v55 = vadd.f32 %v1673_v59, %v1660_v48  ;;  %v3131_v36 = vrot.slane %v3129_v41, 4  ;;  %v3146_v42 = vrot.slane %v3144_v46, 4  ;;  %v3161_v7 = vrot.slane %v3159_v38, 4  ;;  %v8924_v59 = vld [vmem:[#allocation14_spill] sm:$0xff]  ;;  %v3189_v8 = vld [vmem:[%s5492_s29 + $0x5] sm:$0x1] }
  0xf4   : > { %v3176_v62 = vrot.slane %v3174_v53, 4  ;;  %v3487_v49 = vadd.f32 %v3485_v31, %v3472_v23  ;;  %v1539_v2 = vadd.f32 %v1537_v47, %v1524_v9  ;;  %v3118_v17 = vmul.f32 %v8921_v5, %v3116_v39  ;;  %v3234_v46 = vld [vmem:[%s5492_s29 + $0x8] sm:$0x1]  ;;  %v8926_v9 = vld [vmem:[#allocation15_spill] sm:$0xff] }
  0xf5   : > { %v1690_v35 = vadd.f32 %v1688_v16, %v1675_v55  ;;  %v3133_v24 = vmul.f32 %v8922_v1, %v3131_v36  ;;  %v3148_v13 = vmul.f32 %v8923_v11, %v3146_v42  ;;  %v3163_v48 = vmul.f32 %v8924_v59, %v3161_v7  ;;  %v3204_v7 = vld [vmem:[%s5492_s29 + $0x6] sm:$0x1] }
  0xf6   : > { %v3178_v3 = vmul.f32 %v8925_v0, %v3176_v62  ;;  %v3502_v12 = vadd.f32 %v3500_v29, %v3487_v49  ;;  %v1554_v16 = vadd.f32 %v1552_v33, %v1539_v2  ;;  %v6673_v31 = vrot.slane %v3118_v17, %v6664_v52 }
  0xf7   : > { %v1705_v41 = vadd.f32 %v1703_v56, %v1690_v35  ;;  %v6676_v47 = vrot.slane %v3133_v24, %v6664_v52  ;;  %v6679_v60 = vrot.slane %v3148_v13, %v6664_v52  ;;  %v6682_v42 = vrot.slane %v3163_v48, %v6664_v52  ;;  %v3219_v56 = vld [vmem:[%s5492_s29 + $0x7] sm:$0x1]  ;;  %v3249_v13 = vld [vmem:[%s5492_s29 + $0x9] sm:$0x1] }
  0xf8   : > { %v6685_v62 = vrot.slane %v3178_v3, %v6664_v52  ;;  %v3517_v49 = vadd.f32 %v6594_v21, %v3502_v12  ;;  %v1569_v29 = vadd.f32 %v1567_v10, %v1554_v16  ;;  %v3124_v24 = vmul.f32 %v8921_v5, %v6673_v31  ;;  %v8927_v12 = vld [vmem:[#allocation16_spill] sm:$0xff] }
  0xf9   : > { %5037 = vmatpush3.msra.mxu0 %v1705_v41  ;;  %5128 = vmatpush3.msra.mxu1 %v1705_v41  ;;  %v3191_v33 = vrot.slane %v3189_v8, 4  ;;  %v3139_v38 = vmul.f32 %v8922_v1, %v6676_v47  ;;  %v3154_v53 = vmul.f32 %v8923_v11, %v6679_v60  ;;  %v3169_v55 = vmul.f32 %v8924_v59, %v6682_v42 }
  0xfa   : > { %v3184_v23 = vmul.f32 %v8925_v0, %v6685_v62  ;;  %v3532_v21 = vadd.f32 %v6598_v6, %v3517_v49  ;;  %v1584_v10 = vadd.f32 %v1582_v45, %v1569_v29  ;;  %v3206_v36 = vrot.slane %v3204_v7, 4  ;;  %v8928_v45 = vld [vmem:[#allocation17_spill] sm:$0xff]  ;;  %v8929_v29 = vld [vmem:[#allocation18_spill] sm:$0xff] }
  0xfb   : > { %v3193_v39 = vmul.f32 %v8926_v9, %v3191_v33  ;;  %v3141_v35 = vadd.f32 %v3139_v38, %v3124_v24  ;;  %v3221_v2 = vrot.slane %v3219_v56, 4  ;;  %v3236_v17 = vrot.slane %v3234_v46, 4  ;;  %v8930_v24 = vld [vmem:[#allocation19_spill] sm:$0xff]  ;;  %v3264_v33 = vld [vmem:[%s5492_s29 + $0xa] sm:$0x1] }
  0xfc   : > { %v3251_v48 = vrot.slane %v3249_v13, 4  ;;  %v3547_v3 = vadd.f32 %v6602_v57, %v3532_v21  ;;  %v1599_v8 = vadd.f32 %v6634_v40, %v1584_v10  ;;  %v3208_v6 = vmul.f32 %v8927_v12, %v3206_v36 }
  0xfd   : > { %v6707_v41 = vrot.slane %v3193_v39, %v6664_v52  ;;  %v3156_v16 = vadd.f32 %v3154_v53, %v3141_v35  ;;  %v3223_v49 = vmul.f32 %v8928_v45, %v3221_v2  ;;  %v3238_v7 = vmul.f32 %v8929_v29, %v3236_v17  ;;  %v3294_v39 = vld [vmem:[%s5492_s29 + $0xc] sm:$0x1]  ;;  %v3309_v35 = vld [vmem:[%s5492_s29 + $0xd] sm:$0x1]  ;;  %v3324_v2 = vld [vmem:[%s5492_s29 + $0xe] sm:$0x1] }
  0xfe   : > { %v3253_v56 = vmul.f32 %v8930_v24, %v3251_v48  ;;  %v3562_v57 = vadd.f32 %v6606_v26, %v3547_v3  ;;  %v1614_v40 = vadd.f32 %v6638_v51, %v1599_v8  ;;  %v1702_v46 = vmul.f32 %v6552_v22, %v6576_v27  ;;  %v3279_v26 = vld [vmem:[%s5492_s29 + $0xb] sm:$0x1] }
  0xff   : > { %v6719_v13 = vrot.slane %v3208_v6, %v6664_v52  ;;  %v3171_v38 = vadd.f32 %v3169_v55, %v3156_v16  ;;  %v3199_v53 = vmul.f32 %v8926_v9, %v6707_v41  ;;  %v6724_v21 = vrot.slane %v3223_v49, %v6664_v52  ;;  %v3339_v6 = vld [vmem:[%s5492_s29 + $0xf] sm:$0x1] }
 0x100   : > { %v6727_v10 = vrot.slane %v3238_v7, %v6664_v52  ;;  %v3577_v51 = vadd.f32 %v6610_v34, %v3562_v57  ;;  %v1629_v27 = vadd.f32 %v6642_v25, %v1614_v40  ;;  %v6734_v36 = vrot.slane %v3253_v56, %v6664_v52  ;;  %v8931_v16 = vld [vmem:[#allocation20_spill] sm:$0xff] }
 0x101   : > { %v3266_v55 = vrot.slane %v3264_v33, 4  ;;  %v3186_v17 = vadd.f32 %v3184_v23, %v3171_v38  ;;  %v3214_v48 = vmul.f32 %v8927_v12, %v6719_v13  ;;  %v3229_v3 = vmul.f32 %v8928_v45, %v6724_v21 }
 0x102   : > { %v3244_v8 = vmul.f32 %v8929_v29, %v6727_v10  ;;  %v3592_v34 = vadd.f32 %v6620_v32, %v3577_v51  ;;  %v1644_v25 = vadd.f32 %v6648_v43, %v1629_v27  ;;  %v3281_v7 = vrot.slane %v3279_v26, 4 }
 0x103   : > { %v3268_v49 = vmul.f32 %v8931_v16, %v3266_v55  ;;  %v3201_v56 = vadd.f32 %v3199_v53, %v3186_v17  ;;  %v3296_v23 = vrot.slane %v3294_v39, 4  ;;  %v3311_v33 = vrot.slane %v3309_v35, 4  ;;  %v1226_v39 = vld [vmem:[%s5492_s29] sm:$0x1] }
 0x104   : > { %v3326_v57 = vrot.slane %v3324_v2, 4  ;;  %5038 = vmatprep.subr.mxu0 %v3592_v34  ;;  %5113 = vmatprep.subr.mxu1 %v3592_v34  ;;  %v1659_v40 = vadd.f32 %v6655_v30, %v1644_v25  ;;  %v3283_v32 = vmul.f32 %v6352_v61, %v3281_v7  ;;  %v3341_v43 = vrot.slane %v3339_v6, 4  ;;  %v1256_v25 = vld [vmem:[%s5492_s29 + $0x2] sm:$0x1] }
 0x105   : > { %v6750_v38 = vrot.slane %v3268_v49, %v6664_v52  ;;  %v3216_v51 = vadd.f32 %v3214_v48, %v3201_v56  ;;  %v3298_v27 = vmul.f32 %v6362_v14, %v3296_v23  ;;  %v3313_v53 = vmul.f32 %v6367_v20, %v3311_v33  ;;  %v1271_v23 = vld [vmem:[%s5492_s29 + $0x3] sm:$0x1]  ;;  %v1286_v33 = vld [vmem:[%s5492_s29 + $0x4] sm:$0x1] }
 0x106   : > { %v3328_v26 = vmul.f32 %v6370_v58, %v3326_v57  ;;  %v1674_v30 = vadd.f32 %v6658_v50, %v1659_v40  ;;  %v3259_v55 = vmul.f32 %v8930_v24, %v6734_v36  ;;  %v6761_v35 = vrot.slane %v3283_v32, %v6664_v52  ;;  %v1241_v50 = vld [vmem:[%s5492_s29 + $0x1] sm:$0x1] }
 0x107   : > { %v3343_v2 = vmul.f32 %v6381_v37, %v3341_v43  ;;  %v3231_v17 = vadd.f32 %v3229_v3, %v3216_v51  ;;  %v6765_v48 = vrot.slane %v3298_v27, %v6664_v52  ;;  %v6768_v6 = vrot.slane %v3313_v53, %v6664_v52  ;;  %v1316_v51 = vld [vmem:[%s5492_s29 + $0x6] sm:$0x1] }
 0x108   : > { %8932 = vst [vmem:[#allocation27_spill] sm:$0xff] %v6761_v35  ;;  %v6771_v34 = vrot.slane %v3328_v26, %v6664_v52  ;;  %v1689_v49 = vadd.f32 %v6661_v44, %v1674_v30  ;;  %v3274_v7 = vmul.f32 %v8931_v16, %v6750_v38  ;;  %v3289_v3 = vmul.f32 %v6352_v61, %v6761_v35  ;;  %v1301_v44 = vld [vmem:[%s5492_s29 + $0x5] sm:$0x1] }
 0x109   : > { %8933 = vst [vmem:[#allocation30_spill] sm:$0xff] %v6765_v48  ;;  %8934 = vst [vmem:[#allocation31_spill] sm:$0xff] %v6768_v6  ;;  %v1228_v56 = vrot.slane %v1226_v39, 4  ;;  %v3246_v57 = vadd.f32 %v3244_v8, %v3231_v17  ;;  %v3304_v40 = vmul.f32 %v6362_v14, %v6765_v48  ;;  %v3319_v32 = vmul.f32 %v6367_v20, %v6768_v6 }
 0x10a   : > { %8935 = vst [vmem:[#allocation29_spill] sm:$0xff] %v6771_v34  ;;  %v6787_v43 = vrot.slane %v3343_v2, %v6664_v52  ;;  %v1704_v27 = vadd.f32 %v1702_v46, %v1689_v49  ;;  %v3334_v53 = vmul.f32 %v6370_v58, %v6771_v34  ;;  %v1243_v39 = vrot.slane %v1241_v50, 4  ;;  %v1331_v50 = vld [vmem:[%s5492_s29 + $0x7] sm:$0x1] }
 0x10b   : > { %v1230_v26 = vmul.f32 %v6406_v4, %v1228_v56  ;;  %v3261_v8 = vadd.f32 %v3259_v55, %v3246_v57  ;;  %v1258_v30 = vrot.slane %v1256_v25, 4  ;;  %v1273_v17 = vrot.slane %v1271_v23, 4 }
 0x10c   : > { %8936 = vst [vmem:[#allocation32_spill] sm:$0xff] %v6787_v43  ;;  %v1288_v48 = vrot.slane %v1286_v33, 4  ;;  %5039 = vmatpush3.msra.mxu0 %v1704_v27  ;;  %5129 = vmatpush3.msra.mxu1 %v1704_v27  ;;  %v1245_v2 = vmul.f32 %v6413_v19, %v1243_v39  ;;  %v1303_v46 = vrot.slane %v1301_v44, 4  ;;  %v1318_v49 = vrot.slane %v1316_v51, 4 }
 0x10d   : > { %v6795_v6 = vrot.slane %v1230_v26, %v6664_v52  ;;  %v3276_v35 = vadd.f32 %v3274_v7, %v3261_v8  ;;  %v1260_v34 = vmul.f32 %v6424_v63, %v1258_v30  ;;  %v1275_v56 = vmul.f32 %v6430_v18, %v1273_v17 }
 0x10e   : > { %v1290_v55 = vmul.f32 %v6433_v54, %v1288_v48  ;;  %v6805_v23 = vrot.slane %v1245_v2, %v6664_v52  ;;  %v1305_v33 = vmul.f32 %v6441_v15, %v1303_v46  ;;  %v1320_v57 = vmul.f32 %v6448_v28, %v1318_v49  ;;  %v1391_v46 = vld [vmem:[%s5492_s29 + $0xb] sm:$0x1]  ;;  %v1406_v49 = vld [vmem:[%s5492_s29 + $0xc] sm:$0x1] }
 0x10f   : > { %8937 = vst [vmem:[#allocation33_spill] sm:$0xff] %v6795_v6  ;;  %v1236_v25 = vmul.f32 %v8921_v5, %v6795_v6  ;;  %v3291_v7 = vadd.f32 %v3289_v3, %v3276_v35  ;;  %v6810_v44 = vrot.slane %v1260_v34, %v6664_v52  ;;  %v6813_v48 = vrot.slane %v1275_v56, %v6664_v52  ;;  %v1346_v5 = vld [vmem:[%s5492_s29 + $0x8] sm:$0x1]  ;;  %v1361_v3 = vld [vmem:[%s5492_s29 + $0x9] sm:$0x1]  ;;  %v8945_v6 = vld [vmem:[#allocation41_spill] sm:$0xff] }
 0x110   : > { %8938 = vst [vmem:[#allocation45_spill] sm:$0xff] %v6805_v23  ;;  %v6816_v51 = vrot.slane %v1290_v55, %v6664_v52  ;;  %v3349_v27 = vmul.f32 %v6381_v37, %v6787_v43  ;;  %v1251_v26 = vmul.f32 %v8922_v1, %v6805_v23  ;;  %v6824_v39 = vrot.slane %v1305_v33, %v6664_v52  ;;  %v1376_v34 = vld [vmem:[%s5492_s29 + $0xa] sm:$0x1] }
 0x111   : > { %8939 = vst [vmem:[#allocation23_spill] sm:$0xff] %v6810_v44  ;;  %8940 = vst [vmem:[#allocation24_spill] sm:$0xff] %v6813_v48  ;;  %v1333_v35 = vrot.slane %v1331_v50, 4  ;;  %v3306_v8 = vadd.f32 %v3304_v40, %v3291_v7  ;;  %v1266_v30 = vmul.f32 %v8923_v11, %v6810_v44  ;;  %v1281_v17 = vmul.f32 %v8924_v59, %v6813_v48  ;;  %v8942_v40 = vld [vmem:[#allocation36_spill] sm:$0xff]  ;;  %v8943_v44 = vld [vmem:[#allocation37_spill] sm:$0xff] }
 0x112   : > { %8941 = vst [vmem:[#allocation25_spill] sm:$0xff] %v6816_v51  ;;  %v6833_v2 = vrot.slane %v1320_v57, %v6664_v52  ;;  %v1253_v56 = vadd.f32 %v1251_v26, %v1236_v25  ;;  %v1296_v1 = vmul.f32 %v8925_v0, %v6816_v51  ;;  %v1311_v55 = vmul.f32 %v8926_v9, %v6824_v39  ;;  %v8944_v0 = vld [vmem:[#allocation39_spill] sm:$0xff] }
 0x113   : > { %v1335_v50 = vmul.f32 %v8942_v40, %v1333_v35  ;;  %v3321_v33 = vadd.f32 %v3319_v32, %v3306_v8  ;;  %v1348_v11 = vrot.slane %v1346_v5, 4  ;;  %v1363_v7 = vrot.slane %v1361_v3, 4  ;;  %v1421_v35 = vld [vmem:[%s5492_s29 + $0xd] sm:$0x1]  ;;  %v8946_v3 = vld [vmem:[#allocation43_spill] sm:$0xff] }
 0x114   : > { %v1378_v59 = vrot.slane %v1376_v34, 4  ;;  %v1268_v48 = vadd.f32 %v1266_v30, %v1253_v56  ;;  %v1393_v43 = vrot.slane %v1391_v46, 4  ;;  %v1408_v25 = vrot.slane %v1406_v49, 4  ;;  %v8947_v8 = vld [vmem:[#allocation44_spill] sm:$0xff] }
 0x115   : > { %v6843_v57 = vrot.slane %v1335_v50, %v6664_v52  ;;  %v3336_v26 = vadd.f32 %v3334_v53, %v3321_v33  ;;  %v1350_v23 = vmul.f32 %v8943_v44, %v1348_v11  ;;  %v1365_v51 = vmul.f32 %v8944_v0, %v1363_v7  ;;  %v1436_v56 = vld [vmem:[%s5492_s29 + $0xe] sm:$0x1] }
 0x116   : > { %v1380_v9 = vmul.f32 %v8945_v6, %v1378_v59  ;;  %v1283_v32 = vadd.f32 %v1281_v17, %v1268_v48  ;;  %v1326_v5 = vmul.f32 %v8927_v12, %v6833_v2  ;;  %v1395_v34 = vmul.f32 %v8946_v3, %v1393_v43  ;;  %v1451_v17 = vld [vmem:[%s5492_s29 + $0xf] sm:$0x1] }
 0x117   : > { %v1410_v30 = vmul.f32 %v8947_v8, %v1408_v25  ;;  %v3351_v46 = vadd.f32 %v3349_v27, %v3336_v26  ;;  %v6855_v53 = vrot.slane %v1350_v23, %v6664_v52  ;;  %v6858_v49 = vrot.slane %v1365_v51, %v6664_v52  ;;  %v8948_v25 = vld [vmem:[#allocation26_spill] sm:$0xff] }
 0x118   : > { %v6861_v50 = vrot.slane %v1380_v9, %v6664_v52  ;;  %v1298_v33 = vadd.f32 %v1296_v1, %v1283_v32  ;;  %v6864_v48 = vrot.slane %v1395_v34, %v6664_v52  ;;  %v1423_v43 = vrot.slane %v1421_v35, 4  ;;  %v8949_v9 = vld [vmem:[#allocation28_spill] sm:$0xff] }
 0x119   : > { %v6867_v12 = vrot.slane %v1410_v30, %v6664_v52  ;;  %5040 = vmatprep.subr.mxu0 %v3351_v46  ;;  %5114 = vmatprep.subr.mxu1 %v3351_v46  ;;  %v1341_v23 = vmul.f32 %v8928_v45, %v6843_v57  ;;  %v1356_v51 = vmul.f32 %v8929_v29, %v6855_v53  ;;  %v1438_v1 = vrot.slane %v1436_v56, 4 }
 0x11a   : > { %v1371_v27 = vmul.f32 %v8930_v24, %v6858_v49  ;;  %v1313_v11 = vadd.f32 %v1311_v55, %v1298_v33  ;;  %v1386_v7 = vmul.f32 %v8931_v16, %v6861_v50  ;;  %v1401_v59 = vmul.f32 %v6352_v61, %v6864_v48 }
 0x11b   : > { %v1425_v26 = vmul.f32 %v8948_v25, %v1423_v43  ;;  %v1440_v35 = vmul.f32 %v8949_v9, %v1438_v1  ;;  %v1453_v32 = vrot.slane %v1451_v17, 4  ;;  %v3123_v45 = vmul.f32 %v6673_v31, %v6406_v4 }
 0x11c   : > { %v3138_v29 = vmul.f32 %v6413_v19, %v6676_v47  ;;  %v1328_v24 = vadd.f32 %v1326_v5, %v1313_v11  ;;  %v1416_v55 = vmul.f32 %v6362_v14, %v6867_v12  ;;  %v3153_v61 = vmul.f32 %v6424_v63, %v6679_v60  ;;  %v8952_v11 = vld [vmem:[#allocation31_spill] sm:$0xff] }
 0x11d   : > { %v1429_v16 = vrot.slane %v1425_v26, %v6664_v52  ;;  %v1444_v34 = vrot.slane %v1440_v35, %v6664_v52  ;;  %v1455_v30 = vmul.f32 %v6552_v22, %v1453_v32  ;;  %v3168_v31 = vmul.f32 %v6430_v18, %v6682_v42 }
 0x11e   : > { %v3140_v56 = vadd.f32 %v3138_v29, %v3123_v45  ;;  %v1343_v46 = vadd.f32 %v1341_v23, %v1328_v24  ;;  %v3183_v5 = vmul.f32 %v6433_v54, %v6685_v62  ;;  %v3198_v14 = vmul.f32 %v6441_v15, %v6707_v41  ;;  %v8955_v45 = vld [vmem:[#allocation45_spill] sm:$0xff]  ;;  %v8956_v29 = vld [vmem:[#allocation23_spill] sm:$0xff] }
 0x11f   : > { %v1431_v47 = vmul.f32 %v6367_v20, %v1429_v16  ;;  %v1446_v33 = vmul.f32 %v6370_v58, %v1444_v34  ;;  %v6902_v60 = vrot.slane %v1455_v30, %v6664_v52  ;;  %v3213_v17 = vmul.f32 %v6448_v28, %v6719_v13  ;;  %v8950_v13 = vld [vmem:[#allocation27_spill] sm:$0xff]  ;;  %v8957_v30 = vld [vmem:[#allocation32_spill] sm:$0xff] }
 0x120   : > { %v3155_v43 = vadd.f32 %v3153_v61, %v3140_v56  ;;  %v1358_v1 = vadd.f32 %v1356_v51, %v1343_v46  ;;  %v3228_v42 = vmul.f32 %v8942_v40, %v6724_v21  ;;  %v3243_v20 = vmul.f32 %v8943_v44, %v6727_v10  ;;  %v8951_v51 = vld [vmem:[#allocation30_spill] sm:$0xff] }
 0x121   : > { %v3258_v62 = vmul.f32 %v8944_v0, %v6734_v36  ;;  %v6914_v58 = vmul.f32 %v6381_v37, %v6902_v60  ;;  %v6918_v41 = vmul.f32 %v8945_v6, %v6750_v38  ;;  %v6922_v23 = vmul.f32 %v8946_v3, %v8950_v13  ;;  %v8953_v37 = vld [vmem:[#allocation29_spill] sm:$0xff] }
 0x122   : > { %v3170_v52 = vadd.f32 %v3168_v31, %v3155_v43  ;;  %v1373_v21 = vadd.f32 %v1371_v27, %v1358_v1  ;;  %v6926_v10 = vmul.f32 %v8947_v8, %v8951_v51  ;;  %v6930_v36 = vmul.f32 %v8948_v25, %v8952_v11  ;;  %v8954_v38 = vld [vmem:[#allocation33_spill] sm:$0xff]  ;;  %v8958_v31 = vld [vmem:[#allocation24_spill] sm:$0xff]  ;;  %v7005_v51 = vld [vmem:[%s5485_s30 + $0x48] sm:$0xff] }
 0x123   : > { %v6934_v26 = vmul.f32 %v8949_v9, %v8953_v37  ;;  %v1235_v32 = vmul.f32 %v6406_v4, %v8954_v38  ;;  %v1250_v27 = vmul.f32 %v6413_v19, %v8955_v45  ;;  %v1265_v24 = vmul.f32 %v6424_v63, %v8956_v29  ;;  %8965 = vst [vmem:[#allocation40_spill] sm:$0xff] %v7005_v51 }
 0x124   : > { %v3185_v35 = vadd.f32 %v3183_v5, %v3170_v52  ;;  %v1388_v61 = vadd.f32 %v1386_v7, %v1373_v21  ;;  %v6944_v56 = vmul.f32 %v6552_v22, %v8957_v30  ;;  %v1280_v46 = vmul.f32 %v6430_v18, %v8958_v31  ;;  %v8959_v5 = vld [vmem:[#allocation25_spill] sm:$0xff]  ;;  %v6996_v21 = vld [vmem:[%s5485_s30 + $0x18] sm:$0xff] }
 0x125   : > { %v1295_v43 = vmul.f32 %v6433_v54, %v8959_v5  ;;  %v1252_v1 = vadd.f32 %v1250_v27, %v1235_v32  ;;  %v1310_v19 = vmul.f32 %v6441_v15, %v6824_v39  ;;  %v1325_v63 = vmul.f32 %v6448_v28, %v6833_v2  ;;  %8962 = vst [vmem:[#allocation34_spill] sm:$0xff] %v6996_v21 }
 0x126   : > { %v3200_v4 = vadd.f32 %v3198_v14, %v3185_v35  ;;  %v1403_v7 = vadd.f32 %v1401_v59, %v1388_v61  ;;  %v6956_v52 = vmul.f32 %v8942_v40, %v6843_v57  ;;  %v6960_v18 = vmul.f32 %v8943_v44, %v6855_v53  ;;  %v2872_v14 = vld [vmem:[%s5492_s29] sm:$0x1]  ;;  %v2887_v44 = vld [vmem:[%s5492_s29 + $0x1] sm:$0x1]  ;;  %v2902_v40 = vld [vmem:[%s5492_s29 + $0x2] sm:$0x1] }
 0x127   : > { %v6964_v54 = vmul.f32 %v8944_v0, %v6858_v49  ;;  %v1267_v39 = vadd.f32 %v1265_v24, %v1252_v1  ;;  %v6969_v28 = vmul.f32 %v8945_v6, %v6861_v50  ;;  %v6973_v2 = vmul.f32 %v8946_v3, %v6864_v48  ;;  %v2917_v57 = vld [vmem:[%s5492_s29 + $0x3] sm:$0x1]  ;;  %v6989_v50 = vld [vmem:[%s5485_s30 + $0x8] sm:$0xff]  ;;  %v2932_v3 = vld [vmem:[%s5492_s29 + $0x4] sm:$0x1] }
 0x128   : > { %v3215_v15 = vadd.f32 %v3213_v17, %v3200_v4  ;;  %v1418_v53 = vadd.f32 %v1416_v55, %v1403_v7  ;;  %v6980_v0 = vmul.f32 %v8947_v8, %v6867_v12  ;;  %v6983_v49 = vmul.f32 %v8948_v25, %v1429_v16  ;;  %8960 = vst [vmem:[#allocation22_spill] sm:$0xff] %v6989_v50  ;;  %v8961_v17 = vld [vmem:[#allocation13_spill] sm:$0xff]  ;;  %v6999_v8 = vld [vmem:[%s5485_s30 + $0x28] sm:$0xff]  ;;  %v7002_v12 = vld [vmem:[%s5485_s30 + $0x38] sm:$0xff] }
 0x129   : > { %v6986_v6 = vmul.f32 %v8949_v9, %v1444_v34  ;;  %v1282_v59 = vadd.f32 %v1280_v46, %v1267_v39  ;;  %v6993_v13 = vsub.s32 3, %v8961_v17  ;;  %v2874_v55 = vrot.slane %v2872_v14, 5  ;;  %8963 = vst [vmem:[#allocation35_spill] sm:$0xff] %v6999_v8  ;;  %8964 = vst [vmem:[#allocation38_spill] sm:$0xff] %v7002_v12  ;;  %v2947_v61 = vld [vmem:[%s5492_s29 + $0x5] sm:$0x1] }
 0x12a   : > { %v3230_v48 = vadd.f32 %v3228_v42, %v3215_v15  ;;  %v1433_v25 = vadd.f32 %v1431_v47, %v1418_v53  ;;  %v2889_v16 = vrot.slane %v2887_v44, 5  ;;  %v2904_v9 = vrot.slane %v2902_v40, 5  ;;  %v7034_v1 = vld [vmem:[%s5485_s30 + $0x58] sm:$0xff]  ;;  %v7045_v39 = vld [vmem:[%s5485_s30 + $0x68] sm:$0xff] }
 0x12b   : > { %v2919_v34 = vrot.slane %v2917_v57, 5  ;;  %v1297_v42 = vadd.f32 %v1295_v43, %v1282_v59  ;;  %v2876_v37 = vmul.f32 %v2874_v55, %v6989_v50  ;;  %v2934_v35 = vrot.slane %v2932_v3, 5  ;;  %8966 = vst [vmem:[#allocation42_spill] sm:$0xff] %v7034_v1  ;;  %v2992_v7 = vld [vmem:[%s5492_s29 + $0x8] sm:$0x1] }
 0x12c   : > { %v3245_v11 = vadd.f32 %v3243_v20, %v3230_v48  ;;  %v1448_v38 = vadd.f32 %v1446_v33, %v1433_v25  ;;  %v2891_v32 = vmul.f32 %v6996_v21, %v2889_v16  ;;  %v2906_v45 = vmul.f32 %v6999_v8, %v2904_v9  ;;  %v3007_v44 = vld [vmem:[%s5492_s29 + $0x9] sm:$0x1]  ;;  %v1164_v17 = vld [vmem:[%s5492_s29 + $0xc] sm:$0x1] }
 0x12d   : > { %v2921_v47 = vmul.f32 %v7002_v12, %v2919_v34  ;;  %v1312_v29 = vadd.f32 %v1310_v19, %v1297_v42  ;;  %v7012_v24 = vrot.slane %v2876_v37, %v6993_v13  ;;  %v2936_v20 = vmul.f32 %v7005_v51, %v2934_v35  ;;  %v2977_v19 = vld [vmem:[%s5492_s29 + $0x7] sm:$0x1]  ;;  %v7053_v48 = vld [vmem:[%s5485_s30 + $0x78] sm:$0xff]  ;;  %v7056_v59 = vld [vmem:[%s5485_s30 + $0x88] sm:$0xff] }
 0x12e   : > { %v3260_v27 = vadd.f32 %v3258_v62, %v3245_v11  ;;  %v1463_v30 = vadd.f32 %v6914_v58, %v1448_v38  ;;  %v7018_v33 = vrot.slane %v2891_v32, %v6993_v13  ;;  %v7021_v31 = vrot.slane %v2906_v45, %v6993_v13  ;;  %v2962_v62 = vld [vmem:[%s5492_s29 + $0x6] sm:$0x1]  ;;  %8967 = vst [vmem:[#allocation14_spill] sm:$0xff] %v7053_v48  ;;  %v7060_v34 = vld [vmem:[%s5485_s30 + $0x98] sm:$0xff] }
 0x12f   : > { %v7024_v46 = vrot.slane %v2921_v47, %v6993_v13  ;;  %v1327_v43 = vadd.f32 %v1325_v63, %v1312_v29  ;;  %v2882_v4 = vmul.f32 %v7012_v24, %v6989_v50  ;;  %v7031_v58 = vrot.slane %v2936_v20, %v6993_v13 }
 0x130   : > { %v3275_v5 = vadd.f32 %v6918_v41, %v3260_v27  ;;  %5041 = vmatpush3.msra.mxu0 %v1463_v30  ;;  %5130 = vmatpush3.msra.mxu1 %v1463_v30  ;;  %v2897_v14 = vmul.f32 %v6996_v21, %v7018_v33  ;;  %v2912_v41 = vmul.f32 %v6999_v8, %v7021_v31  ;;  %v2949_v15 = vrot.slane %v2947_v61, 5  ;;  %v3022_v27 = vld [vmem:[%s5492_s29 + $0xa] sm:$0x1] }
 0x131   : > { %v2927_v63 = vmul.f32 %v7002_v12, %v7024_v46  ;;  %v1342_v57 = vadd.f32 %v6956_v52, %v1327_v43  ;;  %v2942_v53 = vmul.f32 %v7005_v51, %v7031_v58  ;;  %v2964_v3 = vrot.slane %v2962_v62, 5 }
 0x132   : > { %v3290_v40 = vadd.f32 %v6922_v23, %v3275_v5  ;;  %v2899_v55 = vadd.f32 %v2897_v14, %v2882_v4  ;;  %v2951_v25 = vmul.f32 %v7034_v1, %v2949_v15  ;;  %v2979_v16 = vrot.slane %v2977_v19, 5  ;;  %v7093_v4 = vld [vmem:[%s5485_s30 + $0xa8] sm:$0xff] }
 0x133   : > { %v2994_v9 = vrot.slane %v2992_v7, 5  ;;  %v1357_v52 = vadd.f32 %v6960_v18, %v1342_v57  ;;  %v2966_v11 = vmul.f32 %v7045_v39, %v2964_v3  ;;  %v3009_v42 = vrot.slane %v3007_v44, 5  ;;  %8968 = vst [vmem:[#allocation21_spill] sm:$0xff] %v7093_v4  ;;  %v3052_v19 = vld [vmem:[%s5492_s29 + $0xc] sm:$0x1] }
 0x134   : > { %v3305_v23 = vadd.f32 %v6926_v10, %v3290_v40  ;;  %v2914_v37 = vadd.f32 %v2912_v41, %v2899_v55  ;;  %v7066_v35 = vrot.slane %v2951_v25, %v6993_v13  ;;  %v2981_v38 = vmul.f32 %v7053_v48, %v2979_v16  ;;  %v3067_v7 = vld [vmem:[%s5492_s29 + $0xd] sm:$0x1] }
 0x135   : > { %v2996_v32 = vmul.f32 %v7056_v59, %v2994_v9  ;;  %v1372_v10 = vadd.f32 %v6964_v54, %v1357_v52  ;;  %v7073_v18 = vrot.slane %v2966_v11, %v6993_v13  ;;  %v3011_v47 = vmul.f32 %v7060_v34, %v3009_v42  ;;  %v3037_v54 = vld [vmem:[%s5492_s29 + $0xb] sm:$0x1] }
 0x136   : > { %v3320_v45 = vadd.f32 %v6930_v36, %v3305_v23  ;;  %v2929_v29 = vadd.f32 %v2927_v63, %v2914_v37  ;;  %v2957_v20 = vmul.f32 %v7034_v1, %v7066_v35  ;;  %v7080_v61 = vrot.slane %v2981_v38, %v6993_v13  ;;  %v3097_v63 = vld [vmem:[%s5492_s29 + $0xf] sm:$0x1] }
 0x137   : > { %v7083_v36 = vrot.slane %v2996_v32, %v6993_v13  ;;  %v1387_v62 = vadd.f32 %v6969_v28, %v1372_v10  ;;  %v1460_v5 = vmul.f32 %v6552_v22, %v6902_v60  ;;  %v2972_v43 = vmul.f32 %v7045_v39, %v7073_v18  ;;  %v7103_v22 = vld [vmem:[%s5485_s30 + $0xb8] sm:$0xff]  ;;  %v7119_v23 = vld [vmem:[%s5485_s30 + $0xe8] sm:$0xff] }
 0x138   : > { %v3335_v30 = vadd.f32 %v6934_v26, %v3320_v45  ;;  %v2944_v14 = vadd.f32 %v2942_v53, %v2929_v29  ;;  %v2987_v41 = vmul.f32 %v7053_v48, %v7080_v61  ;;  %v7100_v26 = vrot.slane %v3011_v47, %v6993_v13  ;;  %8969 = vst [vmem:[#allocation15_spill] sm:$0xff] %v7103_v22  ;;  %v3082_v60 = vld [vmem:[%s5492_s29 + $0xe] sm:$0x1]  ;;  %v984_v29 = vld [vmem:[%s5492_s29] sm:$0x1] }
 0x139   : > { %v3024_v28 = vrot.slane %v3022_v27, 5  ;;  %v1402_v44 = vadd.f32 %v6973_v2, %v1387_v62  ;;  %v3002_v40 = vmul.f32 %v7056_v59, %v7083_v36  ;;  %v3039_v57 = vrot.slane %v3037_v54, 5  ;;  %v7112_v53 = vld [vmem:[%s5485_s30 + $0xc8] sm:$0xff]  ;;  %v7115_v3 = vld [vmem:[%s5485_s30 + $0xd8] sm:$0xff]  ;;  %v7147_v62 = vld [vmem:[%s5485_s30] sm:$0xff] }
 0x13a   : > { %v3350_v15 = vadd.f32 %v6944_v56, %v3335_v30  ;;  %8970 = vst [vmem:[#allocation16_spill] sm:$0xff] %v7112_v53  ;;  %v2959_v55 = vadd.f32 %v2957_v20, %v2944_v14  ;;  %v3054_v16 = vrot.slane %v3052_v19, 5  ;;  %v3069_v9 = vrot.slane %v3067_v7, 5  ;;  %v7122_v52 = vld [vmem:[%s5485_s30 + $0xf8] sm:$0xff]  ;;  %8972 = vst [vmem:[#allocation18_spill] sm:$0xff] %v7147_v62 }
 0x13b   : > { %v3026_v25 = vmul.f32 %v7093_v4, %v3024_v28  ;;  %8971 = vst [vmem:[#allocation17_spill] sm:$0xff] %v7122_v52  ;;  %v1417_v56 = vadd.f32 %v6980_v0, %v1402_v44  ;;  %v3041_v2 = vmul.f32 %v7103_v22, %v3039_v57  ;;  %v3084_v11 = vrot.slane %v3082_v60, 5  ;;  %v1014_v28 = vld [vmem:[%s5492_s29 + $0x2] sm:$0x1]  ;;  %v1029_v60 = vld [vmem:[%s5492_s29 + $0x3] sm:$0x1] }
 0x13c   : > { %5042 = vmatprep.subr.mxu0 %v3350_v15  ;;  %5115 = vmatprep.subr.mxu1 %v3350_v15  ;;  %v3099_v42 = vrot.slane %v3097_v63, 5  ;;  %v2974_v37 = vadd.f32 %v2972_v43, %v2959_v55  ;;  %v3056_v32 = vmul.f32 %v7112_v53, %v3054_v16  ;;  %v3071_v45 = vmul.f32 %v7115_v3, %v3069_v9  ;;  %v999_v43 = vld [vmem:[%s5492_s29 + $0x1] sm:$0x1]  ;;  %v1044_v63 = vld [vmem:[%s5492_s29 + $0x4] sm:$0x1] }
 0x13d   : > { %v7127_v38 = vrot.slane %v3026_v25, %v6993_v13  ;;  %v1432_v10 = vadd.f32 %v6983_v49, %v1417_v56  ;;  %v7133_v0 = vrot.slane %v3041_v2, %v6993_v13  ;;  %v3086_v47 = vmul.f32 %v7119_v23, %v3084_v11  ;;  %v7167_v55 = vld [vmem:[%s5485_s30 + $0x10] sm:$0xff]  ;;  %v7176_v11 = vld [vmem:[%s5485_s30 + $0x20] sm:$0xff] }
 0x13e   : > { %v3101_v27 = vmul.f32 %v7122_v52, %v3099_v42  ;;  %v2989_v20 = vadd.f32 %v2987_v41, %v2974_v37  ;;  %v3017_v54 = vmul.f32 %v7060_v34, %v7100_v26  ;;  %v7141_v30 = vrot.slane %v3056_v32, %v6993_v13  ;;  %v1059_v25 = vld [vmem:[%s5492_s29 + $0x5] sm:$0x1]  ;;  %v1074_v16 = vld [vmem:[%s5492_s29 + $0x6] sm:$0x1] }
 0x13f   : > { %v7144_v49 = vrot.slane %v3071_v45, %v6993_v13  ;;  %v1447_v19 = vadd.f32 %v6986_v6, %v1432_v10  ;;  %v3032_v7 = vmul.f32 %v7093_v4, %v7127_v38  ;;  %v3047_v14 = vmul.f32 %v7103_v22, %v7133_v0  ;;  %v7179_v42 = vld [vmem:[%s5485_s30 + $0x30] sm:$0xff] }
 0x140   : > { %v7156_v41 = vrot.slane %v3086_v47, %v6993_v13  ;;  %v3004_v15 = vadd.f32 %v3002_v40, %v2989_v20  ;;  %v3062_v44 = vmul.f32 %v7112_v53, %v7141_v30  ;;  %v7164_v6 = vrot.slane %v3101_v27, %v6993_v13  ;;  %v7183_v47 = vld [vmem:[%s5485_s30 + $0x40] sm:$0xff]  ;;  %v7186_v27 = vld [vmem:[%s5485_s30 + $0x50] sm:$0xff] }
 0x141   : > { %v986_v57 = vrot.slane %v984_v29, 5  ;;  %v1462_v9 = vadd.f32 %v1460_v5, %v1447_v19  ;;  %v3077_v56 = vmul.f32 %v7115_v3, %v7144_v49  ;;  %v1001_v2 = vrot.slane %v999_v43, 5  ;;  %v7189_v5 = vld [vmem:[%s5485_s30 + $0x60] sm:$0xff] }
 0x142   : > { %8973 = vst [vmem:[#allocation19_spill] sm:$0xff] %v7156_v41  ;;  %8974 = vst [vmem:[#allocation20_spill] sm:$0xff] %v7164_v6  ;;  %v3092_v40 = vmul.f32 %v7119_v23, %v7156_v41  ;;  %v3019_v37 = vadd.f32 %v3017_v54, %v3004_v15  ;;  %v1016_v45 = vrot.slane %v1014_v28, 5  ;;  %v1031_v10 = vrot.slane %v1029_v60, 5 }
 0x143   : > { %v988_v32 = vmul.f32 %v986_v57, %v7147_v62  ;;  %5043 = vmatpush3.msra.mxu0 %v1462_v9  ;;  %5131 = vmatpush3.msra.mxu1 %v1462_v9  ;;  %v1003_v29 = vmul.f32 %v7167_v55, %v1001_v2  ;;  %v1046_v20 = vrot.slane %v1044_v63, 5  ;;  %v1061_v43 = vrot.slane %v1059_v25, 5 }
 0x144   : > { %v1076_v19 = vrot.slane %v1074_v16, 5  ;;  %v3034_v54 = vadd.f32 %v3032_v7, %v3019_v37  ;;  %v1018_v28 = vmul.f32 %v7176_v11, %v1016_v45  ;;  %v1033_v60 = vmul.f32 %v7179_v42, %v1031_v10  ;;  %v1089_v7 = vld [vmem:[%s5492_s29 + $0x7] sm:$0x1] }
 0x145   : > { %v7193_v15 = vrot.slane %v988_v32, %v6993_v13  ;;  %v7198_v57 = vrot.slane %v1003_v29, %v6993_v13  ;;  %v1048_v9 = vmul.f32 %v7183_v47, %v1046_v20  ;;  %v1063_v63 = vmul.f32 %v7186_v27, %v1061_v43  ;;  %v7213_v45 = vld [vmem:[%s5485_s30 + $0x70] sm:$0xff]  ;;  %v1104_v43 = vld [vmem:[%s5492_s29 + $0x8] sm:$0x1] }
 0x146   : > { %v1078_v25 = vmul.f32 %v7189_v5, %v1076_v19  ;;  %v3049_v16 = vadd.f32 %v3047_v14, %v3034_v54  ;;  %v7207_v37 = vrot.slane %v1018_v28, %v6993_v13  ;;  %v7210_v32 = vrot.slane %v1033_v60, %v6993_v13  ;;  %v1119_v19 = vld [vmem:[%s5492_s29 + $0x9] sm:$0x1]  ;;  %v1134_v54 = vld [vmem:[%s5492_s29 + $0xa] sm:$0x1] }
 0x147   : > { %8975 = vst [vmem:[#allocation36_spill] sm:$0xff] %v7193_v15  ;;  %8976 = vst [vmem:[#allocation37_spill] sm:$0xff] %v7198_v57  ;;  %v994_v2 = vmul.f32 %v6989_v50, %v7193_v15  ;;  %v3107_v10 = vmul.f32 %v7122_v52, %v7164_v6  ;;  %v1009_v29 = vmul.f32 %v6996_v21, %v7198_v57  ;;  %v1091_v21 = vrot.slane %v1089_v7, 5 }
 0x148   : > { %8977 = vst [vmem:[#allocation39_spill] sm:$0xff] %v7207_v37  ;;  %8978 = vst [vmem:[#allocation41_spill] sm:$0xff] %v7210_v32  ;;  %v7220_v14 = vrot.slane %v1048_v9, %v6993_v13  ;;  %v7223_v20 = vrot.slane %v1063_v63, %v6993_v13  ;;  %v3064_v28 = vadd.f32 %v3062_v44, %v3049_v16  ;;  %v1149_v9 = vld [vmem:[%s5492_s29 + $0xb] sm:$0x1]  ;;  %v7242_v16 = vld [vmem:[%s5485_s30 + $0x80] sm:$0xff]  ;;  %v1106_v7 = vrot.slane %v1104_v43, 5 }
 0x149   : > { %v1024_v60 = vmul.f32 %v6999_v8, %v7207_v37  ;;  %v7231_v50 = vrot.slane %v1078_v25, %v6993_v13  ;;  %v1011_v6 = vadd.f32 %v1009_v29, %v994_v2  ;;  %v1039_v63 = vmul.f32 %v7002_v12, %v7210_v32  ;;  %v7245_v8 = vld [vmem:[%s5485_s30 + $0x90] sm:$0xff]  ;;  %v7249_v2 = vld [vmem:[%s5485_s30 + $0xa0] sm:$0xff] }
 0x14a   : > { %8979 = vst [vmem:[#allocation43_spill] sm:$0xff] %v7220_v14  ;;  %8980 = vst [vmem:[#allocation44_spill] sm:$0xff] %v7223_v20  ;;  %v1054_v57 = vmul.f32 %v7005_v51, %v7220_v14  ;;  %v1069_v44 = vmul.f32 %v7034_v1, %v7223_v20  ;;  %v3079_v25 = vadd.f32 %v3077_v56, %v3064_v28  ;;  %v1121_v15 = vrot.slane %v1119_v19, 5  ;;  %v7252_v29 = vld [vmem:[%s5485_s30 + $0xb0] sm:$0xff]  ;;  %v7255_v12 = vld [vmem:[%s5485_s30 + $0xc0] sm:$0xff] }
 0x14b   : > { %8981 = vst [vmem:[#allocation26_spill] sm:$0xff] %v7245_v8  ;;  %v1093_v37 = vmul.f32 %v7213_v45, %v1091_v21  ;;  %8982 = vst [vmem:[#allocation28_spill] sm:$0xff] %v7249_v2  ;;  %v1026_v51 = vadd.f32 %v1024_v60, %v1011_v6  ;;  %v1136_v14 = vrot.slane %v1134_v54, 5  ;;  %v1151_v1 = vrot.slane %v1149_v9, 5  ;;  %v1179_v54 = vld [vmem:[%s5492_s29 + $0xd] sm:$0x1] }
 0x14c   : > { %8983 = vst [vmem:[#allocation27_spill] sm:$0xff] %v7252_v29  ;;  %8984 = vst [vmem:[#allocation30_spill] sm:$0xff] %v7255_v12  ;;  %v1166_v20 = vrot.slane %v1164_v17, 5  ;;  %v3094_v32 = vadd.f32 %v3092_v40, %v3079_v25  ;;  %v1108_v21 = vmul.f32 %v7242_v16, %v1106_v7  ;;  %v1123_v56 = vmul.f32 %v7245_v8, %v1121_v15  ;;  %v1194_v17 = vld [vmem:[%s5492_s29 + $0xe] sm:$0x1] }
 0x14d   : > { %v7258_v41 = vrot.slane %v1093_v37, %v6993_v13  ;;  %v1041_v43 = vadd.f32 %v1039_v63, %v1026_v51  ;;  %v1138_v19 = vmul.f32 %v7249_v2, %v1136_v14  ;;  %v1153_v28 = vmul.f32 %v7252_v29, %v1151_v1 }
 0x14e   : > { %v1168_v6 = vmul.f32 %v7255_v12, %v1166_v20  ;;  %v3109_v40 = vadd.f32 %v3107_v10, %v3094_v32  ;;  %v1084_v37 = vmul.f32 %v7045_v39, %v7231_v50  ;;  %v7270_v60 = vrot.slane %v1108_v21, %v6993_v13  ;;  %v7285_v32 = vld [vmem:[%s5485_s30 + $0xd0] sm:$0xff]  ;;  %v7288_v10 = vld [vmem:[%s5485_s30 + $0xe0] sm:$0xff]  ;;  %v1209_v20 = vld [vmem:[%s5492_s29 + $0xf] sm:$0x1] }
 0x14f   : > { %v7273_v15 = vrot.slane %v1123_v56, %v6993_v13  ;;  %v1056_v51 = vadd.f32 %v1054_v57, %v1041_v43  ;;  %v7276_v9 = vrot.slane %v1138_v19, %v6993_v13  ;;  %v7279_v1 = vrot.slane %v1153_v28, %v6993_v13  ;;  %8985 = vst [vmem:[#allocation31_spill] sm:$0xff] %v7285_v32  ;;  %v7302_v28 = vld [vmem:[%s5485_s30 + $0xf0] sm:$0xff] }
 0x150   : > { %v7282_v14 = vrot.slane %v1168_v6, %v6993_v13  ;;  %8986 = vst [vmem:[#allocation29_spill] sm:$0xff] %v7288_v10  ;;  %5044 = vmatprep.subr.mxu0 %v3109_v40  ;;  %5116 = vmatprep.subr.mxu1 %v3109_v40  ;;  %v1099_v57 = vmul.f32 %v7053_v48, %v7258_v41  ;;  %v1181_v25 = vrot.slane %v1179_v54, 5  ;;  %v1196_v7 = vrot.slane %v1194_v17, 5 }
 0x151   : > { %v1114_v63 = vmul.f32 %v7056_v59, %v7270_v60  ;;  %v1071_v21 = vadd.f32 %v1069_v44, %v1056_v51  ;;  %v1129_v56 = vmul.f32 %v7060_v34, %v7273_v15  ;;  %v1144_v43 = vmul.f32 %v7093_v4, %v7276_v9 }
 0x152   : > { %v1159_v19 = vmul.f32 %v7103_v22, %v7279_v1  ;;  %v1183_v6 = vmul.f32 %v7285_v32, %v1181_v25  ;;  %v1198_v40 = vmul.f32 %v7288_v10, %v1196_v7  ;;  %v1211_v48 = vrot.slane %v1209_v20, 5 }
 0x153   : > { %v2881_v54 = vmul.f32 %v7012_v24, %v7147_v62  ;;  %v1086_v44 = vadd.f32 %v1084_v37, %v1071_v21  ;;  %v1174_v17 = vmul.f32 %v7112_v53, %v7282_v14  ;;  %v2896_v51 = vmul.f32 %v7167_v55, %v7018_v33 }
 0x154   : > { %v2911_v22 = vmul.f32 %v7176_v11, %v7021_v31  ;;  %v1187_v4 = vrot.slane %v1183_v6, %v6993_v13  ;;  %v1202_v25 = vrot.slane %v1198_v40, %v6993_v13  ;;  %v1213_v7 = vmul.f32 %v7302_v28, %v1211_v48 }
 0x155   : > { %v2926_v20 = vmul.f32 %v7179_v42, %v7024_v46  ;;  %v1101_v24 = vadd.f32 %v1099_v57, %v1086_v44  ;;  %v2898_v37 = vadd.f32 %v2896_v51, %v2881_v54  ;;  %v2941_v21 = vmul.f32 %v7183_v47, %v7031_v58  ;;  %v8987_v44 = vld [vmem:[#allocation19_spill] sm:$0xff] }
 0x156   : > { %v2956_v33 = vmul.f32 %v7186_v27, %v7066_v35  ;;  %v1189_v53 = vmul.f32 %v7115_v3, %v1187_v4  ;;  %v1204_v31 = vmul.f32 %v7119_v23, %v1202_v25  ;;  %v7326_v6 = vrot.slane %v1213_v7, %v6993_v13  ;;  %v8990_v7 = vld [vmem:[#allocation39_spill] sm:$0xff] }
 0x157   : > { %v2971_v48 = vmul.f32 %v7189_v5, %v7073_v18  ;;  %v1116_v40 = vadd.f32 %v1114_v63, %v1101_v24  ;;  %v2913_v46 = vadd.f32 %v2911_v22, %v2898_v37  ;;  %v2986_v57 = vmul.f32 %v7213_v45, %v7080_v61  ;;  %v8991_v37 = vld [vmem:[#allocation20_spill] sm:$0xff] }
 0x158   : > { %v3001_v58 = vmul.f32 %v7242_v16, %v7083_v36  ;;  %v1219_v35 = vmul.f32 %v7122_v52, %v7326_v6  ;;  %v3016_v54 = vmul.f32 %v7245_v8, %v7100_v26  ;;  %v7340_v13 = vmul.f32 %v7249_v2, %v7127_v38  ;;  %v8988_v38 = vld [vmem:[#allocation36_spill] sm:$0xff]  ;;  %v8993_v52 = vld [vmem:[#allocation43_spill] sm:$0xff] }
 0x159   : > { %v7344_v18 = vmul.f32 %v7252_v29, %v7133_v0  ;;  %v1131_v22 = vadd.f32 %v1129_v56, %v1116_v40  ;;  %v2928_v63 = vadd.f32 %v2926_v20, %v2913_v46  ;;  %v7348_v61 = vmul.f32 %v7255_v12, %v7141_v30  ;;  %v8989_v0 = vld [vmem:[#allocation37_spill] sm:$0xff] }
 0x15a   : > { %v7352_v36 = vmul.f32 %v7285_v32, %v7144_v49  ;;  %v7356_v26 = vmul.f32 %v7288_v10, %v8987_v44  ;;  %v993_v51 = vmul.f32 %v8988_v38, %v7147_v62  ;;  %v1008_v56 = vmul.f32 %v7167_v55, %v8989_v0  ;;  %v8992_v40 = vld [vmem:[#allocation41_spill] sm:$0xff]  ;;  %v8994_v62 = vld [vmem:[#allocation44_spill] sm:$0xff] }
 0x15b   : > { %v1023_v20 = vmul.f32 %v7176_v11, %v8990_v7  ;;  %v1146_v30 = vadd.f32 %v1144_v43, %v1131_v22  ;;  %v2943_v24 = vadd.f32 %v2941_v21, %v2928_v63  ;;  %v7366_v49 = vmul.f32 %v7302_v28, %v8991_v37 }
 0x15c   : > { %v1038_v46 = vmul.f32 %v7179_v42, %v8992_v40  ;;  %v1010_v44 = vadd.f32 %v1008_v56, %v993_v51  ;;  %v1053_v38 = vmul.f32 %v7183_v47, %v8993_v52  ;;  %v1068_v0 = vmul.f32 %v7186_v27, %v8994_v62  ;;  %v2630_v51 = vld [vmem:[%s5492_s29] sm:$0x1] }
 0x15d   : > { %v1083_v43 = vmul.f32 %v7189_v5, %v7231_v50  ;;  %v1161_v21 = vadd.f32 %v1159_v19, %v1146_v30  ;;  %v2958_v22 = vadd.f32 %v2956_v33, %v2943_v24  ;;  %v1098_v63 = vmul.f32 %v7213_v45, %v7258_v41  ;;  %v2645_v19 = vld [vmem:[%s5492_s29 + $0x1] sm:$0x1]  ;;  %v2660_v33 = vld [vmem:[%s5492_s29 + $0x2] sm:$0x1]  ;;  %v2690_v24 = vld [vmem:[%s5492_s29 + $0x4] sm:$0x1] }
 0x15e   : > { %v1113_v7 = vmul.f32 %v7242_v16, %v7270_v60  ;;  %v1025_v56 = vadd.f32 %v1023_v20, %v1010_v44  ;;  %v7383_v52 = vmul.f32 %v7245_v8, %v7273_v15  ;;  %v7387_v62 = vmul.f32 %v7249_v2, %v7276_v9  ;;  %v2675_v15 = vld [vmem:[%s5492_s29 + $0x3] sm:$0x1] }
 0x15f   : > { %v7391_v50 = vmul.f32 %v7252_v29, %v7279_v1  ;;  %v1176_v41 = vadd.f32 %v1174_v17, %v1161_v21  ;;  %v2973_v30 = vadd.f32 %v2971_v48, %v2958_v22  ;;  %v7397_v60 = vmul.f32 %v7255_v12, %v7282_v14  ;;  %v8995_v40 = vld [vmem:[#allocation13_spill] sm:$0xff]  ;;  %v8996_v22 = vld [vmem:[#allocation22_spill] sm:$0xff] }
 0x160   : > { %v7400_v20 = vmul.f32 %v7285_v32, %v1187_v4  ;;  %v1040_v37 = vadd.f32 %v1038_v46, %v1025_v56  ;;  %v7405_v9 = vmul.f32 %v7288_v10, %v1202_v25  ;;  %v7408_v1 = vsub.s32 2, %v8995_v40  ;;  %v8997_v56 = vld [vmem:[#allocation34_spill] sm:$0xff]  ;;  %v8998_v10 = vld [vmem:[#allocation35_spill] sm:$0xff] }
 0x161   : > { %v2632_v44 = vrot.slane %v2630_v51, 6  ;;  %v1191_v29 = vadd.f32 %v1189_v53, %v1176_v41  ;;  %v2988_v17 = vadd.f32 %v2986_v57, %v2973_v30  ;;  %v2647_v48 = vrot.slane %v2645_v19, 6  ;;  %v8999_v57 = vld [vmem:[#allocation38_spill] sm:$0xff]  ;;  %v9000_v19 = vld [vmem:[#allocation40_spill] sm:$0xff] }
 0x162   : > { %v2662_v21 = vrot.slane %v2660_v33, 6  ;;  %v1055_v14 = vadd.f32 %v1053_v38, %v1040_v37  ;;  %v2677_v4 = vrot.slane %v2675_v15, 6  ;;  %v2692_v32 = vrot.slane %v2690_v24, 6  ;;  %v2705_v33 = vld [vmem:[%s5492_s29 + $0x5] sm:$0x1] }
 0x163   : > { %v2634_v12 = vmul.f32 %v8996_v22, %v2632_v44  ;;  %v1206_v2 = vadd.f32 %v1204_v31, %v1191_v29  ;;  %v3003_v46 = vadd.f32 %v3001_v58, %v2988_v17  ;;  %v2649_v25 = vmul.f32 %v8997_v56, %v2647_v48  ;;  %v2720_v58 = vld [vmem:[%s5492_s29 + $0x6] sm:$0x1]  ;;  %v2750_v24 = vld [vmem:[%s5492_s29 + $0x8] sm:$0x1]  ;;  %v2765_v37 = vld [vmem:[%s5492_s29 + $0x9] sm:$0x1] }
 0x164   : > { %v2664_v40 = vmul.f32 %v8998_v10, %v2662_v21  ;;  %v1070_v8 = vadd.f32 %v1068_v0, %v1055_v14  ;;  %v2679_v51 = vmul.f32 %v8999_v57, %v2677_v4  ;;  %v2694_v38 = vmul.f32 %v9000_v19, %v2692_v32  ;;  %v9001_v14 = vld [vmem:[#allocation42_spill] sm:$0xff] }
 0x165   : > { %v7414_v53 = vrot.slane %v2634_v12, %v7408_v1  ;;  %v1221_v41 = vadd.f32 %v1219_v35, %v1206_v2  ;;  %v3018_v30 = vadd.f32 %v3016_v54, %v3003_v46  ;;  %v7420_v29 = vrot.slane %v2649_v25, %v7408_v1  ;;  %v2735_v2 = vld [vmem:[%s5492_s29 + $0x7] sm:$0x1] }
 0x166   : > { %v7423_v31 = vrot.slane %v2664_v40, %v7408_v1  ;;  %v1085_v0 = vadd.f32 %v1083_v43, %v1070_v8  ;;  %v7429_v15 = vrot.slane %v2679_v51, %v7408_v1  ;;  %v7432_v32 = vrot.slane %v2694_v38, %v7408_v1 }
 0x167   : > { %v2640_v12 = vmul.f32 %v8996_v22, %v7414_v53  ;;  %5045 = vmatpush3.msra.mxu0 %v1221_v41  ;;  %5132 = vmatpush3.msra.mxu1 %v1221_v41  ;;  %v3033_v35 = vadd.f32 %v7340_v13, %v3018_v30  ;;  %v2655_v54 = vmul.f32 %v8997_v56, %v7420_v29  ;;  %v2707_v43 = vrot.slane %v2705_v33, 6 }
 0x168   : > { %v2670_v8 = vmul.f32 %v8998_v10, %v7423_v31  ;;  %v1100_v40 = vadd.f32 %v1098_v63, %v1085_v0  ;;  %v2685_v44 = vmul.f32 %v8999_v57, %v7429_v15  ;;  %v2700_v17 = vmul.f32 %v9000_v19, %v7432_v32 }
 0x169   : > { %v2722_v48 = vrot.slane %v2720_v58, 6  ;;  %v3048_v21 = vadd.f32 %v7344_v18, %v3033_v35  ;;  %v2657_v13 = vadd.f32 %v2655_v54, %v2640_v12  ;;  %v2709_v4 = vmul.f32 %v9001_v14, %v2707_v43  ;;  %v9002_v58 = vld [vmem:[#allocation14_spill] sm:$0xff] }
 0x16a   : > { %v2737_v46 = vrot.slane %v2735_v2, 6  ;;  %v1115_v25 = vadd.f32 %v1113_v7, %v1100_v40  ;;  %v2752_v38 = vrot.slane %v2750_v24, 6  ;;  %v2767_v63 = vrot.slane %v2765_v37, 6  ;;  %v2780_v35 = vld [vmem:[%s5492_s29 + $0xa] sm:$0x1] }
 0x16b   : > { %v2724_v51 = vmul.f32 %v7045_v39, %v2722_v48  ;;  %v3063_v33 = vadd.f32 %v7348_v61, %v3048_v21  ;;  %v2672_v41 = vadd.f32 %v2670_v8, %v2657_v13  ;;  %v7451_v30 = vrot.slane %v2709_v4, %v7408_v1 }
 0x16c   : > { %v2739_v18 = vmul.f32 %v9002_v58, %v2737_v46  ;;  %v1130_v0 = vadd.f32 %v7383_v52, %v1115_v25  ;;  %v2754_v7 = vmul.f32 %v7056_v59, %v2752_v38  ;;  %v2769_v2 = vmul.f32 %v7060_v34, %v2767_v63  ;;  %v2795_v52 = vld [vmem:[%s5492_s29 + $0xb] sm:$0x1]  ;;  %v2825_v46 = vld [vmem:[%s5492_s29 + $0xd] sm:$0x1]  ;;  %v2840_v25 = vld [vmem:[%s5492_s29 + $0xe] sm:$0x1] }
 0x16d   : > { %v7456_v12 = vrot.slane %v2724_v51, %v7408_v1  ;;  %v3078_v61 = vadd.f32 %v7352_v36, %v3063_v33  ;;  %v2687_v54 = vadd.f32 %v2685_v44, %v2672_v41  ;;  %v2715_v8 = vmul.f32 %v9001_v14, %v7451_v30  ;;  %v2810_v36 = vld [vmem:[%s5492_s29 + $0xc] sm:$0x1]  ;;  %v2855_v63 = vld [vmem:[%s5492_s29 + $0xf] sm:$0x1] }
 0x16e   : > { %v7465_v43 = vrot.slane %v2739_v18, %v7408_v1  ;;  %v1145_v24 = vadd.f32 %v7387_v62, %v1130_v0  ;;  %v1218_v37 = vmul.f32 %v7302_v28, %v7326_v6  ;;  %v7474_v48 = vrot.slane %v2754_v7, %v7408_v1  ;;  %v9004_v7 = vld [vmem:[#allocation15_spill] sm:$0xff] }
 0x16f   : > { %v2730_v40 = vmul.f32 %v7045_v39, %v7456_v12  ;;  %v3093_v44 = vadd.f32 %v7356_v26, %v3078_v61  ;;  %v2702_v21 = vadd.f32 %v2700_v17, %v2687_v54  ;;  %v7479_v13 = vrot.slane %v2769_v2, %v7408_v1  ;;  %v9003_v17 = vld [vmem:[#allocation21_spill] sm:$0xff] }
 0x170   : > { %v2782_v4 = vrot.slane %v2780_v35, 6  ;;  %v1160_v62 = vadd.f32 %v7391_v50, %v1145_v24  ;;  %v2745_v6 = vmul.f32 %v9002_v58, %v7465_v43  ;;  %v2760_v51 = vmul.f32 %v7056_v59, %v7474_v48 }
 0x171   : > { %v2797_v38 = vrot.slane %v2795_v52, 6  ;;  %v3108_v33 = vadd.f32 %v7366_v49, %v3093_v44  ;;  %v2717_v26 = vadd.f32 %v2715_v8, %v2702_v21  ;;  %v2812_v18 = vrot.slane %v2810_v36, 6  ;;  %v9006_v52 = vld [vmem:[#allocation16_spill] sm:$0xff]  ;;  %v742_v21 = vld [vmem:[%s5492_s29] sm:$0x1] }
 0x172   : > { %v2784_v41 = vmul.f32 %v9003_v17, %v2782_v4  ;;  %v1175_v0 = vadd.f32 %v7397_v60, %v1160_v62  ;;  %v2827_v50 = vrot.slane %v2825_v46, 6  ;;  %v2842_v35 = vrot.slane %v2840_v25, 6  ;;  %v9009_v25 = vld [vmem:[#allocation17_spill] sm:$0xff] }
 0x173   : > { %v2799_v2 = vmul.f32 %v9004_v7, %v2797_v38  ;;  %5046 = vmatprep.subr.mxu0 %v3108_v33  ;;  %5117 = vmatprep.subr.mxu1 %v3108_v33  ;;  %v2732_v61 = vadd.f32 %v2730_v40, %v2717_v26  ;;  %v2814_v49 = vmul.f32 %v9006_v52, %v2812_v18  ;;  %v2857_v8 = vrot.slane %v2855_v63, 6  ;;  %v772_v26 = vld [vmem:[%s5492_s29 + $0x2] sm:$0x1] }
 0x174   : > { %v7494_v54 = vrot.slane %v2784_v41, %v7408_v1  ;;  %v1190_v24 = vadd.f32 %v7400_v20, %v1175_v0  ;;  %v2829_v36 = vmul.f32 %v7115_v3, %v2827_v50  ;;  %v2844_v44 = vmul.f32 %v7119_v23, %v2842_v35  ;;  %v757_v20 = vld [vmem:[%s5492_s29 + $0x1] sm:$0x1]  ;;  %v787_v41 = vld [vmem:[%s5492_s29 + $0x3] sm:$0x1]  ;;  %v802_v50 = vld [vmem:[%s5492_s29 + $0x4] sm:$0x1] }
 0x175   : > { %v7499_v60 = vrot.slane %v2799_v2, %v7408_v1  ;;  %v2747_v40 = vadd.f32 %v2745_v6, %v2732_v61  ;;  %v2775_v4 = vmul.f32 %v7060_v34, %v7479_v13  ;;  %v7507_v46 = vrot.slane %v2814_v49, %v7408_v1  ;;  %v817_v35 = vld [vmem:[%s5492_s29 + $0x5] sm:$0x1] }
 0x176   : > { %9005 = vst [vmem:[#allocation33_spill] sm:$0xff] %v7494_v54  ;;  %v2859_v62 = vmul.f32 %v9009_v25, %v2857_v8  ;;  %v1205_v38 = vadd.f32 %v7405_v9, %v1190_v24  ;;  %v2790_v63 = vmul.f32 %v9003_v17, %v7494_v54  ;;  %v7515_v33 = vrot.slane %v2829_v36, %v7408_v1  ;;  %v832_v36 = vld [vmem:[%s5492_s29 + $0x6] sm:$0x1] }
 0x177   : > { %9007 = vst [vmem:[#allocation45_spill] sm:$0xff] %v7499_v60  ;;  %9008 = vst [vmem:[#allocation23_spill] sm:$0xff] %v7507_v46  ;;  %v7518_v6 = vrot.slane %v2844_v44, %v7408_v1  ;;  %v2762_v18 = vadd.f32 %v2760_v51, %v2747_v40  ;;  %v2805_v0 = vmul.f32 %v9004_v7, %v7499_v60  ;;  %v744_v9 = vrot.slane %v742_v21, 6  ;;  %v9012_v40 = vld [vmem:[#allocation18_spill] sm:$0xff] }
 0x178   : > { %9010 = vst [vmem:[#allocation32_spill] sm:$0xff] %v7515_v33  ;;  %v2820_v2 = vmul.f32 %v9006_v52, %v7507_v46  ;;  %v1220_v61 = vadd.f32 %v1218_v37, %v1205_v38  ;;  %v2835_v49 = vmul.f32 %v7115_v3, %v7515_v33  ;;  %v7531_v8 = vrot.slane %v2859_v62, %v7408_v1 }
 0x179   : > { %v759_v24 = vrot.slane %v757_v20, 6  ;;  %v2777_v44 = vadd.f32 %v2775_v4, %v2762_v18  ;;  %v2850_v51 = vmul.f32 %v7119_v23, %v7518_v6  ;;  %v746_v60 = vmul.f32 %v9012_v40, %v744_v9 }
 0x17a   : > { %9011 = vst [vmem:[#allocation24_spill] sm:$0xff] %v7531_v8  ;;  %v774_v46 = vrot.slane %v772_v26, 6  ;;  %5047 = vmatpush3.msra.mxu0 %v1220_v61  ;;  %5133 = vmatpush3.msra.mxu1 %v1220_v61  ;;  %v789_v21 = vrot.slane %v787_v41, 6  ;;  %v804_v38 = vrot.slane %v802_v50, 6  ;;  %v819_v33 = vrot.slane %v817_v35, 6 }
 0x17b   : > { %v761_v37 = vmul.f32 %v7167_v55, %v759_v24  ;;  %v2792_v54 = vadd.f32 %v2790_v63, %v2777_v44  ;;  %v7539_v62 = vrot.slane %v746_v60, %v7408_v1  ;;  %v834_v20 = vrot.slane %v832_v36, 6  ;;  %v847_v50 = vld [vmem:[%s5492_s29 + $0x7] sm:$0x1] }
 0x17c   : > { %v776_v4 = vmul.f32 %v7176_v11, %v774_v46  ;;  %v791_v26 = vmul.f32 %v7179_v42, %v789_v21  ;;  %v806_v9 = vmul.f32 %v7183_v47, %v804_v38  ;;  %v821_v41 = vmul.f32 %v7186_v27, %v819_v33  ;;  %v892_v21 = vld [vmem:[%s5492_s29 + $0xa] sm:$0x1]  ;;  %v907_v38 = vld [vmem:[%s5492_s29 + $0xb] sm:$0x1] }
 0x17d   : > { %v7543_v18 = vrot.slane %v761_v37, %v7408_v1  ;;  %v2807_v63 = vadd.f32 %v2805_v0, %v2792_v54  ;;  %v752_v60 = vmul.f32 %v8996_v22, %v7539_v62  ;;  %v836_v35 = vmul.f32 %v7189_v5, %v834_v20  ;;  %v862_v0 = vld [vmem:[%s5492_s29 + $0x8] sm:$0x1]  ;;  %v877_v22 = vld [vmem:[%s5492_s29 + $0x9] sm:$0x1] }
 0x17e   : > { %v7552_v46 = vrot.slane %v776_v4, %v7408_v1  ;;  %v7558_v24 = vrot.slane %v791_v26, %v7408_v1  ;;  %v7561_v33 = vrot.slane %v806_v9, %v7408_v1  ;;  %v7564_v54 = vrot.slane %v821_v41, %v7408_v1 }
 0x17f   : > { %9013 = vst [vmem:[#allocation25_spill] sm:$0xff] %v7543_v18  ;;  %v767_v61 = vmul.f32 %v8997_v56, %v7543_v18  ;;  %v2822_v36 = vadd.f32 %v2820_v2, %v2807_v63  ;;  %v2865_v44 = vmul.f32 %v9009_v25, %v7531_v8  ;;  %v849_v56 = vrot.slane %v847_v50, 6  ;;  %v922_v2 = vld [vmem:[%s5492_s29 + $0xc] sm:$0x1]  ;;  %v9020_v18 = vld [vmem:[#allocation27_spill] sm:$0xff] }
 0x180   : > { %9014 = vst [vmem:[#allocation19_spill] sm:$0xff] %v7552_v46  ;;  %9015 = vst [vmem:[#allocation36_spill] sm:$0xff] %v7558_v24  ;;  %v782_v37 = vmul.f32 %v8998_v10, %v7552_v46  ;;  %v797_v20 = vmul.f32 %v8999_v57, %v7558_v24  ;;  %v812_v26 = vmul.f32 %v9000_v19, %v7561_v33  ;;  %v864_v50 = vrot.slane %v862_v0, 6  ;;  %v937_v0 = vld [vmem:[%s5492_s29 + $0xd] sm:$0x1] }
 0x181   : > { %9016 = vst [vmem:[#allocation37_spill] sm:$0xff] %v7561_v33  ;;  %9017 = vst [vmem:[#allocation39_spill] sm:$0xff] %v7564_v54  ;;  %v769_v4 = vadd.f32 %v767_v61, %v752_v60  ;;  %v7579_v9 = vrot.slane %v836_v35, %v7408_v1  ;;  %v2837_v41 = vadd.f32 %v2835_v49, %v2822_v36  ;;  %v879_v61 = vrot.slane %v877_v22, 6  ;;  %v9018_v33 = vld [vmem:[#allocation26_spill] sm:$0xff] }
 0x182   : > { %v827_v63 = vmul.f32 %v9001_v14, %v7564_v54  ;;  %v851_v10 = vmul.f32 %v7213_v45, %v849_v56  ;;  %v894_v46 = vrot.slane %v892_v21, 6  ;;  %v909_v57 = vrot.slane %v907_v38, 6  ;;  %v9019_v14 = vld [vmem:[#allocation28_spill] sm:$0xff]  ;;  %v9021_v38 = vld [vmem:[#allocation30_spill] sm:$0xff] }
 0x183   : > { %v784_v60 = vadd.f32 %v782_v37, %v769_v4  ;;  %v2852_v24 = vadd.f32 %v2850_v51, %v2837_v41  ;;  %v866_v35 = vmul.f32 %v7242_v16, %v864_v50  ;;  %v924_v49 = vrot.slane %v922_v2, 6  ;;  %v952_v37 = vld [vmem:[%s5492_s29 + $0xe] sm:$0x1] }
 0x184   : > { %v7586_v19 = vrot.slane %v851_v10, %v7408_v1  ;;  %v881_v8 = vmul.f32 %v9018_v33, %v879_v61  ;;  %v896_v54 = vmul.f32 %v9019_v14, %v894_v46  ;;  %v911_v56 = vmul.f32 %v9020_v18, %v909_v57  ;;  %v967_v10 = vld [vmem:[%s5492_s29 + $0xf] sm:$0x1]  ;;  %v9022_v57 = vld [vmem:[#allocation31_spill] sm:$0xff] }
 0x185   : > { %v799_v36 = vadd.f32 %v797_v20, %v784_v60  ;;  %v2867_v22 = vadd.f32 %v2865_v44, %v2852_v24  ;;  %v842_v51 = vmul.f32 %v7045_v39, %v7579_v9  ;;  %v7597_v21 = vrot.slane %v866_v35, %v7408_v1  ;;  %v9023_v35 = vld [vmem:[#allocation29_spill] sm:$0xff] }
 0x186   : > { %v926_v4 = vmul.f32 %v9021_v38, %v924_v49  ;;  %v7601_v20 = vrot.slane %v881_v8, %v7408_v1  ;;  %v7604_v2 = vrot.slane %v896_v54, %v7408_v1  ;;  %v7607_v46 = vrot.slane %v911_v56, %v7408_v1 }
 0x187   : > { %v814_v41 = vadd.f32 %v812_v26, %v799_v36  ;;  %5048 = vmatprep.subr.mxu0 %v2867_v22  ;;  %5118 = vmatprep.subr.mxu1 %v2867_v22  ;;  %v857_v39 = vmul.f32 %v9002_v58, %v7586_v19  ;;  %v939_v44 = vrot.slane %v937_v0, 6  ;;  %v954_v26 = vrot.slane %v952_v37, 6 }
 0x188   : > { %v7613_v24 = vrot.slane %v926_v4, %v7408_v1  ;;  %v872_v8 = vmul.f32 %v7056_v59, %v7597_v21  ;;  %v887_v54 = vmul.f32 %v7060_v34, %v7601_v20  ;;  %v902_v60 = vmul.f32 %v9003_v17, %v7604_v2 }
 0x189   : > { %v829_v50 = vadd.f32 %v827_v63, %v814_v41  ;;  %v917_v61 = vmul.f32 %v9004_v7, %v7607_v46  ;;  %v941_v58 = vmul.f32 %v9022_v57, %v939_v44  ;;  %v956_v49 = vmul.f32 %v9023_v35, %v954_v26 }
 0x18a   : > { %v969_v36 = vrot.slane %v967_v10, 6  ;;  %v2639_v63 = vmul.f32 %v7414_v53, %v9012_v40  ;;  %v2654_v59 = vmul.f32 %v7167_v55, %v7420_v29  ;;  %v2669_v34 = vmul.f32 %v7176_v11, %v7423_v31 }
 0x18b   : > { %v844_v56 = vadd.f32 %v842_v51, %v829_v50  ;;  %v932_v17 = vmul.f32 %v9006_v52, %v7613_v24  ;;  %v945_v7 = vrot.slane %v941_v58, %v7408_v1  ;;  %v960_v0 = vrot.slane %v956_v49, %v7408_v1  ;;  %v9025_v50 = vld [vmem:[#allocation45_spill] sm:$0xff]  ;;  %v9027_v58 = vld [vmem:[#allocation32_spill] sm:$0xff] }
 0x18c   : > { %v971_v37 = vmul.f32 %v7302_v28, %v969_v36  ;;  %v2656_v51 = vadd.f32 %v2654_v59, %v2639_v63  ;;  %v2684_v53 = vmul.f32 %v7179_v42, %v7429_v15  ;;  %v2699_v29 = vmul.f32 %v7183_v47, %v7432_v32  ;;  %v9024_v32 = vld [vmem:[#allocation33_spill] sm:$0xff]  ;;  %v9029_v59 = vld [vmem:[#allocation24_spill] sm:$0xff] }
 0x18d   : > { %v859_v22 = vadd.f32 %v857_v39, %v844_v56  ;;  %v947_v4 = vmul.f32 %v7115_v3, %v945_v7  ;;  %v7642_v31 = vmul.f32 %v7119_v23, %v960_v0  ;;  %v2714_v41 = vmul.f32 %v7186_v27, %v7451_v30  ;;  %v9028_v49 = vld [vmem:[#allocation25_spill] sm:$0xff] }
 0x18e   : > { %v7645_v52 = vrot.slane %v971_v37, %v7408_v1  ;;  %v2671_v39 = vadd.f32 %v2669_v34, %v2656_v51  ;;  %v2729_v44 = vmul.f32 %v7189_v5, %v7456_v12  ;;  %v2744_v15 = vmul.f32 %v7213_v45, %v7465_v43  ;;  %v9030_v37 = vld [vmem:[#allocation19_spill] sm:$0xff]  ;;  %v9031_v51 = vld [vmem:[#allocation36_spill] sm:$0xff] }
 0x18f   : > { %v874_v10 = vadd.f32 %v872_v8, %v859_v22  ;;  %v2759_v23 = vmul.f32 %v7242_v16, %v7474_v48  ;;  %v7661_v1 = vmul.f32 %v9018_v33, %v7479_v13  ;;  %v7665_v30 = vmul.f32 %v9019_v14, %v9024_v32  ;;  %v9026_v8 = vld [vmem:[#allocation23_spill] sm:$0xff] }
 0x190   : > { %v7655_v3 = vmul.f32 %v9009_v25, %v7645_v52  ;;  %v2686_v12 = vadd.f32 %v2684_v53, %v2671_v39  ;;  %v7669_v43 = vmul.f32 %v9020_v18, %v9025_v50  ;;  %v7673_v25 = vmul.f32 %v9021_v38, %v9026_v8 }
 0x191   : > { %v889_v26 = vadd.f32 %v887_v54, %v874_v10  ;;  %v7677_v48 = vmul.f32 %v9022_v57, %v9027_v58  ;;  %v7681_v13 = vmul.f32 %v9023_v35, %v7518_v6  ;;  %v751_v54 = vmul.f32 %v9012_v40, %v7539_v62  ;;  %v9032_v40 = vld [vmem:[#allocation37_spill] sm:$0xff]  ;;  %v7752_v58 = vld [vmem:[%s5485_s30 + $0x48] sm:$0xff] }
 0x192   : > { %v766_v36 = vmul.f32 %v7167_v55, %v9028_v49  ;;  %v2701_v63 = vadd.f32 %v2699_v29, %v2686_v12  ;;  %v7689_v34 = vmul.f32 %v7302_v28, %v9029_v59  ;;  %v781_v22 = vmul.f32 %v7176_v11, %v9030_v37  ;;  %v9033_v55 = vld [vmem:[#allocation39_spill] sm:$0xff]  ;;  %v7749_v12 = vld [vmem:[%s5485_s30 + $0x38] sm:$0xff]  ;;  %9039 = vst [vmem:[#allocation22_spill] sm:$0xff] %v7752_v58 }
 0x193   : > { %v904_v56 = vadd.f32 %v902_v60, %v889_v26  ;;  %v796_v53 = vmul.f32 %v7179_v42, %v9031_v51  ;;  %v811_v62 = vmul.f32 %v7183_v47, %v9032_v40  ;;  %v826_v60 = vmul.f32 %v7186_v27, %v9033_v55  ;;  %9038 = vst [vmem:[#allocation44_spill] sm:$0xff] %v7749_v12 }
 0x194   : > { %v768_v6 = vadd.f32 %v766_v36, %v751_v54  ;;  %v2716_v10 = vadd.f32 %v2714_v41, %v2701_v63  ;;  %v841_v39 = vmul.f32 %v7189_v5, %v7579_v9  ;;  %v7703_v11 = vmul.f32 %v7213_v45, %v7586_v19  ;;  %v7718_v5 = vld [vmem:[%s5485_s30 + $0x8] sm:$0xff]  ;;  %v2388_v45 = vld [vmem:[%s5492_s29] sm:$0x1]  ;;  %v2403_v9 = vld [vmem:[%s5492_s29 + $0x1] sm:$0x1] }
 0x195   : > { %v919_v29 = vadd.f32 %v917_v61, %v904_v56  ;;  %v7707_v42 = vmul.f32 %v7242_v16, %v7597_v21  ;;  %v7711_v47 = vmul.f32 %v9018_v33, %v7601_v20  ;;  %v7715_v27 = vmul.f32 %v9019_v14, %v7604_v2  ;;  %9034 = vst [vmem:[#allocation20_spill] sm:$0xff] %v7718_v5  ;;  %v2418_v21 = vld [vmem:[%s5492_s29 + $0x2] sm:$0x1]  ;;  %v2433_v14 = vld [vmem:[%s5492_s29 + $0x3] sm:$0x1] }
 0x196   : > { %v783_v32 = vadd.f32 %v781_v22, %v768_v6  ;;  %v2731_v61 = vadd.f32 %v2729_v44, %v2716_v10  ;;  %v7724_v16 = vmul.f32 %v9020_v18, %v7607_v46  ;;  %v7728_v33 = vmul.f32 %v9021_v38, %v7613_v24  ;;  %v2448_v20 = vld [vmem:[%s5492_s29 + $0x4] sm:$0x1]  ;;  %v7743_v18 = vld [vmem:[%s5485_s30 + $0x18] sm:$0xff]  ;;  %v7746_v46 = vld [vmem:[%s5485_s30 + $0x28] sm:$0xff] }
 0x197   : > { %v934_v19 = vadd.f32 %v932_v17, %v919_v29  ;;  %v7734_v41 = vmul.f32 %v9022_v57, %v945_v7  ;;  %v7737_v26 = vmul.f32 %v9023_v35, %v960_v0  ;;  %v9035_v17 = vld [vmem:[#allocation13_spill] sm:$0xff]  ;;  %9036 = vst [vmem:[#allocation41_spill] sm:$0xff] %v7743_v18  ;;  %9037 = vst [vmem:[#allocation43_spill] sm:$0xff] %v7746_v46  ;;  %v2390_v50 = vrot.slane %v2388_v45, 7  ;;  %v4081_v57 = vld [vmem:[#allocation7 + $0x8] sm:$0xff] }
 0x198   : > { %v798_v2 = vadd.f32 %v796_v53, %v783_v32  ;;  %v7740_v44 = vsub.s32 1, %v9035_v17  ;;  %v2746_v24 = vadd.f32 %v2744_v15, %v2731_v61  ;;  %v2405_v8 = vrot.slane %v2403_v9, 7  ;;  %v4097_v7 = vld [vmem:[#allocation7 + $0x88] sm:$0xff]  ;;  %4208 = vmatprep.mubr.f32.mxu0 %v4081_v57  ;;  %v2463_v6 = vld [vmem:[%s5492_s29 + $0x5] sm:$0x1]  ;;  %v7809_v57 = vld [vmem:[%s5485_s30 + $0x98] sm:$0xff] }
 0x199   : > { %v949_v38 = vadd.f32 %v947_v4, %v934_v19  ;;  %v2420_v0 = vrot.slane %v2418_v21, 7  ;;  %v2435_v54 = vrot.slane %v2433_v14, 7  ;;  %v2450_v49 = vrot.slane %v2448_v20, 7  ;;  %4248 = vmatprep.mubr.f32.mxu1 %v4097_v7  ;;  %v2493_v29 = vld [vmem:[%s5492_s29 + $0x7] sm:$0x1]  ;;  %v7798_v20 = vld [vmem:[%s5485_s30 + $0x68] sm:$0xff] }
 0x19a   : > { %v813_v35 = vadd.f32 %v811_v62, %v798_v2  ;;  %v2761_v56 = vadd.f32 %v2759_v23, %v2746_v24  ;;  %v2392_v4 = vmul.f32 %v2390_v50, %v7718_v5  ;;  %v2407_v15 = vmul.f32 %v7743_v18, %v2405_v8  ;;  %v2508_v9 = vld [vmem:[%s5492_s29 + $0x8] sm:$0x1]  ;;  %v2523_v19 = vld [vmem:[%s5492_s29 + $0x9] sm:$0x1]  ;;  %v7986_v17 = vld [vmem:[%s5485_s30 + $0x80] sm:$0xff] }
 0x19b   : > { %v964_v36 = vadd.f32 %v7642_v31, %v949_v38  ;;  %v2422_v59 = vmul.f32 %v7746_v46, %v2420_v0  ;;  %v2437_v37 = vmul.f32 %v7749_v12, %v2435_v54  ;;  %v2452_v22 = vmul.f32 %v7752_v58, %v2450_v49  ;;  %v7803_v8 = vld [vmem:[%s5485_s30 + $0x78] sm:$0xff]  ;;  %9056 = vst [vmem:[#allocation29_spill] sm:$0xff] %v7986_v17 }
 0x19c   : > { %v828_v63 = vadd.f32 %v826_v60, %v813_v35  ;;  %v2776_v31 = vadd.f32 %v7661_v1, %v2761_v56  ;;  %v7764_v23 = vrot.slane %v2392_v4, %v7740_v44  ;;  %v7767_v53 = vrot.slane %v2407_v15, %v7740_v44  ;;  %v2478_v1 = vld [vmem:[%s5492_s29 + $0x6] sm:$0x1] }
 0x19d   : > { %v979_v51 = vadd.f32 %v7655_v3, %v964_v36  ;;  %v7770_v62 = vrot.slane %v2422_v59, %v7740_v44  ;;  %v7773_v55 = vrot.slane %v2437_v37, %v7740_v44  ;;  %v7776_v60 = vrot.slane %v2452_v22, %v7740_v44  ;;  %v7779_v3 = vld [vmem:[%s5485_s30 + $0x58] sm:$0xff] }
 0x19e   : > { %v843_v40 = vadd.f32 %v841_v39, %v828_v63  ;;  %v2791_v10 = vadd.f32 %v7665_v30, %v2776_v31  ;;  %v2398_v39 = vmul.f32 %v7764_v23, %v7718_v5  ;;  %v2413_v32 = vmul.f32 %v7743_v18, %v7767_v53  ;;  %v2538_v59 = vld [vmem:[%s5492_s29 + $0xa] sm:$0x1] }
 0x19f   : > { %5049 = vmatpush3.msra.mxu0 %v979_v51  ;;  %5134 = vmatpush3.msra.mxu1 %v979_v51  ;;  %v2465_v45 = vrot.slane %v2463_v6, 7  ;;  %v2428_v21 = vmul.f32 %v7746_v46, %v7770_v62  ;;  %v2443_v14 = vmul.f32 %v7749_v12, %v7773_v55  ;;  %v2458_v30 = vmul.f32 %v7752_v58, %v7776_v60 }
 0x1a0   : > { %v858_v61 = vadd.f32 %v7703_v11, %v843_v40  ;;  %v2806_v2 = vadd.f32 %v7669_v43, %v2791_v10  ;;  %v2415_v38 = vadd.f32 %v2413_v32, %v2398_v39  ;;  %v2480_v50 = vrot.slane %v2478_v1, 7  ;;  %v7806_v11 = vld [vmem:[%s5485_s30 + $0x88] sm:$0xff] }
 0x1a1   : > { %v2467_v24 = vmul.f32 %v7779_v3, %v2465_v45  ;;  %9040 = vst [vmem:[#allocation34_spill] sm:$0xff] %v7806_v11  ;;  %v2495_v35 = vrot.slane %v2493_v29, 7  ;;  %v2510_v0 = vrot.slane %v2508_v9, 7  ;;  %v2525_v54 = vrot.slane %v2523_v19, 7  ;;  %v7838_v40 = vld [vmem:[%s5485_s30 + $0xa8] sm:$0xff] }
 0x1a2   : > { %v873_v7 = vadd.f32 %v7707_v42, %v858_v61  ;;  %v2821_v49 = vadd.f32 %v7673_v25, %v2806_v2  ;;  %v2430_v36 = vadd.f32 %v2428_v21, %v2415_v38  ;;  %v2482_v56 = vmul.f32 %v7798_v20, %v2480_v50  ;;  %9041 = vst [vmem:[#allocation35_spill] sm:$0xff] %v7838_v40  ;;  %v2553_v1 = vld [vmem:[%s5492_s29 + $0xb] sm:$0x1]  ;;  %v2568_v29 = vld [vmem:[%s5492_s29 + $0xc] sm:$0x1] }
 0x1a3   : > { %v7814_v43 = vrot.slane %v2467_v24, %v7740_v44  ;;  %v2497_v15 = vmul.f32 %v7803_v8, %v2495_v35  ;;  %v2512_v42 = vmul.f32 %v7806_v11, %v2510_v0  ;;  %v2527_v63 = vmul.f32 %v7809_v57, %v2525_v54  ;;  %v2598_v32 = vld [vmem:[%s5492_s29 + $0xe] sm:$0x1]  ;;  %v2613_v21 = vld [vmem:[%s5492_s29 + $0xf] sm:$0x1] }
 0x1a4   : > { %v888_v4 = vadd.f32 %v7711_v47, %v873_v7  ;;  %v2836_v25 = vadd.f32 %v7677_v48, %v2821_v49  ;;  %v2445_v37 = vadd.f32 %v2443_v14, %v2430_v36  ;;  %v7826_v6 = vrot.slane %v2482_v56, %v7740_v44  ;;  %v7856_v61 = vld [vmem:[%s5485_s30 + $0xb8] sm:$0xff]  ;;  %v7868_v50 = vld [vmem:[%s5485_s30 + $0xe8] sm:$0xff] }
 0x1a5   : > { %v2473_v22 = vmul.f32 %v7779_v3, %v7814_v43  ;;  %v976_v51 = vmul.f32 %v7302_v28, %v7645_v52  ;;  %v7832_v31 = vrot.slane %v2497_v15, %v7740_v44  ;;  %v7835_v48 = vrot.slane %v2512_v42, %v7740_v44  ;;  %v7865_v24 = vld [vmem:[%s5485_s30 + $0xd8] sm:$0xff] }
 0x1a6   : > { %v903_v47 = vadd.f32 %v7715_v27, %v888_v4  ;;  %v2851_v10 = vadd.f32 %v7681_v13, %v2836_v25  ;;  %v2460_v39 = vadd.f32 %v2458_v30, %v2445_v37  ;;  %v2488_v28 = vmul.f32 %v7798_v20, %v7826_v6  ;;  %v2583_v27 = vld [vmem:[%s5492_s29 + $0xd] sm:$0x1]  ;;  %9042 = vst [vmem:[#allocation38_spill] sm:$0xff] %v7865_v24 }
 0x1a7   : > { %v2540_v52 = vrot.slane %v2538_v59, 7  ;;  %v2503_v9 = vmul.f32 %v7803_v8, %v7832_v31  ;;  %v2518_v19 = vmul.f32 %v7806_v11, %v7835_v48  ;;  %v7853_v13 = vrot.slane %v2527_v63, %v7740_v44  ;;  %v7872_v49 = vld [vmem:[%s5485_s30 + $0xf8] sm:$0xff]  ;;  %v500_v59 = vld [vmem:[%s5492_s29] sm:$0x1] }
 0x1a8   : > { %v918_v45 = vadd.f32 %v7724_v16, %v903_v47  ;;  %v2866_v14 = vadd.f32 %v7689_v34, %v2851_v10  ;;  %v2475_v30 = vadd.f32 %v2473_v22, %v2460_v39  ;;  %v2555_v38 = vrot.slane %v2553_v1, 7  ;;  %v7862_v16 = vld [vmem:[%s5485_s30 + $0xc8] sm:$0xff]  ;;  %9043 = vst [vmem:[#allocation40_spill] sm:$0xff] %v7872_v49  ;;  %v7890_v1 = vld [vmem:[%s5485_s30] sm:$0xff] }
 0x1a9   : > { %v2542_v2 = vmul.f32 %v7838_v40, %v2540_v52  ;;  %v2570_v35 = vrot.slane %v2568_v29, 7  ;;  %v2585_v0 = vrot.slane %v2583_v27, 7  ;;  %v2600_v54 = vrot.slane %v2598_v32, 7  ;;  %v515_v39 = vld [vmem:[%s5492_s29 + $0x1] sm:$0x1] }
 0x1aa   : > { %v933_v7 = vadd.f32 %v7728_v33, %v918_v45  ;;  %5050 = vmatprep.subr.mxu0 %v2866_v14  ;;  %5119 = vmatprep.subr.mxu1 %v2866_v14  ;;  %v2490_v34 = vadd.f32 %v2488_v28, %v2475_v30  ;;  %v2557_v56 = vmul.f32 %v7856_v61, %v2555_v38  ;;  %v2615_v4 = vrot.slane %v2613_v21, 7  ;;  %v530_v28 = vld [vmem:[%s5492_s29 + $0x2] sm:$0x1]  ;;  %v545_v52 = vld [vmem:[%s5492_s29 + $0x3] sm:$0x1] }
 0x1ab   : > { %v7875_v36 = vrot.slane %v2542_v2, %v7740_v44  ;;  %v2572_v15 = vmul.f32 %v7862_v16, %v2570_v35  ;;  %v2587_v42 = vmul.f32 %v7865_v24, %v2585_v0  ;;  %v2602_v63 = vmul.f32 %v7868_v50, %v2600_v54  ;;  %v575_v21 = vld [vmem:[%s5492_s29 + $0x5] sm:$0x1]  ;;  %v590_v35 = vld [vmem:[%s5492_s29 + $0x6] sm:$0x1] }
 0x1ac   : > { %v948_v33 = vadd.f32 %v7734_v41, %v933_v7  ;;  %v2505_v25 = vadd.f32 %v2503_v9, %v2490_v34  ;;  %v2533_v37 = vmul.f32 %v7809_v57, %v7853_v13  ;;  %v7886_v22 = vrot.slane %v2557_v56, %v7740_v44  ;;  %v560_v9 = vld [vmem:[%s5492_s29 + $0x4] sm:$0x1] }
 0x1ad   : > { %v2617_v47 = vmul.f32 %v7872_v49, %v2615_v4  ;;  %v7894_v29 = vrot.slane %v2572_v15, %v7740_v44  ;;  %v7897_v10 = vrot.slane %v2587_v42, %v7740_v44  ;;  %v2548_v32 = vmul.f32 %v7838_v40, %v7875_v36  ;;  %v7917_v38 = vld [vmem:[%s5485_s30 + $0x10] sm:$0xff]  ;;  %v7920_v7 = vld [vmem:[%s5485_s30 + $0x20] sm:$0xff] }
 0x1ae   : > { %v963_v41 = vadd.f32 %v7737_v26, %v948_v33  ;;  %v2520_v27 = vadd.f32 %v2518_v19, %v2505_v25  ;;  %v7905_v45 = vrot.slane %v2602_v63, %v7740_v44  ;;  %v502_v26 = vrot.slane %v500_v59, 7  ;;  %9048 = vst [vmem:[#allocation16_spill] sm:$0xff] %v7917_v38  ;;  %9049 = vst [vmem:[#allocation17_spill] sm:$0xff] %v7920_v7  ;;  %v7927_v56 = vld [vmem:[%s5485_s30 + $0x30] sm:$0xff]  ;;  %v7930_v4 = vld [vmem:[%s5485_s30 + $0x40] sm:$0xff] }
 0x1af   : > { %9044 = vst [vmem:[#allocation42_spill] sm:$0xff] %v7894_v29  ;;  %9045 = vst [vmem:[#allocation14_spill] sm:$0xff] %v7897_v10  ;;  %v2563_v30 = vmul.f32 %v7856_v61, %v7886_v22  ;;  %v2578_v2 = vmul.f32 %v7862_v16, %v7894_v29  ;;  %v7914_v19 = vrot.slane %v2617_v47, %v7740_v44  ;;  %v517_v34 = vrot.slane %v515_v39, 7  ;;  %v7933_v33 = vld [vmem:[%s5485_s30 + $0x50] sm:$0xff]  ;;  %v7936_v25 = vld [vmem:[%s5485_s30 + $0x60] sm:$0xff] }
 0x1b0   : > { %9046 = vst [vmem:[#allocation21_spill] sm:$0xff] %v7905_v45  ;;  %v978_v14 = vadd.f32 %v976_v51, %v963_v41  ;;  %v2535_v0 = vadd.f32 %v2533_v37, %v2520_v27  ;;  %v2593_v54 = vmul.f32 %v7865_v24, %v7897_v10  ;;  %v504_v51 = vmul.f32 %v502_v26, %v7890_v1  ;;  %v7993_v10 = vld [vmem:[%s5485_s30 + $0x90] sm:$0xff]  ;;  %v8002_v29 = vld [vmem:[%s5485_s30 + $0xc0] sm:$0xff] }
 0x1b1   : > { %9047 = vst [vmem:[#allocation15_spill] sm:$0xff] %v7914_v19  ;;  %v532_v15 = vrot.slane %v530_v28, 7  ;;  %v547_v42 = vrot.slane %v545_v52, 7  ;;  %v562_v63 = vrot.slane %v560_v9, 7  ;;  %v577_v59 = vrot.slane %v575_v21, 7  ;;  %9050 = vst [vmem:[#allocation18_spill] sm:$0xff] %v7936_v25 }
 0x1b2   : > { %5051 = vmatpush3.msra.mxu0 %v978_v14  ;;  %5135 = vmatpush3.msra.mxu1 %v978_v14  ;;  %v2550_v37 = vadd.f32 %v2548_v32, %v2535_v0  ;;  %v7939_v47 = vrot.slane %v504_v51, %v7740_v44  ;;  %v519_v41 = vmul.f32 %v7917_v38, %v517_v34  ;;  %v592_v39 = vrot.slane %v590_v35, 7  ;;  %v605_v9 = vld [vmem:[%s5492_s29 + $0x7] sm:$0x1] }
 0x1b3   : > { %v534_v27 = vmul.f32 %v7920_v7, %v532_v15  ;;  %v549_v26 = vmul.f32 %v7927_v56, %v547_v42  ;;  %v564_v28 = vmul.f32 %v7930_v4, %v562_v63  ;;  %v579_v52 = vmul.f32 %v7933_v33, %v577_v59  ;;  %v7965_v15 = vld [vmem:[%s5485_s30 + $0x70] sm:$0xff]  ;;  %v620_v42 = vld [vmem:[%s5492_s29 + $0x8] sm:$0x1]  ;;  %v635_v63 = vld [vmem:[%s5492_s29 + $0x9] sm:$0x1]  ;;  %9057 = vst [vmem:[#allocation33_spill] sm:$0xff] %v7993_v10 }
 0x1b4   : > { %v2565_v32 = vadd.f32 %v2563_v30, %v2550_v37  ;;  %v510_v21 = vmul.f32 %v7718_v5, %v7939_v47  ;;  %v7950_v14 = vrot.slane %v519_v41, %v7740_v44  ;;  %v594_v35 = vmul.f32 %v7936_v25, %v592_v39  ;;  %9055 = vst [vmem:[#allocation31_spill] sm:$0xff] %v7965_v15 }
 0x1b5   : > { %v2608_v0 = vmul.f32 %v7868_v50, %v7905_v45  ;;  %v7956_v51 = vrot.slane %v534_v27, %v7740_v44  ;;  %v7959_v34 = vrot.slane %v549_v26, %v7740_v44  ;;  %v7962_v30 = vrot.slane %v564_v28, %v7740_v44  ;;  %v650_v27 = vld [vmem:[%s5492_s29 + $0xa] sm:$0x1]  ;;  %v665_v26 = vld [vmem:[%s5492_s29 + $0xb] sm:$0x1] }
 0x1b6   : > { %9051 = vst [vmem:[#allocation26_spill] sm:$0xff] %v7950_v14  ;;  %v2580_v59 = vadd.f32 %v2578_v2, %v2565_v32  ;;  %v2623_v37 = vmul.f32 %v7872_v49, %v7914_v19  ;;  %v525_v41 = vmul.f32 %v7743_v18, %v7950_v14  ;;  %v607_v39 = vrot.slane %v605_v9, 7  ;;  %v680_v18 = vld [vmem:[%s5492_s29 + $0xc] sm:$0x1] }
 0x1b7   : > { %9052 = vst [vmem:[#allocation28_spill] sm:$0xff] %v7956_v51  ;;  %9053 = vst [vmem:[#allocation27_spill] sm:$0xff] %v7959_v34  ;;  %v540_v28 = vmul.f32 %v7746_v46, %v7956_v51  ;;  %v555_v5 = vmul.f32 %v7749_v12, %v7959_v34  ;;  %v7980_v2 = vrot.slane %v579_v52, %v7740_v44  ;;  %v7996_v12 = vld [vmem:[%s5485_s30 + $0xa0] sm:$0xff]  ;;  %v7999_v52 = vld [vmem:[%s5485_s30 + $0xb0] sm:$0xff]  ;;  %v637_v34 = vrot.slane %v635_v63, 7 }
 0x1b8   : > { %9054 = vst [vmem:[#allocation30_spill] sm:$0xff] %v7962_v30  ;;  %v7983_v32 = vrot.slane %v594_v35, %v7740_v44  ;;  %v2595_v19 = vadd.f32 %v2593_v54, %v2580_v59  ;;  %v527_v9 = vadd.f32 %v525_v41, %v510_v21  ;;  %v570_v45 = vmul.f32 %v7752_v58, %v7962_v30  ;;  %v695_v63 = vld [vmem:[%s5492_s29 + $0xd] sm:$0x1] }
 0x1b9   : > { %v609_v46 = vmul.f32 %v7965_v15, %v607_v39  ;;  %9058 = vst [vmem:[#allocation45_spill] sm:$0xff] %v7996_v12  ;;  %9059 = vst [vmem:[#allocation23_spill] sm:$0xff] %v7999_v52  ;;  %v622_v35 = vrot.slane %v620_v42, 7  ;;  %v652_v51 = vrot.slane %v650_v27, 7  ;;  %v667_v14 = vrot.slane %v665_v26, 7 }
 0x1ba   : > { %v2610_v54 = vadd.f32 %v2608_v0, %v2595_v19  ;;  %v542_v21 = vadd.f32 %v540_v28, %v527_v9  ;;  %v682_v41 = vrot.slane %v680_v18, 7  ;;  %v639_v58 = vmul.f32 %v7993_v10, %v637_v34  ;;  %v710_v27 = vld [vmem:[%s5492_s29 + $0xe] sm:$0x1]  ;;  %v8022_v34 = vld [vmem:[%s5485_s30 + $0xd0] sm:$0xff] }
 0x1bb   : > { %v8005_v59 = vrot.slane %v609_v46, %v7740_v44  ;;  %v624_v39 = vmul.f32 %v7986_v17, %v622_v35  ;;  %v654_v30 = vmul.f32 %v7996_v12, %v652_v51  ;;  %v669_v42 = vmul.f32 %v7999_v52, %v667_v14  ;;  %v8025_v51 = vld [vmem:[%s5485_s30 + $0xe0] sm:$0xff]  ;;  %v725_v35 = vld [vmem:[%s5492_s29 + $0xf] sm:$0x1] }
 0x1bc   : > { %v2625_v26 = vadd.f32 %v2623_v37, %v2610_v54  ;;  %v557_v19 = vadd.f32 %v555_v5, %v542_v21  ;;  %v585_v0 = vmul.f32 %v7779_v3, %v7980_v2  ;;  %v684_v46 = vmul.f32 %v8002_v29, %v682_v41 }
 0x1bd   : > { %v600_v18 = vmul.f32 %v7798_v20, %v7983_v32  ;;  %v8019_v28 = vrot.slane %v624_v39, %v7740_v44  ;;  %v8028_v5 = vrot.slane %v639_v58, %v7740_v44  ;;  %v697_v37 = vrot.slane %v695_v63, 7 }
 0x1be   : > { %5052 = vmatprep.subr.mxu0 %v2625_v26  ;;  %5120 = vmatprep.subr.mxu1 %v2625_v26  ;;  %v572_v14 = vadd.f32 %v570_v45, %v557_v19  ;;  %v712_v9 = vrot.slane %v710_v27, 7  ;;  %v615_v54 = vmul.f32 %v7803_v8, %v8005_v59  ;;  %v8034_v21 = vrot.slane %v654_v30, %v7740_v44  ;;  %v8047_v27 = vld [vmem:[%s5485_s30 + $0xf0] sm:$0xff] }
 0x1bf   : > { %v8037_v41 = vrot.slane %v669_v42, %v7740_v44  ;;  %v8040_v39 = vrot.slane %v684_v46, %v7740_v44  ;;  %v630_v58 = vmul.f32 %v7806_v11, %v8019_v28  ;;  %v699_v45 = vmul.f32 %v8022_v34, %v697_v37 }
 0x1c0   : > { %v587_v26 = vadd.f32 %v585_v0, %v572_v14  ;;  %v714_v63 = vmul.f32 %v8025_v51, %v712_v9  ;;  %v727_v19 = vrot.slane %v725_v35, 7  ;;  %v2397_v30 = vmul.f32 %v7764_v23, %v7890_v1 }
 0x1c1   : > { %v2412_v42 = vmul.f32 %v7917_v38, %v7767_v53  ;;  %v2427_v46 = vmul.f32 %v7920_v7, %v7770_v62  ;;  %v645_v14 = vmul.f32 %v7809_v57, %v8028_v5  ;;  %v8058_v37 = vrot.slane %v699_v45, %v7740_v44 }
 0x1c2   : > { %v602_v0 = vadd.f32 %v600_v18, %v587_v26  ;;  %v8061_v9 = vrot.slane %v714_v63, %v7740_v44  ;;  %v660_v35 = vmul.f32 %v7838_v40, %v8034_v21  ;;  %v729_v23 = vmul.f32 %v8047_v27, %v727_v19 }
 0x1c3   : > { %v2414_v11 = vadd.f32 %v2412_v42, %v2397_v30  ;;  %v2442_v53 = vmul.f32 %v7927_v56, %v7773_v55  ;;  %v675_v18 = vmul.f32 %v7856_v61, %v8037_v41  ;;  %v690_v26 = vmul.f32 %v7862_v16, %v8040_v39 }
 0x1c4   : > { %v617_v62 = vadd.f32 %v615_v54, %v602_v0  ;;  %v2457_v45 = vmul.f32 %v7930_v4, %v7776_v60  ;;  %v705_v63 = vmul.f32 %v7865_v24, %v8058_v37  ;;  %v8077_v40 = vrot.slane %v729_v23, %v7740_v44  ;;  %v9060_v23 = vld [vmem:[#allocation42_spill] sm:$0xff] }
 0x1c5   : > { %v2429_v19 = vadd.f32 %v2427_v46, %v2414_v11  ;;  %v2472_v55 = vmul.f32 %v7933_v33, %v7814_v43  ;;  %v720_v30 = vmul.f32 %v7868_v50, %v8061_v9  ;;  %v2487_v42 = vmul.f32 %v7936_v25, %v7826_v6 }
 0x1c6   : > { %v632_v54 = vadd.f32 %v630_v58, %v617_v62  ;;  %v2502_v60 = vmul.f32 %v7965_v15, %v7832_v31  ;;  %v2517_v24 = vmul.f32 %v7986_v17, %v7835_v48  ;;  %v2532_v44 = vmul.f32 %v7993_v10, %v7853_v13  ;;  %v9061_v13 = vld [vmem:[#allocation26_spill] sm:$0xff] }
 0x1c7   : > { %v2444_v0 = vadd.f32 %v2442_v53, %v2429_v19  ;;  %v2547_v11 = vmul.f32 %v7996_v12, %v7875_v36  ;;  %v735_v58 = vmul.f32 %v7872_v49, %v8077_v40  ;;  %v8097_v6 = vmul.f32 %v7999_v52, %v7886_v22  ;;  %v9063_v19 = vld [vmem:[#allocation14_spill] sm:$0xff]  ;;  %v9066_v49 = vld [vmem:[#allocation27_spill] sm:$0xff] }
 0x1c8   : > { %v647_v43 = vadd.f32 %v645_v14, %v632_v54  ;;  %v509_v31 = vmul.f32 %v7939_v47, %v7890_v1  ;;  %v8103_v48 = vmul.f32 %v8002_v29, %v9060_v23  ;;  %v524_v36 = vmul.f32 %v7917_v38, %v9061_v13  ;;  %v9062_v14 = vld [vmem:[#allocation28_spill] sm:$0xff]  ;;  %v9064_v54 = vld [vmem:[#allocation21_spill] sm:$0xff] }
 0x1c9   : > { %v2459_v46 = vadd.f32 %v2457_v45, %v2444_v0  ;;  %v539_v53 = vmul.f32 %v7920_v7, %v9062_v14  ;;  %v8111_v22 = vmul.f32 %v8022_v34, %v9063_v19  ;;  %v8115_v47 = vmul.f32 %v8025_v51, %v9064_v54  ;;  %v9065_v45 = vld [vmem:[#allocation15_spill] sm:$0xff] }
 0x1ca   : > { %v662_v62 = vadd.f32 %v660_v35, %v647_v43  ;;  %v8119_v0 = vmul.f32 %v8047_v27, %v9065_v45  ;;  %v526_v13 = vadd.f32 %v524_v36, %v509_v31  ;;  %v554_v35 = vmul.f32 %v7927_v56, %v9066_v49  ;;  %v9067_v43 = vld [vmem:[#allocation30_spill] sm:$0xff]  ;;  %v2194_v38 = vld [vmem:[%s5492_s29] sm:$0x1] }
 0x1cb   : > { %v2474_v23 = vadd.f32 %v2472_v55, %v2459_v46  ;;  %v569_v14 = vmul.f32 %v7930_v4, %v9067_v43  ;;  %v584_v54 = vmul.f32 %v7933_v33, %v7980_v2  ;;  %v599_v7 = vmul.f32 %v7936_v25, %v7983_v32  ;;  %v2206_v55 = vld [vmem:[%s5492_s29 + $0x1] sm:$0x1]  ;;  %v2242_v2 = vld [vmem:[%s5492_s29 + $0x4] sm:$0x1]  ;;  %v9072_v25 = vld [vmem:[#allocation44_spill] sm:$0xff] }
 0x1cc   : > { %v677_v19 = vadd.f32 %v675_v18, %v662_v62  ;;  %v614_v45 = vmul.f32 %v7965_v15, %v8005_v59  ;;  %v541_v31 = vadd.f32 %v539_v53, %v526_v13  ;;  %v629_v49 = vmul.f32 %v7986_v17, %v8019_v28  ;;  %v2218_v18 = vld [vmem:[%s5492_s29 + $0x2] sm:$0x1]  ;;  %v2230_v62 = vld [vmem:[%s5492_s29 + $0x3] sm:$0x1] }
 0x1cd   : > { %v2489_v46 = vadd.f32 %v2487_v42, %v2474_v23  ;;  %v8137_v36 = vmul.f32 %v7993_v10, %v8028_v5  ;;  %v8144_v32 = vmul.f32 %v7996_v12, %v8034_v21  ;;  %v8148_v59 = vmul.f32 %v7999_v52, %v8037_v41  ;;  %v9068_v42 = vld [vmem:[#allocation13_spill] sm:$0xff]  ;;  %v9069_v5 = vld [vmem:[#allocation20_spill] sm:$0xff]  ;;  %v9073_v12 = vld [vmem:[#allocation22_spill] sm:$0xff] }
 0x1ce   : > { %v692_v43 = vadd.f32 %v690_v26, %v677_v19  ;;  %v8151_v53 = vsub.s32 0, %v9068_v42  ;;  %v556_v23 = vadd.f32 %v554_v35, %v541_v31  ;;  %v2195_v13 = vmul.f32 %v9069_v5, %v2194_v38  ;;  %v9070_v10 = vld [vmem:[#allocation41_spill] sm:$0xff]  ;;  %v9071_v26 = vld [vmem:[#allocation43_spill] sm:$0xff] }
 0x1cf   : > { %v2504_v28 = vadd.f32 %v2502_v60, %v2489_v46  ;;  %v2207_v17 = vmul.f32 %v9070_v10, %v2206_v55  ;;  %v2219_v19 = vmul.f32 %v9071_v26, %v2218_v18  ;;  %v2231_v21 = vmul.f32 %v9072_v25, %v2230_v62  ;;  %v2254_v31 = vld [vmem:[%s5492_s29 + $0x5] sm:$0x1]  ;;  %v2290_v62 = vld [vmem:[%s5492_s29 + $0x8] sm:$0x1] }
 0x1d0   : > { %v707_v15 = vadd.f32 %v705_v63, %v692_v43  ;;  %v2243_v41 = vmul.f32 %v9073_v12, %v2242_v2  ;;  %v571_v42 = vadd.f32 %v569_v14, %v556_v23  ;;  %v8159_v60 = vrot.slane %v2195_v13, %v8151_v53 }
 0x1d1   : > { %v2519_v52 = vadd.f32 %v2517_v24, %v2504_v28  ;;  %v8162_v35 = vrot.slane %v2207_v17, %v8151_v53  ;;  %v8165_v63 = vrot.slane %v2219_v19, %v8151_v53  ;;  %v8168_v55 = vrot.slane %v2231_v21, %v8151_v53  ;;  %v2302_v19 = vld [vmem:[%s5492_s29 + $0x9] sm:$0x1] }
 0x1d2   : > { %v722_v38 = vadd.f32 %v720_v30, %v707_v15  ;;  %v8171_v46 = vrot.slane %v2243_v41, %v8151_v53  ;;  %v586_v14 = vadd.f32 %v584_v54, %v571_v42  ;;  %v2201_v18 = vmul.f32 %v9069_v5, %v8159_v60  ;;  %v2266_v15 = vld [vmem:[%s5492_s29 + $0x6] sm:$0x1]  ;;  %v2278_v30 = vld [vmem:[%s5492_s29 + $0x7] sm:$0x1]  ;;  %v9074_v41 = vld [vmem:[#allocation34_spill] sm:$0xff] }
 0x1d3   : > { %v2534_v24 = vadd.f32 %v2532_v44, %v2519_v52  ;;  %v2213_v17 = vmul.f32 %v9070_v10, %v8162_v35  ;;  %v2225_v43 = vmul.f32 %v9071_v26, %v8165_v63  ;;  %v2237_v28 = vmul.f32 %v9072_v25, %v8168_v55 }
 0x1d4   : > { %v737_v2 = vadd.f32 %v735_v58, %v722_v38  ;;  %v2249_v52 = vmul.f32 %v9073_v12, %v8171_v46  ;;  %v601_v54 = vadd.f32 %v599_v7, %v586_v14  ;;  %v2255_v13 = vmul.f32 %v7779_v3, %v2254_v31  ;;  %v4291_v38 = vld [vmem:[%s8576_s3 + $0x10] sm:$0xff] }
 0x1d5   : > { %v2549_v44 = vadd.f32 %v2547_v11, %v2534_v24  ;;  %v2215_v23 = vadd.f32 %v2213_v17, %v2201_v18  ;;  %v2267_v58 = vmul.f32 %v7798_v20, %v2266_v15  ;;  %v2279_v21 = vmul.f32 %v7803_v8, %v2278_v30  ;;  %v4289_v18 = vld [vmem:[%s8576_s3] sm:$0xff]  ;;  %v2314_v30 = vld [vmem:[%s5492_s29 + $0xa] sm:$0x1] }
 0x1d6   : > { %5053 = vmatpush3.msra.mxu0 %v737_v2  ;;  %5136 = vmatpush3.msra.mxu1 %v737_v2  ;;  %v2291_v42 = vmul.f32 %v9074_v41, %v2290_v62  ;;  %v616_v7 = vadd.f32 %v614_v45, %v601_v54  ;;  %v8197_v31 = vrot.slane %v2255_v13, %v8151_v53  ;;  %v5332_v14 = vmov 0   ;;  %v2326_v54 = vld [vmem:[%s5492_s29 + $0xb] sm:$0x1] }
 0x1d7   : > { %v2564_v11 = vadd.f32 %v8097_v6, %v2549_v44  ;;  %v2227_v24 = vadd.f32 %v2225_v43, %v2215_v23  ;;  %5202 = vset.pattern.permute.xlu1 %v5332_v14  ;;  %v689_v17 = vmul.f32 %v8002_v29, %v8040_v39  ;;  %v8205_v15 = vrot.slane %v2267_v58, %v8151_v53  ;;  %v2338_v23 = vld [vmem:[%s5492_s29 + $0xc] sm:$0x1]  ;;  %v2350_v39 = vld [vmem:[%s5492_s29 + $0xd] sm:$0x1] }
 0x1d8   : > { %v8208_v6 = vrot.slane %v2279_v21, %v8151_v53  ;;  %v2303_v45 = vmul.f32 %v7809_v57, %v2302_v19  ;;  %5201 = vset.pattern.permute.xlu0 %v5332_v14  ;;  %v631_v2 = vadd.f32 %v629_v49, %v616_v7  ;;  %v2261_v44 = vmul.f32 %v7779_v3, %v8197_v31  ;;  %v4292_v49 = vld [vmem:[%s8576_s3 + $0x18] sm:$0xff]  ;;  %v4290_v7 = vld [vmem:[%s8576_s3 + $0x8] sm:$0xff] }
 0x1d9   : > { %v2579_v62 = vadd.f32 %v8103_v48, %v2564_v11  ;;  %v2239_v43 = vadd.f32 %v2237_v28, %v2227_v24  ;;  %4317 = vperm.xlu1 %5202, %v4291_v38   ;;  %v704_v13 = vmul.f32 %v8022_v34, %v8058_v37  ;;  %v2273_v58 = vmul.f32 %v7798_v20, %v8205_v15  ;;  %v9077_v38 = vld [vmem:[#allocation35_spill] sm:$0xff] }
 0x1da   : > { %9075 = vst [vmem:[#allocation32_spill] sm:$0xff] %v8208_v6  ;;  %v2285_v19 = vmul.f32 %v7803_v8, %v8208_v6  ;;  %v8225_v48 = vrot.slane %v2291_v42, %v8151_v53  ;;  %4307 = vperm.xlu0 %5201, %v4289_v18   ;;  %v646_v21 = vadd.f32 %v8137_v36, %v631_v2  ;;  %v9079_v18 = vld [vmem:[#allocation38_spill] sm:$0xff] }
 0x1db   : > { %v2594_v28 = vadd.f32 %v8111_v22, %v2579_v62  ;;  %v2251_v37 = vadd.f32 %v2249_v52, %v2239_v43  ;;  %v2315_v11 = vmul.f32 %v9077_v38, %v2314_v30  ;;  %v8237_v42 = vrot.slane %v2303_v45, %v8151_v53  ;;  %v2362_v62 = vld [vmem:[%s5492_s29 + $0xe] sm:$0x1] }
 0x1dc   : > { %9076 = vst [vmem:[#allocation25_spill] sm:$0xff] %v8225_v48  ;;  %v2327_v24 = vmul.f32 %v7856_v61, %v2326_v54  ;;  %v2339_v14 = vmul.f32 %v7862_v16, %v2338_v23  ;;  %v2351_v6 = vmul.f32 %v9079_v18, %v2350_v39  ;;  %v661_v36 = vadd.f32 %v8144_v32, %v646_v21  ;;  %v291_v32 = vld [vmem:[%s5492_s29] sm:$0x1]  ;;  %v304_v39 = vld [vmem:[%s5492_s29 + $0x1] sm:$0x1] }
 0x1dd   : > { %9078 = vst [vmem:[#allocation24_spill] sm:$0xff] %v8237_v42  ;;  %v2609_v22 = vadd.f32 %v8115_v47, %v2594_v28  ;;  %v2263_v52 = vadd.f32 %v2261_v44, %v2251_v37  ;;  %v8245_v30 = vrot.slane %v2315_v11, %v8151_v53  ;;  %4322 = vperm.xlu1 %5202, %v4292_v49   ;;  %v317_v49 = vld [vmem:[%s5492_s29 + $0x2] sm:$0x1]  ;;  %v4294_v28 = vld [vmem:[%s8576_s3 + $0x28] sm:$0xff] }
 0x1de   : > { %v719_v45 = vmul.f32 %v8025_v51, %v8061_v9  ;;  %v2297_v2 = vmul.f32 %v9074_v41, %v8225_v48  ;;  %v8253_v43 = vrot.slane %v2327_v24, %v8151_v53  ;;  %v8256_v47 = vrot.slane %v2339_v14, %v8151_v53  ;;  %4312 = vperm.xlu0 %5201, %v4290_v7   ;;  %v4293_v37 = vld [vmem:[%s8576_s3 + $0x20] sm:$0xff] }
 0x1df   : > { %9080 = vst [vmem:[#allocation19_spill] sm:$0xff] %v8245_v30  ;;  %v2624_v44 = vadd.f32 %v8119_v0, %v2609_v22  ;;  %v676_v54 = vadd.f32 %v8148_v59, %v661_v36  ;;  %v2275_v23 = vadd.f32 %v2273_v58, %v2263_v52  ;;  %v8262_v9 = vrot.slane %v2351_v6, %v8151_v53  ;;  %v330_v6 = vld [vmem:[%s5492_s29 + $0x3] sm:$0x1]  ;;  %v343_v24 = vld [vmem:[%s5492_s29 + $0x4] sm:$0x1]  ;;  %v9083_v52 = vld [vmem:[#allocation16_spill] sm:$0xff] }
 0x1e0   : > { %9081 = vst [vmem:[#allocation36_spill] sm:$0xff] %v8256_v47  ;;  %v734_v21 = vmul.f32 %v8047_v27, %v8077_v40  ;;  %v2309_v0 = vmul.f32 %v7809_v57, %v8237_v42  ;;  %v2321_v59 = vmul.f32 %v9077_v38, %v8245_v30  ;;  %v2363_v58 = vmul.f32 %v7868_v50, %v2362_v62  ;;  %v2374_v22 = vld [vmem:[%s5492_s29 + $0xf] sm:$0x1]  ;;  %v9084_v30 = vld [vmem:[#allocation17_spill] sm:$0xff] }
 0x1e1   : > { %9082 = vst [vmem:[#allocation37_spill] sm:$0xff] %v8262_v9  ;;  %5054 = vmatprep.subr.mxu0 %v2624_v44  ;;  %5121 = vmatprep.subr.mxu1 %v2624_v44  ;;  %v691_v11 = vadd.f32 %v689_v17, %v676_v54  ;;  %v2287_v7 = vadd.f32 %v2285_v19, %v2275_v23  ;;  %v4296_v54 = vld [vmem:[%s8576_s3 + $0x38] sm:$0xff] }
 0x1e2   : > { %v2333_v40 = vmul.f32 %v7856_v61, %v8253_v43  ;;  %v2345_v14 = vmul.f32 %v7862_v16, %v8256_v47  ;;  %v292_v36 = vmul.f32 %v7890_v1, %v291_v32  ;;  %v305_v62 = vmul.f32 %v9083_v52, %v304_v39  ;;  %4332 = vperm.xlu1 %5202, %v4294_v28   ;;  %v356_v39 = vld [vmem:[%s5492_s29 + $0x5] sm:$0x1] }
 0x1e3   : > { %v318_v42 = vmul.f32 %v9084_v30, %v317_v49  ;;  %v706_v48 = vadd.f32 %v704_v13, %v691_v11  ;;  %v2299_v17 = vadd.f32 %v2297_v2, %v2287_v7  ;;  %v2357_v19 = vmul.f32 %v9079_v18, %v8262_v9  ;;  %4327 = vperm.xlu0 %5201, %v4293_v37   ;;  %v4295_v49 = vld [vmem:[%s8576_s3 + $0x30] sm:$0xff]  ;;  %v9085_v37 = vld [vmem:[#allocation40_spill] sm:$0xff] }
 0x1e4   : > { %v331_v44 = vmul.f32 %v7927_v56, %v330_v6  ;;  %v8296_v32 = vrot.slane %v292_v36, %v8151_v53  ;;  %v8299_v23 = vrot.slane %v305_v62, %v8151_v53  ;;  %v344_v2 = vmul.f32 %v7930_v4, %v343_v24  ;;  %v369_v36 = vld [vmem:[%s5492_s29 + $0x6] sm:$0x1]  ;;  %v382_v62 = vld [vmem:[%s5492_s29 + $0x7] sm:$0x1] }
 0x1e5   : > { %v8302_v13 = vrot.slane %v318_v42, %v8151_v53  ;;  %v721_v28 = vadd.f32 %v719_v45, %v706_v48  ;;  %v2311_v6 = vadd.f32 %v2309_v0, %v2299_v17  ;;  %v2375_v11 = vmul.f32 %v9085_v37, %v2374_v22  ;;  %v395_v17 = vld [vmem:[%s5492_s29 + $0x8] sm:$0x1] }
 0x1e6   : > { %v8311_v7 = vrot.slane %v331_v44, %v8151_v53  ;;  %v298_v42 = vmul.f32 %v9069_v5, %v8296_v32  ;;  %v311_v24 = vmul.f32 %v9070_v10, %v8299_v23  ;;  %v8322_v47 = vrot.slane %v344_v2, %v8151_v53  ;;  %4342 = vperm.xlu1 %5202, %v4296_v54   ;;  %v4298_v10 = vld [vmem:[%s8576_s3 + $0x48] sm:$0xff] }
 0x1e7   : > { %v324_v9 = vmul.f32 %v9071_v26, %v8302_v13  ;;  %v736_v48 = vadd.f32 %v734_v21, %v721_v28  ;;  %v2323_v45 = vadd.f32 %v2321_v59, %v2311_v6  ;;  %v8325_v0 = vrot.slane %v2363_v58, %v8151_v53  ;;  %4337 = vperm.xlu0 %5201, %v4295_v49   ;;  %v9086_v44 = vld [vmem:[#allocation18_spill] sm:$0xff]  ;;  %v9087_v21 = vld [vmem:[#allocation31_spill] sm:$0xff]  ;;  %v4297_v58 = vld [vmem:[%s8576_s3 + $0x40] sm:$0xff] }
 0x1e8   : > { %v357_v22 = vmul.f32 %v7933_v33, %v356_v39  ;;  %v313_v5 = vadd.f32 %v311_v24, %v298_v42  ;;  %v337_v26 = vmul.f32 %v9072_v25, %v8311_v7  ;;  %v370_v54 = vmul.f32 %v9086_v44, %v369_v36  ;;  %v408_v28 = vld [vmem:[%s5492_s29 + $0x9] sm:$0x1] }
 0x1e9   : > { %v383_v59 = vmul.f32 %v9087_v21, %v382_v62  ;;  %5055 = vmatpush3.msra.mxu0 %v736_v48  ;;  %5137 = vmatpush3.msra.mxu1 %v736_v48  ;;  %v2335_v2 = vadd.f32 %v2333_v40, %v2323_v45  ;;  %v8340_v39 = vrot.slane %v2375_v11, %v8151_v53  ;;  %v9089_v62 = vld [vmem:[#allocation29_spill] sm:$0xff]  ;;  %v421_v11 = vld [vmem:[%s5492_s29 + $0xa] sm:$0x1] }
 0x1ea   : > { %v8343_v49 = vrot.slane %v357_v22, %v8151_v53  ;;  %v326_v25 = vadd.f32 %v324_v9, %v313_v5  ;;  %v350_v6 = vmul.f32 %v9073_v12, %v8322_v47  ;;  %v8349_v36 = vrot.slane %v370_v54, %v8151_v53  ;;  %4352 = vperm.xlu1 %5202, %v4298_v10   ;;  %v4300_v9 = vld [vmem:[%s8576_s3 + $0x58] sm:$0xff]  ;;  %v9090_v22 = vld [vmem:[#allocation33_spill] sm:$0xff] }
 0x1eb   : > { %9088 = vst [vmem:[#allocation39_spill] sm:$0xff] %v8340_v39  ;;  %v396_v42 = vmul.f32 %v9089_v62, %v395_v17  ;;  %v2347_v24 = vadd.f32 %v2345_v14, %v2335_v2  ;;  %v2369_v40 = vmul.f32 %v7868_v50, %v8325_v0  ;;  %4347 = vperm.xlu0 %5201, %v4297_v58   ;;  %v4299_v14 = vld [vmem:[%s8576_s3 + $0x50] sm:$0xff]  ;;  %v434_v54 = vld [vmem:[%s5492_s29 + $0xb] sm:$0x1] }
 0x1ec   : > { %v339_v48 = vadd.f32 %v337_v26, %v326_v25  ;;  %v363_v12 = vmul.f32 %v7779_v3, %v8343_v49  ;;  %v8361_v45 = vrot.slane %v383_v59, %v8151_v53  ;;  %v409_v17 = vmul.f32 %v9090_v22, %v408_v28  ;;  %v9091_v59 = vld [vmem:[#allocation45_spill] sm:$0xff]  ;;  %v447_v25 = vld [vmem:[%s5492_s29 + $0xc] sm:$0x1] }
 0x1ed   : > { %v2359_v10 = vadd.f32 %v2357_v19, %v2347_v24  ;;  %v2381_v5 = vmul.f32 %v9085_v37, %v8340_v39  ;;  %v376_v26 = vmul.f32 %v7798_v20, %v8349_v36  ;;  %v8373_v3 = vrot.slane %v396_v42, %v8151_v53  ;;  %v4302_v19 = vld [vmem:[%s8576_s3 + $0x68] sm:$0xff]  ;;  %v9092_v42 = vld [vmem:[#allocation23_spill] sm:$0xff] }
 0x1ee   : > { %v352_v58 = vadd.f32 %v350_v6, %v339_v48  ;;  %v422_v2 = vmul.f32 %v9091_v59, %v421_v11  ;;  %4362 = vperm.xlu1 %5202, %v4300_v9   ;;  %v389_v6 = vmul.f32 %v7803_v8, %v8361_v45  ;;  %v8383_v20 = vrot.slane %v409_v17, %v8151_v53  ;;  %v460_v39 = vld [vmem:[%s5492_s29 + $0xd] sm:$0x1]  ;;  %v4301_v9 = vld [vmem:[%s8576_s3 + $0x60] sm:$0xff] }
 0x1ef   : > { %v2371_v28 = vadd.f32 %v2369_v40, %v2359_v10  ;;  %4357 = vperm.xlu0 %5201, %v4299_v14   ;;  %v435_v48 = vmul.f32 %v9092_v42, %v434_v54  ;;  %v2200_v40 = vmul.f32 %v8159_v60, %v7890_v1  ;;  %v448_v17 = vmul.f32 %v8002_v29, %v447_v25  ;;  %v473_v60 = vld [vmem:[%s5492_s29 + $0xe] sm:$0x1] }
 0x1f0   : > { %v365_v24 = vadd.f32 %v363_v12, %v352_v58  ;;  %v402_v12 = vmul.f32 %v9074_v41, %v8373_v3  ;;  %v8395_v8 = vrot.slane %v422_v2, %v8151_v53  ;;  %v461_v10 = vmul.f32 %v8022_v34, %v460_v39  ;;  %v4304_v41 = vld [vmem:[%s8576_s3 + $0x78] sm:$0xff] }
 0x1f1   : > { %v2383_v11 = vadd.f32 %v2381_v5, %v2371_v28  ;;  %v2212_v5 = vmul.f32 %v9083_v52, %v8162_v35  ;;  %v2224_v54 = vmul.f32 %v9084_v30, %v8165_v63  ;;  %v8410_v2 = vrot.slane %v435_v48, %v8151_v53  ;;  %v486_v39 = vld [vmem:[%s5492_s29 + $0xf] sm:$0x1]  ;;  %v4303_v63 = vld [vmem:[%s8576_s3 + $0x70] sm:$0xff]  ;;  %s4543_s29 = sshll.u32 %s5481_s25, 7 }
 0x1f2   : > { %v378_v14 = vadd.f32 %v376_v26, %v365_v24  ;;  %4372 = vperm.xlu1 %5202, %v4302_v19   ;;  %v415_v26 = vmul.f32 %v7809_v57, %v8383_v20  ;;  %v2236_v35 = vmul.f32 %v7927_v56, %v8168_v55  ;;  %v428_v19 = vmul.f32 %v9077_v38, %v8395_v8  ;;  %s8501_s6 = scalar_lea.vmem [#allocation9], %s4543_s29 }
 0x1f3   : > { %5056 = vmatprep.subr.mxu0 %v2383_v11  ;;  %5122 = vmatprep.subr.mxu1 %v2383_v11  ;;  %v2214_v28 = vadd.f32 %v2212_v5, %v2200_v40  ;;  %v8421_v24 = vrot.slane %v448_v17, %v8151_v53  ;;  %v474_v57 = vmul.f32 %v8025_v51, %v473_v60  ;;  %s4430_s8 = sshll.u32 %s8501_s6, 4  ;;  %s8527_s8 = int_to_ptr.vmem [resolvable:$true] %s4430_s8 }
 0x1f4   : > { %v391_v58 = vadd.f32 %v389_v6, %v378_v14  ;;  %4367 = vperm.xlu0 %5201, %v4301_v9   ;;  %v8425_v6 = vrot.slane %v461_v10, %v8151_v53  ;;  %v2248_v55 = vmul.f32 %v7930_v4, %v8171_v46  ;;  %v441_v40 = vmul.f32 %v7856_v61, %v8410_v2  ;;  %s5255_s13 = scalar_lea.vmem %s8527_s8, 2048  ;;  %p5262_p0 = scmp.lt.s32.totalorder %s8527_s8, %s5260_s20 }
 0x1f5   : > { %v2226_v48 = vadd.f32 %v2224_v54, %v2214_v28  ;;  %v487_v9 = vmul.f32 %v8047_v27, %v486_v39  ;;  %v297_v38 = vmul.f32 %v7890_v1, %v8296_v32  ;;  %v310_v17 = vmul.f32 %v9083_v52, %v8299_v23  ;;  %v9094_v28 = vld [vmem:[#allocation25_spill] sm:$0xff]  ;;  %p5256_p10 = scmp.ne.s32.totalorder %s8527_s8, %s5255_s13  ;;  %p5263_p7 = scmp.lt.s32.totalorder %s5261_s11, %s5255_s13 }
 0x1f6   : > { %v404_v25 = vadd.f32 %v402_v12, %v391_v58  ;;  %4382 = vperm.xlu1 %5202, %v4304_v41   ;;  %v2260_v12 = vmul.f32 %v7933_v33, %v8197_v31  ;;  %v323_v46 = vmul.f32 %v9084_v30, %v8302_v13  ;;  %v454_v61 = vmul.f32 %v7862_v16, %v8421_v24  ;;  %v9093_v13 = vld [vmem:[#allocation32_spill] sm:$0xff] }
 0x1f7   : > { %v2238_v14 = vadd.f32 %v2236_v35, %v2226_v48  ;;  %v478_v60 = vrot.slane %v474_v57, %v8151_v53  ;;  %v2272_v1 = vmul.f32 %v9086_v44, %v8205_v15  ;;  %v312_v32 = vadd.f32 %v310_v17, %v297_v38  ;;  %v9096_v48 = vld [vmem:[#allocation19_spill] sm:$0xff]  ;;  %p5257_p1 = pnand %p5256_p10, %p9100_p12  ;;  %p5264_p3 = por %p5263_p7, %p5262_p0 }
 0x1f8   : > { %v417_v11 = vadd.f32 %v415_v26, %v404_v25  ;;  %4377 = vperm.xlu0 %5201, %v4303_v63   ;;  %v336_v31 = vmul.f32 %v7927_v56, %v8311_v7  ;;  %v467_v52 = vmul.f32 %v9079_v18, %v8425_v6  ;;  %v491_v30 = vrot.slane %v487_v9, %v8151_v53  ;;  %v9095_v25 = vld [vmem:[#allocation24_spill] sm:$0xff] }
 0x1f9   : > { %v2250_v5 = vadd.f32 %v2248_v55, %v2238_v14  ;;  %v2284_v16 = vmul.f32 %v9087_v21, %v9093_v13  ;;  %v325_v41 = vadd.f32 %v323_v46, %v312_v32  ;;  %v349_v58 = vmul.f32 %v7930_v4, %v8322_v47  ;;  %v9099_v32 = vld [vmem:[#allocation39_spill] sm:$0xff]  ;;  %p5258_p2 = pneg %p5257_p1 }
 0x1fa   : > { %v430_v10 = vadd.f32 %v428_v19, %v417_v11  ;;  %v480_v15 = vmul.f32 %v7868_v50, %v478_v60  ;;  %v2296_v56 = vmul.f32 %v9089_v62, %v9094_v28  ;;  %v362_v18 = vmul.f32 %v7933_v33, %v8343_v49  ;;  %v4102_v28 = vld [vmem:[#allocation7 + $0xb0] sm:$0xff] }
 0x1fb   : > { %v2262_v23 = vadd.f32 %v2260_v12, %v2250_v5  ;;  %v338_v7 = vadd.f32 %v336_v31, %v325_v41  ;;  %v493_v35 = vmul.f32 %v9085_v37, %v491_v30  ;;  %v2308_v19 = vmul.f32 %v9090_v22, %v9095_v25  ;;  %v4080_v41 = vld [vmem:[#allocation7] sm:$0xff]  ;;  %v4090_v25 = vld [vmem:[#allocation7 + $0x50] sm:$0xff]  ;;  %p5265_p8 = pnand %p5264_p3, %p5258_p2 }
 0x1fc   : > { %v443_v54 = vadd.f32 %v441_v40, %v430_v10  ;;  %v375_v4 = vmul.f32 %v9086_v44, %v8349_v36  ;;  %v2320_v55 = vmul.f32 %v9091_v59, %v9096_v48  ;;  %v388_v33 = vmul.f32 %v9087_v21, %v8361_v45  ;;  %v9097_v36 = vld [vmem:[#allocation36_spill] sm:$0xff]  ;;  %v9098_v45 = vld [vmem:[#allocation37_spill] sm:$0xff] }
 0x1fd   : > { %v2274_v39 = vadd.f32 %v2272_v1, %v2262_v23  ;;  %v351_v57 = vadd.f32 %v349_v58, %v338_v7  ;;  %v2332_v37 = vmul.f32 %v9092_v42, %v8253_v43  ;;  %v401_v38 = vmul.f32 %v9089_v62, %v8373_v3  ;;  %v4096_v58 = vld [vmem:[#allocation7 + $0x80] sm:$0xff]  ;;  %v4105_v7 = vld [vmem:[#allocation7 + $0xc8] sm:$0xff]  ;;  %v4095_v48 = vld [vmem:[#allocation7 + $0x78] sm:$0xff] }
 0x1fe   : > { %v456_v26 = vadd.f32 %v454_v61, %v443_v54  ;;  %v2344_v14 = vmul.f32 %v8002_v29, %v9097_v36  ;;  %v414_v17 = vmul.f32 %v9090_v22, %v8383_v20  ;;  %v2356_v46 = vmul.f32 %v8022_v34, %v9098_v45 }
 0x1ff   : > { %v2286_v63 = vadd.f32 %v2284_v16, %v2274_v39  ;;  %v364_v11 = vadd.f32 %v362_v18, %v351_v57  ;;  %v427_v43 = vmul.f32 %v9091_v59, %v8395_v8  ;;  %v2368_v62 = vmul.f32 %v8025_v51, %v8325_v0  ;;  %v4086_v39 = vld [vmem:[#allocation7 + $0x30] sm:$0xff]  ;;  %v4088_v18 = vld [vmem:[#allocation7 + $0x40] sm:$0xff]  ;;  %v4093_v57 = vld [vmem:[#allocation7 + $0x68] sm:$0xff] }
 0x200   : > { %v469_v53 = vadd.f32 %v467_v52, %v456_v26  ;;  %v440_v5 = vmul.f32 %v9092_v42, %v8410_v2  ;;  %v2380_v22 = vmul.f32 %v8047_v27, %v9099_v32  ;;  %v453_v31 = vmul.f32 %v8002_v29, %v8421_v24  ;;  %v4083_v26 = vld [vmem:[#allocation7 + $0x18] sm:$0xff]  ;;  %v4098_v24 = vld [vmem:[#allocation7 + $0x90] sm:$0xff] }
 0x201   : > { %v2298_v47 = vadd.f32 %v2296_v56, %v2286_v63  ;;  %v377_v9 = vadd.f32 %v375_v4, %v364_v11  ;;  %v466_v59 = vmul.f32 %v8022_v34, %v8425_v6  ;;  %v479_v0 = vmul.f32 %v8025_v51, %v478_v60  ;;  %v4099_v29 = vld [vmem:[#allocation7 + $0x98] sm:$0xff]  ;;  %v4082_v34 = vld [vmem:[#allocation7 + $0x10] sm:$0xff]  ;;  %v4085_v51 = vld [vmem:[#allocation7 + $0x28] sm:$0xff] }
 0x202   : > { %v482_v50 = vadd.f32 %v480_v15, %v469_v53  ;;  %v492_v2 = vmul.f32 %v8047_v27, %v491_v30  ;;  %v4101_v6 = vld [vmem:[#allocation7 + $0xa8] sm:$0xff]  ;;  %v4084_v27 = vld [vmem:[#allocation7 + $0x20] sm:$0xff]  ;;  %v4087_v30 = vld [vmem:[#allocation7 + $0x38] sm:$0xff] }
 0x203   : > { %v2310_v40 = vadd.f32 %v2308_v19, %v2298_v47  ;;  %v390_v12 = vadd.f32 %v388_v33, %v377_v9  ;;  %v4100_v60 = vld [vmem:[#allocation7 + $0xa0] sm:$0xff]  ;;  %v4103_v15 = vld [vmem:[#allocation7 + $0xb8] sm:$0xff]  ;;  %v4089_v56 = vld [vmem:[#allocation7 + $0x48] sm:$0xff] }
 0x204   : > { %v495_v49 = vadd.f32 %v493_v35, %v482_v50  ;;  %v4104_v53 = vld [vmem:[#allocation7 + $0xc0] sm:$0xff]  ;;  %v4091_v35 = vld [vmem:[#allocation7 + $0x58] sm:$0xff]  ;;  %v4106_v19 = vld [vmem:[#allocation7 + $0xd0] sm:$0xff] }
 0x205   : > { %v2322_v44 = vadd.f32 %v2320_v55, %v2310_v40  ;;  %v403_v10 = vadd.f32 %v401_v38, %v390_v12  ;;  %v4107_v63 = vld [vmem:[#allocation7 + $0xd8] sm:$0xff]  ;;  %v4109_v4 = vld [vmem:[#allocation7 + $0xe8] sm:$0xff]  ;;  %v4092_v50 = vld [vmem:[#allocation7 + $0x60] sm:$0xff] }
 0x206   : > { %5057 = vmatpush3.msra.mxu0 %v495_v49  ;;  %5138 = vmatpush3.msra.mxu1 %v495_v49  ;;  %v4108_v47 = vld [vmem:[#allocation7 + $0xe0] sm:$0xff]  ;;  %v4111_v55 = vld [vmem:[#allocation7 + $0xf8] sm:$0xff]  ;;  %v4094_v11 = vld [vmem:[#allocation7 + $0x70] sm:$0xff] }
 0x207   : > { %v2334_v21 = vadd.f32 %v2332_v37, %v2322_v44  ;;  %v416_v3 = vadd.f32 %v414_v17, %v403_v10  ;;  %v4110_v33 = vld [vmem:[#allocation7 + $0xf0] sm:$0xff] }
 0x209   : > { %v2346_v61 = vadd.f32 %v2344_v14, %v2334_v21  ;;  %v429_v20 = vadd.f32 %v427_v43, %v416_v3 }
 0x20b   : > { %v2358_v1 = vadd.f32 %v2356_v46, %v2346_v61  ;;  %v442_v52 = vadd.f32 %v440_v5, %v429_v20 }
 0x20d   : > { %v2370_v54 = vadd.f32 %v2368_v62, %v2358_v1  ;;  %v455_v23 = vadd.f32 %v453_v31, %v442_v52 }
 0x20f   : > { %v2382_v8 = vadd.f32 %v2380_v22, %v2370_v54  ;;  %v468_v42 = vadd.f32 %v466_v59, %v455_v23 }
 0x211   : > { %5058 = vmatprep.subr.mxu0 %v2382_v8  ;;  %5123 = vmatprep.subr.mxu1 %v2382_v8  ;;  %v481_v13 = vadd.f32 %v479_v0, %v468_v42 }
 0x213   : > { %v494_v16 = vadd.f32 %v492_v2, %v481_v13 }
 0x215   : > { %5059 = vmatpush3.msra.mxu0 %v494_v16  ;;  %5139 = vmatpush3.msra.mxu1 %v494_v16 }
 0x216   : > { %4209 = vmatmul.mubr.f32.vlgmr.msra.gmra.mxu0 %v4080_v41  ;;  %4249 = vmatmul.mubr.f32.vlgmr.msra.gmra.mxu1 %v4096_v58 }
 0x217   : > { %4213 = vmatprep.mubr.f32.mxu0 %v4083_v26  ;;  %4253 = vmatprep.mubr.f32.mxu1 %v4099_v29 }
 0x21a   : > { %4214 = vmatmul.mubr.f32.gmra.mxu0 %v4082_v34  ;;  %4254 = vmatmul.mubr.f32.gmra.mxu1 %v4098_v24 }
 0x21b   : > { %4218 = vmatprep.mubr.f32.mxu0 %v4085_v51  ;;  %4258 = vmatprep.mubr.f32.mxu1 %v4101_v6 }
 0x21e   : > { %4219 = vmatmul.mubr.f32.gmra.mxu0 %v4084_v27  ;;  %4259 = vmatmul.mubr.f32.gmra.mxu1 %v4100_v60 }
 0x21f   : > { %4223 = vmatprep.mubr.f32.mxu0 %v4087_v30  ;;  %4263 = vmatprep.mubr.f32.mxu1 %v4103_v15 }
 0x222   : > { %4224 = vmatmul.mubr.f32.gmra.mxu0 %v4086_v39  ;;  %4264 = vmatmul.mubr.f32.gmra.mxu1 %v4102_v28 }
 0x223   : > { %4228 = vmatprep.mubr.f32.mxu0 %v4089_v56  ;;  %4268 = vmatprep.mubr.f32.mxu1 %v4105_v7 }
 0x226   : > { %4229 = vmatmul.mubr.f32.gmra.mxu0 %v4088_v18  ;;  %4269 = vmatmul.mubr.f32.gmra.mxu1 %v4104_v53 }
 0x227   : > { %4233 = vmatprep.mubr.f32.mxu0 %v4091_v35  ;;  %4273 = vmatprep.mubr.f32.mxu1 %v4107_v63 }
 0x22a   : > { %4234 = vmatmul.mubr.f32.gmra.mxu0 %v4090_v25  ;;  %4274 = vmatmul.mubr.f32.gmra.mxu1 %v4106_v19 }
 0x22b   : > { %4238 = vmatprep.mubr.f32.mxu0 %v4093_v57  ;;  %4278 = vmatprep.mubr.f32.mxu1 %v4109_v4 }
 0x22e   : > { %4239 = vmatmul.mubr.f32.gmra.mxu0 %v4092_v50  ;;  %4279 = vmatmul.mubr.f32.gmra.mxu1 %v4108_v47 }
 0x22f   : > { %4243 = vmatprep.mubr.f32.mxu0 %v4095_v48  ;;  %4283 = vmatprep.mubr.f32.mxu1 %v4111_v55 }
 0x232   : > { %4244 = vmatmul.mubr.f32.gmra.mxu0 %v4094_v11  ;;  %4284 = vmatmul.mubr.f32.gmra.mxu1 %v4110_v33 }
 0x254   : > { %v4318_v40 = vpop.permute.xlu1 %4317 }
 0x255   : > { %v4308_v49 = vpop.permute.xlu0 %4307 }
 0x258   : > { %v4323_v9 = vpop.permute.xlu1 %4322 }
 0x259   : > { %v4313_v37 = vpop.permute.xlu0 %4312 }
 0x25d   : > { %v8494_v44 = vpop.permute.xlu1 %4332 }
 0x25e   : > { %v8492_v38 = vpop.permute.xlu0 %4327 }
 0x261   : > { %v8498_v17 = vpop.permute.xlu1 %4342 }
 0x262   : > { %v8496_v36 = vpop.permute.xlu0 %4337 }
 0x265   : > { %v4353_v22 = vpop.permute.xlu1 %4352 }
 0x266   : > { %v4348_v46 = vpop.permute.xlu0 %4347 }
 0x269   : > { %v4363_v24 = vpop.permute.xlu1 %4362 }
 0x26a   : > { %v4358_v42 = vpop.permute.xlu0 %4357 }
 0x26d   : > { %v4373_v4 = vpop.permute.xlu1 %4372 }
 0x26f   : > { %v4368_v56 = vpop.permute.xlu0 %4367 }
 0x2d6   : > { %v5060_v14 = vpop.f32.mrf.mxu0  ;;  %v5084_v12 = vpop.f32.mrf.mxu1 }
 0x2d8   : > { %v5061_v21 = vpop.f32.mrf.mxu0  ;;  %v5085_v45 = vpop.f32.mrf.mxu1 }
 0x2d9   : > { %v5062_v10 = vadd.f32 %v5061_v21, %v5060_v14  ;;  %v5086_v43 = vadd.f32 %v5085_v45, %v5084_v12 }
 0x2da   : > { %v5063_v61 = vpop.f32.mrf.mxu0  ;;  %v5087_v62 = vpop.f32.mrf.mxu1 }
 0x2db   : > { %v4385_v3 = vsub.f32 %v5062_v10, %v4308_v49  ;;  %v4393_v5 = vsub.f32 %v5086_v43, %v4348_v46 }
 0x2dc   : > { %v5064_v1 = vpop.f32.mrf.mxu0  ;;  %v5088_v32 = vpop.f32.mrf.mxu1 }
 0x2dd   : > { %4401 = vst [vmem:[%s8501_s6] sm:$0xff] %v4385_v3  ;;  %4409 = vst [vmem:[%s8501_s6 + $0x40] sm:$0xff] %v4393_v5  ;;  %v5065_v20 = vadd.f32 %v5064_v1, %v5063_v61  ;;  %v5089_v31 = vadd.f32 %v5088_v32, %v5087_v62  ;;  %v4383_v61 = vpop.permute.xlu1 %4382 }
 0x2de   : > { %v5066_v54 = vpop.f32.mrf.mxu0  ;;  %v5090_v52 = vpop.f32.mrf.mxu1 }
 0x2df   : > { %v4386_v59 = vsub.f32 %v5065_v20, %v4313_v37  ;;  %v4394_v8 = vsub.f32 %v5089_v31, %v4353_v22  ;;  %v4378_v37 = vpop.permute.xlu0 %4377 }
 0x2e0   : > { %v5067_v23 = vpop.f32.mrf.mxu0  ;;  %v5091_v0 = vpop.f32.mrf.mxu1 }
 0x2e1   : > { %4402 = vst [vmem:[%s8501_s6 + $0x8] sm:$0xff] %v4386_v59  ;;  %4410 = vst [vmem:[%s8501_s6 + $0x48] sm:$0xff] %v4394_v8  ;;  %v5068_v2 = vadd.f32 %v5067_v23, %v5066_v54  ;;  %v5092_v13 = vadd.f32 %v5091_v0, %v5090_v52 }
 0x2e2   : > { %v5069_v16 = vpop.f32.mrf.mxu0  ;;  %v5093_v41 = vpop.f32.mrf.mxu1 }
 0x2e3   : > { %v4387_v58 = vsub.f32 %v5068_v2, %v4318_v40  ;;  %v4395_v26 = vsub.f32 %v5092_v13, %v4358_v42 }
 0x2e4   : > { %v5070_v29 = vpop.f32.mrf.mxu0  ;;  %v5094_v34 = vpop.f32.mrf.mxu1 }
 0x2e5   : > { %4403 = vst [vmem:[%s8501_s6 + $0x10] sm:$0xff] %v4387_v58  ;;  %4411 = vst [vmem:[%s8501_s6 + $0x50] sm:$0xff] %v4395_v26  ;;  %v5071_v51 = vadd.f32 %v5070_v29, %v5069_v16  ;;  %v5095_v6 = vadd.f32 %v5094_v34, %v5093_v41 }
 0x2e6   : > { %v5072_v27 = vpop.f32.mrf.mxu0  ;;  %v5096_v60 = vpop.f32.mrf.mxu1 }
 0x2e7   : > { %v4388_v30 = vsub.f32 %v5071_v51, %v4323_v9  ;;  %v4396_v15 = vsub.f32 %v5095_v6, %v4363_v24 }
 0x2e8   : > { %v5073_v39 = vpop.f32.mrf.mxu0  ;;  %v5097_v28 = vpop.f32.mrf.mxu1 }
 0x2e9   : > { %4404 = vst [vmem:[%s8501_s6 + $0x18] sm:$0xff] %v4388_v30  ;;  %4412 = vst [vmem:[%s8501_s6 + $0x58] sm:$0xff] %v4396_v15  ;;  %v5074_v7 = vadd.f32 %v5073_v39, %v5072_v27  ;;  %v5098_v18 = vadd.f32 %v5097_v28, %v5096_v60 }
 0x2ea   : > { %v5075_v53 = vpop.f32.mrf.mxu0  ;;  %v5099_v35 = vpop.f32.mrf.mxu1 }
 0x2eb   : > { %v4389_v63 = vsub.f32 %v5074_v7, %v8492_v38  ;;  %v4397_v25 = vsub.f32 %v5098_v18, %v4368_v56 }
 0x2ec   : > { %v5076_v19 = vpop.f32.mrf.mxu0  ;;  %v5100_v57 = vpop.f32.mrf.mxu1 }
 0x2ed   : > { %4405 = vst [vmem:[%s8501_s6 + $0x20] sm:$0xff] %v4389_v63  ;;  %4413 = vst [vmem:[%s8501_s6 + $0x60] sm:$0xff] %v4397_v25  ;;  %v5077_v50 = vadd.f32 %v5076_v19, %v5075_v53  ;;  %v5101_v47 = vadd.f32 %v5100_v57, %v5099_v35 }
 0x2ee   : > { %v5078_v48 = vpop.f32.mrf.mxu0  ;;  %v5102_v55 = vpop.f32.mrf.mxu1 }
 0x2ef   : > { %v4390_v11 = vsub.f32 %v5077_v50, %v8494_v44  ;;  %v4398_v33 = vsub.f32 %v5101_v47, %v4373_v4 }
 0x2f0   : > { %v5079_v49 = vpop.f32.mrf.mxu0  ;;  %v5103_v40 = vpop.f32.mrf.mxu1 }
 0x2f1   : > { %4406 = vst [vmem:[%s8501_s6 + $0x28] sm:$0xff] %v4390_v11  ;;  %4414 = vst [vmem:[%s8501_s6 + $0x68] sm:$0xff] %v4398_v33  ;;  %v5080_v9 = vadd.f32 %v5079_v49, %v5078_v48  ;;  %v5104_v38 = vadd.f32 %v5103_v40, %v5102_v55 }
 0x2f2   : > { %v5081_v14 = vpop.f32.mrf.mxu0  ;;  %v5105_v12 = vpop.f32.mrf.mxu1 }
 0x2f3   : > { %v4391_v21 = vsub.f32 %v5080_v9, %v8496_v36  ;;  %v4399_v45 = vsub.f32 %v5104_v38, %v4378_v37 }
 0x2f4   : > { %v5082_v44 = vpop.f32.mrf.mxu0  ;;  %v5106_v46 = vpop.f32.mrf.mxu1 }
 0x2f5   : > { %4407 = vst [vmem:[%s8501_s6 + $0x30] sm:$0xff] %v4391_v21  ;;  %4415 = vst [vmem:[%s8501_s6 + $0x70] sm:$0xff] %v4399_v45  ;;  %v5083_v10 = vadd.f32 %v5082_v44, %v5081_v14  ;;  %v5107_v43 = vadd.f32 %v5106_v46, %v5105_v12 }
 0x2f7   : > { %v4392_v36 = vsub.f32 %v5083_v10, %v8498_v17  ;;  %v4400_v62 = vsub.f32 %v5107_v43, %v4383_v61 }
 0x2f9   : > { %4408 = vst [vmem:[%s8501_s6 + $0x38] sm:$0xff] %v4392_v36  ;;  %4416 = vst [vmem:[%s8501_s6 + $0x78] sm:$0xff] %v4400_v62 }
 0x2fa   : > { %5268 = shalt.err (!%p5265_p8)
}
 0x2fb   : > { %s5269_s22 = scalar_lea.hbm %s8525_s12, 2048  ;;  %s5273_s26 = scalar_lea.hbm %s8577_s4, 4096 }
 0x2fc   : > { %p5270_p9 = scmp.ne.s32.totalorder %s8525_s12, %s5269_s22  ;;  %p5274_p4 = scmp.lt.s32.totalorder %s8525_s12, %s8577_s4 }
 0x2fd   : > { %p5275_p5 = scmp.lt.s32.totalorder %s5273_s26, %s5269_s22 }
 0x2fe   : > { %p5271_p6 = pnand %p5270_p9, %p9100_p12 }
 0x2ff   : > { %p5276_p13 = por %p5275_p5, %p5274_p4 }
 0x300   : > { %p5272_p11 = pneg %p5271_p6 }
 0x302   : > { %p5277_p10 = pnand %p5276_p13, %p5272_p11 }
 0x304   : > { %5280 = shalt.err (!%p5277_p10)
}
 0x305   : > { %s5334_s6 = smov 128   ;;  %s5335_s7 = smov 256  }
 0x306   : > { %s5336_s9 = smov 8  }
 0x307   : > { %5146 = dma.vmem_to_hbm [thread:$0]  (%p9100_p12), %s8527_s8, 2048, %s8525_s12, %s4418_s19, %s5334_s6, %s5335_s7, %s5336_s9  }
 0x308 PF: > { %s4445_s10 = sand.u32 1, %s5311_s15   ;;  %p9101_p1 = scmp.ne.s32.totalorder %s8803_s28, 0 }
 0x309   : > { %p9102_p2 = scmp.ge.s32.totalorder %s5323_s18, 2  ;;  %s4446_s13 = scalar_lea.sflag [#allocation5], %s4445_s10 }
 0x30b   : > { %p5153_p0 = pnand %p9102_p2, %p9101_p1 }
 0x30d   : > { %p5154_p7 = pneg %p5153_p0 }
 0x30f   : > { %5306 = dma.done.wait (%p5154_p7), %s4446_s13, 2048  }
 0x310   : > { %5308 = vsyncadd (%p5154_p7), %s4446_s13, 4294965248  ;;  %p18_p3 = scmp.ge.s32.totalorder %s5387_s21, 4   ;;  %s9103_s15 = smov %s5315_s16 }
 0x311   : > { %s9104_s16 = smov %s5319_s17  ;;  %s9105_s17 = smov %s5399_s24 }
 0x312   : > { %s9106_s18 = smov %s5387_s21  ;;  %20 = sbr.rel (!%p18_p3) target bundleno = 6 (0x6), region = 146 }
 0x317   :  { %4451 = vsyncpa [#allocation4], 1 }
 0x318   :  { %4453 = vsyncpa [#allocation4 + $0x1], 1 }
 0x319   :  { %4454 = vsyncpa [#allocation8], 1 }
 0x31a   :  { %4455 = vsyncpa [#allocation5], 1 }
 0x31b   :  { %4457 = vsyncpa [#allocation5 + $0x1], 1 }

</bundles_post_ra>
